<compile_context>
chip_gen: v7x
topology: tpu7x:2x2x1
jax: 0.10.0
libtpu: 0.0.40
codegen_flags: <defaults>
</compile_context>

<pallas_src>
import functools
from dataclasses import dataclass

import numpy as np
import jax
import jax.numpy as jnp
from jax.experimental import pallas as pl
from jax.experimental.pallas import tpu as pltpu


# ----------------------------------------------------------------------------
# The fused kernel.  Row conventions (per batch element, M = N * T rows):
#   (n,t)-rows: row = n*T + t   ("spatial" layout, torch NCHW order)
#   (t,n)-rows: row = t*N + n   ("attention" layout, torch x.transpose(1,3))
# ----------------------------------------------------------------------------
def _gwnet_kernel(*refs, names, nb, nh, ksize, nlayers, tap_offsets, alpha):
    w = dict(zip(names, refs[: len(names)]))
    o_ref = refs[len(names)]

    def dot(a, b):
        return jnp.dot(a, b, preferred_element_type=jnp.float32)

    def elu(v):
        return jnp.where(v > 0, v, jnp.exp(jnp.minimum(v, 0.0)) - 1.0)

    # Structural operator constants.
    P = w['P'][...]            # (n,t)-rows -> (t,n)-rows permutation
    Gsel = w['Gsel'][...]      # block-diagonal "same (b,t) group" selector
    Cmap = w['Cmap'][...]      # (t,n)-row -> one-hot over its node index
    CmapT = w['CmapT'][...]
    K = w['K_adp'][...]        # adaptive-support graph hop on (n,t)-rows
    nodevec1 = w['nodevec1'][...]
    adj_rows = dot(Cmap, w['adj'][...])           # [M, N]: row (t,i) = adj[i, :]
    neg_big = -jnp.finfo(jnp.float32).max

    # Start 1x1 convs for the three input streams (computed once, reused by blocks).
    acts = [dot(w[nm][0], w['w_start'][i]) + w['b_start'][i]
            for i, nm in enumerate(('rec', 'day', 'week'))]

    def gat_attention(Wh, a1, a2):
        s1 = jnp.sum(Wh * a1, axis=-1, keepdims=True)          # [M, 1]
        s2 = jnp.sum(Wh * a2, axis=-1, keepdims=True)          # [M, 1]
        s2_all = dot(Gsel, s2 * Cmap)                          # [M, N] (s2 of peers)
        e = s1 + s2_all
        e = jnp.where(e > 0, e, alpha * e)                     # LeakyReLU(alpha)
        att = jnp.where(adj_rows > 0, e, neg_big)
        att = jnp.exp(att - jnp.max(att, axis=-1, keepdims=True))
        att = att * pl.reciprocal(jnp.sum(att, axis=-1, keepdims=True), approx=True)
        att_big = Gsel * dot(att, CmapT)                       # block-diagonal [M, M]
        return dot(att_big, Wh)                                # attention @ Wh

    skip = None
    for blk in range(nb):
        # ---- gated dilated TCNs (3 branches x nlayers) ----
        branch_out = []
        for br in range(3):
            xc = acts[br]
            for layer in range(nlayers):
                wi = ((blk * 3 + br) * nlayers + layer) * ksize
                bi = (blk * 3 + br) * nlayers + layer
                x_acc = w['tcn_bx'][bi]
                g_acc = w['tcn_bg'][bi]
                for j in range(ksize):
                    if tap_offsets[layer][j] == 0:
                        xj = xc
                    else:
                        xj = dot(w['S_taps'][layer * ksize + j], xc)
                    x_acc = x_acc + dot(xj, w['tcn_wx'][wi + j])
                    g_acc = g_acc + dot(xj, w['tcn_wg'][wi + j])
                xc = x_acc * jax.nn.sigmoid(g_acc)
            branch_out.append(xc)

        # Block mlp over concat([x1, x2, x3]) == sum of per-branch 1x1 convs.
        x = w['mlp_b'][blk]
        for br in range(3):
            x = x + dot(branch_out[br], w['mlp_w'][blk * 3 + br])       # [M,C] (n,t)
        x_t = dot(P, x)                                                 # [M,C] (t,n)

        # Time-branch attention score.
        n_q_t = dot(nodevec1, w['wt_w'][blk]) + w['wt_b'][blk]
        a_t = jnp.sum(x_t * dot(Cmap, n_q_t), axis=-1, keepdims=True)

        # Graph conv (order 2, adaptive support); eval-BN folded into weights.
        xg1 = dot(K, x)
        xg2 = dot(K, xg1)
        xbn = (w['gconv_b'][blk]
               + dot(x, w['gconv_w'][blk * 3 + 0])
               + dot(xg1, w['gconv_w'][blk * 3 + 1])
               + dot(xg2, w['gconv_w'][blk * 3 + 2]))
        x_ls = dot(P, xbn)                                              # (t,n)

        # GAT over the static adjacency: nh heads (elu) + output layer (elu).
        heads = []
        for h in range(nh):
            gi = blk * nh + h
            Wh = dot(x_t, w['gat_hw'][gi])
            heads.append(elu(gat_attention(Wh, w['gat_ha1'][gi], w['gat_ha2'][gi])))
        Wh_o = dot(heads[0], w['gat_ow'][blk * nh + 0])
        for h in range(1, nh):
            Wh_o = Wh_o + dot(heads[h], w['gat_ow'][blk * nh + h])
        x_ds = elu(gat_attention(Wh_o, w['gat_oa1'][blk], w['gat_oa2'][blk]))

        # Gate(x_ls, x_ds).
        g = jax.nn.sigmoid(dot(x_ls, w['gate_w1'][blk]) + w['gate_b1'][blk]
                           + dot(x_ds, w['gate_w2'][blk]) + w['gate_b2'][blk])
        x_lsg = g * x_ls + (1.0 - g) * x_ds

        # Long-branch attention score (from the gated tensor, as in the reference).
        n_q_ls = dot(nodevec1, w['wls_w'][blk]) + w['wls_b'][blk]
        a_ls = jnp.sum(x_lsg * dot(Cmap, n_q_ls), axis=-1, keepdims=True)

        # STAM: softmax over the two scores, mix x_t with the (un-gated) x_ls.
        mx = jnp.maximum(a_t, a_ls)
        e_t = jnp.exp(a_t - mx)
        e_ls = jnp.exp(a_ls - mx)
        inv = pl.reciprocal(e_t + e_ls, approx=True)
        comb = (e_t * x_t + e_ls * x_ls) * inv

        # Skip conv (the torch block returns s; earlier skips are dead code).
        skip = dot(comb, w['skip_w'][blk]) + w['skip_b'][blk]           # [M, skip_ch]

    # relu -> end_conv_1 -> relu -> end_conv_2
    y = jnp.maximum(skip, 0.0)
    y = jnp.maximum(dot(y, w['end1_w'][...]) + w['end1_b'][...], 0.0)
    y = dot(y, w['end2_w'][...]) + w['end2_b'][...]
    o_ref[0] = y


# ----------------------------------------------------------------------------
# Host-side packing: weights are split/stacked into flat-indexed arrays, the
# eval-mode BN is folded into the graph-conv mlp, and the structural operator
# matrices (permutation / graph-hop / shift / group-select) are built.
# ----------------------------------------------------------------------------
def _pack_inputs(cfg, params, rec, day, week):
    B = rec.shape[0]
    N, T = cfg.num_nodes, rec.shape[-1]
    M = N * T
    C = cfg.residual_channels
    dil = cfg.dilation_channels
    nh, k, L = cfg.nheads, cfg.kernel_size, cfg.layers

    def rows(v):  # NCHW [B, Cin, N, T] -> [B, N*T, Cin]  ((n, t)-ordered rows)
        return jnp.transpose(v, (0, 2, 3, 1)).reshape(B, M, v.shape[1])

    packed = {'rec': rows(rec), 'day': rows(day), 'week': rows(week)}

    # Structural constants (numpy -> compile-time constants under jit).
    P = np.zeros((M, M), np.float32)                  # (n,t)-rows -> (t,n)-rows
    for n in range(N):
        for t in range(T):
            P[t * N + n, n * T + t] = 1.0
    packed['P'] = jnp.asarray(P)
    packed['Gsel'] = jnp.asarray(np.kron(np.eye(T, dtype=np.float32),
                                         np.ones((N, N), np.float32)))
    Cmap = np.tile(np.eye(N, dtype=np.float32), (T, 1))
    packed['Cmap'] = jnp.asarray(Cmap)
    packed['CmapT'] = jnp.asarray(np.ascontiguousarray(Cmap.T))

    s_taps, tap_offsets = [], []
    for layer in range(L):
        d = 2 ** layer
        pad = (k - 1) * d // 2
        offs = []
        for j in range(k):
            off = j * d - pad
            offs.append(off)
            S = np.zeros((M, M), np.float32)          # within-group temporal shift
            for n in range(N):
                for t in range(T):
                    if 0 <= t + off < T:
                        S[n * T + t, n * T + t + off] = 1.0
            s_taps.append(S)
        tap_offsets.append(tuple(offs))
    packed['S_taps'] = jnp.asarray(np.stack(s_taps))

    packed['adj'] = params['supports'][0]
    packed['nodevec1'] = params['nodevec1']

    # Adaptive support -> graph-hop operator acting on (n,t)-rows.
    adp = jax.nn.softmax(
        jnp.eye(N, dtype=jnp.float32)
        + jax.nn.relu(jnp.tanh(params['nodevec1'] @ params['nodevec2'])), axis=1)
    packed['K_adp'] = jnp.kron(adp.T, jnp.eye(T, dtype=jnp.float32))

    packed['w_start'] = jnp.stack([params['start_rec_w'], params['start_day_w'],
                                   params['start_week_w']])
    packed['b_start'] = jnp.stack([params['start_rec_b'].reshape(1, C),
                                   params['start_day_b'].reshape(1, C),
                                   params['start_week_b'].reshape(1, C)])

    tcn_wx, tcn_wg, tcn_bx, tcn_bg = [], [], [], []
    mlp_w, mlp_b, gconv_w, gconv_b = [], [], [], []
    wt_w, wt_b, wls_w, wls_b = [], [], [], []
    gat_hw, gat_ha1, gat_ha2, gat_ow, gat_oa1, gat_oa2 = [], [], [], [], [], []
    gate_w1, gate_b1, gate_w2, gate_b2 = [], [], [], []
    skip_w, skip_b = [], []
    for bp in params['blocks']:
        for nm in ('tcr', 'tcd', 'tcw'):
            for lp in bp[nm]:
                for j in range(k):
                    tcn_wx.append(lp['w'][j, :, :dil])
                    tcn_wg.append(lp['w'][j, :, dil:])
                tcn_bx.append(lp['b'][:dil].reshape(1, dil))
                tcn_bg.append(lp['b'][dil:].reshape(1, dil))
        for i in range(3):
            mlp_w.append(bp['mlp_w'][i * dil:(i + 1) * dil, :])
        mlp_b.append(bp['mlp_b'].reshape(1, C))
        # eval-mode BatchNorm folded into the graph-conv 1x1 that precedes it
        scale = bp['bn_gamma'] / jnp.sqrt(bp['bn_var'] + 1e-5)
        shift = bp['bn_beta'] - bp['bn_mean'] * scale
        for i in range(3):
            gconv_w.append(bp['gconv']['mlp_w'][i * dil:(i + 1) * dil, :] * scale[None, :])
        gconv_b.append((bp['gconv']['mlp_b'] * scale + shift).reshape(1, C))
        wt_w.append(bp['wt_w']);   wt_b.append(bp['wt_b'].reshape(1, C))
        wls_w.append(bp['wls_w']); wls_b.append(bp['wls_b'].reshape(1, C))
        for hp in bp['gat']['heads']:
            gat_hw.append(hp['W'])
            gat_ha1.append(hp['a'][:C, 0].reshape(1, C))
            gat_ha2.append(hp['a'][C:, 0].reshape(1, C))
        for h in range(nh):
            gat_ow.append(bp['gat']['out']['W'][h * C:(h + 1) * C, :])
        gat_oa1.append(bp['gat']['out']['a'][:C, 0].reshape(1, C))
        gat_oa2.append(bp['gat']['out']['a'][C:, 0].reshape(1, C))
        gate_w1.append(bp['gate']['w1']); gate_b1.append(bp['gate']['b1'].reshape(1, C))
        gate_w2.append(bp['gate']['w2']); gate_b2.append(bp['gate']['b2'].reshape(1, C))
        skip_w.append(bp['skip_w'])
        skip_b.append(bp['skip_b'].reshape(1, cfg.skip_channels))

    packed.update(
        tcn_wx=jnp.stack(tcn_wx), tcn_wg=jnp.stack(tcn_wg),
        tcn_bx=jnp.stack(tcn_bx), tcn_bg=jnp.stack(tcn_bg),
        mlp_w=jnp.stack(mlp_w), mlp_b=jnp.stack(mlp_b),
        gconv_w=jnp.stack(gconv_w), gconv_b=jnp.stack(gconv_b),
        wt_w=jnp.stack(wt_w), wt_b=jnp.stack(wt_b),
        wls_w=jnp.stack(wls_w), wls_b=jnp.stack(wls_b),
        gat_hw=jnp.stack(gat_hw), gat_ha1=jnp.stack(gat_ha1), gat_ha2=jnp.stack(gat_ha2),
        gat_ow=jnp.stack(gat_ow), gat_oa1=jnp.stack(gat_oa1), gat_oa2=jnp.stack(gat_oa2),
        gate_w1=jnp.stack(gate_w1), gate_b1=jnp.stack(gate_b1),
        gate_w2=jnp.stack(gate_w2), gate_b2=jnp.stack(gate_b2),
        skip_w=jnp.stack(skip_w), skip_b=jnp.stack(skip_b),
        end1_w=params['end1_w'], end1_b=params['end1_b'].reshape(1, -1),
        end2_w=params['end2_w'], end2_b=params['end2_b'].reshape(1, -1),
    )
    return packed, tuple(tap_offsets)


def _const_index_map(nd):
    return lambda b: (0,) * nd


def gwnet_forward(cfg, params, rec, day, week):
    # TODO(synk): implements the default config path only (use_tcn/use_gconv/
    # use_gat/use_gate/use_stam = True, gcn_bool & addaptadj & supports), in
    # inference mode (dropout = identity, eval-BN folded into weights).
    B = rec.shape[0]
    N, T = cfg.num_nodes, rec.shape[-1]
    M = N * T

    packed, tap_offsets = _pack_inputs(cfg, params, rec, day, week)
    names = tuple(packed.keys())
    arrays = [packed[nm] for nm in names]

    in_specs = []
    for nm in names:
        arr = packed[nm]
        if nm in ('rec', 'day', 'week'):
            in_specs.append(pl.BlockSpec((1,) + arr.shape[1:], lambda b: (b, 0, 0)))
        else:  # weights / constants: full block, resident across the batch grid
            in_specs.append(pl.BlockSpec(arr.shape, _const_index_map(arr.ndim)))

    kernel = functools.partial(
        _gwnet_kernel, names=names, nb=cfg.blocks, nh=cfg.nheads,
        ksize=cfg.kernel_size, nlayers=cfg.layers,
        tap_offsets=tap_offsets, alpha=cfg.alpha)

    out = pl.pallas_call(
        kernel,
        out_shape=jax.ShapeDtypeStruct((B, M, cfg.out_dim), jnp.float32),
        grid=(B,),
        in_specs=in_specs,
        out_specs=pl.BlockSpec((1, M, cfg.out_dim), lambda b: (b, 0, 0)),
        compiler_params=pltpu.CompilerParams(dimension_semantics=("parallel",)),
    )(*arrays)

    # kernel rows are (t, n)-ordered -> NCHW [B, out_dim, N, T]
    return jnp.transpose(out.reshape(B, T, N, cfg.out_dim), (0, 3, 2, 1))


# ----------------------------------------------------------------------------
# Config + deterministic synthetic parameters (no checkpoint loading)
# ----------------------------------------------------------------------------
@dataclass
class Config:
    in_dim: int = 2
    residual_channels: int = 16
    dilation_channels: int = 16
    skip_channels: int = 32
    end_channels: int = 32
    out_dim: int = 4
    num_nodes: int = 8
    apt_size: int = 10
    kernel_size: int = 3
    layers: int = 2        # TCN layers per GatedTCN
    blocks: int = 2
    nheads: int = 2
    alpha: float = 0.1
    dropout: float = 0.3   # inference mode -> identity
    tcn_drop: float = 0.0
    stam_drop: float = 0.0
    gcn_bool: bool = True
    addaptadj: bool = True
    use_tcn: bool = True
    use_gconv: bool = True
    use_gat: bool = True
    use_gate: bool = True
    use_stam: bool = True


def init_params(cfg, key):
    res, dil, n = cfg.residual_channels, cfg.dilation_channels, cfg.num_nodes
    keys = iter(jax.random.split(key, 1024))

    def nrm(shape, scale=0.15):
        return scale * jax.random.normal(next(keys), shape, jnp.float32)

    p = {}
    for nm in ('rec', 'day', 'week'):
        p[f'start_{nm}_w'] = nrm((cfg.in_dim, res))
        p[f'start_{nm}_b'] = nrm((res,), 0.01)
    p['nodevec1'] = jax.random.normal(next(keys), (n, cfg.apt_size), jnp.float32)
    p['nodevec2'] = jax.random.normal(next(keys), (cfg.apt_size, n), jnp.float32)

    adj = (jax.random.uniform(next(keys), (n, n)) > 0.5).astype(jnp.float32)
    adj = adj + jnp.eye(n, dtype=jnp.float32)
    adj = adj / jnp.sum(adj, axis=1, keepdims=True)
    p['supports'] = [adj]

    support_len = 1  # matches GWNET: gcn_bool & addaptadj & supports -> supports_len = 1
    blocks = []
    for _ in range(cfg.blocks):
        bp = {}
        for nm in ('tcr', 'tcd', 'tcw'):
            bp[nm] = [{'w': nrm((cfg.kernel_size, res, 2 * dil)),
                       'b': nrm((2 * dil,), 0.01)} for _ in range(cfg.layers)]
        bp['mlp_w'] = nrm((3 * dil, res))
        bp['mlp_b'] = nrm((res,), 0.01)
        bp['skip_w'] = nrm((dil, cfg.skip_channels))
        bp['skip_b'] = nrm((cfg.skip_channels,), 0.01)
        bp['bn_gamma'] = jnp.ones((res,), jnp.float32)
        bp['bn_beta'] = jnp.zeros((res,), jnp.float32)
        bp['bn_mean'] = jnp.zeros((res,), jnp.float32)
        bp['bn_var'] = jnp.ones((res,), jnp.float32)
        bp['gconv'] = {'mlp_w': nrm(((2 * support_len + 1) * dil, res)),
                       'mlp_b': nrm((res,), 0.01)}
        bp['wt_w'] = nrm((cfg.apt_size, res))
        bp['wt_b'] = nrm((res,), 0.01)
        bp['wls_w'] = nrm((cfg.apt_size, res))
        bp['wls_b'] = nrm((res,), 0.01)
        bp['gat'] = {
            'heads': [{'W': nrm((res, res), 0.3), 'a': nrm((2 * res, 1), 0.3)}
                      for _ in range(cfg.nheads)],
            'out': {'W': nrm((res * cfg.nheads, res), 0.3),
                    'a': nrm((2 * res, 1), 0.3)},
        }
        bp['gate'] = {'w1': nrm((res, res)), 'b1': nrm((res,), 0.01),
                      'w2': nrm((res, res)), 'b2': nrm((res,), 0.01)}
        blocks.append(bp)
    p['blocks'] = blocks
    p['end1_w'] = nrm((cfg.skip_channels, cfg.end_channels))
    p['end1_b'] = nrm((cfg.end_channels,), 0.01)
    p['end2_w'] = nrm((cfg.end_channels, cfg.out_dim))
    p['end2_b'] = nrm((cfg.out_dim,), 0.01)
    return p


if __name__ == "__main__":
    cfg = Config()
    B, T = 2, 12
    key = jax.random.PRNGKey(0)
    key, k1, k2, k3, kp = jax.random.split(key, 5)
    shape = (B, cfg.in_dim, cfg.num_nodes, T)   # NCHW, as in the torch module
    rec = jax.random.normal(k1, shape, jnp.float32)
    day = jax.random.normal(k2, shape, jnp.float32)
    week = jax.random.normal(k3, shape, jnp.float32)
    params = init_params(cfg, kp)

    fwd = jax.jit(lambda p, r, d, w: gwnet_forward(cfg, p, r, d, w))
    out = fwd(params, rec, day, week)
    out = jax.block_until_ready(out)

    assert out.shape == (B, cfg.out_dim, cfg.num_nodes, T), out.shape
    assert bool(jnp.all(jnp.isfinite(out)))
    print("KERNEL_OK")
</pallas_src>

<mosaic_0001>
module attributes {stable_mosaic.version = 11 : i64} {
  func.func @_gwnet_kernel(%arg0: i32, %arg1: memref<1x96x2xf32, #tpu.memory_space<vmem>>, %arg2: memref<1x96x2xf32, #tpu.memory_space<vmem>>, %arg3: memref<1x96x2xf32, #tpu.memory_space<vmem>>, %arg4: memref<96x96xf32, #tpu.memory_space<vmem>>, %arg5: memref<96x96xf32, #tpu.memory_space<vmem>>, %arg6: memref<96x8xf32, #tpu.memory_space<vmem>>, %arg7: memref<8x96xf32, #tpu.memory_space<vmem>>, %arg8: memref<6x96x96xf32, #tpu.memory_space<vmem>>, %arg9: memref<8x8xf32, #tpu.memory_space<vmem>>, %arg10: memref<8x10xf32, #tpu.memory_space<vmem>>, %arg11: memref<96x96xf32, #tpu.memory_space<vmem>>, %arg12: memref<3x2x16xf32, #tpu.memory_space<vmem>>, %arg13: memref<3x1x16xf32, #tpu.memory_space<vmem>>, %arg14: memref<36x16x16xf32, #tpu.memory_space<vmem>>, %arg15: memref<36x16x16xf32, #tpu.memory_space<vmem>>, %arg16: memref<12x1x16xf32, #tpu.memory_space<vmem>>, %arg17: memref<12x1x16xf32, #tpu.memory_space<vmem>>, %arg18: memref<6x16x16xf32, #tpu.memory_space<vmem>>, %arg19: memref<2x1x16xf32, #tpu.memory_space<vmem>>, %arg20: memref<6x16x16xf32, #tpu.memory_space<vmem>>, %arg21: memref<2x1x16xf32, #tpu.memory_space<vmem>>, %arg22: memref<2x10x16xf32, #tpu.memory_space<vmem>>, %arg23: memref<2x1x16xf32, #tpu.memory_space<vmem>>, %arg24: memref<2x10x16xf32, #tpu.memory_space<vmem>>, %arg25: memref<2x1x16xf32, #tpu.memory_space<vmem>>, %arg26: memref<4x16x16xf32, #tpu.memory_space<vmem>>, %arg27: memref<4x1x16xf32, #tpu.memory_space<vmem>>, %arg28: memref<4x1x16xf32, #tpu.memory_space<vmem>>, %arg29: memref<4x16x16xf32, #tpu.memory_space<vmem>>, %arg30: memref<2x1x16xf32, #tpu.memory_space<vmem>>, %arg31: memref<2x1x16xf32, #tpu.memory_space<vmem>>, %arg32: memref<2x16x16xf32, #tpu.memory_space<vmem>>, %arg33: memref<2x1x16xf32, #tpu.memory_space<vmem>>, %arg34: memref<2x16x16xf32, #tpu.memory_space<vmem>>, %arg35: memref<2x1x16xf32, #tpu.memory_space<vmem>>, %arg36: memref<2x16x32xf32, #tpu.memory_space<vmem>>, %arg37: memref<2x1x32xf32, #tpu.memory_space<vmem>>, %arg38: memref<32x32xf32, #tpu.memory_space<vmem>>, %arg39: memref<1x32xf32, #tpu.memory_space<vmem>>, %arg40: memref<32x4xf32, #tpu.memory_space<vmem>>, %arg41: memref<1x4xf32, #tpu.memory_space<vmem>>, %arg42: memref<1x96x4xf32, #tpu.memory_space<vmem>>) attributes {dimension_semantics = [#tpu.dimension_semantics<parallel>], iteration_bounds = array<i64: 2>, scalar_prefetch = 0 : i64, scratch_operands = 0 : i64, tpu.core_type = #tpu.core_type<tc>, window_params = [{transform_indices = @transform_0, window_bounds = array<i64: 1, 96, 2>}, {transform_indices = @transform_1, window_bounds = array<i64: 1, 96, 2>}, {transform_indices = @transform_2, window_bounds = array<i64: 1, 96, 2>}, {pipeline_mode = #tpu.pipeline_mode<synchronous>, transform_indices = @transform_3, window_bounds = array<i64: 96, 96>}, {pipeline_mode = #tpu.pipeline_mode<synchronous>, transform_indices = @transform_4, window_bounds = array<i64: 96, 96>}, {pipeline_mode = #tpu.pipeline_mode<synchronous>, transform_indices = @transform_5, window_bounds = array<i64: 96, 8>}, {pipeline_mode = #tpu.pipeline_mode<synchronous>, transform_indices = @transform_6, window_bounds = array<i64: 8, 96>}, {pipeline_mode = #tpu.pipeline_mode<synchronous>, transform_indices = @transform_7, window_bounds = array<i64: 6, 96, 96>}, {pipeline_mode = #tpu.pipeline_mode<synchronous>, transform_indices = @transform_8, window_bounds = array<i64: 8, 8>}, {pipeline_mode = #tpu.pipeline_mode<synchronous>, transform_indices = @transform_9, window_bounds = array<i64: 8, 10>}, {pipeline_mode = #tpu.pipeline_mode<synchronous>, transform_indices = @transform_10, window_bounds = array<i64: 96, 96>}, {pipeline_mode = #tpu.pipeline_mode<synchronous>, transform_indices = @transform_11, window_bounds = array<i64: 3, 2, 16>}, {pipeline_mode = #tpu.pipeline_mode<synchronous>, transform_indices = @transform_12, window_bounds = array<i64: 3, 1, 16>}, {pipeline_mode = #tpu.pipeline_mode<synchronous>, transform_indices = @transform_13, window_bounds = array<i64: 36, 16, 16>}, {pipeline_mode = #tpu.pipeline_mode<synchronous>, transform_indices = @transform_14, window_bounds = array<i64: 36, 16, 16>}, {pipeline_mode = #tpu.pipeline_mode<synchronous>, transform_indices = @transform_15, window_bounds = array<i64: 12, 1, 16>}, {pipeline_mode = #tpu.pipeline_mode<synchronous>, transform_indices = @transform_16, window_bounds = array<i64: 12, 1, 16>}, {pipeline_mode = #tpu.pipeline_mode<synchronous>, transform_indices = @transform_17, window_bounds = array<i64: 6, 16, 16>}, {pipeline_mode = #tpu.pipeline_mode<synchronous>, transform_indices = @transform_18, window_bounds = array<i64: 2, 1, 16>}, {pipeline_mode = #tpu.pipeline_mode<synchronous>, transform_indices = @transform_19, window_bounds = array<i64: 6, 16, 16>}, {pipeline_mode = #tpu.pipeline_mode<synchronous>, transform_indices = @transform_20, window_bounds = array<i64: 2, 1, 16>}, {pipeline_mode = #tpu.pipeline_mode<synchronous>, transform_indices = @transform_21, window_bounds = array<i64: 2, 10, 16>}, {pipeline_mode = #tpu.pipeline_mode<synchronous>, transform_indices = @transform_22, window_bounds = array<i64: 2, 1, 16>}, {pipeline_mode = #tpu.pipeline_mode<synchronous>, transform_indices = @transform_23, window_bounds = array<i64: 2, 10, 16>}, {pipeline_mode = #tpu.pipeline_mode<synchronous>, transform_indices = @transform_24, window_bounds = array<i64: 2, 1, 16>}, {pipeline_mode = #tpu.pipeline_mode<synchronous>, transform_indices = @transform_25, window_bounds = array<i64: 4, 16, 16>}, {pipeline_mode = #tpu.pipeline_mode<synchronous>, transform_indices = @transform_26, window_bounds = array<i64: 4, 1, 16>}, {pipeline_mode = #tpu.pipeline_mode<synchronous>, transform_indices = @transform_27, window_bounds = array<i64: 4, 1, 16>}, {pipeline_mode = #tpu.pipeline_mode<synchronous>, transform_indices = @transform_28, window_bounds = array<i64: 4, 16, 16>}, {pipeline_mode = #tpu.pipeline_mode<synchronous>, transform_indices = @transform_29, window_bounds = array<i64: 2, 1, 16>}, {pipeline_mode = #tpu.pipeline_mode<synchronous>, transform_indices = @transform_30, window_bounds = array<i64: 2, 1, 16>}, {pipeline_mode = #tpu.pipeline_mode<synchronous>, transform_indices = @transform_31, window_bounds = array<i64: 2, 16, 16>}, {pipeline_mode = #tpu.pipeline_mode<synchronous>, transform_indices = @transform_32, window_bounds = array<i64: 2, 1, 16>}, {pipeline_mode = #tpu.pipeline_mode<synchronous>, transform_indices = @transform_33, window_bounds = array<i64: 2, 16, 16>}, {pipeline_mode = #tpu.pipeline_mode<synchronous>, transform_indices = @transform_34, window_bounds = array<i64: 2, 1, 16>}, {pipeline_mode = #tpu.pipeline_mode<synchronous>, transform_indices = @transform_35, window_bounds = array<i64: 2, 16, 32>}, {pipeline_mode = #tpu.pipeline_mode<synchronous>, transform_indices = @transform_36, window_bounds = array<i64: 2, 1, 32>}, {pipeline_mode = #tpu.pipeline_mode<synchronous>, transform_indices = @transform_37, window_bounds = array<i64: 32, 32>}, {pipeline_mode = #tpu.pipeline_mode<synchronous>, transform_indices = @transform_38, window_bounds = array<i64: 1, 32>}, {pipeline_mode = #tpu.pipeline_mode<synchronous>, transform_indices = @transform_39, window_bounds = array<i64: 32, 4>}, {pipeline_mode = #tpu.pipeline_mode<synchronous>, transform_indices = @transform_40, window_bounds = array<i64: 1, 4>}, {transform_indices = @transform_41, window_bounds = array<i64: 1, 96, 4>}]} {
    %c0 = arith.constant 0 : index
    %c0_0 = arith.constant 0 : index
    %0 = vector.load %arg4[%c0, %c0_0] : memref<96x96xf32, #tpu.memory_space<vmem>>, vector<96x96xf32>
    %c0_1 = arith.constant 0 : index
    %c0_2 = arith.constant 0 : index
    %1 = vector.load %arg5[%c0_1, %c0_2] : memref<96x96xf32, #tpu.memory_space<vmem>>, vector<96x96xf32>
    %c0_3 = arith.constant 0 : index
    %c0_4 = arith.constant 0 : index
    %2 = vector.load %arg6[%c0_3, %c0_4] : memref<96x8xf32, #tpu.memory_space<vmem>>, vector<96x8xf32>
    %c0_5 = arith.constant 0 : index
    %c0_6 = arith.constant 0 : index
    %3 = vector.load %arg7[%c0_5, %c0_6] : memref<8x96xf32, #tpu.memory_space<vmem>>, vector<8x96xf32>
    %c0_7 = arith.constant 0 : index
    %c0_8 = arith.constant 0 : index
    %4 = vector.load %arg11[%c0_7, %c0_8] : memref<96x96xf32, #tpu.memory_space<vmem>>, vector<96x96xf32>
    %c0_9 = arith.constant 0 : index
    %c0_10 = arith.constant 0 : index
    %5 = vector.load %arg10[%c0_9, %c0_10] : memref<8x10xf32, #tpu.memory_space<vmem>>, vector<8x10xf32>
    %c0_11 = arith.constant 0 : index
    %c0_12 = arith.constant 0 : index
    %6 = vector.load %arg9[%c0_11, %c0_12] : memref<8x8xf32, #tpu.memory_space<vmem>>, vector<8x8xf32>
    %cst = arith.constant dense<0.000000e+00> : vector<96x8xf32>
    %7 = tpu.matmul %2, %6, %cst {dimension_numbers = #tpu.dot_dimension_numbers<[1], [0], [0], [1], [0, 0, 1, 1], [], []>} : vector<96x8xf32>, vector<8x8xf32>, vector<96x8xf32> -> vector<96x8xf32>
    %c0_13 = arith.constant 0 : index
    %c0_14 = arith.constant 0 : index
    %c0_15 = arith.constant 0 : index
    %8 = vector.load %arg1[%c0_13, %c0_14, %c0_15] : memref<1x96x2xf32, #tpu.memory_space<vmem>>, vector<1x96x2xf32>
    %9 = vector.shape_cast %8 : vector<1x96x2xf32> to vector<96x2xf32>
    %c0_16 = arith.constant 0 : index
    %c0_17 = arith.constant 0 : index
    %c0_18 = arith.constant 0 : index
    %10 = vector.load %arg12[%c0_16, %c0_17, %c0_18] : memref<3x2x16xf32, #tpu.memory_space<vmem>>, vector<1x2x16xf32>
    %11 = vector.shape_cast %10 : vector<1x2x16xf32> to vector<2x16xf32>
    %cst_19 = arith.constant dense<0.000000e+00> : vector<96x16xf32>
    %12 = tpu.matmul %9, %11, %cst_19 {dimension_numbers = #tpu.dot_dimension_numbers<[1], [0], [0], [1], [0, 0, 1, 1], [], []>} : vector<96x2xf32>, vector<2x16xf32>, vector<96x16xf32> -> vector<96x16xf32>
    %c0_20 = arith.constant 0 : index
    %c0_21 = arith.constant 0 : index
    %c0_22 = arith.constant 0 : index
    %13 = vector.load %arg13[%c0_20, %c0_21, %c0_22] : memref<3x1x16xf32, #tpu.memory_space<vmem>>, vector<1x1x16xf32>
    %14 = vector.shape_cast %13 : vector<1x1x16xf32> to vector<1x16xf32>
    %15 = vector.broadcast %14 : vector<1x16xf32> to vector<96x16xf32>
    %16 = arith.addf %12, %15 : vector<96x16xf32>
    %c0_23 = arith.constant 0 : index
    %c0_24 = arith.constant 0 : index
    %c0_25 = arith.constant 0 : index
    %17 = vector.load %arg2[%c0_23, %c0_24, %c0_25] : memref<1x96x2xf32, #tpu.memory_space<vmem>>, vector<1x96x2xf32>
    %18 = vector.shape_cast %17 : vector<1x96x2xf32> to vector<96x2xf32>
    %c1 = arith.constant 1 : index
    %c0_26 = arith.constant 0 : index
    %c0_27 = arith.constant 0 : index
    %19 = vector.load %arg12[%c1, %c0_26, %c0_27] : memref<3x2x16xf32, #tpu.memory_space<vmem>>, vector<1x2x16xf32>
    %20 = vector.shape_cast %19 : vector<1x2x16xf32> to vector<2x16xf32>
    %cst_28 = arith.constant dense<0.000000e+00> : vector<96x16xf32>
    %21 = tpu.matmul %18, %20, %cst_28 {dimension_numbers = #tpu.dot_dimension_numbers<[1], [0], [0], [1], [0, 0, 1, 1], [], []>} : vector<96x2xf32>, vector<2x16xf32>, vector<96x16xf32> -> vector<96x16xf32>
    %c1_29 = arith.constant 1 : index
    %c0_30 = arith.constant 0 : index
    %c0_31 = arith.constant 0 : index
    %22 = vector.load %arg13[%c1_29, %c0_30, %c0_31] : memref<3x1x16xf32, #tpu.memory_space<vmem>>, vector<1x1x16xf32>
    %23 = vector.shape_cast %22 : vector<1x1x16xf32> to vector<1x16xf32>
    %24 = vector.broadcast %23 : vector<1x16xf32> to vector<96x16xf32>
    %25 = arith.addf %21, %24 : vector<96x16xf32>
    %c0_32 = arith.constant 0 : index
    %c0_33 = arith.constant 0 : index
    %c0_34 = arith.constant 0 : index
    %26 = vector.load %arg3[%c0_32, %c0_33, %c0_34] : memref<1x96x2xf32, #tpu.memory_space<vmem>>, vector<1x96x2xf32>
    %27 = vector.shape_cast %26 : vector<1x96x2xf32> to vector<96x2xf32>
    %c2 = arith.constant 2 : index
    %c0_35 = arith.constant 0 : index
    %c0_36 = arith.constant 0 : index
    %28 = vector.load %arg12[%c2, %c0_35, %c0_36] : memref<3x2x16xf32, #tpu.memory_space<vmem>>, vector<1x2x16xf32>
    %29 = vector.shape_cast %28 : vector<1x2x16xf32> to vector<2x16xf32>
    %cst_37 = arith.constant dense<0.000000e+00> : vector<96x16xf32>
    %30 = tpu.matmul %27, %29, %cst_37 {dimension_numbers = #tpu.dot_dimension_numbers<[1], [0], [0], [1], [0, 0, 1, 1], [], []>} : vector<96x2xf32>, vector<2x16xf32>, vector<96x16xf32> -> vector<96x16xf32>
    %c2_38 = arith.constant 2 : index
    %c0_39 = arith.constant 0 : index
    %c0_40 = arith.constant 0 : index
    %31 = vector.load %arg13[%c2_38, %c0_39, %c0_40] : memref<3x1x16xf32, #tpu.memory_space<vmem>>, vector<1x1x16xf32>
    %32 = vector.shape_cast %31 : vector<1x1x16xf32> to vector<1x16xf32>
    %33 = vector.broadcast %32 : vector<1x16xf32> to vector<96x16xf32>
    %34 = arith.addf %30, %33 : vector<96x16xf32>
    %c6 = arith.constant 6 : index
    %c0_41 = arith.constant 0 : index
    %c0_42 = arith.constant 0 : index
    %35 = vector.load %arg16[%c6, %c0_41, %c0_42] : memref<12x1x16xf32, #tpu.memory_space<vmem>>, vector<1x1x16xf32>
    %36 = vector.shape_cast %35 : vector<1x1x16xf32> to vector<1x16xf32>
    %c6_43 = arith.constant 6 : index
    %c0_44 = arith.constant 0 : index
    %c0_45 = arith.constant 0 : index
    %37 = vector.load %arg17[%c6_43, %c0_44, %c0_45] : memref<12x1x16xf32, #tpu.memory_space<vmem>>, vector<1x1x16xf32>
    %38 = vector.shape_cast %37 : vector<1x1x16xf32> to vector<1x16xf32>
    %c0_46 = arith.constant 0 : index
    %c0_47 = arith.constant 0 : index
    %c0_48 = arith.constant 0 : index
    %39 = vector.load %arg8[%c0_46, %c0_47, %c0_48] : memref<6x96x96xf32, #tpu.memory_space<vmem>>, vector<1x96x96xf32>
    %40 = vector.shape_cast %39 : vector<1x96x96xf32> to vector<96x96xf32>
    %cst_49 = arith.constant dense<0.000000e+00> : vector<96x16xf32>
    %41 = tpu.matmul %40, %16, %cst_49 {dimension_numbers = #tpu.dot_dimension_numbers<[1], [0], [0], [1], [0, 0, 1, 1], [], []>} : vector<96x96xf32>, vector<96x16xf32>, vector<96x16xf32> -> vector<96x16xf32>
    %c18 = arith.constant 18 : index
    %c0_50 = arith.constant 0 : index
    %c0_51 = arith.constant 0 : index
    %42 = vector.load %arg14[%c18, %c0_50, %c0_51] : memref<36x16x16xf32, #tpu.memory_space<vmem>>, vector<1x16x16xf32>
    %43 = vector.shape_cast %42 : vector<1x16x16xf32> to vector<16x16xf32>
    %cst_52 = arith.constant dense<0.000000e+00> : vector<96x16xf32>
    %44 = tpu.matmul %41, %43, %cst_52 {dimension_numbers = #tpu.dot_dimension_numbers<[1], [0], [0], [1], [0, 0, 1, 1], [], []>} : vector<96x16xf32>, vector<16x16xf32>, vector<96x16xf32> -> vector<96x16xf32>
    %45 = vector.broadcast %36 : vector<1x16xf32> to vector<96x16xf32>
    %46 = arith.addf %45, %44 : vector<96x16xf32>
    %c18_53 = arith.constant 18 : index
    %c0_54 = arith.constant 0 : index
    %c0_55 = arith.constant 0 : index
    %47 = vector.load %arg15[%c18_53, %c0_54, %c0_55] : memref<36x16x16xf32, #tpu.memory_space<vmem>>, vector<1x16x16xf32>
    %48 = vector.shape_cast %47 : vector<1x16x16xf32> to vector<16x16xf32>
    %cst_56 = arith.constant dense<0.000000e+00> : vector<96x16xf32>
    %49 = tpu.matmul %41, %48, %cst_56 {dimension_numbers = #tpu.dot_dimension_numbers<[1], [0], [0], [1], [0, 0, 1, 1], [], []>} : vector<96x16xf32>, vector<16x16xf32>, vector<96x16xf32> -> vector<96x16xf32>
    %50 = vector.broadcast %38 : vector<1x16xf32> to vector<96x16xf32>
    %51 = arith.addf %50, %49 : vector<96x16xf32>
    %c19 = arith.constant 19 : index
    %c0_57 = arith.constant 0 : index
    %c0_58 = arith.constant 0 : index
    %52 = vector.load %arg14[%c19, %c0_57, %c0_58] : memref<36x16x16xf32, #tpu.memory_space<vmem>>, vector<1x16x16xf32>
    %53 = vector.shape_cast %52 : vector<1x16x16xf32> to vector<16x16xf32>
    %cst_59 = arith.constant dense<0.000000e+00> : vector<96x16xf32>
    %54 = tpu.matmul %16, %53, %cst_59 {dimension_numbers = #tpu.dot_dimension_numbers<[1], [0], [0], [1], [0, 0, 1, 1], [], []>} : vector<96x16xf32>, vector<16x16xf32>, vector<96x16xf32> -> vector<96x16xf32>
    %55 = arith.addf %46, %54 : vector<96x16xf32>
    %c19_60 = arith.constant 19 : index
    %c0_61 = arith.constant 0 : index
    %c0_62 = arith.constant 0 : index
    %56 = vector.load %arg15[%c19_60, %c0_61, %c0_62] : memref<36x16x16xf32, #tpu.memory_space<vmem>>, vector<1x16x16xf32>
    %57 = vector.shape_cast %56 : vector<1x16x16xf32> to vector<16x16xf32>
    %cst_63 = arith.constant dense<0.000000e+00> : vector<96x16xf32>
    %58 = tpu.matmul %16, %57, %cst_63 {dimension_numbers = #tpu.dot_dimension_numbers<[1], [0], [0], [1], [0, 0, 1, 1], [], []>} : vector<96x16xf32>, vector<16x16xf32>, vector<96x16xf32> -> vector<96x16xf32>
    %59 = arith.addf %51, %58 : vector<96x16xf32>
    %c2_64 = arith.constant 2 : index
    %c0_65 = arith.constant 0 : index
    %c0_66 = arith.constant 0 : index
    %60 = vector.load %arg8[%c2_64, %c0_65, %c0_66] : memref<6x96x96xf32, #tpu.memory_space<vmem>>, vector<1x96x96xf32>
    %61 = vector.shape_cast %60 : vector<1x96x96xf32> to vector<96x96xf32>
    %cst_67 = arith.constant dense<0.000000e+00> : vector<96x16xf32>
    %62 = tpu.matmul %61, %16, %cst_67 {dimension_numbers = #tpu.dot_dimension_numbers<[1], [0], [0], [1], [0, 0, 1, 1], [], []>} : vector<96x96xf32>, vector<96x16xf32>, vector<96x16xf32> -> vector<96x16xf32>
    %c20 = arith.constant 20 : index
    %c0_68 = arith.constant 0 : index
    %c0_69 = arith.constant 0 : index
    %63 = vector.load %arg14[%c20, %c0_68, %c0_69] : memref<36x16x16xf32, #tpu.memory_space<vmem>>, vector<1x16x16xf32>
    %64 = vector.shape_cast %63 : vector<1x16x16xf32> to vector<16x16xf32>
    %cst_70 = arith.constant dense<0.000000e+00> : vector<96x16xf32>
    %65 = tpu.matmul %62, %64, %cst_70 {dimension_numbers = #tpu.dot_dimension_numbers<[1], [0], [0], [1], [0, 0, 1, 1], [], []>} : vector<96x16xf32>, vector<16x16xf32>, vector<96x16xf32> -> vector<96x16xf32>
    %66 = arith.addf %55, %65 : vector<96x16xf32>
    %c20_71 = arith.constant 20 : index
    %c0_72 = arith.constant 0 : index
    %c0_73 = arith.constant 0 : index
    %67 = vector.load %arg15[%c20_71, %c0_72, %c0_73] : memref<36x16x16xf32, #tpu.memory_space<vmem>>, vector<1x16x16xf32>
    %68 = vector.shape_cast %67 : vector<1x16x16xf32> to vector<16x16xf32>
    %cst_74 = arith.constant dense<0.000000e+00> : vector<96x16xf32>
    %69 = tpu.matmul %62, %68, %cst_74 {dimension_numbers = #tpu.dot_dimension_numbers<[1], [0], [0], [1], [0, 0, 1, 1], [], []>} : vector<96x16xf32>, vector<16x16xf32>, vector<96x16xf32> -> vector<96x16xf32>
    %70 = arith.addf %59, %69 : vector<96x16xf32>
    %71 = arith.negf %70 : vector<96x16xf32>
    %72 = math.exp %71 : vector<96x16xf32>
    %cst_75 = arith.constant 1.000000e+00 : f32
    %73 = vector.broadcast %cst_75 : f32 to vector<96x16xf32>
    %74 = arith.addf %73, %72 : vector<96x16xf32>
    %75 = arith.divf %73, %74 : vector<96x16xf32>
    %76 = arith.mulf %66, %75 : vector<96x16xf32>
    %c7 = arith.constant 7 : index
    %c0_76 = arith.constant 0 : index
    %c0_77 = arith.constant 0 : index
    %77 = vector.load %arg16[%c7, %c0_76, %c0_77] : memref<12x1x16xf32, #tpu.memory_space<vmem>>, vector<1x1x16xf32>
    %78 = vector.shape_cast %77 : vector<1x1x16xf32> to vector<1x16xf32>
    %c7_78 = arith.constant 7 : index
    %c0_79 = arith.constant 0 : index
    %c0_80 = arith.constant 0 : index
    %79 = vector.load %arg17[%c7_78, %c0_79, %c0_80] : memref<12x1x16xf32, #tpu.memory_space<vmem>>, vector<1x1x16xf32>
    %80 = vector.shape_cast %79 : vector<1x1x16xf32> to vector<1x16xf32>
    %c3 = arith.constant 3 : index
    %c0_81 = arith.constant 0 : index
    %c0_82 = arith.constant 0 : index
    %81 = vector.load %arg8[%c3, %c0_81, %c0_82] : memref<6x96x96xf32, #tpu.memory_space<vmem>>, vector<1x96x96xf32>
    %82 = vector.shape_cast %81 : vector<1x96x96xf32> to vector<96x96xf32>
    %cst_83 = arith.constant dense<0.000000e+00> : vector<96x16xf32>
    %83 = tpu.matmul %82, %76, %cst_83 {dimension_numbers = #tpu.dot_dimension_numbers<[1], [0], [0], [1], [0, 0, 1, 1], [], []>} : vector<96x96xf32>, vector<96x16xf32>, vector<96x16xf32> -> vector<96x16xf32>
    %c21 = arith.constant 21 : index
    %c0_84 = arith.constant 0 : index
    %c0_85 = arith.constant 0 : index
    %84 = vector.load %arg14[%c21, %c0_84, %c0_85] : memref<36x16x16xf32, #tpu.memory_space<vmem>>, vector<1x16x16xf32>
    %85 = vector.shape_cast %84 : vector<1x16x16xf32> to vector<16x16xf32>
    %cst_86 = arith.constant dense<0.000000e+00> : vector<96x16xf32>
    %86 = tpu.matmul %83, %85, %cst_86 {dimension_numbers = #tpu.dot_dimension_numbers<[1], [0], [0], [1], [0, 0, 1, 1], [], []>} : vector<96x16xf32>, vector<16x16xf32>, vector<96x16xf32> -> vector<96x16xf32>
    %87 = vector.broadcast %78 : vector<1x16xf32> to vector<96x16xf32>
    %88 = arith.addf %87, %86 : vector<96x16xf32>
    %c21_87 = arith.constant 21 : index
    %c0_88 = arith.constant 0 : index
    %c0_89 = arith.constant 0 : index
    %89 = vector.load %arg15[%c21_87, %c0_88, %c0_89] : memref<36x16x16xf32, #tpu.memory_space<vmem>>, vector<1x16x16xf32>
    %90 = vector.shape_cast %89 : vector<1x16x16xf32> to vector<16x16xf32>
    %cst_90 = arith.constant dense<0.000000e+00> : vector<96x16xf32>
    %91 = tpu.matmul %83, %90, %cst_90 {dimension_numbers = #tpu.dot_dimension_numbers<[1], [0], [0], [1], [0, 0, 1, 1], [], []>} : vector<96x16xf32>, vector<16x16xf32>, vector<96x16xf32> -> vector<96x16xf32>
    %92 = vector.broadcast %80 : vector<1x16xf32> to vector<96x16xf32>
    %93 = arith.addf %92, %91 : vector<96x16xf32>
    %c22 = arith.constant 22 : index
    %c0_91 = arith.constant 0 : index
    %c0_92 = arith.constant 0 : index
    %94 = vector.load %arg14[%c22, %c0_91, %c0_92] : memref<36x16x16xf32, #tpu.memory_space<vmem>>, vector<1x16x16xf32>
    %95 = vector.shape_cast %94 : vector<1x16x16xf32> to vector<16x16xf32>
    %cst_93 = arith.constant dense<0.000000e+00> : vector<96x16xf32>
    %96 = tpu.matmul %76, %95, %cst_93 {dimension_numbers = #tpu.dot_dimension_numbers<[1], [0], [0], [1], [0, 0, 1, 1], [], []>} : vector<96x16xf32>, vector<16x16xf32>, vector<96x16xf32> -> vector<96x16xf32>
    %97 = arith.addf %88, %96 : vector<96x16xf32>
    %c22_94 = arith.constant 22 : index
    %c0_95 = arith.constant 0 : index
    %c0_96 = arith.constant 0 : index
    %98 = vector.load %arg15[%c22_94, %c0_95, %c0_96] : memref<36x16x16xf32, #tpu.memory_space<vmem>>, vector<1x16x16xf32>
    %99 = vector.shape_cast %98 : vector<1x16x16xf32> to vector<16x16xf32>
    %cst_97 = arith.constant dense<0.000000e+00> : vector<96x16xf32>
    %100 = tpu.matmul %76, %99, %cst_97 {dimension_numbers = #tpu.dot_dimension_numbers<[1], [0], [0], [1], [0, 0, 1, 1], [], []>} : vector<96x16xf32>, vector<16x16xf32>, vector<96x16xf32> -> vector<96x16xf32>
    %101 = arith.addf %93, %100 : vector<96x16xf32>
    %c5 = arith.constant 5 : index
    %c0_98 = arith.constant 0 : index
    %c0_99 = arith.constant 0 : index
    %102 = vector.load %arg8[%c5, %c0_98, %c0_99] : memref<6x96x96xf32, #tpu.memory_space<vmem>>, vector<1x96x96xf32>
    %103 = vector.shape_cast %102 : vector<1x96x96xf32> to vector<96x96xf32>
    %cst_100 = arith.constant dense<0.000000e+00> : vector<96x16xf32>
    %104 = tpu.matmul %103, %76, %cst_100 {dimension_numbers = #tpu.dot_dimension_numbers<[1], [0], [0], [1], [0, 0, 1, 1], [], []>} : vector<96x96xf32>, vector<96x16xf32>, vector<96x16xf32> -> vector<96x16xf32>
    %c23 = arith.constant 23 : index
    %c0_101 = arith.constant 0 : index
    %c0_102 = arith.constant 0 : index
    %105 = vector.load %arg14[%c23, %c0_101, %c0_102] : memref<36x16x16xf32, #tpu.memory_space<vmem>>, vector<1x16x16xf32>
    %106 = vector.shape_cast %105 : vector<1x16x16xf32> to vector<16x16xf32>
    %cst_103 = arith.constant dense<0.000000e+00> : vector<96x16xf32>
    %107 = tpu.matmul %104, %106, %cst_103 {dimension_numbers = #tpu.dot_dimension_numbers<[1], [0], [0], [1], [0, 0, 1, 1], [], []>} : vector<96x16xf32>, vector<16x16xf32>, vector<96x16xf32> -> vector<96x16xf32>
    %108 = arith.addf %97, %107 : vector<96x16xf32>
    %c23_104 = arith.constant 23 : index
    %c0_105 = arith.constant 0 : index
    %c0_106 = arith.constant 0 : index
    %109 = vector.load %arg15[%c23_104, %c0_105, %c0_106] : memref<36x16x16xf32, #tpu.memory_space<vmem>>, vector<1x16x16xf32>
    %110 = vector.shape_cast %109 : vector<1x16x16xf32> to vector<16x16xf32>
    %cst_107 = arith.constant dense<0.000000e+00> : vector<96x16xf32>
    %111 = tpu.matmul %104, %110, %cst_107 {dimension_numbers = #tpu.dot_dimension_numbers<[1], [0], [0], [1], [0, 0, 1, 1], [], []>} : vector<96x16xf32>, vector<16x16xf32>, vector<96x16xf32> -> vector<96x16xf32>
    %112 = arith.addf %101, %111 : vector<96x16xf32>
    %113 = arith.negf %112 : vector<96x16xf32>
    %114 = math.exp %113 : vector<96x16xf32>
    %cst_108 = arith.constant 1.000000e+00 : f32
    %115 = vector.broadcast %cst_108 : f32 to vector<96x16xf32>
    %116 = arith.addf %115, %114 : vector<96x16xf32>
    %117 = arith.divf %115, %116 : vector<96x16xf32>
    %118 = arith.mulf %108, %117 : vector<96x16xf32>
    %c8 = arith.constant 8 : index
    %c0_109 = arith.constant 0 : index
    %c0_110 = arith.constant 0 : index
    %119 = vector.load %arg16[%c8, %c0_109, %c0_110] : memref<12x1x16xf32, #tpu.memory_space<vmem>>, vector<1x1x16xf32>
    %120 = vector.shape_cast %119 : vector<1x1x16xf32> to vector<1x16xf32>
    %c8_111 = arith.constant 8 : index
    %c0_112 = arith.constant 0 : index
    %c0_113 = arith.constant 0 : index
    %121 = vector.load %arg17[%c8_111, %c0_112, %c0_113] : memref<12x1x16xf32, #tpu.memory_space<vmem>>, vector<1x1x16xf32>
    %122 = vector.shape_cast %121 : vector<1x1x16xf32> to vector<1x16xf32>
    %c0_114 = arith.constant 0 : index
    %c0_115 = arith.constant 0 : index
    %c0_116 = arith.constant 0 : index
    %123 = vector.load %arg8[%c0_114, %c0_115, %c0_116] : memref<6x96x96xf32, #tpu.memory_space<vmem>>, vector<1x96x96xf32>
    %124 = vector.shape_cast %123 : vector<1x96x96xf32> to vector<96x96xf32>
    %cst_117 = arith.constant dense<0.000000e+00> : vector<96x16xf32>
    %125 = tpu.matmul %124, %25, %cst_117 {dimension_numbers = #tpu.dot_dimension_numbers<[1], [0], [0], [1], [0, 0, 1, 1], [], []>} : vector<96x96xf32>, vector<96x16xf32>, vector<96x16xf32> -> vector<96x16xf32>
    %c24 = arith.constant 24 : index
    %c0_118 = arith.constant 0 : index
    %c0_119 = arith.constant 0 : index
    %126 = vector.load %arg14[%c24, %c0_118, %c0_119] : memref<36x16x16xf32, #tpu.memory_space<vmem>>, vector<1x16x16xf32>
    %127 = vector.shape_cast %126 : vector<1x16x16xf32> to vector<16x16xf32>
    %cst_120 = arith.constant dense<0.000000e+00> : vector<96x16xf32>
    %128 = tpu.matmul %125, %127, %cst_120 {dimension_numbers = #tpu.dot_dimension_numbers<[1], [0], [0], [1], [0, 0, 1, 1], [], []>} : vector<96x16xf32>, vector<16x16xf32>, vector<96x16xf32> -> vector<96x16xf32>
    %129 = vector.broadcast %120 : vector<1x16xf32> to vector<96x16xf32>
    %130 = arith.addf %129, %128 : vector<96x16xf32>
    %c24_121 = arith.constant 24 : index
    %c0_122 = arith.constant 0 : index
    %c0_123 = arith.constant 0 : index
    %131 = vector.load %arg15[%c24_121, %c0_122, %c0_123] : memref<36x16x16xf32, #tpu.memory_space<vmem>>, vector<1x16x16xf32>
    %132 = vector.shape_cast %131 : vector<1x16x16xf32> to vector<16x16xf32>
    %cst_124 = arith.constant dense<0.000000e+00> : vector<96x16xf32>
    %133 = tpu.matmul %125, %132, %cst_124 {dimension_numbers = #tpu.dot_dimension_numbers<[1], [0], [0], [1], [0, 0, 1, 1], [], []>} : vector<96x16xf32>, vector<16x16xf32>, vector<96x16xf32> -> vector<96x16xf32>
    %134 = vector.broadcast %122 : vector<1x16xf32> to vector<96x16xf32>
    %135 = arith.addf %134, %133 : vector<96x16xf32>
    %c25 = arith.constant 25 : index
    %c0_125 = arith.constant 0 : index
    %c0_126 = arith.constant 0 : index
    %136 = vector.load %arg14[%c25, %c0_125, %c0_126] : memref<36x16x16xf32, #tpu.memory_space<vmem>>, vector<1x16x16xf32>
    %137 = vector.shape_cast %136 : vector<1x16x16xf32> to vector<16x16xf32>
    %cst_127 = arith.constant dense<0.000000e+00> : vector<96x16xf32>
    %138 = tpu.matmul %25, %137, %cst_127 {dimension_numbers = #tpu.dot_dimension_numbers<[1], [0], [0], [1], [0, 0, 1, 1], [], []>} : vector<96x16xf32>, vector<16x16xf32>, vector<96x16xf32> -> vector<96x16xf32>
    %139 = arith.addf %130, %138 : vector<96x16xf32>
    %c25_128 = arith.constant 25 : index
    %c0_129 = arith.constant 0 : index
    %c0_130 = arith.constant 0 : index
    %140 = vector.load %arg15[%c25_128, %c0_129, %c0_130] : memref<36x16x16xf32, #tpu.memory_space<vmem>>, vector<1x16x16xf32>
    %141 = vector.shape_cast %140 : vector<1x16x16xf32> to vector<16x16xf32>
    %cst_131 = arith.constant dense<0.000000e+00> : vector<96x16xf32>
    %142 = tpu.matmul %25, %141, %cst_131 {dimension_numbers = #tpu.dot_dimension_numbers<[1], [0], [0], [1], [0, 0, 1, 1], [], []>} : vector<96x16xf32>, vector<16x16xf32>, vector<96x16xf32> -> vector<96x16xf32>
    %143 = arith.addf %135, %142 : vector<96x16xf32>
    %c2_132 = arith.constant 2 : index
    %c0_133 = arith.constant 0 : index
    %c0_134 = arith.constant 0 : index
    %144 = vector.load %arg8[%c2_132, %c0_133, %c0_134] : memref<6x96x96xf32, #tpu.memory_space<vmem>>, vector<1x96x96xf32>
    %145 = vector.shape_cast %144 : vector<1x96x96xf32> to vector<96x96xf32>
    %cst_135 = arith.constant dense<0.000000e+00> : vector<96x16xf32>
    %146 = tpu.matmul %145, %25, %cst_135 {dimension_numbers = #tpu.dot_dimension_numbers<[1], [0], [0], [1], [0, 0, 1, 1], [], []>} : vector<96x96xf32>, vector<96x16xf32>, vector<96x16xf32> -> vector<96x16xf32>
    %c26 = arith.constant 26 : index
    %c0_136 = arith.constant 0 : index
    %c0_137 = arith.constant 0 : index
    %147 = vector.load %arg14[%c26, %c0_136, %c0_137] : memref<36x16x16xf32, #tpu.memory_space<vmem>>, vector<1x16x16xf32>
    %148 = vector.shape_cast %147 : vector<1x16x16xf32> to vector<16x16xf32>
    %cst_138 = arith.constant dense<0.000000e+00> : vector<96x16xf32>
    %149 = tpu.matmul %146, %148, %cst_138 {dimension_numbers = #tpu.dot_dimension_numbers<[1], [0], [0], [1], [0, 0, 1, 1], [], []>} : vector<96x16xf32>, vector<16x16xf32>, vector<96x16xf32> -> vector<96x16xf32>
    %150 = arith.addf %139, %149 : vector<96x16xf32>
    %c26_139 = arith.constant 26 : index
    %c0_140 = arith.constant 0 : index
    %c0_141 = arith.constant 0 : index
    %151 = vector.load %arg15[%c26_139, %c0_140, %c0_141] : memref<36x16x16xf32, #tpu.memory_space<vmem>>, vector<1x16x16xf32>
    %152 = vector.shape_cast %151 : vector<1x16x16xf32> to vector<16x16xf32>
    %cst_142 = arith.constant dense<0.000000e+00> : vector<96x16xf32>
    %153 = tpu.matmul %146, %152, %cst_142 {dimension_numbers = #tpu.dot_dimension_numbers<[1], [0], [0], [1], [0, 0, 1, 1], [], []>} : vector<96x16xf32>, vector<16x16xf32>, vector<96x16xf32> -> vector<96x16xf32>
    %154 = arith.addf %143, %153 : vector<96x16xf32>
    %155 = arith.negf %154 : vector<96x16xf32>
    %156 = math.exp %155 : vector<96x16xf32>
    %cst_143 = arith.constant 1.000000e+00 : f32
    %157 = vector.broadcast %cst_143 : f32 to vector<96x16xf32>
    %158 = arith.addf %157, %156 : vector<96x16xf32>
    %159 = arith.divf %157, %158 : vector<96x16xf32>
    %160 = arith.mulf %150, %159 : vector<96x16xf32>
    %c9 = arith.constant 9 : index
    %c0_144 = arith.constant 0 : index
    %c0_145 = arith.constant 0 : index
    %161 = vector.load %arg16[%c9, %c0_144, %c0_145] : memref<12x1x16xf32, #tpu.memory_space<vmem>>, vector<1x1x16xf32>
    %162 = vector.shape_cast %161 : vector<1x1x16xf32> to vector<1x16xf32>
    %c9_146 = arith.constant 9 : index
    %c0_147 = arith.constant 0 : index
    %c0_148 = arith.constant 0 : index
    %163 = vector.load %arg17[%c9_146, %c0_147, %c0_148] : memref<12x1x16xf32, #tpu.memory_space<vmem>>, vector<1x1x16xf32>
    %164 = vector.shape_cast %163 : vector<1x1x16xf32> to vector<1x16xf32>
    %c3_149 = arith.constant 3 : index
    %c0_150 = arith.constant 0 : index
    %c0_151 = arith.constant 0 : index
    %165 = vector.load %arg8[%c3_149, %c0_150, %c0_151] : memref<6x96x96xf32, #tpu.memory_space<vmem>>, vector<1x96x96xf32>
    %166 = vector.shape_cast %165 : vector<1x96x96xf32> to vector<96x96xf32>
    %cst_152 = arith.constant dense<0.000000e+00> : vector<96x16xf32>
    %167 = tpu.matmul %166, %160, %cst_152 {dimension_numbers = #tpu.dot_dimension_numbers<[1], [0], [0], [1], [0, 0, 1, 1], [], []>} : vector<96x96xf32>, vector<96x16xf32>, vector<96x16xf32> -> vector<96x16xf32>
    %c27 = arith.constant 27 : index
    %c0_153 = arith.constant 0 : index
    %c0_154 = arith.constant 0 : index
    %168 = vector.load %arg14[%c27, %c0_153, %c0_154] : memref<36x16x16xf32, #tpu.memory_space<vmem>>, vector<1x16x16xf32>
    %169 = vector.shape_cast %168 : vector<1x16x16xf32> to vector<16x16xf32>
    %cst_155 = arith.constant dense<0.000000e+00> : vector<96x16xf32>
    %170 = tpu.matmul %167, %169, %cst_155 {dimension_numbers = #tpu.dot_dimension_numbers<[1], [0], [0], [1], [0, 0, 1, 1], [], []>} : vector<96x16xf32>, vector<16x16xf32>, vector<96x16xf32> -> vector<96x16xf32>
    %171 = vector.broadcast %162 : vector<1x16xf32> to vector<96x16xf32>
    %172 = arith.addf %171, %170 : vector<96x16xf32>
    %c27_156 = arith.constant 27 : index
    %c0_157 = arith.constant 0 : index
    %c0_158 = arith.constant 0 : index
    %173 = vector.load %arg15[%c27_156, %c0_157, %c0_158] : memref<36x16x16xf32, #tpu.memory_space<vmem>>, vector<1x16x16xf32>
    %174 = vector.shape_cast %173 : vector<1x16x16xf32> to vector<16x16xf32>
    %cst_159 = arith.constant dense<0.000000e+00> : vector<96x16xf32>
    %175 = tpu.matmul %167, %174, %cst_159 {dimension_numbers = #tpu.dot_dimension_numbers<[1], [0], [0], [1], [0, 0, 1, 1], [], []>} : vector<96x16xf32>, vector<16x16xf32>, vector<96x16xf32> -> vector<96x16xf32>
    %176 = vector.broadcast %164 : vector<1x16xf32> to vector<96x16xf32>
    %177 = arith.addf %176, %175 : vector<96x16xf32>
    %c28 = arith.constant 28 : index
    %c0_160 = arith.constant 0 : index
    %c0_161 = arith.constant 0 : index
    %178 = vector.load %arg14[%c28, %c0_160, %c0_161] : memref<36x16x16xf32, #tpu.memory_space<vmem>>, vector<1x16x16xf32>
    %179 = vector.shape_cast %178 : vector<1x16x16xf32> to vector<16x16xf32>
    %cst_162 = arith.constant dense<0.000000e+00> : vector<96x16xf32>
    %180 = tpu.matmul %160, %179, %cst_162 {dimension_numbers = #tpu.dot_dimension_numbers<[1], [0], [0], [1], [0, 0, 1, 1], [], []>} : vector<96x16xf32>, vector<16x16xf32>, vector<96x16xf32> -> vector<96x16xf32>
    %181 = arith.addf %172, %180 : vector<96x16xf32>
    %c28_163 = arith.constant 28 : index
    %c0_164 = arith.constant 0 : index
    %c0_165 = arith.constant 0 : index
    %182 = vector.load %arg15[%c28_163, %c0_164, %c0_165] : memref<36x16x16xf32, #tpu.memory_space<vmem>>, vector<1x16x16xf32>
    %183 = vector.shape_cast %182 : vector<1x16x16xf32> to vector<16x16xf32>
    %cst_166 = arith.constant dense<0.000000e+00> : vector<96x16xf32>
    %184 = tpu.matmul %160, %183, %cst_166 {dimension_numbers = #tpu.dot_dimension_numbers<[1], [0], [0], [1], [0, 0, 1, 1], [], []>} : vector<96x16xf32>, vector<16x16xf32>, vector<96x16xf32> -> vector<96x16xf32>
    %185 = arith.addf %177, %184 : vector<96x16xf32>
    %c5_167 = arith.constant 5 : index
    %c0_168 = arith.constant 0 : index
    %c0_169 = arith.constant 0 : index
    %186 = vector.load %arg8[%c5_167, %c0_168, %c0_169] : memref<6x96x96xf32, #tpu.memory_space<vmem>>, vector<1x96x96xf32>
    %187 = vector.shape_cast %186 : vector<1x96x96xf32> to vector<96x96xf32>
    %cst_170 = arith.constant dense<0.000000e+00> : vector<96x16xf32>
    %188 = tpu.matmul %187, %160, %cst_170 {dimension_numbers = #tpu.dot_dimension_numbers<[1], [0], [0], [1], [0, 0, 1, 1], [], []>} : vector<96x96xf32>, vector<96x16xf32>, vector<96x16xf32> -> vector<96x16xf32>
    %c29 = arith.constant 29 : index
    %c0_171 = arith.constant 0 : index
    %c0_172 = arith.constant 0 : index
    %189 = vector.load %arg14[%c29, %c0_171, %c0_172] : memref<36x16x16xf32, #tpu.memory_space<vmem>>, vector<1x16x16xf32>
    %190 = vector.shape_cast %189 : vector<1x16x16xf32> to vector<16x16xf32>
    %cst_173 = arith.constant dense<0.000000e+00> : vector<96x16xf32>
    %191 = tpu.matmul %188, %190, %cst_173 {dimension_numbers = #tpu.dot_dimension_numbers<[1], [0], [0], [1], [0, 0, 1, 1], [], []>} : vector<96x16xf32>, vector<16x16xf32>, vector<96x16xf32> -> vector<96x16xf32>
    %192 = arith.addf %181, %191 : vector<96x16xf32>
    %c29_174 = arith.constant 29 : index
    %c0_175 = arith.constant 0 : index
    %c0_176 = arith.constant 0 : index
    %193 = vector.load %arg15[%c29_174, %c0_175, %c0_176] : memref<36x16x16xf32, #tpu.memory_space<vmem>>, vector<1x16x16xf32>
    %194 = vector.shape_cast %193 : vector<1x16x16xf32> to vector<16x16xf32>
    %cst_177 = arith.constant dense<0.000000e+00> : vector<96x16xf32>
    %195 = tpu.matmul %188, %194, %cst_177 {dimension_numbers = #tpu.dot_dimension_numbers<[1], [0], [0], [1], [0, 0, 1, 1], [], []>} : vector<96x16xf32>, vector<16x16xf32>, vector<96x16xf32> -> vector<96x16xf32>
    %196 = arith.addf %185, %195 : vector<96x16xf32>
    %197 = arith.negf %196 : vector<96x16xf32>
    %198 = math.exp %197 : vector<96x16xf32>
    %cst_178 = arith.constant 1.000000e+00 : f32
    %199 = vector.broadcast %cst_178 : f32 to vector<96x16xf32>
    %200 = arith.addf %199, %198 : vector<96x16xf32>
    %201 = arith.divf %199, %200 : vector<96x16xf32>
    %202 = arith.mulf %192, %201 : vector<96x16xf32>
    %c10 = arith.constant 10 : index
    %c0_179 = arith.constant 0 : index
    %c0_180 = arith.constant 0 : index
    %203 = vector.load %arg16[%c10, %c0_179, %c0_180] : memref<12x1x16xf32, #tpu.memory_space<vmem>>, vector<1x1x16xf32>
    %204 = vector.shape_cast %203 : vector<1x1x16xf32> to vector<1x16xf32>
    %c10_181 = arith.constant 10 : index
    %c0_182 = arith.constant 0 : index
    %c0_183 = arith.constant 0 : index
    %205 = vector.load %arg17[%c10_181, %c0_182, %c0_183] : memref<12x1x16xf32, #tpu.memory_space<vmem>>, vector<1x1x16xf32>
    %206 = vector.shape_cast %205 : vector<1x1x16xf32> to vector<1x16xf32>
    %c0_184 = arith.constant 0 : index
    %c0_185 = arith.constant 0 : index
    %c0_186 = arith.constant 0 : index
    %207 = vector.load %arg8[%c0_184, %c0_185, %c0_186] : memref<6x96x96xf32, #tpu.memory_space<vmem>>, vector<1x96x96xf32>
    %208 = vector.shape_cast %207 : vector<1x96x96xf32> to vector<96x96xf32>
    %cst_187 = arith.constant dense<0.000000e+00> : vector<96x16xf32>
    %209 = tpu.matmul %208, %34, %cst_187 {dimension_numbers = #tpu.dot_dimension_numbers<[1], [0], [0], [1], [0, 0, 1, 1], [], []>} : vector<96x96xf32>, vector<96x16xf32>, vector<96x16xf32> -> vector<96x16xf32>
    %c30 = arith.constant 30 : index
    %c0_188 = arith.constant 0 : index
    %c0_189 = arith.constant 0 : index
    %210 = vector.load %arg14[%c30, %c0_188, %c0_189] : memref<36x16x16xf32, #tpu.memory_space<vmem>>, vector<1x16x16xf32>
    %211 = vector.shape_cast %210 : vector<1x16x16xf32> to vector<16x16xf32>
    %cst_190 = arith.constant dense<0.000000e+00> : vector<96x16xf32>
    %212 = tpu.matmul %209, %211, %cst_190 {dimension_numbers = #tpu.dot_dimension_numbers<[1], [0], [0], [1], [0, 0, 1, 1], [], []>} : vector<96x16xf32>, vector<16x16xf32>, vector<96x16xf32> -> vector<96x16xf32>
    %213 = vector.broadcast %204 : vector<1x16xf32> to vector<96x16xf32>
    %214 = arith.addf %213, %212 : vector<96x16xf32>
    %c30_191 = arith.constant 30 : index
    %c0_192 = arith.constant 0 : index
    %c0_193 = arith.constant 0 : index
    %215 = vector.load %arg15[%c30_191, %c0_192, %c0_193] : memref<36x16x16xf32, #tpu.memory_space<vmem>>, vector<1x16x16xf32>
    %216 = vector.shape_cast %215 : vector<1x16x16xf32> to vector<16x16xf32>
    %cst_194 = arith.constant dense<0.000000e+00> : vector<96x16xf32>
    %217 = tpu.matmul %209, %216, %cst_194 {dimension_numbers = #tpu.dot_dimension_numbers<[1], [0], [0], [1], [0, 0, 1, 1], [], []>} : vector<96x16xf32>, vector<16x16xf32>, vector<96x16xf32> -> vector<96x16xf32>
    %218 = vector.broadcast %206 : vector<1x16xf32> to vector<96x16xf32>
    %219 = arith.addf %218, %217 : vector<96x16xf32>
    %c31 = arith.constant 31 : index
    %c0_195 = arith.constant 0 : index
    %c0_196 = arith.constant 0 : index
    %220 = vector.load %arg14[%c31, %c0_195, %c0_196] : memref<36x16x16xf32, #tpu.memory_space<vmem>>, vector<1x16x16xf32>
    %221 = vector.shape_cast %220 : vector<1x16x16xf32> to vector<16x16xf32>
    %cst_197 = arith.constant dense<0.000000e+00> : vector<96x16xf32>
    %222 = tpu.matmul %34, %221, %cst_197 {dimension_numbers = #tpu.dot_dimension_numbers<[1], [0], [0], [1], [0, 0, 1, 1], [], []>} : vector<96x16xf32>, vector<16x16xf32>, vector<96x16xf32> -> vector<96x16xf32>
    %223 = arith.addf %214, %222 : vector<96x16xf32>
    %c31_198 = arith.constant 31 : index
    %c0_199 = arith.constant 0 : index
    %c0_200 = arith.constant 0 : index
    %224 = vector.load %arg15[%c31_198, %c0_199, %c0_200] : memref<36x16x16xf32, #tpu.memory_space<vmem>>, vector<1x16x16xf32>
    %225 = vector.shape_cast %224 : vector<1x16x16xf32> to vector<16x16xf32>
    %cst_201 = arith.constant dense<0.000000e+00> : vector<96x16xf32>
    %226 = tpu.matmul %34, %225, %cst_201 {dimension_numbers = #tpu.dot_dimension_numbers<[1], [0], [0], [1], [0, 0, 1, 1], [], []>} : vector<96x16xf32>, vector<16x16xf32>, vector<96x16xf32> -> vector<96x16xf32>
    %227 = arith.addf %219, %226 : vector<96x16xf32>
    %c2_202 = arith.constant 2 : index
    %c0_203 = arith.constant 0 : index
    %c0_204 = arith.constant 0 : index
    %228 = vector.load %arg8[%c2_202, %c0_203, %c0_204] : memref<6x96x96xf32, #tpu.memory_space<vmem>>, vector<1x96x96xf32>
    %229 = vector.shape_cast %228 : vector<1x96x96xf32> to vector<96x96xf32>
    %cst_205 = arith.constant dense<0.000000e+00> : vector<96x16xf32>
    %230 = tpu.matmul %229, %34, %cst_205 {dimension_numbers = #tpu.dot_dimension_numbers<[1], [0], [0], [1], [0, 0, 1, 1], [], []>} : vector<96x96xf32>, vector<96x16xf32>, vector<96x16xf32> -> vector<96x16xf32>
    %c32 = arith.constant 32 : index
    %c0_206 = arith.constant 0 : index
    %c0_207 = arith.constant 0 : index
    %231 = vector.load %arg14[%c32, %c0_206, %c0_207] : memref<36x16x16xf32, #tpu.memory_space<vmem>>, vector<1x16x16xf32>
    %232 = vector.shape_cast %231 : vector<1x16x16xf32> to vector<16x16xf32>
    %cst_208 = arith.constant dense<0.000000e+00> : vector<96x16xf32>
    %233 = tpu.matmul %230, %232, %cst_208 {dimension_numbers = #tpu.dot_dimension_numbers<[1], [0], [0], [1], [0, 0, 1, 1], [], []>} : vector<96x16xf32>, vector<16x16xf32>, vector<96x16xf32> -> vector<96x16xf32>
    %234 = arith.addf %223, %233 : vector<96x16xf32>
    %c32_209 = arith.constant 32 : index
    %c0_210 = arith.constant 0 : index
    %c0_211 = arith.constant 0 : index
    %235 = vector.load %arg15[%c32_209, %c0_210, %c0_211] : memref<36x16x16xf32, #tpu.memory_space<vmem>>, vector<1x16x16xf32>
    %236 = vector.shape_cast %235 : vector<1x16x16xf32> to vector<16x16xf32>
    %cst_212 = arith.constant dense<0.000000e+00> : vector<96x16xf32>
    %237 = tpu.matmul %230, %236, %cst_212 {dimension_numbers = #tpu.dot_dimension_numbers<[1], [0], [0], [1], [0, 0, 1, 1], [], []>} : vector<96x16xf32>, vector<16x16xf32>, vector<96x16xf32> -> vector<96x16xf32>
    %238 = arith.addf %227, %237 : vector<96x16xf32>
    %239 = arith.negf %238 : vector<96x16xf32>
    %240 = math.exp %239 : vector<96x16xf32>
    %cst_213 = arith.constant 1.000000e+00 : f32
    %241 = vector.broadcast %cst_213 : f32 to vector<96x16xf32>
    %242 = arith.addf %241, %240 : vector<96x16xf32>
    %243 = arith.divf %241, %242 : vector<96x16xf32>
    %244 = arith.mulf %234, %243 : vector<96x16xf32>
    %c11 = arith.constant 11 : index
    %c0_214 = arith.constant 0 : index
    %c0_215 = arith.constant 0 : index
    %245 = vector.load %arg16[%c11, %c0_214, %c0_215] : memref<12x1x16xf32, #tpu.memory_space<vmem>>, vector<1x1x16xf32>
    %246 = vector.shape_cast %245 : vector<1x1x16xf32> to vector<1x16xf32>
    %c11_216 = arith.constant 11 : index
    %c0_217 = arith.constant 0 : index
    %c0_218 = arith.constant 0 : index
    %247 = vector.load %arg17[%c11_216, %c0_217, %c0_218] : memref<12x1x16xf32, #tpu.memory_space<vmem>>, vector<1x1x16xf32>
    %248 = vector.shape_cast %247 : vector<1x1x16xf32> to vector<1x16xf32>
    %c3_219 = arith.constant 3 : index
    %c0_220 = arith.constant 0 : index
    %c0_221 = arith.constant 0 : index
    %249 = vector.load %arg8[%c3_219, %c0_220, %c0_221] : memref<6x96x96xf32, #tpu.memory_space<vmem>>, vector<1x96x96xf32>
    %250 = vector.shape_cast %249 : vector<1x96x96xf32> to vector<96x96xf32>
    %cst_222 = arith.constant dense<0.000000e+00> : vector<96x16xf32>
    %251 = tpu.matmul %250, %244, %cst_222 {dimension_numbers = #tpu.dot_dimension_numbers<[1], [0], [0], [1], [0, 0, 1, 1], [], []>} : vector<96x96xf32>, vector<96x16xf32>, vector<96x16xf32> -> vector<96x16xf32>
    %c33 = arith.constant 33 : index
    %c0_223 = arith.constant 0 : index
    %c0_224 = arith.constant 0 : index
    %252 = vector.load %arg14[%c33, %c0_223, %c0_224] : memref<36x16x16xf32, #tpu.memory_space<vmem>>, vector<1x16x16xf32>
    %253 = vector.shape_cast %252 : vector<1x16x16xf32> to vector<16x16xf32>
    %cst_225 = arith.constant dense<0.000000e+00> : vector<96x16xf32>
    %254 = tpu.matmul %251, %253, %cst_225 {dimension_numbers = #tpu.dot_dimension_numbers<[1], [0], [0], [1], [0, 0, 1, 1], [], []>} : vector<96x16xf32>, vector<16x16xf32>, vector<96x16xf32> -> vector<96x16xf32>
    %255 = vector.broadcast %246 : vector<1x16xf32> to vector<96x16xf32>
    %256 = arith.addf %255, %254 : vector<96x16xf32>
    %c33_226 = arith.constant 33 : index
    %c0_227 = arith.constant 0 : index
    %c0_228 = arith.constant 0 : index
    %257 = vector.load %arg15[%c33_226, %c0_227, %c0_228] : memref<36x16x16xf32, #tpu.memory_space<vmem>>, vector<1x16x16xf32>
    %258 = vector.shape_cast %257 : vector<1x16x16xf32> to vector<16x16xf32>
    %cst_229 = arith.constant dense<0.000000e+00> : vector<96x16xf32>
    %259 = tpu.matmul %251, %258, %cst_229 {dimension_numbers = #tpu.dot_dimension_numbers<[1], [0], [0], [1], [0, 0, 1, 1], [], []>} : vector<96x16xf32>, vector<16x16xf32>, vector<96x16xf32> -> vector<96x16xf32>
    %260 = vector.broadcast %248 : vector<1x16xf32> to vector<96x16xf32>
    %261 = arith.addf %260, %259 : vector<96x16xf32>
    %c34 = arith.constant 34 : index
    %c0_230 = arith.constant 0 : index
    %c0_231 = arith.constant 0 : index
    %262 = vector.load %arg14[%c34, %c0_230, %c0_231] : memref<36x16x16xf32, #tpu.memory_space<vmem>>, vector<1x16x16xf32>
    %263 = vector.shape_cast %262 : vector<1x16x16xf32> to vector<16x16xf32>
    %cst_232 = arith.constant dense<0.000000e+00> : vector<96x16xf32>
    %264 = tpu.matmul %244, %263, %cst_232 {dimension_numbers = #tpu.dot_dimension_numbers<[1], [0], [0], [1], [0, 0, 1, 1], [], []>} : vector<96x16xf32>, vector<16x16xf32>, vector<96x16xf32> -> vector<96x16xf32>
    %265 = arith.addf %256, %264 : vector<96x16xf32>
    %c34_233 = arith.constant 34 : index
    %c0_234 = arith.constant 0 : index
    %c0_235 = arith.constant 0 : index
    %266 = vector.load %arg15[%c34_233, %c0_234, %c0_235] : memref<36x16x16xf32, #tpu.memory_space<vmem>>, vector<1x16x16xf32>
    %267 = vector.shape_cast %266 : vector<1x16x16xf32> to vector<16x16xf32>
    %cst_236 = arith.constant dense<0.000000e+00> : vector<96x16xf32>
    %268 = tpu.matmul %244, %267, %cst_236 {dimension_numbers = #tpu.dot_dimension_numbers<[1], [0], [0], [1], [0, 0, 1, 1], [], []>} : vector<96x16xf32>, vector<16x16xf32>, vector<96x16xf32> -> vector<96x16xf32>
    %269 = arith.addf %261, %268 : vector<96x16xf32>
    %c5_237 = arith.constant 5 : index
    %c0_238 = arith.constant 0 : index
    %c0_239 = arith.constant 0 : index
    %270 = vector.load %arg8[%c5_237, %c0_238, %c0_239] : memref<6x96x96xf32, #tpu.memory_space<vmem>>, vector<1x96x96xf32>
    %271 = vector.shape_cast %270 : vector<1x96x96xf32> to vector<96x96xf32>
    %cst_240 = arith.constant dense<0.000000e+00> : vector<96x16xf32>
    %272 = tpu.matmul %271, %244, %cst_240 {dimension_numbers = #tpu.dot_dimension_numbers<[1], [0], [0], [1], [0, 0, 1, 1], [], []>} : vector<96x96xf32>, vector<96x16xf32>, vector<96x16xf32> -> vector<96x16xf32>
    %c35 = arith.constant 35 : index
    %c0_241 = arith.constant 0 : index
    %c0_242 = arith.constant 0 : index
    %273 = vector.load %arg14[%c35, %c0_241, %c0_242] : memref<36x16x16xf32, #tpu.memory_space<vmem>>, vector<1x16x16xf32>
    %274 = vector.shape_cast %273 : vector<1x16x16xf32> to vector<16x16xf32>
    %cst_243 = arith.constant dense<0.000000e+00> : vector<96x16xf32>
    %275 = tpu.matmul %272, %274, %cst_243 {dimension_numbers = #tpu.dot_dimension_numbers<[1], [0], [0], [1], [0, 0, 1, 1], [], []>} : vector<96x16xf32>, vector<16x16xf32>, vector<96x16xf32> -> vector<96x16xf32>
    %276 = arith.addf %265, %275 : vector<96x16xf32>
    %c35_244 = arith.constant 35 : index
    %c0_245 = arith.constant 0 : index
    %c0_246 = arith.constant 0 : index
    %277 = vector.load %arg15[%c35_244, %c0_245, %c0_246] : memref<36x16x16xf32, #tpu.memory_space<vmem>>, vector<1x16x16xf32>
    %278 = vector.shape_cast %277 : vector<1x16x16xf32> to vector<16x16xf32>
    %cst_247 = arith.constant dense<0.000000e+00> : vector<96x16xf32>
    %279 = tpu.matmul %272, %278, %cst_247 {dimension_numbers = #tpu.dot_dimension_numbers<[1], [0], [0], [1], [0, 0, 1, 1], [], []>} : vector<96x16xf32>, vector<16x16xf32>, vector<96x16xf32> -> vector<96x16xf32>
    %280 = arith.addf %269, %279 : vector<96x16xf32>
    %281 = arith.negf %280 : vector<96x16xf32>
    %282 = math.exp %281 : vector<96x16xf32>
    %cst_248 = arith.constant 1.000000e+00 : f32
    %283 = vector.broadcast %cst_248 : f32 to vector<96x16xf32>
    %284 = arith.addf %283, %282 : vector<96x16xf32>
    %285 = arith.divf %283, %284 : vector<96x16xf32>
    %286 = arith.mulf %276, %285 : vector<96x16xf32>
    %c1_249 = arith.constant 1 : index
    %c0_250 = arith.constant 0 : index
    %c0_251 = arith.constant 0 : index
    %287 = vector.load %arg19[%c1_249, %c0_250, %c0_251] : memref<2x1x16xf32, #tpu.memory_space<vmem>>, vector<1x1x16xf32>
    %288 = vector.shape_cast %287 : vector<1x1x16xf32> to vector<1x16xf32>
    %c3_252 = arith.constant 3 : index
    %c0_253 = arith.constant 0 : index
    %c0_254 = arith.constant 0 : index
    %289 = vector.load %arg18[%c3_252, %c0_253, %c0_254] : memref<6x16x16xf32, #tpu.memory_space<vmem>>, vector<1x16x16xf32>
    %290 = vector.shape_cast %289 : vector<1x16x16xf32> to vector<16x16xf32>
    %cst_255 = arith.constant dense<0.000000e+00> : vector<96x16xf32>
    %291 = tpu.matmul %118, %290, %cst_255 {dimension_numbers = #tpu.dot_dimension_numbers<[1], [0], [0], [1], [0, 0, 1, 1], [], []>} : vector<96x16xf32>, vector<16x16xf32>, vector<96x16xf32> -> vector<96x16xf32>
    %292 = vector.broadcast %288 : vector<1x16xf32> to vector<96x16xf32>
    %293 = arith.addf %292, %291 : vector<96x16xf32>
    %c4 = arith.constant 4 : index
    %c0_256 = arith.constant 0 : index
    %c0_257 = arith.constant 0 : index
    %294 = vector.load %arg18[%c4, %c0_256, %c0_257] : memref<6x16x16xf32, #tpu.memory_space<vmem>>, vector<1x16x16xf32>
    %295 = vector.shape_cast %294 : vector<1x16x16xf32> to vector<16x16xf32>
    %cst_258 = arith.constant dense<0.000000e+00> : vector<96x16xf32>
    %296 = tpu.matmul %202, %295, %cst_258 {dimension_numbers = #tpu.dot_dimension_numbers<[1], [0], [0], [1], [0, 0, 1, 1], [], []>} : vector<96x16xf32>, vector<16x16xf32>, vector<96x16xf32> -> vector<96x16xf32>
    %297 = arith.addf %293, %296 : vector<96x16xf32>
    %c5_259 = arith.constant 5 : index
    %c0_260 = arith.constant 0 : index
    %c0_261 = arith.constant 0 : index
    %298 = vector.load %arg18[%c5_259, %c0_260, %c0_261] : memref<6x16x16xf32, #tpu.memory_space<vmem>>, vector<1x16x16xf32>
    %299 = vector.shape_cast %298 : vector<1x16x16xf32> to vector<16x16xf32>
    %cst_262 = arith.constant dense<0.000000e+00> : vector<96x16xf32>
    %300 = tpu.matmul %286, %299, %cst_262 {dimension_numbers = #tpu.dot_dimension_numbers<[1], [0], [0], [1], [0, 0, 1, 1], [], []>} : vector<96x16xf32>, vector<16x16xf32>, vector<96x16xf32> -> vector<96x16xf32>
    %301 = arith.addf %297, %300 : vector<96x16xf32>
    %cst_263 = arith.constant dense<0.000000e+00> : vector<96x16xf32>
    %302 = tpu.matmul %0, %301, %cst_263 {dimension_numbers = #tpu.dot_dimension_numbers<[1], [0], [0], [1], [0, 0, 1, 1], [], []>} : vector<96x96xf32>, vector<96x16xf32>, vector<96x16xf32> -> vector<96x16xf32>
    %c1_264 = arith.constant 1 : index
    %c0_265 = arith.constant 0 : index
    %c0_266 = arith.constant 0 : index
    %303 = vector.load %arg22[%c1_264, %c0_265, %c0_266] : memref<2x10x16xf32, #tpu.memory_space<vmem>>, vector<1x10x16xf32>
    %304 = vector.shape_cast %303 : vector<1x10x16xf32> to vector<10x16xf32>
    %cst_267 = arith.constant dense<0.000000e+00> : vector<8x16xf32>
    %305 = tpu.matmul %5, %304, %cst_267 {dimension_numbers = #tpu.dot_dimension_numbers<[1], [0], [0], [1], [0, 0, 1, 1], [], []>} : vector<8x10xf32>, vector<10x16xf32>, vector<8x16xf32> -> vector<8x16xf32>
    %c1_268 = arith.constant 1 : index
    %c0_269 = arith.constant 0 : index
    %c0_270 = arith.constant 0 : index
    %306 = vector.load %arg23[%c1_268, %c0_269, %c0_270] : memref<2x1x16xf32, #tpu.memory_space<vmem>>, vector<1x1x16xf32>
    %307 = vector.shape_cast %306 : vector<1x1x16xf32> to vector<1x16xf32>
    %308 = vector.broadcast %307 : vector<1x16xf32> to vector<8x16xf32>
    %309 = arith.addf %305, %308 : vector<8x16xf32>
    %cst_271 = arith.constant dense<0.000000e+00> : vector<96x16xf32>
    %310 = tpu.matmul %2, %309, %cst_271 {dimension_numbers = #tpu.dot_dimension_numbers<[1], [0], [0], [1], [0, 0, 1, 1], [], []>} : vector<96x8xf32>, vector<8x16xf32>, vector<96x16xf32> -> vector<96x16xf32>
    %311 = arith.mulf %302, %310 : vector<96x16xf32>
    %cst_272 = arith.constant dense<0.000000e+00> : vector<96xf32>
    %312 = vector.multi_reduction <add>, %311, %cst_272 [1] : vector<96x16xf32> to vector<96xf32>
    %313 = vector.shape_cast %312 : vector<96xf32> to vector<96x1xf32>
    %cst_273 = arith.constant dense<0.000000e+00> : vector<96x16xf32>
    %314 = tpu.matmul %4, %301, %cst_273 {dimension_numbers = #tpu.dot_dimension_numbers<[1], [0], [0], [1], [0, 0, 1, 1], [], []>} : vector<96x96xf32>, vector<96x16xf32>, vector<96x16xf32> -> vector<96x16xf32>
    %cst_274 = arith.constant dense<0.000000e+00> : vector<96x16xf32>
    %315 = tpu.matmul %4, %314, %cst_274 {dimension_numbers = #tpu.dot_dimension_numbers<[1], [0], [0], [1], [0, 0, 1, 1], [], []>} : vector<96x96xf32>, vector<96x16xf32>, vector<96x16xf32> -> vector<96x16xf32>
    %c1_275 = arith.constant 1 : index
    %c0_276 = arith.constant 0 : index
    %c0_277 = arith.constant 0 : index
    %316 = vector.load %arg21[%c1_275, %c0_276, %c0_277] : memref<2x1x16xf32, #tpu.memory_space<vmem>>, vector<1x1x16xf32>
    %317 = vector.shape_cast %316 : vector<1x1x16xf32> to vector<1x16xf32>
    %c3_278 = arith.constant 3 : index
    %c0_279 = arith.constant 0 : index
    %c0_280 = arith.constant 0 : index
    %318 = vector.load %arg20[%c3_278, %c0_279, %c0_280] : memref<6x16x16xf32, #tpu.memory_space<vmem>>, vector<1x16x16xf32>
    %319 = vector.shape_cast %318 : vector<1x16x16xf32> to vector<16x16xf32>
    %cst_281 = arith.constant dense<0.000000e+00> : vector<96x16xf32>
    %320 = tpu.matmul %301, %319, %cst_281 {dimension_numbers = #tpu.dot_dimension_numbers<[1], [0], [0], [1], [0, 0, 1, 1], [], []>} : vector<96x16xf32>, vector<16x16xf32>, vector<96x16xf32> -> vector<96x16xf32>
    %321 = vector.broadcast %317 : vector<1x16xf32> to vector<96x16xf32>
    %322 = arith.addf %321, %320 : vector<96x16xf32>
    %c4_282 = arith.constant 4 : index
    %c0_283 = arith.constant 0 : index
    %c0_284 = arith.constant 0 : index
    %323 = vector.load %arg20[%c4_282, %c0_283, %c0_284] : memref<6x16x16xf32, #tpu.memory_space<vmem>>, vector<1x16x16xf32>
    %324 = vector.shape_cast %323 : vector<1x16x16xf32> to vector<16x16xf32>
    %cst_285 = arith.constant dense<0.000000e+00> : vector<96x16xf32>
    %325 = tpu.matmul %314, %324, %cst_285 {dimension_numbers = #tpu.dot_dimension_numbers<[1], [0], [0], [1], [0, 0, 1, 1], [], []>} : vector<96x16xf32>, vector<16x16xf32>, vector<96x16xf32> -> vector<96x16xf32>
    %326 = arith.addf %322, %325 : vector<96x16xf32>
    %c5_286 = arith.constant 5 : index
    %c0_287 = arith.constant 0 : index
    %c0_288 = arith.constant 0 : index
    %327 = vector.load %arg20[%c5_286, %c0_287, %c0_288] : memref<6x16x16xf32, #tpu.memory_space<vmem>>, vector<1x16x16xf32>
    %328 = vector.shape_cast %327 : vector<1x16x16xf32> to vector<16x16xf32>
    %cst_289 = arith.constant dense<0.000000e+00> : vector<96x16xf32>
    %329 = tpu.matmul %315, %328, %cst_289 {dimension_numbers = #tpu.dot_dimension_numbers<[1], [0], [0], [1], [0, 0, 1, 1], [], []>} : vector<96x16xf32>, vector<16x16xf32>, vector<96x16xf32> -> vector<96x16xf32>
    %330 = arith.addf %326, %329 : vector<96x16xf32>
    %cst_290 = arith.constant dense<0.000000e+00> : vector<96x16xf32>
    %331 = tpu.matmul %0, %330, %cst_290 {dimension_numbers = #tpu.dot_dimension_numbers<[1], [0], [0], [1], [0, 0, 1, 1], [], []>} : vector<96x96xf32>, vector<96x16xf32>, vector<96x16xf32> -> vector<96x16xf32>
    %c2_291 = arith.constant 2 : index
    %c0_292 = arith.constant 0 : index
    %c0_293 = arith.constant 0 : index
    %332 = vector.load %arg26[%c2_291, %c0_292, %c0_293] : memref<4x16x16xf32, #tpu.memory_space<vmem>>, vector<1x16x16xf32>
    %333 = vector.shape_cast %332 : vector<1x16x16xf32> to vector<16x16xf32>
    %cst_294 = arith.constant dense<0.000000e+00> : vector<96x16xf32>
    %334 = tpu.matmul %302, %333, %cst_294 {dimension_numbers = #tpu.dot_dimension_numbers<[1], [0], [0], [1], [0, 0, 1, 1], [], []>} : vector<96x16xf32>, vector<16x16xf32>, vector<96x16xf32> -> vector<96x16xf32>
    %c2_295 = arith.constant 2 : index
    %c0_296 = arith.constant 0 : index
    %c0_297 = arith.constant 0 : index
    %335 = vector.load %arg27[%c2_295, %c0_296, %c0_297] : memref<4x1x16xf32, #tpu.memory_space<vmem>>, vector<1x1x16xf32>
    %336 = vector.shape_cast %335 : vector<1x1x16xf32> to vector<1x16xf32>
    %c2_298 = arith.constant 2 : index
    %c0_299 = arith.constant 0 : index
    %c0_300 = arith.constant 0 : index
    %337 = vector.load %arg28[%c2_298, %c0_299, %c0_300] : memref<4x1x16xf32, #tpu.memory_space<vmem>>, vector<1x1x16xf32>
    %338 = vector.shape_cast %337 : vector<1x1x16xf32> to vector<1x16xf32>
    %339 = vector.broadcast %336 : vector<1x16xf32> to vector<96x16xf32>
    %340 = arith.mulf %334, %339 : vector<96x16xf32>
    %cst_301 = arith.constant dense<0.000000e+00> : vector<96xf32>
    %341 = vector.multi_reduction <add>, %340, %cst_301 [1] : vector<96x16xf32> to vector<96xf32>
    %342 = vector.shape_cast %341 : vector<96xf32> to vector<96x1xf32>
    %343 = vector.broadcast %338 : vector<1x16xf32> to vector<96x16xf32>
    %344 = arith.mulf %334, %343 : vector<96x16xf32>
    %cst_302 = arith.constant dense<0.000000e+00> : vector<96xf32>
    %345 = vector.multi_reduction <add>, %344, %cst_302 [1] : vector<96x16xf32> to vector<96xf32>
    %346 = vector.shape_cast %345 : vector<96xf32> to vector<96x1xf32>
    %347 = vector.broadcast %346 : vector<96x1xf32> to vector<96x8xf32>
    %348 = arith.mulf %347, %2 : vector<96x8xf32>
    %cst_303 = arith.constant dense<0.000000e+00> : vector<96x8xf32>
    %349 = tpu.matmul %1, %348, %cst_303 {dimension_numbers = #tpu.dot_dimension_numbers<[1], [0], [0], [1], [0, 0, 1, 1], [], []>} : vector<96x96xf32>, vector<96x8xf32>, vector<96x8xf32> -> vector<96x8xf32>
    %350 = vector.broadcast %342 : vector<96x1xf32> to vector<96x8xf32>
    %351 = arith.addf %350, %349 : vector<96x8xf32>
    %cst_304 = arith.constant 0.000000e+00 : f32
    %352 = vector.broadcast %cst_304 : f32 to vector<96x8xf32>
    %353 = arith.cmpf ogt, %351, %352 : vector<96x8xf32>
    %cst_305 = arith.constant 1.000000e-01 : f32
    %354 = vector.broadcast %cst_305 : f32 to vector<96x8xf32>
    %355 = arith.mulf %354, %351 : vector<96x8xf32>
    %356 = arith.select %353, %351, %355 : vector<96x8xi1>, vector<96x8xf32>
    %cst_306 = arith.constant 0.000000e+00 : f32
    %357 = vector.broadcast %cst_306 : f32 to vector<96x8xf32>
    %358 = arith.cmpf ogt, %7, %357 : vector<96x8xf32>
    %cst_307 = arith.constant -3.40282347E+38 : f32
    %359 = vector.broadcast %cst_307 : f32 to vector<96x8xf32>
    %360 = arith.select %358, %356, %359 : vector<96x8xi1>, vector<96x8xf32>
    %cst_308 = arith.constant dense<0xFF800000> : vector<96xf32>
    %361 = vector.multi_reduction <maximumf>, %360, %cst_308 [1] : vector<96x8xf32> to vector<96xf32>
    %362 = vector.shape_cast %361 : vector<96xf32> to vector<96x1xf32>
    %363 = vector.broadcast %362 : vector<96x1xf32> to vector<96x8xf32>
    %364 = arith.subf %360, %363 : vector<96x8xf32>
    %365 = math.exp %364 : vector<96x8xf32>
    %cst_309 = arith.constant dense<0.000000e+00> : vector<96xf32>
    %366 = vector.multi_reduction <add>, %365, %cst_309 [1] : vector<96x8xf32> to vector<96xf32>
    %367 = vector.shape_cast %366 : vector<96xf32> to vector<96x1xf32>
    %368 = tpu.reciprocal %367 {approx = true} : vector<96x1xf32> -> vector<96x1xf32>
    %369 = vector.broadcast %368 : vector<96x1xf32> to vector<96x8xf32>
    %370 = arith.mulf %365, %369 : vector<96x8xf32>
    %cst_310 = arith.constant dense<0.000000e+00> : vector<96x96xf32>
    %371 = tpu.matmul %370, %3, %cst_310 {dimension_numbers = #tpu.dot_dimension_numbers<[1], [0], [0], [1], [0, 0, 1, 1], [], []>} : vector<96x8xf32>, vector<8x96xf32>, vector<96x96xf32> -> vector<96x96xf32>
    %372 = arith.mulf %1, %371 : vector<96x96xf32>
    %cst_311 = arith.constant dense<0.000000e+00> : vector<96x16xf32>
    %373 = tpu.matmul %372, %334, %cst_311 {dimension_numbers = #tpu.dot_dimension_numbers<[1], [0], [0], [1], [0, 0, 1, 1], [], []>} : vector<96x96xf32>, vector<96x16xf32>, vector<96x16xf32> -> vector<96x16xf32>
    %cst_312 = arith.constant 0.000000e+00 : f32
    %374 = vector.broadcast %cst_312 : f32 to vector<96x16xf32>
    %375 = arith.cmpf ogt, %373, %374 : vector<96x16xf32>
    %cst_313 = arith.constant 0.000000e+00 : f32
    %376 = vector.broadcast %cst_313 : f32 to vector<96x16xf32>
    %377 = arith.minimumf %373, %376 : vector<96x16xf32>
    %378 = math.exp %377 : vector<96x16xf32>
    %cst_314 = arith.constant 1.000000e+00 : f32
    %379 = vector.broadcast %cst_314 : f32 to vector<96x16xf32>
    %380 = arith.subf %378, %379 : vector<96x16xf32>
    %381 = arith.select %375, %373, %380 : vector<96x16xi1>, vector<96x16xf32>
    %c3_315 = arith.constant 3 : index
    %c0_316 = arith.constant 0 : index
    %c0_317 = arith.constant 0 : index
    %382 = vector.load %arg26[%c3_315, %c0_316, %c0_317] : memref<4x16x16xf32, #tpu.memory_space<vmem>>, vector<1x16x16xf32>
    %383 = vector.shape_cast %382 : vector<1x16x16xf32> to vector<16x16xf32>
    %cst_318 = arith.constant dense<0.000000e+00> : vector<96x16xf32>
    %384 = tpu.matmul %302, %383, %cst_318 {dimension_numbers = #tpu.dot_dimension_numbers<[1], [0], [0], [1], [0, 0, 1, 1], [], []>} : vector<96x16xf32>, vector<16x16xf32>, vector<96x16xf32> -> vector<96x16xf32>
    %c3_319 = arith.constant 3 : index
    %c0_320 = arith.constant 0 : index
    %c0_321 = arith.constant 0 : index
    %385 = vector.load %arg27[%c3_319, %c0_320, %c0_321] : memref<4x1x16xf32, #tpu.memory_space<vmem>>, vector<1x1x16xf32>
    %386 = vector.shape_cast %385 : vector<1x1x16xf32> to vector<1x16xf32>
    %c3_322 = arith.constant 3 : index
    %c0_323 = arith.constant 0 : index
    %c0_324 = arith.constant 0 : index
    %387 = vector.load %arg28[%c3_322, %c0_323, %c0_324] : memref<4x1x16xf32, #tpu.memory_space<vmem>>, vector<1x1x16xf32>
    %388 = vector.shape_cast %387 : vector<1x1x16xf32> to vector<1x16xf32>
    %389 = vector.broadcast %386 : vector<1x16xf32> to vector<96x16xf32>
    %390 = arith.mulf %384, %389 : vector<96x16xf32>
    %cst_325 = arith.constant dense<0.000000e+00> : vector<96xf32>
    %391 = vector.multi_reduction <add>, %390, %cst_325 [1] : vector<96x16xf32> to vector<96xf32>
    %392 = vector.shape_cast %391 : vector<96xf32> to vector<96x1xf32>
    %393 = vector.broadcast %388 : vector<1x16xf32> to vector<96x16xf32>
    %394 = arith.mulf %384, %393 : vector<96x16xf32>
    %cst_326 = arith.constant dense<0.000000e+00> : vector<96xf32>
    %395 = vector.multi_reduction <add>, %394, %cst_326 [1] : vector<96x16xf32> to vector<96xf32>
    %396 = vector.shape_cast %395 : vector<96xf32> to vector<96x1xf32>
    %397 = vector.broadcast %396 : vector<96x1xf32> to vector<96x8xf32>
    %398 = arith.mulf %397, %2 : vector<96x8xf32>
    %cst_327 = arith.constant dense<0.000000e+00> : vector<96x8xf32>
    %399 = tpu.matmul %1, %398, %cst_327 {dimension_numbers = #tpu.dot_dimension_numbers<[1], [0], [0], [1], [0, 0, 1, 1], [], []>} : vector<96x96xf32>, vector<96x8xf32>, vector<96x8xf32> -> vector<96x8xf32>
    %400 = vector.broadcast %392 : vector<96x1xf32> to vector<96x8xf32>
    %401 = arith.addf %400, %399 : vector<96x8xf32>
    %cst_328 = arith.constant 0.000000e+00 : f32
    %402 = vector.broadcast %cst_328 : f32 to vector<96x8xf32>
    %403 = arith.cmpf ogt, %401, %402 : vector<96x8xf32>
    %cst_329 = arith.constant 1.000000e-01 : f32
    %404 = vector.broadcast %cst_329 : f32 to vector<96x8xf32>
    %405 = arith.mulf %404, %401 : vector<96x8xf32>
    %406 = arith.select %403, %401, %405 : vector<96x8xi1>, vector<96x8xf32>
    %cst_330 = arith.constant 0.000000e+00 : f32
    %407 = vector.broadcast %cst_330 : f32 to vector<96x8xf32>
    %408 = arith.cmpf ogt, %7, %407 : vector<96x8xf32>
    %cst_331 = arith.constant -3.40282347E+38 : f32
    %409 = vector.broadcast %cst_331 : f32 to vector<96x8xf32>
    %410 = arith.select %408, %406, %409 : vector<96x8xi1>, vector<96x8xf32>
    %cst_332 = arith.constant dense<0xFF800000> : vector<96xf32>
    %411 = vector.multi_reduction <maximumf>, %410, %cst_332 [1] : vector<96x8xf32> to vector<96xf32>
    %412 = vector.shape_cast %411 : vector<96xf32> to vector<96x1xf32>
    %413 = vector.broadcast %412 : vector<96x1xf32> to vector<96x8xf32>
    %414 = arith.subf %410, %413 : vector<96x8xf32>
    %415 = math.exp %414 : vector<96x8xf32>
    %cst_333 = arith.constant dense<0.000000e+00> : vector<96xf32>
    %416 = vector.multi_reduction <add>, %415, %cst_333 [1] : vector<96x8xf32> to vector<96xf32>
    %417 = vector.shape_cast %416 : vector<96xf32> to vector<96x1xf32>
    %418 = tpu.reciprocal %417 {approx = true} : vector<96x1xf32> -> vector<96x1xf32>
    %419 = vector.broadcast %418 : vector<96x1xf32> to vector<96x8xf32>
    %420 = arith.mulf %415, %419 : vector<96x8xf32>
    %cst_334 = arith.constant dense<0.000000e+00> : vector<96x96xf32>
    %421 = tpu.matmul %420, %3, %cst_334 {dimension_numbers = #tpu.dot_dimension_numbers<[1], [0], [0], [1], [0, 0, 1, 1], [], []>} : vector<96x8xf32>, vector<8x96xf32>, vector<96x96xf32> -> vector<96x96xf32>
    %422 = arith.mulf %1, %421 : vector<96x96xf32>
    %cst_335 = arith.constant dense<0.000000e+00> : vector<96x16xf32>
    %423 = tpu.matmul %422, %384, %cst_335 {dimension_numbers = #tpu.dot_dimension_numbers<[1], [0], [0], [1], [0, 0, 1, 1], [], []>} : vector<96x96xf32>, vector<96x16xf32>, vector<96x16xf32> -> vector<96x16xf32>
    %cst_336 = arith.constant 0.000000e+00 : f32
    %424 = vector.broadcast %cst_336 : f32 to vector<96x16xf32>
    %425 = arith.cmpf ogt, %423, %424 : vector<96x16xf32>
    %cst_337 = arith.constant 0.000000e+00 : f32
    %426 = vector.broadcast %cst_337 : f32 to vector<96x16xf32>
    %427 = arith.minimumf %423, %426 : vector<96x16xf32>
    %428 = math.exp %427 : vector<96x16xf32>
    %cst_338 = arith.constant 1.000000e+00 : f32
    %429 = vector.broadcast %cst_338 : f32 to vector<96x16xf32>
    %430 = arith.subf %428, %429 : vector<96x16xf32>
    %431 = arith.select %425, %423, %430 : vector<96x16xi1>, vector<96x16xf32>
    %c2_339 = arith.constant 2 : index
    %c0_340 = arith.constant 0 : index
    %c0_341 = arith.constant 0 : index
    %432 = vector.load %arg29[%c2_339, %c0_340, %c0_341] : memref<4x16x16xf32, #tpu.memory_space<vmem>>, vector<1x16x16xf32>
    %433 = vector.shape_cast %432 : vector<1x16x16xf32> to vector<16x16xf32>
    %cst_342 = arith.constant dense<0.000000e+00> : vector<96x16xf32>
    %434 = tpu.matmul %381, %433, %cst_342 {dimension_numbers = #tpu.dot_dimension_numbers<[1], [0], [0], [1], [0, 0, 1, 1], [], []>} : vector<96x16xf32>, vector<16x16xf32>, vector<96x16xf32> -> vector<96x16xf32>
    %c3_343 = arith.constant 3 : index
    %c0_344 = arith.constant 0 : index
    %c0_345 = arith.constant 0 : index
    %435 = vector.load %arg29[%c3_343, %c0_344, %c0_345] : memref<4x16x16xf32, #tpu.memory_space<vmem>>, vector<1x16x16xf32>
    %436 = vector.shape_cast %435 : vector<1x16x16xf32> to vector<16x16xf32>
    %cst_346 = arith.constant dense<0.000000e+00> : vector<96x16xf32>
    %437 = tpu.matmul %431, %436, %cst_346 {dimension_numbers = #tpu.dot_dimension_numbers<[1], [0], [0], [1], [0, 0, 1, 1], [], []>} : vector<96x16xf32>, vector<16x16xf32>, vector<96x16xf32> -> vector<96x16xf32>
    %438 = arith.addf %434, %437 : vector<96x16xf32>
    %c1_347 = arith.constant 1 : index
    %c0_348 = arith.constant 0 : index
    %c0_349 = arith.constant 0 : index
    %439 = vector.load %arg30[%c1_347, %c0_348, %c0_349] : memref<2x1x16xf32, #tpu.memory_space<vmem>>, vector<1x1x16xf32>
    %440 = vector.shape_cast %439 : vector<1x1x16xf32> to vector<1x16xf32>
    %c1_350 = arith.constant 1 : index
    %c0_351 = arith.constant 0 : index
    %c0_352 = arith.constant 0 : index
    %441 = vector.load %arg31[%c1_350, %c0_351, %c0_352] : memref<2x1x16xf32, #tpu.memory_space<vmem>>, vector<1x1x16xf32>
    %442 = vector.shape_cast %441 : vector<1x1x16xf32> to vector<1x16xf32>
    %443 = vector.broadcast %440 : vector<1x16xf32> to vector<96x16xf32>
    %444 = arith.mulf %438, %443 : vector<96x16xf32>
    %cst_353 = arith.constant dense<0.000000e+00> : vector<96xf32>
    %445 = vector.multi_reduction <add>, %444, %cst_353 [1] : vector<96x16xf32> to vector<96xf32>
    %446 = vector.shape_cast %445 : vector<96xf32> to vector<96x1xf32>
    %447 = vector.broadcast %442 : vector<1x16xf32> to vector<96x16xf32>
    %448 = arith.mulf %438, %447 : vector<96x16xf32>
    %cst_354 = arith.constant dense<0.000000e+00> : vector<96xf32>
    %449 = vector.multi_reduction <add>, %448, %cst_354 [1] : vector<96x16xf32> to vector<96xf32>
    %450 = vector.shape_cast %449 : vector<96xf32> to vector<96x1xf32>
    %451 = vector.broadcast %450 : vector<96x1xf32> to vector<96x8xf32>
    %452 = arith.mulf %451, %2 : vector<96x8xf32>
    %cst_355 = arith.constant dense<0.000000e+00> : vector<96x8xf32>
    %453 = tpu.matmul %1, %452, %cst_355 {dimension_numbers = #tpu.dot_dimension_numbers<[1], [0], [0], [1], [0, 0, 1, 1], [], []>} : vector<96x96xf32>, vector<96x8xf32>, vector<96x8xf32> -> vector<96x8xf32>
    %454 = vector.broadcast %446 : vector<96x1xf32> to vector<96x8xf32>
    %455 = arith.addf %454, %453 : vector<96x8xf32>
    %cst_356 = arith.constant 0.000000e+00 : f32
    %456 = vector.broadcast %cst_356 : f32 to vector<96x8xf32>
    %457 = arith.cmpf ogt, %455, %456 : vector<96x8xf32>
    %cst_357 = arith.constant 1.000000e-01 : f32
    %458 = vector.broadcast %cst_357 : f32 to vector<96x8xf32>
    %459 = arith.mulf %458, %455 : vector<96x8xf32>
    %460 = arith.select %457, %455, %459 : vector<96x8xi1>, vector<96x8xf32>
    %cst_358 = arith.constant 0.000000e+00 : f32
    %461 = vector.broadcast %cst_358 : f32 to vector<96x8xf32>
    %462 = arith.cmpf ogt, %7, %461 : vector<96x8xf32>
    %cst_359 = arith.constant -3.40282347E+38 : f32
    %463 = vector.broadcast %cst_359 : f32 to vector<96x8xf32>
    %464 = arith.select %462, %460, %463 : vector<96x8xi1>, vector<96x8xf32>
    %cst_360 = arith.constant dense<0xFF800000> : vector<96xf32>
    %465 = vector.multi_reduction <maximumf>, %464, %cst_360 [1] : vector<96x8xf32> to vector<96xf32>
    %466 = vector.shape_cast %465 : vector<96xf32> to vector<96x1xf32>
    %467 = vector.broadcast %466 : vector<96x1xf32> to vector<96x8xf32>
    %468 = arith.subf %464, %467 : vector<96x8xf32>
    %469 = math.exp %468 : vector<96x8xf32>
    %cst_361 = arith.constant dense<0.000000e+00> : vector<96xf32>
    %470 = vector.multi_reduction <add>, %469, %cst_361 [1] : vector<96x8xf32> to vector<96xf32>
    %471 = vector.shape_cast %470 : vector<96xf32> to vector<96x1xf32>
    %472 = tpu.reciprocal %471 {approx = true} : vector<96x1xf32> -> vector<96x1xf32>
    %473 = vector.broadcast %472 : vector<96x1xf32> to vector<96x8xf32>
    %474 = arith.mulf %469, %473 : vector<96x8xf32>
    %cst_362 = arith.constant dense<0.000000e+00> : vector<96x96xf32>
    %475 = tpu.matmul %474, %3, %cst_362 {dimension_numbers = #tpu.dot_dimension_numbers<[1], [0], [0], [1], [0, 0, 1, 1], [], []>} : vector<96x8xf32>, vector<8x96xf32>, vector<96x96xf32> -> vector<96x96xf32>
    %476 = arith.mulf %1, %475 : vector<96x96xf32>
    %cst_363 = arith.constant dense<0.000000e+00> : vector<96x16xf32>
    %477 = tpu.matmul %476, %438, %cst_363 {dimension_numbers = #tpu.dot_dimension_numbers<[1], [0], [0], [1], [0, 0, 1, 1], [], []>} : vector<96x96xf32>, vector<96x16xf32>, vector<96x16xf32> -> vector<96x16xf32>
    %cst_364 = arith.constant 0.000000e+00 : f32
    %478 = vector.broadcast %cst_364 : f32 to vector<96x16xf32>
    %479 = arith.cmpf ogt, %477, %478 : vector<96x16xf32>
    %cst_365 = arith.constant 0.000000e+00 : f32
    %480 = vector.broadcast %cst_365 : f32 to vector<96x16xf32>
    %481 = arith.minimumf %477, %480 : vector<96x16xf32>
    %482 = math.exp %481 : vector<96x16xf32>
    %cst_366 = arith.constant 1.000000e+00 : f32
    %483 = vector.broadcast %cst_366 : f32 to vector<96x16xf32>
    %484 = arith.subf %482, %483 : vector<96x16xf32>
    %485 = arith.select %479, %477, %484 : vector<96x16xi1>, vector<96x16xf32>
    %c1_367 = arith.constant 1 : index
    %c0_368 = arith.constant 0 : index
    %c0_369 = arith.constant 0 : index
    %486 = vector.load %arg32[%c1_367, %c0_368, %c0_369] : memref<2x16x16xf32, #tpu.memory_space<vmem>>, vector<1x16x16xf32>
    %487 = vector.shape_cast %486 : vector<1x16x16xf32> to vector<16x16xf32>
    %cst_370 = arith.constant dense<0.000000e+00> : vector<96x16xf32>
    %488 = tpu.matmul %331, %487, %cst_370 {dimension_numbers = #tpu.dot_dimension_numbers<[1], [0], [0], [1], [0, 0, 1, 1], [], []>} : vector<96x16xf32>, vector<16x16xf32>, vector<96x16xf32> -> vector<96x16xf32>
    %c1_371 = arith.constant 1 : index
    %c0_372 = arith.constant 0 : index
    %c0_373 = arith.constant 0 : index
    %489 = vector.load %arg33[%c1_371, %c0_372, %c0_373] : memref<2x1x16xf32, #tpu.memory_space<vmem>>, vector<1x1x16xf32>
    %490 = vector.shape_cast %489 : vector<1x1x16xf32> to vector<1x16xf32>
    %491 = vector.broadcast %490 : vector<1x16xf32> to vector<96x16xf32>
    %492 = arith.addf %488, %491 : vector<96x16xf32>
    %c1_374 = arith.constant 1 : index
    %c0_375 = arith.constant 0 : index
    %c0_376 = arith.constant 0 : index
    %493 = vector.load %arg34[%c1_374, %c0_375, %c0_376] : memref<2x16x16xf32, #tpu.memory_space<vmem>>, vector<1x16x16xf32>
    %494 = vector.shape_cast %493 : vector<1x16x16xf32> to vector<16x16xf32>
    %cst_377 = arith.constant dense<0.000000e+00> : vector<96x16xf32>
    %495 = tpu.matmul %485, %494, %cst_377 {dimension_numbers = #tpu.dot_dimension_numbers<[1], [0], [0], [1], [0, 0, 1, 1], [], []>} : vector<96x16xf32>, vector<16x16xf32>, vector<96x16xf32> -> vector<96x16xf32>
    %496 = arith.addf %492, %495 : vector<96x16xf32>
    %c1_378 = arith.constant 1 : index
    %c0_379 = arith.constant 0 : index
    %c0_380 = arith.constant 0 : index
    %497 = vector.load %arg35[%c1_378, %c0_379, %c0_380] : memref<2x1x16xf32, #tpu.memory_space<vmem>>, vector<1x1x16xf32>
    %498 = vector.shape_cast %497 : vector<1x1x16xf32> to vector<1x16xf32>
    %499 = vector.broadcast %498 : vector<1x16xf32> to vector<96x16xf32>
    %500 = arith.addf %496, %499 : vector<96x16xf32>
    %501 = arith.negf %500 : vector<96x16xf32>
    %502 = math.exp %501 : vector<96x16xf32>
    %cst_381 = arith.constant 1.000000e+00 : f32
    %503 = vector.broadcast %cst_381 : f32 to vector<96x16xf32>
    %504 = arith.addf %503, %502 : vector<96x16xf32>
    %505 = arith.divf %503, %504 : vector<96x16xf32>
    %506 = arith.mulf %505, %331 : vector<96x16xf32>
    %cst_382 = arith.constant 1.000000e+00 : f32
    %507 = vector.broadcast %cst_382 : f32 to vector<96x16xf32>
    %508 = arith.subf %507, %505 : vector<96x16xf32>
    %509 = arith.mulf %508, %485 : vector<96x16xf32>
    %510 = arith.addf %506, %509 : vector<96x16xf32>
    %c1_383 = arith.constant 1 : index
    %c0_384 = arith.constant 0 : index
    %c0_385 = arith.constant 0 : index
    %511 = vector.load %arg24[%c1_383, %c0_384, %c0_385] : memref<2x10x16xf32, #tpu.memory_space<vmem>>, vector<1x10x16xf32>
    %512 = vector.shape_cast %511 : vector<1x10x16xf32> to vector<10x16xf32>
    %cst_386 = arith.constant dense<0.000000e+00> : vector<8x16xf32>
    %513 = tpu.matmul %5, %512, %cst_386 {dimension_numbers = #tpu.dot_dimension_numbers<[1], [0], [0], [1], [0, 0, 1, 1], [], []>} : vector<8x10xf32>, vector<10x16xf32>, vector<8x16xf32> -> vector<8x16xf32>
    %c1_387 = arith.constant 1 : index
    %c0_388 = arith.constant 0 : index
    %c0_389 = arith.constant 0 : index
    %514 = vector.load %arg25[%c1_387, %c0_388, %c0_389] : memref<2x1x16xf32, #tpu.memory_space<vmem>>, vector<1x1x16xf32>
    %515 = vector.shape_cast %514 : vector<1x1x16xf32> to vector<1x16xf32>
    %516 = vector.broadcast %515 : vector<1x16xf32> to vector<8x16xf32>
    %517 = arith.addf %513, %516 : vector<8x16xf32>
    %cst_390 = arith.constant dense<0.000000e+00> : vector<96x16xf32>
    %518 = tpu.matmul %2, %517, %cst_390 {dimension_numbers = #tpu.dot_dimension_numbers<[1], [0], [0], [1], [0, 0, 1, 1], [], []>} : vector<96x8xf32>, vector<8x16xf32>, vector<96x16xf32> -> vector<96x16xf32>
    %519 = arith.mulf %510, %518 : vector<96x16xf32>
    %cst_391 = arith.constant dense<0.000000e+00> : vector<96xf32>
    %520 = vector.multi_reduction <add>, %519, %cst_391 [1] : vector<96x16xf32> to vector<96xf32>
    %521 = vector.shape_cast %520 : vector<96xf32> to vector<96x1xf32>
    %522 = arith.maximumf %313, %521 : vector<96x1xf32>
    %523 = arith.subf %313, %522 : vector<96x1xf32>
    %524 = math.exp %523 : vector<96x1xf32>
    %525 = arith.subf %521, %522 : vector<96x1xf32>
    %526 = math.exp %525 : vector<96x1xf32>
    %527 = arith.addf %524, %526 : vector<96x1xf32>
    %528 = tpu.reciprocal %527 {approx = true} : vector<96x1xf32> -> vector<96x1xf32>
    %529 = vector.broadcast %524 : vector<96x1xf32> to vector<96x16xf32>
    %530 = arith.mulf %529, %302 : vector<96x16xf32>
    %531 = vector.broadcast %526 : vector<96x1xf32> to vector<96x16xf32>
    %532 = arith.mulf %531, %331 : vector<96x16xf32>
    %533 = arith.addf %530, %532 : vector<96x16xf32>
    %534 = vector.broadcast %528 : vector<96x1xf32> to vector<96x16xf32>
    %535 = arith.mulf %533, %534 : vector<96x16xf32>
    %c1_392 = arith.constant 1 : index
    %c0_393 = arith.constant 0 : index
    %c0_394 = arith.constant 0 : index
    %536 = vector.load %arg36[%c1_392, %c0_393, %c0_394] : memref<2x16x32xf32, #tpu.memory_space<vmem>>, vector<1x16x32xf32>
    %537 = vector.shape_cast %536 : vector<1x16x32xf32> to vector<16x32xf32>
    %cst_395 = arith.constant dense<0.000000e+00> : vector<96x32xf32>
    %538 = tpu.matmul %535, %537, %cst_395 {dimension_numbers = #tpu.dot_dimension_numbers<[1], [0], [0], [1], [0, 0, 1, 1], [], []>} : vector<96x16xf32>, vector<16x32xf32>, vector<96x32xf32> -> vector<96x32xf32>
    %c1_396 = arith.constant 1 : index
    %c0_397 = arith.constant 0 : index
    %c0_398 = arith.constant 0 : index
    %539 = vector.load %arg37[%c1_396, %c0_397, %c0_398] : memref<2x1x32xf32, #tpu.memory_space<vmem>>, vector<1x1x32xf32>
    %540 = vector.shape_cast %539 : vector<1x1x32xf32> to vector<1x32xf32>
    %541 = vector.broadcast %540 : vector<1x32xf32> to vector<96x32xf32>
    %542 = arith.addf %538, %541 : vector<96x32xf32>
    %cst_399 = arith.constant 0.000000e+00 : f32
    %543 = vector.broadcast %cst_399 : f32 to vector<96x32xf32>
    %544 = arith.maximumf %542, %543 : vector<96x32xf32>
    %c0_400 = arith.constant 0 : index
    %c0_401 = arith.constant 0 : index
    %545 = vector.load %arg38[%c0_400, %c0_401] : memref<32x32xf32, #tpu.memory_space<vmem>>, vector<32x32xf32>
    %cst_402 = arith.constant dense<0.000000e+00> : vector<96x32xf32>
    %546 = tpu.matmul %544, %545, %cst_402 {dimension_numbers = #tpu.dot_dimension_numbers<[1], [0], [0], [1], [0, 0, 1, 1], [], []>} : vector<96x32xf32>, vector<32x32xf32>, vector<96x32xf32> -> vector<96x32xf32>
    %c0_403 = arith.constant 0 : index
    %c0_404 = arith.constant 0 : index
    %547 = vector.load %arg39[%c0_403, %c0_404] : memref<1x32xf32, #tpu.memory_space<vmem>>, vector<1x32xf32>
    %548 = vector.broadcast %547 : vector<1x32xf32> to vector<96x32xf32>
    %549 = arith.addf %546, %548 : vector<96x32xf32>
    %cst_405 = arith.constant 0.000000e+00 : f32
    %550 = vector.broadcast %cst_405 : f32 to vector<96x32xf32>
    %551 = arith.maximumf %549, %550 : vector<96x32xf32>
    %c0_406 = arith.constant 0 : index
    %c0_407 = arith.constant 0 : index
    %552 = vector.load %arg40[%c0_406, %c0_407] : memref<32x4xf32, #tpu.memory_space<vmem>>, vector<32x4xf32>
    %cst_408 = arith.constant dense<0.000000e+00> : vector<96x4xf32>
    %553 = tpu.matmul %551, %552, %cst_408 {dimension_numbers = #tpu.dot_dimension_numbers<[1], [0], [0], [1], [0, 0, 1, 1], [], []>} : vector<96x32xf32>, vector<32x4xf32>, vector<96x4xf32> -> vector<96x4xf32>
    %c0_409 = arith.constant 0 : index
    %c0_410 = arith.constant 0 : index
    %554 = vector.load %arg41[%c0_409, %c0_410] : memref<1x4xf32, #tpu.memory_space<vmem>>, vector<1x4xf32>
    %555 = vector.broadcast %554 : vector<1x4xf32> to vector<96x4xf32>
    %556 = arith.addf %553, %555 : vector<96x4xf32>
    %c0_411 = arith.constant 0 : index
    %c0_412 = arith.constant 0 : index
    %c0_413 = arith.constant 0 : index
    %557 = vector.load %arg42[%c0_411, %c0_412, %c0_413] : memref<1x96x4xf32, #tpu.memory_space<vmem>>, vector<1x96x4xf32>
    %558 = vector.shape_cast %557 : vector<1x96x4xf32> to vector<96x4xf32>
    %559 = vector.shape_cast %556 : vector<96x4xf32> to vector<1x96x4xf32>
    tpu.vector_store %arg42[%c0_411, %c0_412, %c0_413], %559 {strides = array<i32>} : memref<1x96x4xf32, #tpu.memory_space<vmem>>, vector<1x96x4xf32>,
    return
  }
  func.func @transform_0(%arg0: i32) -> (i32, i32, i32) {
    %c0_i32 = arith.constant 0 : i32
    %c0_i32_0 = arith.constant 0 : i32
    %c0_i32_1 = arith.constant 0 : i32
    return %arg0, %c0_i32, %c0_i32_0 : i32, i32, i32
  }
  func.func @transform_1(%arg0: i32) -> (i32, i32, i32) {
    %c0_i32 = arith.constant 0 : i32
    %c0_i32_0 = arith.constant 0 : i32
    %c0_i32_1 = arith.constant 0 : i32
    return %arg0, %c0_i32, %c0_i32_0 : i32, i32, i32
  }
  func.func @transform_2(%arg0: i32) -> (i32, i32, i32) {
    %c0_i32 = arith.constant 0 : i32
    %c0_i32_0 = arith.constant 0 : i32
    %c0_i32_1 = arith.constant 0 : i32
    return %arg0, %c0_i32, %c0_i32_0 : i32, i32, i32
  }
  func.func @transform_3(%arg0: i32) -> (i32, i32) {
    %c0_i32 = arith.constant 0 : i32
    %c0_i32_0 = arith.constant 0 : i32
    %c0_i32_1 = arith.constant 0 : i32
    return %c0_i32, %c0_i32_0 : i32, i32
  }
  func.func @transform_4(%arg0: i32) -> (i32, i32) {
    %c0_i32 = arith.constant 0 : i32
    %c0_i32_0 = arith.constant 0 : i32
    %c0_i32_1 = arith.constant 0 : i32
    return %c0_i32, %c0_i32_0 : i32, i32
  }
  func.func @transform_5(%arg0: i32) -> (i32, i32) {
    %c0_i32 = arith.constant 0 : i32
    %c0_i32_0 = arith.constant 0 : i32
    %c0_i32_1 = arith.constant 0 : i32
    return %c0_i32, %c0_i32_0 : i32, i32
  }
  func.func @transform_6(%arg0: i32) -> (i32, i32) {
    %c0_i32 = arith.constant 0 : i32
    %c0_i32_0 = arith.constant 0 : i32
    %c0_i32_1 = arith.constant 0 : i32
    return %c0_i32, %c0_i32_0 : i32, i32
  }
  func.func @transform_7(%arg0: i32) -> (i32, i32, i32) {
    %c0_i32 = arith.constant 0 : i32
    %c0_i32_0 = arith.constant 0 : i32
    %c0_i32_1 = arith.constant 0 : i32
    %c0_i32_2 = arith.constant 0 : i32
    return %c0_i32, %c0_i32_0, %c0_i32_1 : i32, i32, i32
  }
  func.func @transform_8(%arg0: i32) -> (i32, i32) {
    %c0_i32 = arith.constant 0 : i32
    %c0_i32_0 = arith.constant 0 : i32
    %c0_i32_1 = arith.constant 0 : i32
    return %c0_i32, %c0_i32_0 : i32, i32
  }
  func.func @transform_9(%arg0: i32) -> (i32, i32) {
    %c0_i32 = arith.constant 0 : i32
    %c0_i32_0 = arith.constant 0 : i32
    %c0_i32_1 = arith.constant 0 : i32
    return %c0_i32, %c0_i32_0 : i32, i32
  }
  func.func @transform_10(%arg0: i32) -> (i32, i32) {
    %c0_i32 = arith.constant 0 : i32
    %c0_i32_0 = arith.constant 0 : i32
    %c0_i32_1 = arith.constant 0 : i32
    return %c0_i32, %c0_i32_0 : i32, i32
  }
  func.func @transform_11(%arg0: i32) -> (i32, i32, i32) {
    %c0_i32 = arith.constant 0 : i32
    %c0_i32_0 = arith.constant 0 : i32
    %c0_i32_1 = arith.constant 0 : i32
    %c0_i32_2 = arith.constant 0 : i32
    return %c0_i32, %c0_i32_0, %c0_i32_1 : i32, i32, i32
  }
  func.func @transform_12(%arg0: i32) -> (i32, i32, i32) {
    %c0_i32 = arith.constant 0 : i32
    %c0_i32_0 = arith.constant 0 : i32
    %c0_i32_1 = arith.constant 0 : i32
    %c0_i32_2 = arith.constant 0 : i32
    return %c0_i32, %c0_i32_0, %c0_i32_1 : i32, i32, i32
  }
  func.func @transform_13(%arg0: i32) -> (i32, i32, i32) {
    %c0_i32 = arith.constant 0 : i32
    %c0_i32_0 = arith.constant 0 : i32
    %c0_i32_1 = arith.constant 0 : i32
    %c0_i32_2 = arith.constant 0 : i32
    return %c0_i32, %c0_i32_0, %c0_i32_1 : i32, i32, i32
  }
  func.func @transform_14(%arg0: i32) -> (i32, i32, i32) {
    %c0_i32 = arith.constant 0 : i32
    %c0_i32_0 = arith.constant 0 : i32
    %c0_i32_1 = arith.constant 0 : i32
    %c0_i32_2 = arith.constant 0 : i32
    return %c0_i32, %c0_i32_0, %c0_i32_1 : i32, i32, i32
  }
  func.func @transform_15(%arg0: i32) -> (i32, i32, i32) {
    %c0_i32 = arith.constant 0 : i32
    %c0_i32_0 = arith.constant 0 : i32
    %c0_i32_1 = arith.constant 0 : i32
    %c0_i32_2 = arith.constant 0 : i32
    return %c0_i32, %c0_i32_0, %c0_i32_1 : i32, i32, i32
  }
  func.func @transform_16(%arg0: i32) -> (i32, i32, i32) {
    %c0_i32 = arith.constant 0 : i32
    %c0_i32_0 = arith.constant 0 : i32
    %c0_i32_1 = arith.constant 0 : i32
    %c0_i32_2 = arith.constant 0 : i32
    return %c0_i32, %c0_i32_0, %c0_i32_1 : i32, i32, i32
  }
  func.func @transform_17(%arg0: i32) -> (i32, i32, i32) {
    %c0_i32 = arith.constant 0 : i32
    %c0_i32_0 = arith.constant 0 : i32
    %c0_i32_1 = arith.constant 0 : i32
    %c0_i32_2 = arith.constant 0 : i32
    return %c0_i32, %c0_i32_0, %c0_i32_1 : i32, i32, i32
  }
  func.func @transform_18(%arg0: i32) -> (i32, i32, i32) {
    %c0_i32 = arith.constant 0 : i32
    %c0_i32_0 = arith.constant 0 : i32
    %c0_i32_1 = arith.constant 0 : i32
    %c0_i32_2 = arith.constant 0 : i32
    return %c0_i32, %c0_i32_0, %c0_i32_1 : i32, i32, i32
  }
  func.func @transform_19(%arg0: i32) -> (i32, i32, i32) {
    %c0_i32 = arith.constant 0 : i32
    %c0_i32_0 = arith.constant 0 : i32
    %c0_i32_1 = arith.constant 0 : i32
    %c0_i32_2 = arith.constant 0 : i32
    return %c0_i32, %c0_i32_0, %c0_i32_1 : i32, i32, i32
  }
  func.func @transform_20(%arg0: i32) -> (i32, i32, i32) {
    %c0_i32 = arith.constant 0 : i32
    %c0_i32_0 = arith.constant 0 : i32
    %c0_i32_1 = arith.constant 0 : i32
    %c0_i32_2 = arith.constant 0 : i32
    return %c0_i32, %c0_i32_0, %c0_i32_1 : i32, i32, i32
  }
  func.func @transform_21(%arg0: i32) -> (i32, i32, i32) {
    %c0_i32 = arith.constant 0 : i32
    %c0_i32_0 = arith.constant 0 : i32
    %c0_i32_1 = arith.constant 0 : i32
    %c0_i32_2 = arith.constant 0 : i32
    return %c0_i32, %c0_i32_0, %c0_i32_1 : i32, i32, i32
  }
  func.func @transform_22(%arg0: i32) -> (i32, i32, i32) {
    %c0_i32 = arith.constant 0 : i32
    %c0_i32_0 = arith.constant 0 : i32
    %c0_i32_1 = arith.constant 0 : i32
    %c0_i32_2 = arith.constant 0 : i32
    return %c0_i32, %c0_i32_0, %c0_i32_1 : i32, i32, i32
  }
  func.func @transform_23(%arg0: i32) -> (i32, i32, i32) {
    %c0_i32 = arith.constant 0 : i32
    %c0_i32_0 = arith.constant 0 : i32
    %c0_i32_1 = arith.constant 0 : i32
    %c0_i32_2 = arith.constant 0 : i32
    return %c0_i32, %c0_i32_0, %c0_i32_1 : i32, i32, i32
  }
  func.func @transform_24(%arg0: i32) -> (i32, i32, i32) {
    %c0_i32 = arith.constant 0 : i32
    %c0_i32_0 = arith.constant 0 : i32
    %c0_i32_1 = arith.constant 0 : i32
    %c0_i32_2 = arith.constant 0 : i32
    return %c0_i32, %c0_i32_0, %c0_i32_1 : i32, i32, i32
  }
  func.func @transform_25(%arg0: i32) -> (i32, i32, i32) {
    %c0_i32 = arith.constant 0 : i32
    %c0_i32_0 = arith.constant 0 : i32
    %c0_i32_1 = arith.constant 0 : i32
    %c0_i32_2 = arith.constant 0 : i32
    return %c0_i32, %c0_i32_0, %c0_i32_1 : i32, i32, i32
  }
  func.func @transform_26(%arg0: i32) -> (i32, i32, i32) {
    %c0_i32 = arith.constant 0 : i32
    %c0_i32_0 = arith.constant 0 : i32
    %c0_i32_1 = arith.constant 0 : i32
    %c0_i32_2 = arith.constant 0 : i32
    return %c0_i32, %c0_i32_0, %c0_i32_1 : i32, i32, i32
  }
  func.func @transform_27(%arg0: i32) -> (i32, i32, i32) {
    %c0_i32 = arith.constant 0 : i32
    %c0_i32_0 = arith.constant 0 : i32
    %c0_i32_1 = arith.constant 0 : i32
    %c0_i32_2 = arith.constant 0 : i32
    return %c0_i32, %c0_i32_0, %c0_i32_1 : i32, i32, i32
  }
  func.func @transform_28(%arg0: i32) -> (i32, i32, i32) {
    %c0_i32 = arith.constant 0 : i32
    %c0_i32_0 = arith.constant 0 : i32
    %c0_i32_1 = arith.constant 0 : i32
    %c0_i32_2 = arith.constant 0 : i32
    return %c0_i32, %c0_i32_0, %c0_i32_1 : i32, i32, i32
  }
  func.func @transform_29(%arg0: i32) -> (i32, i32, i32) {
    %c0_i32 = arith.constant 0 : i32
    %c0_i32_0 = arith.constant 0 : i32
    %c0_i32_1 = arith.constant 0 : i32
    %c0_i32_2 = arith.constant 0 : i32
    return %c0_i32, %c0_i32_0, %c0_i32_1 : i32, i32, i32
  }
  func.func @transform_30(%arg0: i32) -> (i32, i32, i32) {
    %c0_i32 = arith.constant 0 : i32
    %c0_i32_0 = arith.constant 0 : i32
    %c0_i32_1 = arith.constant 0 : i32
    %c0_i32_2 = arith.constant 0 : i32
    return %c0_i32, %c0_i32_0, %c0_i32_1 : i32, i32, i32
  }
  func.func @transform_31(%arg0: i32) -> (i32, i32, i32) {
    %c0_i32 = arith.constant 0 : i32
    %c0_i32_0 = arith.constant 0 : i32
    %c0_i32_1 = arith.constant 0 : i32
    %c0_i32_2 = arith.constant 0 : i32
    return %c0_i32, %c0_i32_0, %c0_i32_1 : i32, i32, i32
  }
  func.func @transform_32(%arg0: i32) -> (i32, i32, i32) {
    %c0_i32 = arith.constant 0 : i32
    %c0_i32_0 = arith.constant 0 : i32
    %c0_i32_1 = arith.constant 0 : i32
    %c0_i32_2 = arith.constant 0 : i32
    return %c0_i32, %c0_i32_0, %c0_i32_1 : i32, i32, i32
  }
  func.func @transform_33(%arg0: i32) -> (i32, i32, i32) {
    %c0_i32 = arith.constant 0 : i32
    %c0_i32_0 = arith.constant 0 : i32
    %c0_i32_1 = arith.constant 0 : i32
    %c0_i32_2 = arith.constant 0 : i32
    return %c0_i32, %c0_i32_0, %c0_i32_1 : i32, i32, i32
  }
  func.func @transform_34(%arg0: i32) -> (i32, i32, i32) {
    %c0_i32 = arith.constant 0 : i32
    %c0_i32_0 = arith.constant 0 : i32
    %c0_i32_1 = arith.constant 0 : i32
    %c0_i32_2 = arith.constant 0 : i32
    return %c0_i32, %c0_i32_0, %c0_i32_1 : i32, i32, i32
  }
  func.func @transform_35(%arg0: i32) -> (i32, i32, i32) {
    %c0_i32 = arith.constant 0 : i32
    %c0_i32_0 = arith.constant 0 : i32
    %c0_i32_1 = arith.constant 0 : i32
    %c0_i32_2 = arith.constant 0 : i32
    return %c0_i32, %c0_i32_0, %c0_i32_1 : i32, i32, i32
  }
  func.func @transform_36(%arg0: i32) -> (i32, i32, i32) {
    %c0_i32 = arith.constant 0 : i32
    %c0_i32_0 = arith.constant 0 : i32
    %c0_i32_1 = arith.constant 0 : i32
    %c0_i32_2 = arith.constant 0 : i32
    return %c0_i32, %c0_i32_0, %c0_i32_1 : i32, i32, i32
  }
  func.func @transform_37(%arg0: i32) -> (i32, i32) {
    %c0_i32 = arith.constant 0 : i32
    %c0_i32_0 = arith.constant 0 : i32
    %c0_i32_1 = arith.constant 0 : i32
    return %c0_i32, %c0_i32_0 : i32, i32
  }
  func.func @transform_38(%arg0: i32) -> (i32, i32) {
    %c0_i32 = arith.constant 0 : i32
    %c0_i32_0 = arith.constant 0 : i32
    %c0_i32_1 = arith.constant 0 : i32
    return %c0_i32, %c0_i32_0 : i32, i32
  }
  func.func @transform_39(%arg0: i32) -> (i32, i32) {
    %c0_i32 = arith.constant 0 : i32
    %c0_i32_0 = arith.constant 0 : i32
    %c0_i32_1 = arith.constant 0 : i32
    return %c0_i32, %c0_i32_0 : i32, i32
  }
  func.func @transform_40(%arg0: i32) -> (i32, i32) {
    %c0_i32 = arith.constant 0 : i32
    %c0_i32_0 = arith.constant 0 : i32
    %c0_i32_1 = arith.constant 0 : i32
    return %c0_i32, %c0_i32_0 : i32, i32
  }
  func.func @transform_41(%arg0: i32) -> (i32, i32, i32) {
    %c0_i32 = arith.constant 0 : i32
    %c0_i32_0 = arith.constant 0 : i32
    %c0_i32_1 = arith.constant 0 : i32
    return %arg0, %c0_i32, %c0_i32_0 : i32, i32, i32
  }
}

</mosaic_0001>

<bundles_post_ra>
// kernel: _lambda_.1
= control target key start
LH: loop header
LB: loop body
LE: loop exit
PB: predicated region body
PF: predicated region fallthrough
CT: control target
= control target key end

     0   :  { %s23795_s6 = smov 1   ;;  %s23796_s10 = smov 2   ;;  %s28044_s0 = inlined_call_operand.smem [shape: u32[42], index: -1, kind: input, shape index: {}] }
   0x1   :  { %s23848_s5 = sld [smem:[%s28044_s0]]   ;;  %s23797_s14 = smov 3  }
   0x2   :  { %s23853_s9 = sld [smem:[%s28044_s0 + %s23795_s6]]   ;;  %s23798_s18 = smov 4  }
   0x3   :  { %s23858_s13 = sld [smem:[%s28044_s0 + %s23796_s10]]   ;;  %s23799_s22 = smov 5  }
   0x4   :  { %s23863_s17 = sld [smem:[%s28044_s0 + %s23797_s14]]   ;;  %s23800_s26 = smov 6  }
   0x5   :  { %s23868_s21 = sld [smem:[%s28044_s0 + %s23798_s18]]   ;;  %s23801_s30 = smov 7  }
   0x6   :  { %s23873_s25 = sld [smem:[%s28044_s0 + %s23799_s22]]   ;;  %s23802_s4 = smov 8  }
   0x7   :  { %s23878_s29 = sld [smem:[%s28044_s0 + %s23800_s26]]   ;;  %s23803_s10 = smov 9  }
   0x8   :  { %s23883_s3 = sld [smem:[%s28044_s0 + %s23801_s30]]   ;;  %s23804_s15 = smov 10  }
   0x9   :  { %s23888_s8 = sld [smem:[%s28044_s0 + %s23802_s4]]   ;;  %s23805_s20 = smov 11  }
   0xa   :  { %s23893_s14 = sld [smem:[%s28044_s0 + %s23803_s10]]   ;;  %s23806_s26 = smov 12  }
   0xb   :  { %28113 = sst [smem:[#allocation2_spill]] %s23868_s21  ;;  %s23807_s1 = smov 13  }
   0xc   :  { %s23898_s19 = sld [smem:[%s28044_s0 + %s23804_s15]]   ;;  %s23808_s7 = smov 14  }
   0xd   :  { %28114 = sst [smem:[#allocation3_spill]] %s23878_s29  ;;  %s23809_s15 = smov 15  }
   0xe   :  { %s23903_s24 = sld [smem:[%s28044_s0 + %s23805_s20]]   ;;  %s23810_s22 = smov 16  }
   0xf   :  { %s23908_s30 = sld [smem:[%s28044_s0 + %s23806_s26]]   ;;  %s23811_s28 = smov 17  }
  0x10   :  { %28115 = sst [smem:[#allocation4_spill]] %s23893_s14 }
  0x11   :  { %s23913_s6 = sld [smem:[%s28044_s0 + %s23807_s1]]  }
  0x12   :  { %28116 = sst [smem:[#allocation5_spill]] %s23898_s19 }
  0x13   :  { %s23918_s12 = sld [smem:[%s28044_s0 + %s23808_s7]]   ;;  %s23812_s7 = smov 18  }
  0x14   :  { %s23923_s20 = sld [smem:[%s28044_s0 + %s23809_s15]]   ;;  %s23813_s15 = smov 19  }
  0x15   :  { %s23928_s27 = sld [smem:[%s28044_s0 + %s23810_s22]]   ;;  %s23814_s22 = smov 20  }
  0x16   :  { %s23933_s4 = sld [smem:[%s28044_s0 + %s23811_s28]]   ;;  %s23815_s28 = smov 21  }
  0x17   :  { %s23938_s29 = sld [smem:[%s28044_s0 + %s23812_s7]]   ;;  %s23816_s7 = smov 22  }
  0x18   :  { %s23943_s21 = sld [smem:[%s28044_s0 + %s23813_s15]]   ;;  %s23817_s15 = smov 23  }
  0x19   :  { %s23948_s19 = sld [smem:[%s28044_s0 + %s23814_s22]]   ;;  %s23818_s22 = smov 24  }
  0x1a   :  { %s23953_s14 = sld [smem:[%s28044_s0 + %s23815_s28]]   ;;  %s23819_s28 = smov 25  }
  0x1d   :  { %28117 = sst [smem:[#allocation6_spill]] %s23938_s29 }
  0x1e   :  { %28118 = sst [smem:[#allocation7_spill]] %s23943_s21 }
  0x1f   :  { %28119 = sst [smem:[#allocation8_spill]] %s23948_s19 }
  0x20   :  { %28120 = sst [smem:[#allocation9_spill]] %s23953_s14 }
  0x21   :  { %s23958_s29 = sld [smem:[%s28044_s0 + %s23816_s7]]   ;;  %s23820_s7 = smov 26  }
  0x22   :  { %s23963_s21 = sld [smem:[%s28044_s0 + %s23817_s15]]   ;;  %s23821_s15 = smov 27  }
  0x23   :  { %s23968_s19 = sld [smem:[%s28044_s0 + %s23818_s22]]   ;;  %s23822_s22 = smov 28  }
  0x24   :  { %s23973_s14 = sld [smem:[%s28044_s0 + %s23819_s28]]   ;;  %s23823_s28 = smov 29  }
  0x27   :  { %28121 = sst [smem:[#allocation10_spill]] %s23958_s29 }
  0x28   :  { %28122 = sst [smem:[#allocation11_spill]] %s23963_s21 }
  0x29   :  { %28123 = sst [smem:[#allocation12_spill]] %s23968_s19 }
  0x2a   :  { %28124 = sst [smem:[#allocation13_spill]] %s23973_s14 }
  0x2b   :  { %s23978_s29 = sld [smem:[%s28044_s0 + %s23820_s7]]   ;;  %s23824_s7 = smov 30  }
  0x2c   :  { %s23983_s21 = sld [smem:[%s28044_s0 + %s23821_s15]]   ;;  %s23825_s15 = smov 31  }
  0x2d   :  { %s23988_s19 = sld [smem:[%s28044_s0 + %s23822_s22]]   ;;  %s23826_s22 = smov 32  }
  0x2e   :  { %s23993_s14 = sld [smem:[%s28044_s0 + %s23823_s28]]   ;;  %s23827_s28 = smov 33  }
  0x31   :  { %28125 = sst [smem:[#allocation14_spill]] %s23978_s29 }
  0x32   :  { %28126 = sst [smem:[#allocation15_spill]] %s23983_s21 }
  0x33   :  { %28127 = sst [smem:[#allocation16_spill]] %s23988_s19 }
  0x34   :  { %28128 = sst [smem:[#allocation17_spill]] %s23993_s14 }
  0x35   :  { %s23998_s29 = sld [smem:[%s28044_s0 + %s23824_s7]]   ;;  %s23828_s7 = smov 34  }
  0x36   :  { %s24003_s21 = sld [smem:[%s28044_s0 + %s23825_s15]]   ;;  %s23829_s15 = smov 35  }
  0x37   :  { %s24008_s19 = sld [smem:[%s28044_s0 + %s23826_s22]]   ;;  %s23830_s22 = smov 36  }
  0x38   :  { %s24013_s14 = sld [smem:[%s28044_s0 + %s23827_s28]]   ;;  %s23831_s28 = smov 37  }
  0x3b   :  { %28129 = sst [smem:[#allocation18_spill]] %s23998_s29 }
  0x3c   :  { %28130 = sst [smem:[#allocation19_spill]] %s24003_s21 }
  0x3d   :  { %28131 = sst [smem:[#allocation20_spill]] %s24008_s19 }
  0x3e   :  { %28132 = sst [smem:[#allocation21_spill]] %s24013_s14 }
  0x3f   :  { %s24018_s29 = sld [smem:[%s28044_s0 + %s23828_s7]]   ;;  %s23832_s7 = smov 38  }
  0x40   :  { %s24023_s21 = sld [smem:[%s28044_s0 + %s23829_s15]]   ;;  %s23833_s15 = smov 39  }
  0x41   :  { %s24028_s19 = sld [smem:[%s28044_s0 + %s23830_s22]]   ;;  %s23834_s22 = smov 40  }
  0x42   :  { %s24033_s14 = sld [smem:[%s28044_s0 + %s23831_s28]]   ;;  %s23835_s28 = smov 41  }
  0x45   :  { %28133 = sst [smem:[#allocation22_spill]] %s24018_s29 }
  0x46   :  { %28134 = sst [smem:[#allocation23_spill]] %s24023_s21 }
  0x47   :  { %28135 = sst [smem:[#allocation24_spill]] %s24028_s19 }
  0x48   :  { %28136 = sst [smem:[#allocation25_spill]] %s24033_s14 }
  0x49   :  { %s24038_s29 = sld [smem:[%s28044_s0 + %s23832_s7]]   ;;  %s24055_s7 = smov 0  }
  0x4a   :  { %s24043_s21 = sld [smem:[%s28044_s0 + %s23833_s15]]  }
  0x4b   :  { %s24048_s19 = sld [smem:[%s28044_s0 + %s23834_s22]]  }
  0x4c   :  { %s24053_s14 = sld [smem:[%s28044_s0 + %s23835_s28]]  }
  0x4d LB: > { %s16724_s10 = sadd.s32 4294967295, %s23793_s7   ;;  %p16728_p0 = scmp.ge.s32.totalorder %s23793_s7, 1  ;;  %s23793_s7 = sphi %s24055_s7, %s93_s7  }
  0x4e   : > { %p1149_p1 = scmp.lt.s32.totalorder %s23793_s7, 3 }
  0x50   : > { %p1150_p2 = pnand %p16728_p0, %p1149_p1 }
  0x52   : > { %1153 = sbr.rel (%p1150_p2) target bundleno = 10377 (0x2889), region = 184 }
  0x59   : > { %v1329_v0 = vld [vmem:[%s23888_s8] sm:$0xff]  ;;  %vm1330_vm0 = vcmask 64512   ;;  %v1304_v2 = vld [vmem:[%s23873_s25 + $0x8] sm:$0xff]  ;;  %vm1549_vm1 = vcmask 1041408   ;;  %p1259_p3 = scmp.lt.s32.totalorder %s16724_s10, 1  ;;  %v1305_v4 = vld [vmem:[%s23873_s25 + $0x10] sm:$0xff] }
  0x5a   : > { %v1303_v1 = vld [vmem:[%s23873_s25] sm:$0xff]  ;;  %19412 = vmatprep.subr.mxu0 %v1329_v0  ;;  %v1306_v5 = vld [vmem:[%s23873_s25 + $0x18] sm:$0xff]  ;;  %vm1512_vm2 = vcmask 15360   ;;  %v1308_v8 = vld [vmem:[%s23873_s25 + $0x28] sm:$0xff]  ;;  %vm2066_vm3 = vcmask 785408   ;;  %vm28094_vm4 = vcmask 130048  }
  0x5b   : > { %19414 = vmatprep.mubr.msk.f32.mxu0 %vm1330_vm0, %v1303_v1  ;;  %v1504_v3 = vld [vmem:[%s23903_s24] sm:$0x3]  ;;  %19413 = vmatpush3.msra.mxu0 %v1329_v0  ;;  %s28368_s10 = smov (!%p1259_p3, %s16724_s10), 1  ;;  %v1309_v11 = vld [vmem:[%s23873_s25 + $0x30] sm:$0xff]  ;;  %v1310_v14 = vld [vmem:[%s23873_s25 + $0x38] sm:$0xff]  ;;  %s28148_s18 = sld [smem:[#allocation6_spill]] }
  0x5c   : > { %22408 = vmatprep.subr.msk.mxu1 %vm1549_vm1, %v1504_v3  ;;  %19415 = vmatmul.mubr.msk.f32.vlgmr.msra.gmra.mrb[0].mxu0 %vm1330_vm0, %v1304_v2  ;;  %s24075_s0 = smul.u32 96, %s28368_s10  ;;  %v1307_v6 = vld [vmem:[%s23873_s25 + $0x20] sm:$0xff]  ;;  %v1312_v18 = vld [vmem:[%s23873_s25 + $0x48] sm:$0xff]  ;;  %v1313_v19 = vld [vmem:[%s23873_s25 + $0x50] sm:$0xff]  ;;  %s28149_s22 = sld [smem:[#allocation9_spill]]  ;;  %vm23837_vm5 = vmmov 1  }
  0x5d   : > { %19432 = vmatprep.subr.msk.mxu0 %vm1549_vm1, %v1504_v3  ;;  %19417 = vmatprep.mubr.msk.f32.mxu0 %vm1330_vm0, %v1305_v4  ;;  %v1311_v15 = vld [vmem:[%s23873_s25 + $0x40] sm:$0xff]  ;;  %v1314_v22 = vld [vmem:[%s23873_s25 + $0x58] sm:$0xff]  ;;  %v16806_v45 = vld [vmem:[%s23913_s6 + $0x128] sm:$0xff]  ;;  %s28153_s23 = sld [smem:[#allocation4_spill]]  ;;  %s28154_s26 = sld [smem:[#allocation5_spill]]  ;;  %vm28086_vm7 = vmmov 0  }
  0x5e   : > { %19433 = vmatpush3.msk.msra.mxu0 %vm1549_vm1, %v1504_v3  ;;  %22409 = vmatpush3.msk.msra.mxu1 %vm1549_vm1, %v1504_v3  ;;  %s24081_s11 = scalar_lea.vmem %s23848_s5, %s24075_s0  ;;  %v16759_v26 = vld [vmem:[%s23903_s24 + $0x2] sm:$0x3]  ;;  %s1268_s15 = scalar_lea.vmem %s23853_s9, %s24075_s0  ;;  %v16775_v40 = vld [vmem:[%s23903_s24 + $0x4] sm:$0x3]  ;;  %vm26203_vm6 = vmpackc.low %vm1549_vm1, %vm23837_vm5  ;;  %vm28085_vm8 = vcmask 80896  }
  0x5f   : > { %v1494_v7 = vld [vmem:[%s24081_s11 + $0x10] sm:$0xff]  ;;  %v1495_v9 = vld [vmem:[%s24081_s11 + $0x18] sm:$0xff]  ;;  %v1496_v10 = vld [vmem:[%s24081_s11 + $0x20] sm:$0xff]  ;;  %19452 = vmatprep.subr.msk.mxu0 %vm1549_vm1, %v16759_v26  ;;  %19472 = vmatprep.subr.msk.mxu1 %vm1549_vm1, %v16775_v40  ;;  %s24147_s16 = scalar_lea.vmem %s23858_s13, %s24075_s0  ;;  %s28155_s28 = sld [smem:[#allocation10_spill]] }
  0x60   : > { %19418 = vmatmul.mubr.msk.f32.gmra.mrb[2].mxu0 %vm1330_vm0, %v1306_v5  ;;  %19437 = vmatprep.mubr.msk.f32.mxu1 %vm1512_vm2, %v1494_v7  ;;  %v1497_v12 = vld [vmem:[%s24081_s11 + $0x28] sm:$0xff]  ;;  %v1498_v13 = vld [vmem:[%s24081_s11 + $0x30] sm:$0xff]  ;;  %v1499_v16 = vld [vmem:[%s24081_s11 + $0x38] sm:$0xff]  ;;  %s28168_s1 = sld [smem:[#allocation7_spill]]  ;;  %s28180_s2 = sld [smem:[#allocation8_spill]] }
  0x61   : > { %19420 = vmatprep.mubr.msk.f32.mxu0 %vm1330_vm0, %v1307_v6  ;;  %19438 = vmatmul.mubr.msk.f32.vlgmr.msra.gmra.mrb[0].mxu1 %vm1512_vm2, %v1495_v9  ;;  %v1500_v17 = vld [vmem:[%s24081_s11 + $0x40] sm:$0xff]  ;;  %v1501_v20 = vld [vmem:[%s24081_s11 + $0x48] sm:$0xff]  ;;  %v1502_v21 = vld [vmem:[%s24081_s11 + $0x50] sm:$0xff]  ;;  %s28181_s10 = sld [smem:[#allocation13_spill]] }
  0x62   : > { %19440 = vmatprep.mubr.msk.f32.mxu1 %vm1512_vm2, %v1496_v10  ;;  %v1492_v23 = vld [vmem:[%s24081_s11] sm:$0xff]  ;;  %v1503_v24 = vld [vmem:[%s24081_s11 + $0x58] sm:$0xff]  ;;  %v1493_v25 = vld [vmem:[%s24081_s11 + $0x8] sm:$0xff]  ;;  %19473 = vmatpush3.msk.msra.mxu1 %vm1549_vm1, %v16775_v40  ;;  %s28182_s11 = sld [smem:[#allocation15_spill]] }
  0x63   : > { %v1678_v27 = vld [vmem:[%s1268_s15] sm:$0xff]  ;;  %v1679_v28 = vld [vmem:[%s1268_s15 + $0x8] sm:$0xff]  ;;  %v1680_v29 = vld [vmem:[%s1268_s15 + $0x10] sm:$0xff] }
  0x64   : > { %19421 = vmatmul.mubr.msk.f32.gmra.mrb[4].mxu0 %vm1330_vm0, %v1308_v8  ;;  %v1681_v30 = vld [vmem:[%s1268_s15 + $0x18] sm:$0xff]  ;;  %v1682_v31 = vld [vmem:[%s1268_s15 + $0x20] sm:$0xff]  ;;  %v1683_v32 = vld [vmem:[%s1268_s15 + $0x28] sm:$0xff] }
  0x65   : > { %19423 = vmatprep.mubr.msk.f32.mxu0 %vm1330_vm0, %v1309_v11  ;;  %19441 = vmatmul.mubr.msk.f32.gmra.mrb[2].mxu1 %vm1512_vm2, %v1497_v12  ;;  %v1684_v33 = vld [vmem:[%s1268_s15 + $0x30] sm:$0xff]  ;;  %v1685_v34 = vld [vmem:[%s1268_s15 + $0x38] sm:$0xff]  ;;  %v1686_v35 = vld [vmem:[%s1268_s15 + $0x40] sm:$0xff] }
  0x66   : > { %19443 = vmatprep.mubr.msk.f32.mxu1 %vm1512_vm2, %v1498_v13  ;;  %v1687_v36 = vld [vmem:[%s1268_s15 + $0x48] sm:$0xff]  ;;  %v1688_v37 = vld [vmem:[%s1268_s15 + $0x50] sm:$0xff]  ;;  %v1689_v38 = vld [vmem:[%s1268_s15 + $0x58] sm:$0xff]  ;;  %s28195_s15 = sld [smem:[#allocation14_spill]] }
  0x67   : > { %v2054_v39 = vld [vmem:[%s23883_s3] sm:$0xff]  ;;  %v1865_v42 = vld [vmem:[%s24147_s16 + $0x8] sm:$0xff]  ;;  %v1866_v43 = vld [vmem:[%s24147_s16 + $0x10] sm:$0xff] }
  0x68   : > { %19424 = vmatmul.mubr.msk.f32.gmra.mrb[6].mxu0 %vm1330_vm0, %v1310_v14  ;;  %v1864_v41 = vld [vmem:[%s24147_s16] sm:$0xff]  ;;  %v1867_v47 = vld [vmem:[%s24147_s16 + $0x18] sm:$0xff]  ;;  %v1869_v49 = vld [vmem:[%s24147_s16 + $0x28] sm:$0xff] }
  0x69   : > { %19426 = vmatprep.mubr.msk.f32.mxu0 %vm1330_vm0, %v1311_v15  ;;  %19444 = vmatmul.mubr.msk.f32.gmra.mrb[4].mxu1 %vm1512_vm2, %v1499_v16  ;;  %v16805_v44 = vld [vmem:[%s23913_s6 + $0x120] sm:$0xff]  ;;  %v1870_v50 = vld [vmem:[%s24147_s16 + $0x30] sm:$0xff]  ;;  %v1871_v51 = vld [vmem:[%s24147_s16 + $0x38] sm:$0xff] }
  0x6a   : > { %19446 = vmatprep.mubr.msk.f32.mxu1 %vm1512_vm2, %v1500_v17  ;;  %v21684_v46 = vpack.c.bf16 %v16806_v45, %v16805_v44  ;;  %v1868_v48 = vld [vmem:[%s24147_s16 + $0x20] sm:$0xff]  ;;  %v1873_v55 = vld [vmem:[%s24147_s16 + $0x48] sm:$0xff]  ;;  %v1874_v59 = vld [vmem:[%s24147_s16 + $0x50] sm:$0xff] }
  0x6b   : > { %v1872_v54 = vld [vmem:[%s24147_s16 + $0x40] sm:$0xff]  ;;  %v1875_v60 = vld [vmem:[%s24147_s16 + $0x58] sm:$0xff]  ;;  %s28196_s16 = sld [smem:[#allocation2_spill]] }
  0x6c   : > { %19427 = vmatmul.mubr.msk.f32.gmra.mrb[8].mxu0 %vm1330_vm0, %v1312_v18  ;;  %21685 = vmatprep.subr.bf16.mxu1 %v21684_v46  ;;  %v16745_v12 = vld [vmem:[%s23908_s30] ss:$0 sm:$0xff]  ;;  %v2057_v40 = vld [vmem:[%s23883_s3 + $0x18] sm:$0xff] }
  0x6d   : > { %19429 = vmatprep.mubr.msk.f32.mxu0 %vm1330_vm0, %v1313_v19  ;;  %19447 = vmatmul.mubr.msk.f32.gmra.mrb[6].mxu1 %vm1512_vm2, %v1501_v20  ;;  %v2061_v44 = vld [vmem:[%s23883_s3 + $0x38] sm:$0xff]  ;;  %v2062_v45 = vld [vmem:[%s23883_s3 + $0x40] sm:$0xff] }
  0x6e   : > { %19449 = vmatprep.mubr.msk.f32.mxu1 %vm1512_vm2, %v1502_v21 }
  0x70   : > { %19430 = vmatmul.mubr.msk.f32.gmra.mrb[10].mxu0 %vm1330_vm0, %v1314_v22 }
  0x71   : > { %19434 = vmatprep.mubr.msk.f32.mxu0 %vm1512_vm2, %v1492_v23  ;;  %19450 = vmatmul.mubr.msk.f32.gmra.mrb[8].mxu1 %vm1512_vm2, %v1503_v24 }
  0x72   : > { %19474 = vmatprep.mubr.msk.f32.mxu1 %vm1512_vm2, %v1864_v41  ;;  %v2058_v41 = vld [vmem:[%s23883_s3 + $0x20] sm:$0xff] }
  0x74   : > { %19435 = vmatmul.mubr.msk.f32.vlgmr.msra.gmra.mrb[12].mxu0 %vm1512_vm2, %v1493_v25 }
  0x75   : > { %19453 = vmatpush3.msk.msra.mxu0 %vm1549_vm1, %v16759_v26  ;;  %19454 = vmatprep.mubr.msk.f32.mxu0 %vm1512_vm2, %v1678_v27 }
  0x76   : > { %19475 = vmatmul.mubr.msk.f32.vlgmr.msra.gmra.mrb[10].mxu1 %vm1512_vm2, %v1865_v42  ;;  %v2059_v42 = vld [vmem:[%s23883_s3 + $0x28] sm:$0xff] }
  0x77   : > { %19477 = vmatprep.mubr.msk.f32.mxu1 %vm1512_vm2, %v1866_v43  ;;  %21687 = vmatpush3.bf16.msra.mxu1 %v21684_v46  ;;  %v2060_v43 = vld [vmem:[%s23883_s3 + $0x30] sm:$0xff]  ;;  %v2063_v46 = vld [vmem:[%s23883_s3 + $0x48] sm:$0xff] }
  0x78   : > { %19455 = vmatmul.mubr.msk.f32.vlgmr.msra.gmra.mrb[14].mxu0 %vm1512_vm2, %v1679_v28 }
  0x79   : > { %19457 = vmatprep.mubr.msk.f32.mxu0 %vm1512_vm2, %v1680_v29 }
  0x7a   : > { %19478 = vmatmul.mubr.msk.f32.gmra.mrb[12].mxu1 %vm1512_vm2, %v1867_v47  ;;  %v2064_v47 = vld [vmem:[%s23883_s3 + $0x50] sm:$0xff] }
  0x7b   : > { %19480 = vmatprep.mubr.msk.f32.mxu1 %vm1512_vm2, %v1868_v48  ;;  %v2065_v48 = vld [vmem:[%s23883_s3 + $0x58] sm:$0xff] }
  0x7c   : > { %19458 = vmatmul.mubr.msk.f32.gmra.mrb[16].mxu0 %vm1512_vm2, %v1681_v30 }
  0x7d   : > { %19460 = vmatprep.mubr.msk.f32.mxu0 %vm1512_vm2, %v1682_v31 }
  0x7e   : > { %19481 = vmatmul.mubr.msk.f32.gmra.mrb[14].mxu1 %vm1512_vm2, %v1869_v49 }
  0x7f   : > { %19483 = vmatprep.mubr.msk.f32.mxu1 %vm1512_vm2, %v1870_v50 }
  0x80   : > { %19461 = vmatmul.mubr.msk.f32.gmra.mrb[18].mxu0 %vm1512_vm2, %v1683_v32 }
  0x81   : > { %19463 = vmatprep.mubr.msk.f32.mxu0 %vm1512_vm2, %v1684_v33 }
  0x82   : > { %19484 = vmatmul.mubr.msk.f32.gmra.mrb[16].mxu1 %vm1512_vm2, %v1871_v51  ;;  %v24289_v51 = vld [vmem:[%s23908_s30 + $0x1] ss:$0 sm:$0xff] }
  0x83   : > { %19486 = vmatprep.mubr.msk.f32.mxu1 %vm1512_vm2, %v1872_v54 }
  0x84   : > { %19464 = vmatmul.mubr.msk.f32.gmra.mrb[20].mxu0 %vm1512_vm2, %v1685_v34 }
  0x85   : > { %19466 = vmatprep.mubr.msk.f32.mxu0 %vm1512_vm2, %v1686_v35  ;;  %v16820_v35 = vld [vmem:[%s23918_s12 + $0x120] sm:$0xff] }
  0x86   : > { %19487 = vmatmul.mubr.msk.f32.gmra.mrb[18].mxu1 %vm1512_vm2, %v1873_v55 }
  0x87   : > { %19489 = vmatprep.mubr.msk.f32.mxu1 %vm1512_vm2, %v1874_v59 }
  0x88   : > { %19467 = vmatmul.mubr.msk.f32.gmra.mrb[22].mxu0 %vm1512_vm2, %v1687_v36  ;;  %v16821_v36 = vld [vmem:[%s23918_s12 + $0x128] sm:$0xff] }
  0x89   : > { %19469 = vmatprep.mubr.msk.f32.mxu0 %vm1512_vm2, %v1688_v37  ;;  %v21688_v37 = vpack.c.bf16 %v16821_v36, %v16820_v35 }
  0x8a   : > { %19490 = vmatmul.mubr.msk.f32.gmra.mrb[20].mxu1 %vm1512_vm2, %v1875_v60 }
  0x8c   : > { %19470 = vmatmul.mubr.msk.f32.gmra.mrb[24].mxu0 %vm1512_vm2, %v1689_v38  ;;  %v2055_v38 = vld [vmem:[%s23883_s3 + $0x8] sm:$0xff] }
  0x8d   : > { %19516 = vmatprep.mubr.msk.f32.mxu0 %vm2066_vm3, %v2054_v39  ;;  %v2056_v39 = vld [vmem:[%s23883_s3 + $0x10] sm:$0xff] }
 0x12f   : > { %v24166_v52 = vpop.f32.mrb[0].mxu0 }
 0x130   : > { %v24168_v53 = vpop.f32.mrb[1].mxu0  ;;  %vm12438_vm11 = vcmp.gt.f32.partialorder %v24166_v52, 0.0 }
 0x131   : > { %28137 = vst [vmem:[#allocation26_spill] sm:$0xff] %v24168_v53 }
 0x133   : > { %v24174_v56 = vpop.f32.mrb[2].mxu0 }
 0x134   : > { %28138 = vst [vmem:[#allocation27_spill] sm:$0xff] %v24174_v56  ;;  %v24176_v57 = vpop.f32.mrb[3].mxu0  ;;  %v19439_v58 = vpop.f32.mrb[0].mxu1 }
 0x135   : > { %28139 = vst [vmem:[#allocation28_spill] sm:$0xff] %v24176_v57  ;;  %v1629_v61 = vpop.f32.mrb[1].mxu1  ;;  %v24200_v16 = vadd.f32 %v19439_v58, %v16745_v12 }
 0x136   : > { %v24202_v17 = vadd.f32 %v16745_v12, %v1629_v61 }
 0x137   : > { %v24182_v62 = vpop.f32.mrb[4].mxu0 }
 0x138   : > { %28140 = vst [vmem:[#allocation29_spill] sm:$0xff] %v24182_v62  ;;  %v24184_v63 = vpop.f32.mrb[5].mxu0  ;;  %v19442_v0 = vpop.f32.mrb[2].mxu1  ;;  %v24218_v24 = vpack.c.bf16 %v24200_v16, %v24202_v17 }
 0x139   : > { %28141 = vst [vmem:[#allocation30_spill] sm:$0xff] %v24184_v63  ;;  %v1639_v1 = vpop.f32.mrb[3].mxu1  ;;  %v24212_v22 = vadd.f32 %v19442_v0, %v16745_v12  ;;  %v17173_v63 = vld [vmem:[%s23918_s12 + $0x1a0] sm:$0xff] }
 0x13a   : > { %v24214_v23 = vadd.f32 %v16745_v12, %v1639_v1 }
 0x13b   : > { %v24187_v2 = vpop.f32.mrb[6].mxu0 }
 0x13c   : > { %28142 = vst [vmem:[#allocation31_spill] sm:$0xff] %v24187_v2  ;;  %v24189_v3 = vpop.f32.mrb[7].mxu0  ;;  %v19445_v4 = vpop.f32.mrb[4].mxu1  ;;  %v24229_v27 = vpack.c.bf16 %v24212_v22, %v24214_v23 }
 0x13d   : > { %28143 = vst [vmem:[#allocation32_spill] sm:$0xff] %v24189_v3  ;;  %v1649_v5 = vpop.f32.mrb[5].mxu1  ;;  %v24223_v25 = vadd.f32 %v19445_v4, %v16745_v12 }
 0x13e   : > { %v24225_v26 = vadd.f32 %v16745_v12, %v1649_v5 }
 0x13f   : > { %v24191_v6 = vpop.f32.mrb[8].mxu0 }
 0x140   : > { %28144 = vst [vmem:[#allocation33_spill] sm:$0xff] %v24191_v6  ;;  %v24193_v7 = vpop.f32.mrb[9].mxu0  ;;  %v19448_v8 = vpop.f32.mrb[6].mxu1  ;;  %v24239_v30 = vpack.c.bf16 %v24223_v25, %v24225_v26 }
 0x141   : > { %28145 = vst [vmem:[#allocation34_spill] sm:$0xff] %v24193_v7  ;;  %v1659_v9 = vpop.f32.mrb[7].mxu1  ;;  %v24233_v28 = vadd.f32 %v19448_v8, %v16745_v12 }
 0x142   : > { %v24235_v29 = vadd.f32 %v16745_v12, %v1659_v9 }
 0x143   : > { %v24195_v10 = vpop.f32.mrb[10].mxu0 }
 0x144   : > { %28146 = vst [vmem:[#allocation35_spill] sm:$0xff] %v24195_v10  ;;  %v24197_v11 = vpop.f32.mrb[11].mxu0  ;;  %v19451_v13 = vpop.f32.mrb[8].mxu1  ;;  %v24249_v33 = vpack.c.bf16 %v24233_v28, %v24235_v29  ;;  %v16902_v10 = vld [vmem:[%s23918_s12 + $0x148] sm:$0xff] }
 0x145   : > { %28147 = vst [vmem:[#allocation36_spill] sm:$0xff] %v24197_v11  ;;  %v1669_v14 = vpop.f32.mrb[9].mxu1  ;;  %v24243_v31 = vadd.f32 %v19451_v13, %v16745_v12 }
 0x146   : > { %v24245_v32 = vadd.f32 %v16745_v12, %v1669_v14 }
 0x147   : > { %v19436_v15 = vpop.f32.mrb[12].mxu0 }
 0x148   : > { %v24204_v18 = vadd.f32 %v19436_v15, %v16745_v12  ;;  %v1619_v19 = vpop.f32.mrb[13].mxu0  ;;  %v24255_v34 = vpack.c.bf16 %v24243_v31, %v24245_v32 }
 0x149   : > { %v24206_v20 = vadd.f32 %v16745_v12, %v1619_v19 }
 0x14b   : > { %v24210_v21 = vpack.c.bf16 %v24204_v18, %v24206_v20  ;;  %v24284_v49 = vpop.f32.mrb[14].mxu0 }
 0x14c   : > { %v24286_v50 = vpop.f32.mrb[15].mxu0 }
 0x14d   : > { %21661 = vmatprep.subr.bf16.mxu0 %v24210_v21 }
 0x14e   : > { %21663 = vmatpush3.bf16.msra.mxu0 %v24210_v21 }
 0x14f   : > { %21665 = vmatprep.subr.bf16.mxu0 %v24218_v24  ;;  %v19459_v54 = vpop.f32.mrb[16].mxu0 }
 0x150   : > { %v24292_v55 = vadd.f32 %v19459_v54, %v24289_v51  ;;  %v1815_v58 = vpop.f32.mrb[17].mxu0 }
 0x151   : > { %v24295_v59 = vadd.f32 %v24289_v51, %v1815_v58 }
 0x152   : > { %21667 = vmatpush3.bf16.msra.mxu0 %v24218_v24 }
 0x153   : > { %21669 = vmatprep.subr.bf16.mxu0 %v24229_v27  ;;  %v19462_v60 = vpop.f32.mrb[18].mxu0 }
 0x154   : > { %v24298_v61 = vadd.f32 %v19462_v60, %v24289_v51  ;;  %v1825_v0 = vpop.f32.mrb[19].mxu0 }
 0x155   : > { %v24301_v1 = vadd.f32 %v24289_v51, %v1825_v0 }
 0x156   : > { %21671 = vmatpush3.bf16.msra.mxu0 %v24229_v27 }
 0x157   : > { %21673 = vmatprep.subr.bf16.mxu0 %v24239_v30  ;;  %v19465_v4 = vpop.f32.mrb[20].mxu0 }
 0x158   : > { %v24304_v5 = vadd.f32 %v19465_v4, %v24289_v51  ;;  %v1835_v8 = vpop.f32.mrb[21].mxu0 }
 0x159   : > { %v24307_v9 = vadd.f32 %v24289_v51, %v1835_v8 }
 0x15a   : > { %21675 = vmatpush3.bf16.msra.mxu0 %v24239_v30 }
 0x15b   : > { %21677 = vmatprep.subr.bf16.mxu0 %v24249_v33  ;;  %v19468_v12 = vpop.f32.mrb[22].mxu0 }
 0x15c   : > { %v24310_v13 = vadd.f32 %v19468_v12, %v24289_v51  ;;  %v1845_v14 = vpop.f32.mrb[23].mxu0 }
 0x15d   : > { %v24313_v15 = vadd.f32 %v24289_v51, %v1845_v14 }
 0x15e   : > { %21679 = vmatpush3.bf16.msra.mxu0 %v24249_v33 }
 0x15f   : > { %21681 = vmatprep.subr.bf16.mxu0 %v24255_v34  ;;  %v19471_v19 = vpop.f32.mrb[24].mxu0 }
 0x160   : > { %v24316_v35 = vadd.f32 %v19471_v19, %v24289_v51  ;;  %v1855_v36 = vpop.f32.mrb[25].mxu0 }
 0x162   : > { %21683 = vmatpush3.bf16.msra.mxu0 %v24255_v34 }
 0x163   : > { %21689 = vmatprep.subr.bf16.mxu0 %v21688_v37 }
 0x165   : > { %19517 = vmatmul.mubr.msk.f32.vlgmr.msra.gmra.mrb[26].mxu0 %vm2066_vm3, %v2055_v38  ;;  %v16835_v38 = vld [vmem:[%s23913_s6 + $0x130] sm:$0xff] }
 0x166   : > { %19519 = vmatprep.mubr.msk.f32.mxu0 %vm2066_vm3, %v2056_v39  ;;  %21691 = vmatpush3.bf16.msra.mxu0 %v21688_v37  ;;  %v24319_v37 = vadd.f32 %v24289_v51, %v1855_v36  ;;  %v16836_v39 = vld [vmem:[%s23913_s6 + $0x138] sm:$0xff] }
 0x169   : > { %19520 = vmatmul.mubr.msk.f32.gmra.mrb[28].mxu0 %vm2066_vm3, %v2057_v40  ;;  %v21692_v40 = vpack.c.bf16 %v16836_v39, %v16835_v38 }
 0x16a   : > { %19522 = vmatprep.mubr.msk.f32.mxu0 %vm2066_vm3, %v2058_v41  ;;  %v16849_v41 = vld [vmem:[%s23918_s12 + $0x130] sm:$0xff] }
 0x16b   : > { %21693 = vmatprep.subr.bf16.mxu1 %v21692_v40 }
 0x16d   : > { %19523 = vmatmul.mubr.msk.f32.gmra.mrb[30].mxu0 %vm2066_vm3, %v2059_v42  ;;  %v16850_v42 = vld [vmem:[%s23918_s12 + $0x138] sm:$0xff] }
 0x16e   : > { %19525 = vmatprep.mubr.msk.f32.mxu0 %vm2066_vm3, %v2060_v43  ;;  %v21696_v43 = vpack.c.bf16 %v16850_v42, %v16849_v41 }
 0x170   : > { %21697 = vmatprep.subr.bf16.mxu0 %v21696_v43 }
 0x171   : > { %19526 = vmatmul.mubr.msk.f32.gmra.mrb[32].mxu0 %vm2066_vm3, %v2061_v44  ;;  %v24325_v44 = vpop.f32.mrb[10].mxu1 }
 0x172   : > { %19528 = vmatprep.mubr.msk.f32.mxu0 %vm2066_vm3, %v2062_v45  ;;  %v24327_v45 = vpop.f32.mrb[11].mxu1 }
 0x175   : > { %19529 = vmatmul.mubr.msk.f32.gmra.mrb[34].mxu0 %vm2066_vm3, %v2063_v46  ;;  %v16777_v46 = vld [vmem:[%s23908_s30 + $0x2] ss:$0 sm:$0xff] }
 0x176   : > { %19531 = vmatprep.mubr.msk.f32.mxu0 %vm2066_vm3, %v2064_v47  ;;  %v19479_v47 = vpop.f32.mrb[12].mxu1 }
 0x177   : > { %v2001_v54 = vpop.f32.mrb[13].mxu1 }
 0x178   : > { %v24332_v58 = vadd.f32 %v16777_v46, %v2001_v54  ;;  %v19482_v60 = vpop.f32.mrb[14].mxu1 }
 0x179   : > { %19532 = vmatmul.mubr.msk.f32.gmra.mrb[36].mxu0 %vm2066_vm3, %v2065_v48  ;;  %v24330_v48 = vadd.f32 %v19479_v47, %v16777_v46  ;;  %v24334_v0 = vadd.f32 %v19482_v60, %v16777_v46  ;;  %v2011_v4 = vpop.f32.mrb[15].mxu1 }
 0x17a   : > { %v24336_v8 = vadd.f32 %v16777_v46, %v2011_v4  ;;  %v19485_v12 = vpop.f32.mrb[16].mxu1  ;;  %v16901_v4 = vld [vmem:[%s23918_s12 + $0x140] sm:$0xff] }
 0x17b   : > { %v24338_v14 = vadd.f32 %v19485_v12, %v16777_v46  ;;  %v2021_v19 = vpop.f32.mrb[17].mxu1  ;;  %v21728_v6 = vpack.c.bf16 %v16902_v10, %v16901_v4 }
 0x17c   : > { %v24340_v36 = vadd.f32 %v16777_v46, %v2021_v19  ;;  %v19488_v38 = vpop.f32.mrb[18].mxu1 }
 0x17d   : > { %v24342_v39 = vadd.f32 %v19488_v38, %v16777_v46  ;;  %v2031_v41 = vpop.f32.mrb[19].mxu1 }
 0x17e   : > { %v24344_v42 = vadd.f32 %v16777_v46, %v2031_v41  ;;  %v19491_v47 = vpop.f32.mrb[20].mxu1 }
 0x17f   : > { %v24346_v54 = vadd.f32 %v19491_v47, %v16777_v46  ;;  %v2041_v60 = vpop.f32.mrb[21].mxu1 }
 0x180   : > { %v24348_v11 = vadd.f32 %v16777_v46, %v2041_v60 }
 0x238   : > { %v19518_v12 = vpop.f32.mrb[26].mxu0 }
 0x239   : > { %v2169_v7 = vpop.f32.mrb[27].mxu0 }
 0x23a   : > { %19538 = vmatprep.mubr.msk.f32.mxu1 %vm28094_vm4, %v2169_v7  ;;  %19560 = vmatprep.mubr.msk.f32.mxu0 %vm28094_vm4, %v2169_v7 }
 0x23b   : > { %19539 = vmatmul.mubr.msk.f32.vlgmr.msra.gmra.mrb[22].mxu1 %vm28094_vm4, %v19518_v12  ;;  %19561 = vmatmul.mubr.msk.f32.vlgmr.msra.gmra.mrb[38].mxu0 %vm28094_vm4, %v19518_v12 }
 0x23c   : > { %21695 = vmatpush3.bf16.msra.mxu1 %v21692_v40  ;;  %v19521_v19 = vpop.f32.mrb[28].mxu0  ;;  %21699 = vmatpush3.bf16.msra.mxu0 %v21696_v43 }
 0x23d   : > { %21701 = vmatprep.subr.bf16.mxu1 %v24210_v21  ;;  %v2179_v46 = vpop.f32.mrb[29].mxu0  ;;  %21729 = vmatprep.subr.bf16.mxu0 %v21728_v6 }
 0x23e   : > { %19541 = vmatprep.mubr.msk.f32.mxu1 %vm28094_vm4, %v2179_v46  ;;  %19563 = vmatprep.mubr.msk.f32.mxu0 %vm28094_vm4, %v2179_v46 }
 0x23f   : > { %19542 = vmatmul.mubr.msk.f32.gmra.mrb[24].mxu1 %vm28094_vm4, %v19521_v19  ;;  %19564 = vmatmul.mubr.msk.f32.gmra.mrb[40].mxu0 %vm28094_vm4, %v19521_v19 }
 0x240   : > { %v19524_v7 = vpop.f32.mrb[30].mxu0 }
 0x241   : > { %v2189_v10 = vpop.f32.mrb[31].mxu0 }
 0x242   : > { %19544 = vmatprep.mubr.msk.f32.mxu1 %vm28094_vm4, %v2189_v10  ;;  %19566 = vmatprep.mubr.msk.f32.mxu0 %vm28094_vm4, %v2189_v10 }
 0x243   : > { %19545 = vmatmul.mubr.msk.f32.gmra.mrb[26].mxu1 %vm28094_vm4, %v19524_v7  ;;  %19567 = vmatmul.mubr.msk.f32.gmra.mrb[42].mxu0 %vm28094_vm4, %v19524_v7 }
 0x244   : > { %v19527_v40 = vpop.f32.mrb[32].mxu0 }
 0x245   : > { %v2199_v43 = vpop.f32.mrb[33].mxu0 }
 0x246   : > { %19547 = vmatprep.mubr.msk.f32.mxu1 %vm28094_vm4, %v2199_v43  ;;  %19569 = vmatprep.mubr.msk.f32.mxu0 %vm28094_vm4, %v2199_v43 }
 0x247   : > { %19548 = vmatmul.mubr.msk.f32.gmra.mrb[28].mxu1 %vm28094_vm4, %v19527_v40  ;;  %19570 = vmatmul.mubr.msk.f32.gmra.mrb[44].mxu0 %vm28094_vm4, %v19527_v40 }
 0x248   : > { %v19530_v38 = vpop.f32.mrb[34].mxu0 }
 0x249   : > { %v2209_v41 = vpop.f32.mrb[35].mxu0 }
 0x24a   : > { %19550 = vmatprep.mubr.msk.f32.mxu1 %vm28094_vm4, %v2209_v41  ;;  %19572 = vmatprep.mubr.msk.f32.mxu0 %vm28094_vm4, %v2209_v41  ;;  %v16953_v41 = vld [vmem:[%s23913_s6 + $0x150] sm:$0xff] }
 0x24b   : > { %19551 = vmatmul.mubr.msk.f32.gmra.mrb[30].mxu1 %vm28094_vm4, %v19530_v38  ;;  %19573 = vmatmul.mubr.msk.f32.gmra.mrb[46].mxu0 %vm28094_vm4, %v19530_v38  ;;  %v16929_v38 = vld [vmem:[%s23883_s3 + $0x120] sm:$0xff] }
 0x24c   : > { %v19533_v47 = vpop.f32.mrb[36].mxu0 }
 0x24d   : > { %v2219_v60 = vpop.f32.mrb[37].mxu0 }
 0x24e   : > { %19553 = vmatprep.mubr.msk.f32.mxu1 %vm28094_vm4, %v2219_v60  ;;  %19575 = vmatprep.mubr.msk.f32.mxu0 %vm28094_vm4, %v2219_v60 }
 0x24f   : > { %19554 = vmatmul.mubr.msk.f32.gmra.mrb[32].mxu1 %vm28094_vm4, %v19533_v47  ;;  %19576 = vmatmul.mubr.msk.f32.gmra.mrb[48].mxu0 %vm28094_vm4, %v19533_v47  ;;  %v16954_v47 = vld [vmem:[%s23913_s6 + $0x158] sm:$0xff] }
 0x250   : > { %19582 = vmatprep.mubr.msk.f32.mxu1 %vm28094_vm4, %v24206_v20  ;;  %19604 = vmatprep.mubr.msk.f32.mxu0 %vm28094_vm4, %v24206_v20  ;;  %v16864_v20 = vld [vmem:[%s23883_s3 + $0xc8] sm:$0xff]  ;;  %v21756_v60 = vpack.c.bf16 %v16954_v47, %v16953_v41 }
 0x253   : > { %19583 = vmatmul.mubr.msk.f32.vlgmr.msra.gmra.mrb[22].mxu1 %vm28094_vm4, %v24204_v18  ;;  %19605 = vmatmul.mubr.msk.f32.vlgmr.msra.gmra.mrb[38].mxu0 %vm28094_vm4, %v24204_v18 }
 0x254   : > { %21703 = vmatpush3.bf16.msra.mxu1 %v24210_v21  ;;  %19585 = vmatprep.mubr.msk.f32.mxu1 %vm28094_vm4, %v24202_v17  ;;  %v16865_v21 = vld [vmem:[%s23883_s3 + $0xd0] sm:$0xff] }
 0x255   : > { %19607 = vmatprep.mubr.msk.f32.mxu0 %vm28094_vm4, %v24202_v17  ;;  %21705 = vmatprep.subr.bf16.mxu1 %v24218_v24  ;;  %v16863_v17 = vld [vmem:[%s23883_s3 + $0xc0] sm:$0xff] }
 0x256   : > { %21731 = vmatpush3.bf16.msra.mxu0 %v21728_v6  ;;  %v16887_v6 = vld [vmem:[%s23913_s6 + $0x140] sm:$0xff] }
 0x257   : > { %19586 = vmatmul.mubr.msk.f32.gmra.mrb[24].mxu1 %vm28094_vm4, %v24200_v16  ;;  %19608 = vmatmul.mubr.msk.f32.gmra.mrb[40].mxu0 %vm28094_vm4, %v24200_v16  ;;  %v16888_v16 = vld [vmem:[%s23913_s6 + $0x148] sm:$0xff] }
 0x258   : > { %21707 = vmatpush3.bf16.msra.mxu1 %v24218_v24  ;;  %19588 = vmatprep.mubr.msk.f32.mxu1 %vm28094_vm4, %v24214_v23  ;;  %v21724_v18 = vpack.c.bf16 %v16888_v16, %v16887_v6  ;;  %v16868_v24 = vld [vmem:[%s23883_s3 + $0xe8] sm:$0xff]  ;;  %v24491_v6 = vld [vmem:[%s23928_s27 + $0x6] ss:$0 sm:$0xff] }
 0x259   : > { %19610 = vmatprep.mubr.msk.f32.mxu0 %vm28094_vm4, %v24214_v23  ;;  %21709 = vmatprep.subr.bf16.mxu1 %v24229_v27  ;;  %v16867_v23 = vld [vmem:[%s23883_s3 + $0xe0] sm:$0xff] }
 0x25b   : > { %19589 = vmatmul.mubr.msk.f32.gmra.mrb[26].mxu1 %vm28094_vm4, %v24212_v22  ;;  %19611 = vmatmul.mubr.msk.f32.gmra.mrb[42].mxu0 %vm28094_vm4, %v24212_v22  ;;  %v16866_v22 = vld [vmem:[%s23883_s3 + $0xd8] sm:$0xff] }
 0x25c   : > { %21711 = vmatpush3.bf16.msra.mxu1 %v24229_v27  ;;  %19591 = vmatprep.mubr.msk.f32.mxu1 %vm28094_vm4, %v24225_v26  ;;  %v16871_v27 = vld [vmem:[%s23883_s3 + $0x100] sm:$0xff] }
 0x25d   : > { %19613 = vmatprep.mubr.msk.f32.mxu0 %vm28094_vm4, %v24225_v26  ;;  %21713 = vmatprep.subr.bf16.mxu1 %v24239_v30  ;;  %v16870_v26 = vld [vmem:[%s23883_s3 + $0xf8] sm:$0xff] }
 0x25f   : > { %19592 = vmatmul.mubr.msk.f32.gmra.mrb[28].mxu1 %vm28094_vm4, %v24223_v25  ;;  %19614 = vmatmul.mubr.msk.f32.gmra.mrb[44].mxu0 %vm28094_vm4, %v24223_v25  ;;  %v16869_v25 = vld [vmem:[%s23883_s3 + $0xf0] sm:$0xff] }
 0x260   : > { %21715 = vmatpush3.bf16.msra.mxu1 %v24239_v30  ;;  %19594 = vmatprep.mubr.msk.f32.mxu1 %vm28094_vm4, %v24235_v29  ;;  %v16874_v30 = vld [vmem:[%s23883_s3 + $0x118] sm:$0xff] }
 0x261   : > { %19616 = vmatprep.mubr.msk.f32.mxu0 %vm28094_vm4, %v24235_v29  ;;  %21717 = vmatprep.subr.bf16.mxu1 %v24249_v33  ;;  %v16873_v29 = vld [vmem:[%s23883_s3 + $0x110] sm:$0xff] }
 0x263   : > { %19595 = vmatmul.mubr.msk.f32.gmra.mrb[30].mxu1 %vm28094_vm4, %v24233_v28  ;;  %19617 = vmatmul.mubr.msk.f32.gmra.mrb[46].mxu0 %vm28094_vm4, %v24233_v28  ;;  %v16872_v28 = vld [vmem:[%s23883_s3 + $0x108] sm:$0xff] }
 0x264   : > { %21719 = vmatpush3.bf16.msra.mxu1 %v24249_v33  ;;  %19597 = vmatprep.mubr.msk.f32.mxu1 %vm28094_vm4, %v24245_v32 }
 0x265   : > { %19619 = vmatprep.mubr.msk.f32.mxu0 %vm28094_vm4, %v24245_v32  ;;  %21721 = vmatprep.subr.bf16.mxu1 %v24255_v34 }
 0x267   : > { %19598 = vmatmul.mubr.msk.f32.gmra.mrb[32].mxu1 %vm28094_vm4, %v24243_v31  ;;  %19620 = vmatmul.mubr.msk.f32.gmra.mrb[48].mxu0 %vm28094_vm4, %v24243_v31 }
 0x268   : > { %21723 = vmatpush3.bf16.msra.mxu1 %v24255_v34  ;;  %19646 = vmatprep.mubr.msk.f32.mxu1 %vm2066_vm3, %v16863_v17 }
 0x269   : > { %21725 = vmatprep.subr.bf16.mxu1 %v21724_v18 }
 0x26b   : > { %19647 = vmatmul.mubr.msk.f32.vlgmr.msra.gmra.mrb[34].mxu1 %vm2066_vm3, %v16864_v20 }
 0x26c   : > { %19649 = vmatprep.mubr.msk.f32.mxu1 %vm2066_vm3, %v16865_v21  ;;  %21727 = vmatpush3.bf16.msra.mxu1 %v21724_v18 }
 0x26d   : > { %21757 = vmatprep.subr.bf16.mxu1 %v21756_v60 }
 0x26f   : > { %19650 = vmatmul.mubr.msk.f32.gmra.mrb[36].mxu1 %vm2066_vm3, %v16866_v22 }
 0x270   : > { %19652 = vmatprep.mubr.msk.f32.mxu1 %vm2066_vm3, %v16867_v23 }
 0x273   : > { %19653 = vmatmul.mubr.msk.f32.gmra.mrb[38].mxu1 %vm2066_vm3, %v16868_v24 }
 0x274   : > { %19655 = vmatprep.mubr.msk.f32.mxu1 %vm2066_vm3, %v16869_v25 }
 0x277   : > { %19656 = vmatmul.mubr.msk.f32.gmra.mrb[40].mxu1 %vm2066_vm3, %v16870_v26 }
 0x278   : > { %19658 = vmatprep.mubr.msk.f32.mxu1 %vm2066_vm3, %v16871_v27 }
 0x27b   : > { %19659 = vmatmul.mubr.msk.f32.gmra.mrb[42].mxu1 %vm2066_vm3, %v16872_v28 }
 0x27c   : > { %19661 = vmatprep.mubr.msk.f32.mxu1 %vm2066_vm3, %v16873_v29 }
 0x27f   : > { %19662 = vmatmul.mubr.msk.f32.gmra.mrb[44].mxu1 %vm2066_vm3, %v16874_v30 }
 0x33e   : > { %v19648_v31 = vpop.f32.mrb[34].mxu1 }
 0x33f   : > { %v2988_v32 = vpop.f32.mrb[35].mxu1 }
 0x340   : > { %19668 = vmatprep.mubr.msk.f32.mxu1 %vm28094_vm4, %v2988_v32  ;;  %19690 = vmatprep.mubr.msk.f32.mxu0 %vm28094_vm4, %v2988_v32 }
 0x341   : > { %19669 = vmatmul.mubr.msk.f32.vlgmr.msra.gmra.mrb[22].mxu1 %vm28094_vm4, %v19648_v31  ;;  %19691 = vmatmul.mubr.msk.f32.vlgmr.msra.gmra.mrb[38].mxu0 %vm28094_vm4, %v19648_v31 }
 0x342   : > { %v19651_v33 = vpop.f32.mrb[36].mxu1  ;;  %21759 = vmatpush3.bf16.msra.mxu1 %v21756_v60 }
 0x343   : > { %v2998_v34 = vpop.f32.mrb[37].mxu1 }
 0x344   : > { %19671 = vmatprep.mubr.msk.f32.mxu1 %vm28094_vm4, %v2998_v34  ;;  %19693 = vmatprep.mubr.msk.f32.mxu0 %vm28094_vm4, %v2998_v34 }
 0x345   : > { %19672 = vmatmul.mubr.msk.f32.gmra.mrb[24].mxu1 %vm28094_vm4, %v19651_v33  ;;  %19694 = vmatmul.mubr.msk.f32.gmra.mrb[40].mxu0 %vm28094_vm4, %v19651_v33 }
 0x346   : > { %v19654_v4 = vpop.f32.mrb[38].mxu1 }
 0x347   : > { %v3008_v12 = vpop.f32.mrb[39].mxu1 }
 0x348   : > { %19674 = vmatprep.mubr.msk.f32.mxu1 %vm28094_vm4, %v3008_v12  ;;  %19696 = vmatprep.mubr.msk.f32.mxu0 %vm28094_vm4, %v3008_v12 }
 0x349   : > { %19675 = vmatmul.mubr.msk.f32.gmra.mrb[26].mxu1 %vm28094_vm4, %v19654_v4  ;;  %19697 = vmatmul.mubr.msk.f32.gmra.mrb[42].mxu0 %vm28094_vm4, %v19654_v4 }
 0x34a   : > { %v19657_v19 = vpop.f32.mrb[40].mxu1 }
 0x34b   : > { %v3018_v46 = vpop.f32.mrb[41].mxu1 }
 0x34c   : > { %19677 = vmatprep.mubr.msk.f32.mxu1 %vm28094_vm4, %v3018_v46  ;;  %19699 = vmatprep.mubr.msk.f32.mxu0 %vm28094_vm4, %v3018_v46 }
 0x34d   : > { %19678 = vmatmul.mubr.msk.f32.gmra.mrb[28].mxu1 %vm28094_vm4, %v19657_v19  ;;  %19700 = vmatmul.mubr.msk.f32.gmra.mrb[44].mxu0 %vm28094_vm4, %v19657_v19 }
 0x34e   : > { %v19660_v7 = vpop.f32.mrb[42].mxu1 }
 0x34f   : > { %v3028_v10 = vpop.f32.mrb[43].mxu1 }
 0x350   : > { %19680 = vmatprep.mubr.msk.f32.mxu1 %vm28094_vm4, %v3028_v10  ;;  %19702 = vmatprep.mubr.msk.f32.mxu0 %vm28094_vm4, %v3028_v10 }
 0x351   : > { %19681 = vmatmul.mubr.msk.f32.gmra.mrb[30].mxu1 %vm28094_vm4, %v19660_v7  ;;  %19703 = vmatmul.mubr.msk.f32.gmra.mrb[46].mxu0 %vm28094_vm4, %v19660_v7 }
 0x352   : > { %v19663_v40 = vpop.f32.mrb[44].mxu1 }
 0x353   : > { %v3038_v43 = vpop.f32.mrb[45].mxu1 }
 0x354   : > { %19683 = vmatprep.mubr.msk.f32.mxu1 %vm28094_vm4, %v3038_v43  ;;  %19705 = vmatprep.mubr.msk.f32.mxu0 %vm28094_vm4, %v3038_v43 }
 0x355   : > { %19684 = vmatmul.mubr.msk.f32.gmra.mrb[32].mxu1 %vm28094_vm4, %v19663_v40  ;;  %19706 = vmatmul.mubr.msk.f32.gmra.mrb[48].mxu0 %vm28094_vm4, %v19663_v40 }
 0x356   : > { %19732 = vmatprep.mubr.msk.f32.mxu0 %vm2066_vm3, %v16929_v38 }
 0x414   : > { %v24493_v16 = vpop.f32.mrb[22].mxu1  ;;  %v19692_v17 = vpop.f32.mrb[38].mxu0 }
 0x415   : > { %v22422_v18 = vadd.f32 %v19692_v17, %v24491_v6  ;;  %v24496_v20 = vpop.f32.mrb[23].mxu1  ;;  %v3292_v21 = vpop.f32.mrb[39].mxu0 }
 0x416   : > { %v22423_v22 = vadd.f32 %v24491_v6, %v3292_v21 }
 0x417   : > { %v16916_v23 = vmul.f32 -1.442695, %v22422_v18 }
 0x418   : > { %v16915_v24 = vmul.f32 -1.442695, %v22423_v22  ;;  %v24499_v25 = vpop.f32.mrb[24].mxu1  ;;  %v19695_v26 = vpop.f32.mrb[40].mxu0 }
 0x419   : > { %23004 = vpow2.f32 %v16916_v23  ;;  %v22424_v27 = vadd.f32 %v19695_v26, %v24491_v6  ;;  %v24502_v28 = vpop.f32.mrb[25].mxu1  ;;  %v3302_v29 = vpop.f32.mrb[41].mxu0 }
 0x41a   : > { %23006 = vpow2.f32 %v16915_v24  ;;  %v22425_v30 = vadd.f32 %v24491_v6, %v3302_v29 }
 0x41b   : > { %v16918_v31 = vmul.f32 -1.442695, %v22424_v27 }
 0x41c   : > { %v16917_v32 = vmul.f32 -1.442695, %v22425_v30  ;;  %v24505_v33 = vpop.f32.mrb[26].mxu1  ;;  %v19698_v34 = vpop.f32.mrb[42].mxu0 }
 0x41d   : > { %23008 = vpow2.f32 %v16918_v31  ;;  %v22426_v4 = vadd.f32 %v19698_v34, %v24491_v6  ;;  %v24508_v12 = vpop.f32.mrb[27].mxu1  ;;  %v3312_v19 = vpop.f32.mrb[43].mxu0 }
 0x41e   : > { %23010 = vpow2.f32 %v16917_v32  ;;  %v22427_v46 = vadd.f32 %v24491_v6, %v3312_v19 }
 0x41f   : > { %v16920_v7 = vmul.f32 -1.442695, %v22426_v4 }
 0x420   : > { %v16919_v10 = vmul.f32 -1.442695, %v22427_v46  ;;  %v24511_v40 = vpop.f32.mrb[28].mxu1  ;;  %v19701_v43 = vpop.f32.mrb[44].mxu0 }
 0x421   : > { %23012 = vpow2.f32 %v16920_v7  ;;  %v22428_v38 = vadd.f32 %v19701_v43, %v24491_v6  ;;  %v24514_v41 = vpop.f32.mrb[29].mxu1  ;;  %v3322_v47 = vpop.f32.mrb[45].mxu0 }
 0x422   : > { %23014 = vpow2.f32 %v16919_v10  ;;  %v22429_v60 = vadd.f32 %v24491_v6, %v3322_v47 }
 0x423   : > { %v23005_v17 = vpop.eup %23004  ;;  %v16922_v18 = vmul.f32 -1.442695, %v22428_v38 }
 0x424   : > { %v23007_v21 = vpop.eup %23006  ;;  %v3400_v22 = vadd.f32 1.0, %v23005_v17  ;;  %v16921_v23 = vmul.f32 -1.442695, %v22429_v60  ;;  %v24517_v24 = vpop.f32.mrb[30].mxu1 }
 0x425   : > { %v19704_v26 = vpop.f32.mrb[46].mxu0  ;;  %v3399_v27 = vadd.f32 1.0, %v23007_v21  ;;  %23016 = vpow2.f32 %v16922_v18  ;;  %v24520_v30 = vpop.f32.mrb[31].mxu1 }
 0x426   : > { %v22430_v29 = vadd.f32 %v19704_v26, %v24491_v6  ;;  %v3332_v31 = vpop.f32.mrb[47].mxu0  ;;  %23018 = vrcp.f32 %v3400_v22 }
 0x427   : > { %v22431_v32 = vadd.f32 %v24491_v6, %v3332_v31  ;;  %v23009_v34 = vpop.eup %23008  ;;  %23020 = vrcp.f32 %v3399_v27  ;;  %v24530_v27 = vld [vmem:[%s23923_s20 + $0x6] ss:$0 sm:$0xff] }
 0x428   : > { %v16924_v4 = vmul.f32 -1.442695, %v22430_v29  ;;  %v23011_v19 = vpop.eup %23010  ;;  %v3402_v46 = vadd.f32 1.0, %v23009_v34  ;;  %23022 = vpow2.f32 %v16921_v23  ;;  %v24523_v10 = vpop.f32.mrb[32].mxu1  ;;  %v22410_v34 = vadd.f32 %v24493_v16, %v24530_v27 }
 0x429   : > { %v16923_v7 = vmul.f32 -1.442695, %v22431_v32  ;;  %v19707_v43 = vpop.f32.mrb[48].mxu0  ;;  %v3401_v38 = vadd.f32 1.0, %v23011_v19  ;;  %v24526_v60 = vpop.f32.mrb[33].mxu1 }
 0x42a   : > { %23024 = vpow2.f32 %v16924_v4  ;;  %v22432_v47 = vadd.f32 %v19707_v43, %v24491_v6  ;;  %v3342_v17 = vpop.f32.mrb[49].mxu0 }
 0x42b   : > { %23026 = vrcp.f32 %v3402_v46  ;;  %v22433_v18 = vadd.f32 %v24491_v6, %v3342_v17  ;;  %v23013_v21 = vpop.eup %23012  ;;  %v22411_v6 = vadd.f32 %v24530_v27, %v24496_v20  ;;  %v22412_v17 = vadd.f32 %v24499_v25, %v24530_v27 }
 0x42c   : > { %23028 = vrcp.f32 %v3401_v38  ;;  %v16926_v22 = vmul.f32 -1.442695, %v22432_v47  ;;  %v23015_v26 = vpop.eup %23014  ;;  %v3404_v23 = vadd.f32 1.0, %v23013_v21  ;;  %v22413_v21 = vadd.f32 %v24530_v27, %v24502_v28 }
 0x42d   : > { %23030 = vpow2.f32 %v16923_v7  ;;  %v16925_v29 = vmul.f32 -1.442695, %v22433_v18  ;;  %v3403_v31 = vadd.f32 1.0, %v23015_v26 }
 0x42e   : > { %23032 = vpow2.f32 %v16926_v22 }
 0x42f   : > { %23034 = vrcp.f32 %v3404_v23  ;;  %v23017_v32 = vpop.eup %23016 }
 0x430   : > { %23036 = vrcp.f32 %v3403_v31  ;;  %v23019_v4 = vpop.eup %23018  ;;  %v3406_v19 = vadd.f32 1.0, %v23017_v32  ;;  %v22414_v32 = vadd.f32 %v24505_v33, %v24530_v27 }
 0x431   : > { %23038 = vpow2.f32 %v16925_v29  ;;  %v23021_v46 = vpop.eup %23020  ;;  %v24536_v43 = vmul.f32 %v23019_v4, %v22410_v34  ;;  %v22415_v4 = vadd.f32 %v24530_v27, %v24508_v12 }
 0x432   : > { %v23023_v38 = vpop.eup %23022  ;;  %23040 = vrcp.f32 %v3406_v19  ;;  %v24538_v7 = vmul.f32 %v23021_v46, %v22411_v6 }
 0x433   : > { %v3405_v18 = vadd.f32 1.0, %v23023_v38 }
 0x434   : > { %v23025_v47 = vpop.eup %23024  ;;  %v24546_v20 = vpack.c.bf16 %v24536_v43, %v24538_v7 }
 0x435   : > { %v23027_v16 = vpop.eup %23026  ;;  %v3408_v22 = vadd.f32 1.0, %v23025_v47  ;;  %23042 = vrcp.f32 %v3405_v18 }
 0x436   : > { %v23029_v26 = vpop.eup %23028  ;;  %v24548_v23 = vmul.f32 %v23027_v16, %v22412_v17  ;;  %21733 = vmatprep.subr.bf16.mxu0 %v24546_v20  ;;  %v22416_v17 = vadd.f32 %v24511_v40, %v24530_v27  ;;  %v22418_v40 = vadd.f32 %v24517_v24, %v24530_v27  ;;  %v22420_v24 = vadd.f32 %v24523_v10, %v24530_v27 }
 0x437   : > { %v23031_v29 = vpop.eup %23030  ;;  %23044 = vrcp.f32 %v3408_v22  ;;  %v24551_v31 = vmul.f32 %v23029_v26, %v22413_v21  ;;  %21735 = vmatpush3.bf16.msra.mxu0 %v24546_v20  ;;  %v22417_v22 = vadd.f32 %v24530_v27, %v24514_v41 }
 0x438   : > { %v23033_v25 = vpop.eup %23032  ;;  %v3407_v28 = vadd.f32 1.0, %v23031_v29 }
 0x439   : > { %v23035_v34 = vpop.eup %23034  ;;  %v3410_v6 = vadd.f32 1.0, %v23033_v25  ;;  %v24560_v19 = vpack.c.bf16 %v24548_v23, %v24551_v31 }
 0x43a   : > { %v23037_v46 = vpop.eup %23036  ;;  %23046 = vrcp.f32 %v3407_v28  ;;  %v24562_v38 = vmul.f32 %v23035_v34, %v22414_v32  ;;  %v22419_v28 = vadd.f32 %v24530_v27, %v24520_v30  ;;  %v22421_v30 = vadd.f32 %v24530_v27, %v24526_v60 }
 0x43b   : > { %v23039_v47 = vpop.eup %23038  ;;  %23048 = vrcp.f32 %v3410_v6  ;;  %21737 = vmatprep.subr.bf16.mxu0 %v24560_v19  ;;  %v24565_v33 = vmul.f32 %v23037_v46, %v22415_v4 }
 0x43c   : > { %v3409_v18 = vadd.f32 1.0, %v23039_v47  ;;  %21739 = vmatpush3.bf16.msra.mxu0 %v24560_v19  ;;  %v23041_v12 = vpop.eup %23040 }
 0x43d   : > { %v24572_v16 = vpack.c.bf16 %v24562_v38, %v24565_v33  ;;  %v24574_v21 = vmul.f32 %v23041_v12, %v22416_v17  ;;  %v16968_v17 = vld [vmem:[%s23918_s12 + $0x150] sm:$0xff] }
 0x43e   : > { %23050 = vrcp.f32 %v3409_v18  ;;  %v16969_v18 = vld [vmem:[%s23918_s12 + $0x158] sm:$0xff] }
 0x43f   : > { %21741 = vmatprep.subr.bf16.mxu0 %v24572_v16  ;;  %v23043_v26 = vpop.eup %23042  ;;  %v21760_v27 = vpack.c.bf16 %v16969_v18, %v16968_v17  ;;  %v16940_v17 = vld [vmem:[%s23883_s3 + $0x178] sm:$0xff]  ;;  %v16983_v18 = vld [vmem:[%s23913_s6 + $0x160] sm:$0xff] }
 0x440   : > { %21743 = vmatpush3.bf16.msra.mxu0 %v24572_v16  ;;  %v24582_v25 = vmul.f32 %v23043_v26, %v22417_v22  ;;  %v16930_v22 = vld [vmem:[%s23883_s3 + $0x128] sm:$0xff]  ;;  %v16931_v26 = vld [vmem:[%s23883_s3 + $0x130] sm:$0xff] }
 0x441   : > { %v23045_v29 = vpop.eup %23044 }
 0x442   : > { %v24584_v32 = vmul.f32 %v23045_v29, %v22418_v40  ;;  %v24590_v41 = vpack.c.bf16 %v24574_v21, %v24582_v25  ;;  %v16932_v40 = vld [vmem:[%s23883_s3 + $0x138] sm:$0xff]  ;;  %v16933_v29 = vld [vmem:[%s23883_s3 + $0x140] sm:$0xff] }
 0x444   : > { %v23047_v34 = vpop.eup %23046  ;;  %21745 = vmatprep.subr.bf16.mxu0 %v24590_v41 }
 0x445   : > { %v23049_v4 = vpop.eup %23048  ;;  %v24595_v6 = vmul.f32 %v23047_v34, %v22419_v28  ;;  %21747 = vmatpush3.bf16.msra.mxu0 %v24590_v41  ;;  %v16934_v28 = vld [vmem:[%s23883_s3 + $0x148] sm:$0xff]  ;;  %v16935_v34 = vld [vmem:[%s23883_s3 + $0x150] sm:$0xff] }
 0x446   : > { %v24598_v46 = vmul.f32 %v23049_v4, %v22420_v24  ;;  %v16936_v24 = vld [vmem:[%s23883_s3 + $0x158] sm:$0xff]  ;;  %v16937_v4 = vld [vmem:[%s23883_s3 + $0x160] sm:$0xff] }
 0x447   : > { %v24604_v47 = vpack.c.bf16 %v24584_v32, %v24595_v6 }
 0x448   : > { %v23051_v10 = vpop.eup %23050 }
 0x449   : > { %21749 = vmatprep.subr.bf16.mxu0 %v24604_v47  ;;  %v24609_v12 = vmul.f32 %v23051_v10, %v22421_v30  ;;  %v16938_v30 = vld [vmem:[%s23883_s3 + $0x168] sm:$0xff]  ;;  %v16939_v10 = vld [vmem:[%s23883_s3 + $0x170] sm:$0xff] }
 0x44a   : > { %21751 = vmatpush3.bf16.msra.mxu0 %v24604_v47 }
 0x44b   : > { %v24614_v60 = vpack.c.bf16 %v24598_v46, %v24609_v12 }
 0x44d   : > { %21753 = vmatprep.subr.bf16.mxu0 %v24614_v60 }
 0x44e   : > { %21755 = vmatpush3.bf16.msra.mxu0 %v24614_v60 }
 0x44f   : > { %21761 = vmatprep.subr.bf16.mxu0 %v21760_v27 }
 0x451   : > { %19733 = vmatmul.mubr.msk.f32.vlgmr.msra.gmra.mrb[50].mxu0 %vm2066_vm3, %v16930_v22 }
 0x452   : > { %19735 = vmatprep.mubr.msk.f32.mxu0 %vm2066_vm3, %v16931_v26  ;;  %21763 = vmatpush3.bf16.msra.mxu0 %v21760_v27  ;;  %v16984_v27 = vld [vmem:[%s23913_s6 + $0x168] sm:$0xff]  ;;  %v16997_v26 = vld [vmem:[%s23918_s12 + $0x160] sm:$0xff] }
 0x453   : > { %v21764_v22 = vpack.c.bf16 %v16984_v27, %v16983_v18 }
 0x455   : > { %19736 = vmatmul.mubr.msk.f32.gmra.mrb[52].mxu0 %vm2066_vm3, %v16932_v40  ;;  %21765 = vmatprep.subr.bf16.mxu1 %v21764_v22  ;;  %v16998_v40 = vld [vmem:[%s23918_s12 + $0x168] sm:$0xff] }
 0x456   : > { %19738 = vmatprep.mubr.msk.f32.mxu0 %vm2066_vm3, %v16933_v29  ;;  %v21768_v29 = vpack.c.bf16 %v16998_v40, %v16997_v26 }
 0x458   : > { %21769 = vmatprep.subr.bf16.mxu0 %v21768_v29 }
 0x459   : > { %19739 = vmatmul.mubr.msk.f32.gmra.mrb[54].mxu0 %vm2066_vm3, %v16934_v28  ;;  %v17049_v28 = vld [vmem:[%s23918_s12 + $0x170] sm:$0xff] }
 0x45a   : > { %19741 = vmatprep.mubr.msk.f32.mxu0 %vm2066_vm3, %v16935_v34  ;;  %v17050_v34 = vld [vmem:[%s23918_s12 + $0x178] sm:$0xff] }
 0x45b   : > { %v21800_v3 = vpack.c.bf16 %v17050_v34, %v17049_v28  ;;  %v24673_v34 = vadd.f32 %v24284_v49, %v24289_v51 }
 0x45d   : > { %19742 = vmatmul.mubr.msk.f32.gmra.mrb[56].mxu0 %vm2066_vm3, %v16936_v24 }
 0x45e   : > { %19744 = vmatprep.mubr.msk.f32.mxu0 %vm2066_vm3, %v16937_v4 }
 0x461   : > { %19745 = vmatmul.mubr.msk.f32.gmra.mrb[58].mxu0 %vm2066_vm3, %v16938_v30 }
 0x462   : > { %19747 = vmatprep.mubr.msk.f32.mxu0 %vm2066_vm3, %v16939_v10 }
 0x465   : > { %19748 = vmatmul.mubr.msk.f32.gmra.mrb[60].mxu0 %vm2066_vm3, %v16940_v17 }
 0x524   : > { %v19734_v24 = vpop.f32.mrb[50].mxu0 }
 0x525   : > { %v3566_v4 = vpop.f32.mrb[51].mxu0 }
 0x526   : > { %19754 = vmatprep.mubr.msk.f32.mxu1 %vm28094_vm4, %v3566_v4  ;;  %19776 = vmatprep.mubr.msk.f32.mxu0 %vm28094_vm4, %v3566_v4 }
 0x527   : > { %19755 = vmatmul.mubr.msk.f32.vlgmr.msra.gmra.mrb[46].mxu1 %vm28094_vm4, %v19734_v24  ;;  %19777 = vmatmul.mubr.msk.f32.vlgmr.msra.gmra.mrb[62].mxu0 %vm28094_vm4, %v19734_v24  ;;  %v24677_v24 = vadd.f32 %v24289_v51, %v24286_v50  ;;  %v17036_v50 = vld [vmem:[%s23913_s6 + $0x178] sm:$0xff]  ;;  %v17011_v51 = vld [vmem:[%s23883_s3 + $0x1e0] sm:$0xff] }
 0x528   : > { %21767 = vmatpush3.bf16.msra.mxu1 %v21764_v22  ;;  %v19737_v30 = vpop.f32.mrb[52].mxu0  ;;  %21771 = vmatpush3.bf16.msra.mxu0 %v21768_v29 }
 0x529   : > { %21773 = vmatprep.subr.bf16.mxu1 %v24546_v20  ;;  %v3576_v10 = vpop.f32.mrb[53].mxu0  ;;  %21801 = vmatprep.subr.bf16.mxu0 %v21800_v3  ;;  %v24690_v49 = vpack.c.bf16 %v24673_v34, %v24677_v24 }
 0x52a   : > { %19757 = vmatprep.mubr.msk.f32.mxu1 %vm28094_vm4, %v3576_v10  ;;  %19779 = vmatprep.mubr.msk.f32.mxu0 %vm28094_vm4, %v3576_v10  ;;  %v24795_v10 = vpack.c.bf16 %v24304_v5, %v24307_v9 }
 0x52b   : > { %19758 = vmatmul.mubr.msk.f32.gmra.mrb[48].mxu1 %vm28094_vm4, %v19737_v30  ;;  %19780 = vmatmul.mubr.msk.f32.gmra.mrb[64].mxu0 %vm28094_vm4, %v19737_v30 }
 0x52c   : > { %v19740_v17 = vpop.f32.mrb[54].mxu0 }
 0x52d   : > { %v3586_v18 = vpop.f32.mrb[55].mxu0 }
 0x52e   : > { %19760 = vmatprep.mubr.msk.f32.mxu1 %vm28094_vm4, %v3586_v18  ;;  %19782 = vmatprep.mubr.msk.f32.mxu0 %vm28094_vm4, %v3586_v18 }
 0x52f   : > { %19761 = vmatmul.mubr.msk.f32.gmra.mrb[50].mxu1 %vm28094_vm4, %v19740_v17  ;;  %19783 = vmatmul.mubr.msk.f32.gmra.mrb[66].mxu0 %vm28094_vm4, %v19740_v17 }
 0x530   : > { %v19743_v27 = vpop.f32.mrb[56].mxu0 }
 0x531   : > { %v3596_v22 = vpop.f32.mrb[57].mxu0 }
 0x532   : > { %19763 = vmatprep.mubr.msk.f32.mxu1 %vm28094_vm4, %v3596_v22  ;;  %19785 = vmatprep.mubr.msk.f32.mxu0 %vm28094_vm4, %v3596_v22 }
 0x533   : > { %19764 = vmatmul.mubr.msk.f32.gmra.mrb[52].mxu1 %vm28094_vm4, %v19743_v27  ;;  %19786 = vmatmul.mubr.msk.f32.gmra.mrb[68].mxu0 %vm28094_vm4, %v19743_v27  ;;  %v24805_v27 = vpack.c.bf16 %v24310_v13, %v24313_v15 }
 0x534   : > { %v19746_v26 = vpop.f32.mrb[58].mxu0 }
 0x535   : > { %v3606_v40 = vpop.f32.mrb[59].mxu0 }
 0x536   : > { %19766 = vmatprep.mubr.msk.f32.mxu1 %vm28094_vm4, %v3606_v40  ;;  %19788 = vmatprep.mubr.msk.f32.mxu0 %vm28094_vm4, %v3606_v40  ;;  %v24815_v40 = vpack.c.bf16 %v24316_v35, %v24319_v37 }
 0x537   : > { %19767 = vmatmul.mubr.msk.f32.gmra.mrb[54].mxu1 %vm28094_vm4, %v19746_v26  ;;  %19789 = vmatmul.mubr.msk.f32.gmra.mrb[70].mxu0 %vm28094_vm4, %v19746_v26 }
 0x538   : > { %v19749_v29 = vpop.f32.mrb[60].mxu0 }
 0x539   : > { %v3616_v28 = vpop.f32.mrb[61].mxu0 }
 0x53a   : > { %19769 = vmatprep.mubr.msk.f32.mxu1 %vm28094_vm4, %v3616_v28  ;;  %19791 = vmatprep.mubr.msk.f32.mxu0 %vm28094_vm4, %v3616_v28 }
 0x53b   : > { %19770 = vmatmul.mubr.msk.f32.gmra.mrb[56].mxu1 %vm28094_vm4, %v19749_v29  ;;  %19792 = vmatmul.mubr.msk.f32.gmra.mrb[72].mxu0 %vm28094_vm4, %v19749_v29 }
 0x53c   : > { %19798 = vmatprep.mubr.msk.f32.mxu1 %vm28094_vm4, %v24538_v7  ;;  %19820 = vmatprep.mubr.msk.f32.mxu0 %vm28094_vm4, %v24538_v7  ;;  %v17012_v7 = vld [vmem:[%s23883_s3 + $0x1e8] sm:$0xff] }
 0x53f   : > { %19799 = vmatmul.mubr.msk.f32.vlgmr.msra.gmra.mrb[46].mxu1 %vm28094_vm4, %v24536_v43  ;;  %19821 = vmatmul.mubr.msk.f32.vlgmr.msra.gmra.mrb[62].mxu0 %vm28094_vm4, %v24536_v43 }
 0x540   : > { %21775 = vmatpush3.bf16.msra.mxu1 %v24546_v20  ;;  %21803 = vmatpush3.bf16.msra.mxu0 %v21800_v3  ;;  %v17035_v3 = vld [vmem:[%s23913_s6 + $0x170] sm:$0xff] }
 0x541   : > { %19801 = vmatprep.mubr.msk.f32.mxu1 %vm28094_vm4, %v24551_v31  ;;  %19823 = vmatprep.mubr.msk.f32.mxu0 %vm28094_vm4, %v24551_v31  ;;  %v21796_v43 = vpack.c.bf16 %v17036_v50, %v17035_v3  ;;  %v17013_v20 = vld [vmem:[%s23883_s3 + $0x1f0] sm:$0xff]  ;;  %v17015_v31 = vld [vmem:[%s23883_s3 + $0x200] sm:$0xff]  ;;  %v23629_v50 = vld [vmem:[%s23883_s3 + $0x8] sm:$0xff] }
 0x542   : > { %21777 = vmatprep.subr.bf16.mxu1 %v24560_v19  ;;  %21805 = vmatprep.subr.bf16.mxu0 %v24690_v49  ;;  %v23628_v3 = vld [vmem:[%s23883_s3] sm:$0xff] }
 0x543   : > { %19802 = vmatmul.mubr.msk.f32.gmra.mrb[48].mxu1 %vm28094_vm4, %v24548_v23  ;;  %19824 = vmatmul.mubr.msk.f32.gmra.mrb[64].mxu0 %vm28094_vm4, %v24548_v23  ;;  %v17014_v23 = vld [vmem:[%s23883_s3 + $0x1f8] sm:$0xff] }
 0x544   : > { %21779 = vmatpush3.bf16.msra.mxu1 %v24560_v19  ;;  %19804 = vmatprep.mubr.msk.f32.mxu1 %vm28094_vm4, %v24565_v33  ;;  %v17016_v19 = vld [vmem:[%s23883_s3 + $0x208] sm:$0xff] }
 0x545   : > { %19826 = vmatprep.mubr.msk.f32.mxu0 %vm28094_vm4, %v24565_v33  ;;  %21781 = vmatprep.subr.bf16.mxu1 %v24572_v16  ;;  %v17018_v33 = vld [vmem:[%s23883_s3 + $0x218] sm:$0xff] }
 0x547   : > { %19805 = vmatmul.mubr.msk.f32.gmra.mrb[50].mxu1 %vm28094_vm4, %v24562_v38  ;;  %19827 = vmatmul.mubr.msk.f32.gmra.mrb[66].mxu0 %vm28094_vm4, %v24562_v38  ;;  %v17017_v38 = vld [vmem:[%s23883_s3 + $0x210] sm:$0xff] }
 0x548   : > { %21783 = vmatpush3.bf16.msra.mxu1 %v24572_v16  ;;  %19807 = vmatprep.mubr.msk.f32.mxu1 %vm28094_vm4, %v24582_v25  ;;  %v17019_v16 = vld [vmem:[%s23883_s3 + $0x220] sm:$0xff] }
 0x549   : > { %19829 = vmatprep.mubr.msk.f32.mxu0 %vm28094_vm4, %v24582_v25  ;;  %21785 = vmatprep.subr.bf16.mxu1 %v24590_v41  ;;  %v17021_v25 = vld [vmem:[%s23883_s3 + $0x230] sm:$0xff] }
 0x54b   : > { %19808 = vmatmul.mubr.msk.f32.gmra.mrb[52].mxu1 %vm28094_vm4, %v24574_v21  ;;  %19830 = vmatmul.mubr.msk.f32.gmra.mrb[68].mxu0 %vm28094_vm4, %v24574_v21  ;;  %v17020_v21 = vld [vmem:[%s23883_s3 + $0x228] sm:$0xff] }
 0x54c   : > { %21787 = vmatpush3.bf16.msra.mxu1 %v24590_v41  ;;  %19810 = vmatprep.mubr.msk.f32.mxu1 %vm28094_vm4, %v24595_v6 }
 0x54d   : > { %19832 = vmatprep.mubr.msk.f32.mxu0 %vm28094_vm4, %v24595_v6  ;;  %21789 = vmatprep.subr.bf16.mxu1 %v24604_v47 }
 0x54f   : > { %19811 = vmatmul.mubr.msk.f32.gmra.mrb[54].mxu1 %vm28094_vm4, %v24584_v32  ;;  %19833 = vmatmul.mubr.msk.f32.gmra.mrb[70].mxu0 %vm28094_vm4, %v24584_v32  ;;  %v17022_v32 = vld [vmem:[%s23883_s3 + $0x238] sm:$0xff] }
 0x550   : > { %21791 = vmatpush3.bf16.msra.mxu1 %v24604_v47  ;;  %19813 = vmatprep.mubr.msk.f32.mxu1 %vm28094_vm4, %v24609_v12 }
 0x551   : > { %19835 = vmatprep.mubr.msk.f32.mxu0 %vm28094_vm4, %v24609_v12  ;;  %21793 = vmatprep.subr.bf16.mxu1 %v24614_v60 }
 0x553   : > { %19814 = vmatmul.mubr.msk.f32.gmra.mrb[56].mxu1 %vm28094_vm4, %v24598_v46  ;;  %19836 = vmatmul.mubr.msk.f32.gmra.mrb[72].mxu0 %vm28094_vm4, %v24598_v46  ;;  %v24775_v46 = vpack.c.bf16 %v24292_v55, %v24295_v59 }
 0x554   : > { %21795 = vmatpush3.bf16.msra.mxu1 %v24614_v60  ;;  %19862 = vmatprep.mubr.msk.f32.mxu1 %vm2066_vm3, %v17011_v51  ;;  %v24785_v60 = vpack.c.bf16 %v24298_v61, %v24301_v1  ;;  %v23630_v51 = vld [vmem:[%s23883_s3 + $0x10] sm:$0xff] }
 0x555   : > { %21797 = vmatprep.subr.bf16.mxu1 %v21796_v43 }
 0x557   : > { %19863 = vmatmul.mubr.msk.f32.vlgmr.msra.gmra.mrb[58].mxu1 %vm2066_vm3, %v17012_v7  ;;  %v23632_v7 = vld [vmem:[%s23883_s3 + $0x20] sm:$0xff] }
 0x558   : > { %19865 = vmatprep.mubr.msk.f32.mxu1 %vm2066_vm3, %v17013_v20  ;;  %21799 = vmatpush3.bf16.msra.mxu1 %v21796_v43  ;;  %v23631_v43 = vld [vmem:[%s23883_s3 + $0x18] sm:$0xff]  ;;  %v23633_v20 = vld [vmem:[%s23883_s3 + $0x28] sm:$0xff] }
 0x55b   : > { %19866 = vmatmul.mubr.msk.f32.gmra.mrb[60].mxu1 %vm2066_vm3, %v17014_v23  ;;  %v23634_v23 = vld [vmem:[%s23883_s3 + $0x30] sm:$0xff] }
 0x55c   : > { %19868 = vmatprep.mubr.msk.f32.mxu1 %vm2066_vm3, %v17015_v31  ;;  %v23635_v31 = vld [vmem:[%s23883_s3 + $0x38] sm:$0xff] }
 0x55f   : > { %19869 = vmatmul.mubr.msk.f32.gmra.mrb[62].mxu1 %vm2066_vm3, %v17016_v19  ;;  %v23636_v19 = vld [vmem:[%s23883_s3 + $0x40] sm:$0xff] }
 0x560   : > { %19871 = vmatprep.mubr.msk.f32.mxu1 %vm2066_vm3, %v17017_v38  ;;  %v23637_v38 = vld [vmem:[%s23883_s3 + $0x48] sm:$0xff] }
 0x563   : > { %19872 = vmatmul.mubr.msk.f32.gmra.mrb[64].mxu1 %vm2066_vm3, %v17018_v33  ;;  %v23638_v33 = vld [vmem:[%s23883_s3 + $0x50] sm:$0xff] }
 0x564   : > { %19874 = vmatprep.mubr.msk.f32.mxu1 %vm2066_vm3, %v17019_v16  ;;  %v23639_v16 = vld [vmem:[%s23883_s3 + $0x58] sm:$0xff] }
 0x567   : > { %19875 = vmatmul.mubr.msk.f32.gmra.mrb[66].mxu1 %vm2066_vm3, %v17020_v21  ;;  %v17089_v21 = vld [vmem:[%s23913_s6 + $0x180] sm:$0xff] }
 0x568   : > { %19877 = vmatprep.mubr.msk.f32.mxu1 %vm2066_vm3, %v17021_v25  ;;  %v17090_v25 = vld [vmem:[%s23913_s6 + $0x188] sm:$0xff] }
 0x56b   : > { %19878 = vmatmul.mubr.msk.f32.gmra.mrb[68].mxu1 %vm2066_vm3, %v17022_v32  ;;  %v21828_v32 = vpack.c.bf16 %v17090_v25, %v17089_v21 }
 0x56d   : > { %21829 = vmatprep.subr.bf16.mxu1 %v21828_v32 }
 0x62a   : > { %v19864_v41 = vpop.f32.mrb[58].mxu1 }
 0x62b   : > { %v4384_v6 = vpop.f32.mrb[59].mxu1 }
 0x62c   : > { %19884 = vmatprep.mubr.msk.f32.mxu1 %vm28094_vm4, %v4384_v6  ;;  %19906 = vmatprep.mubr.msk.f32.mxu0 %vm28094_vm4, %v4384_v6  ;;  %v17105_v6 = vld [vmem:[%s23918_s12 + $0x188] sm:$0xff] }
 0x62d   : > { %19885 = vmatmul.mubr.msk.f32.vlgmr.msra.gmra.mrb[46].mxu1 %vm28094_vm4, %v19864_v41  ;;  %19907 = vmatmul.mubr.msk.f32.vlgmr.msra.gmra.mrb[62].mxu0 %vm28094_vm4, %v19864_v41  ;;  %v17104_v41 = vld [vmem:[%s23918_s12 + $0x180] sm:$0xff] }
 0x62e   : > { %21807 = vmatpush3.bf16.msra.mxu0 %v24690_v49  ;;  %v19867_v47 = vpop.f32.mrb[60].mxu1  ;;  %21831 = vmatpush3.bf16.msra.mxu1 %v21828_v32 }
 0x62f   : > { %21809 = vmatprep.subr.bf16.mxu0 %v24775_v46  ;;  %v4394_v12 = vpop.f32.mrb[61].mxu1 }
 0x630   : > { %19887 = vmatprep.mubr.msk.f32.mxu1 %vm28094_vm4, %v4394_v12  ;;  %19909 = vmatprep.mubr.msk.f32.mxu0 %vm28094_vm4, %v4394_v12  ;;  %v17119_v12 = vld [vmem:[%s23913_s6 + $0x190] sm:$0xff] }
 0x631   : > { %19888 = vmatmul.mubr.msk.f32.gmra.mrb[48].mxu1 %vm28094_vm4, %v19867_v47  ;;  %19910 = vmatmul.mubr.msk.f32.gmra.mrb[64].mxu0 %vm28094_vm4, %v19867_v47  ;;  %v21832_v47 = vpack.c.bf16 %v17105_v6, %v17104_v41 }
 0x632   : > { %21811 = vmatpush3.bf16.msra.mxu0 %v24775_v46  ;;  %v19870_v4 = vpop.f32.mrb[62].mxu1 }
 0x633   : > { %21813 = vmatprep.subr.bf16.mxu0 %v24785_v60  ;;  %v4404_v30 = vpop.f32.mrb[63].mxu1 }
 0x634   : > { %19890 = vmatprep.mubr.msk.f32.mxu1 %vm28094_vm4, %v4404_v30  ;;  %19912 = vmatprep.mubr.msk.f32.mxu0 %vm28094_vm4, %v4404_v30 }
 0x635   : > { %19891 = vmatmul.mubr.msk.f32.gmra.mrb[50].mxu1 %vm28094_vm4, %v19870_v4  ;;  %19913 = vmatmul.mubr.msk.f32.gmra.mrb[66].mxu0 %vm28094_vm4, %v19870_v4  ;;  %v17120_v4 = vld [vmem:[%s23913_s6 + $0x198] sm:$0xff] }
 0x636   : > { %21815 = vmatpush3.bf16.msra.mxu0 %v24785_v60  ;;  %v19873_v17 = vpop.f32.mrb[64].mxu1  ;;  %v24854_v30 = vpack.c.bf16 %v17120_v4, %v17119_v12 }
 0x637   : > { %21817 = vmatprep.subr.bf16.mxu0 %v24795_v10  ;;  %v4414_v18 = vpop.f32.mrb[65].mxu1 }
 0x638   : > { %19893 = vmatprep.mubr.msk.f32.mxu1 %vm28094_vm4, %v4414_v18  ;;  %19915 = vmatprep.mubr.msk.f32.mxu0 %vm28094_vm4, %v4414_v18  ;;  %v17134_v18 = vld [vmem:[%s23918_s12 + $0x198] sm:$0xff] }
 0x639   : > { %19894 = vmatmul.mubr.msk.f32.gmra.mrb[52].mxu1 %vm28094_vm4, %v19873_v17  ;;  %19916 = vmatmul.mubr.msk.f32.gmra.mrb[68].mxu0 %vm28094_vm4, %v19873_v17  ;;  %v17133_v17 = vld [vmem:[%s23918_s12 + $0x190] sm:$0xff] }
 0x63a   : > { %21819 = vmatpush3.bf16.msra.mxu0 %v24795_v10  ;;  %v19876_v22 = vpop.f32.mrb[66].mxu1  ;;  %21837 = vmatprep.subr.bf16.mxu1 %v24854_v30 }
 0x63b   : > { %21821 = vmatprep.subr.bf16.mxu0 %v24805_v27  ;;  %v4424_v26 = vpop.f32.mrb[67].mxu1 }
 0x63c   : > { %19896 = vmatprep.mubr.msk.f32.mxu1 %vm28094_vm4, %v4424_v26  ;;  %19918 = vmatprep.mubr.msk.f32.mxu0 %vm28094_vm4, %v4424_v26  ;;  %v24863_v26 = vld [vmem:[%s23928_s27 + $0x7] ss:$0 sm:$0xff] }
 0x63d   : > { %19897 = vmatmul.mubr.msk.f32.gmra.mrb[54].mxu1 %vm28094_vm4, %v19876_v22  ;;  %19919 = vmatmul.mubr.msk.f32.gmra.mrb[70].mxu0 %vm28094_vm4, %v19876_v22  ;;  %v24859_v22 = vpack.c.bf16 %v17134_v18, %v17133_v17 }
 0x63e   : > { %21823 = vmatpush3.bf16.msra.mxu0 %v24805_v27  ;;  %v19879_v29 = vpop.f32.mrb[68].mxu1 }
 0x63f   : > { %21825 = vmatprep.subr.bf16.mxu0 %v24815_v40  ;;  %v4434_v28 = vpop.f32.mrb[69].mxu1 }
 0x640   : > { %19899 = vmatprep.mubr.msk.f32.mxu1 %vm28094_vm4, %v4434_v28  ;;  %19921 = vmatprep.mubr.msk.f32.mxu0 %vm28094_vm4, %v4434_v28 }
 0x641   : > { %19900 = vmatmul.mubr.msk.f32.gmra.mrb[56].mxu1 %vm28094_vm4, %v19879_v29  ;;  %19922 = vmatmul.mubr.msk.f32.gmra.mrb[72].mxu0 %vm28094_vm4, %v19879_v29 }
 0x642   : > { %21827 = vmatpush3.bf16.msra.mxu0 %v24815_v40  ;;  %19948 = vmatprep.mubr.msk.f32.mxu0 %vm2066_vm3, %v23628_v3 }
 0x643   : > { %21833 = vmatprep.subr.bf16.mxu0 %v21832_v47 }
 0x645   : > { %19949 = vmatmul.mubr.msk.f32.vlgmr.msra.gmra.mrb[74].mxu0 %vm2066_vm3, %v23629_v50 }
 0x646   : > { %19951 = vmatprep.mubr.msk.f32.mxu0 %vm2066_vm3, %v23630_v51  ;;  %21835 = vmatpush3.bf16.msra.mxu0 %v21832_v47 }
 0x647   : > { %21841 = vmatprep.subr.bf16.mxu0 %v24859_v22 }
 0x649   : > { %19952 = vmatmul.mubr.msk.f32.gmra.mrb[76].mxu0 %vm2066_vm3, %v23631_v43 }
 0x64a   : > { %19954 = vmatprep.mubr.msk.f32.mxu0 %vm2066_vm3, %v23632_v7 }
 0x64d   : > { %19955 = vmatmul.mubr.msk.f32.gmra.mrb[78].mxu0 %vm2066_vm3, %v23633_v20 }
 0x64e   : > { %19957 = vmatprep.mubr.msk.f32.mxu0 %vm2066_vm3, %v23634_v23 }
 0x651   : > { %19958 = vmatmul.mubr.msk.f32.gmra.mrb[80].mxu0 %vm2066_vm3, %v23635_v31 }
 0x652   : > { %19960 = vmatprep.mubr.msk.f32.mxu0 %vm2066_vm3, %v23636_v19 }
 0x655   : > { %19961 = vmatmul.mubr.msk.f32.gmra.mrb[82].mxu0 %vm2066_vm3, %v23637_v38 }
 0x656   : > { %19963 = vmatprep.mubr.msk.f32.mxu0 %vm2066_vm3, %v23638_v33 }
 0x659   : > { %19964 = vmatmul.mubr.msk.f32.gmra.mrb[84].mxu0 %vm2066_vm3, %v23639_v16 }
 0x700   : > { %v24865_v29 = vpop.f32.mrb[46].mxu1  ;;  %v19908_v28 = vpop.f32.mrb[62].mxu0 }
 0x701   : > { %v22446_v3 = vadd.f32 %v19908_v28, %v24863_v26  ;;  %v24868_v50 = vpop.f32.mrb[47].mxu1  ;;  %v4688_v51 = vpop.f32.mrb[63].mxu0 }
 0x702   : > { %v22447_v43 = vadd.f32 %v24863_v26, %v4688_v51 }
 0x703   : > { %v17064_v7 = vmul.f32 -1.442695, %v22446_v3 }
 0x704   : > { %v17063_v20 = vmul.f32 -1.442695, %v22447_v43  ;;  %v24871_v23 = vpop.f32.mrb[48].mxu1  ;;  %v19911_v31 = vpop.f32.mrb[64].mxu0 }
 0x705   : > { %23052 = vpow2.f32 %v17064_v7  ;;  %v22448_v19 = vadd.f32 %v19911_v31, %v24863_v26  ;;  %v24874_v38 = vpop.f32.mrb[49].mxu1  ;;  %v4698_v33 = vpop.f32.mrb[65].mxu0 }
 0x706   : > { %23054 = vpow2.f32 %v17063_v20  ;;  %v22449_v16 = vadd.f32 %v24863_v26, %v4698_v33 }
 0x707   : > { %v17066_v21 = vmul.f32 -1.442695, %v22448_v19 }
 0x708   : > { %v17065_v25 = vmul.f32 -1.442695, %v22449_v16  ;;  %v24877_v32 = vpop.f32.mrb[50].mxu1  ;;  %v19914_v41 = vpop.f32.mrb[66].mxu0 }
 0x709   : > { %23056 = vpow2.f32 %v17066_v21  ;;  %v22450_v6 = vadd.f32 %v19914_v41, %v24863_v26  ;;  %v24880_v47 = vpop.f32.mrb[51].mxu1  ;;  %v4708_v12 = vpop.f32.mrb[67].mxu0 }
 0x70a   : > { %23058 = vpow2.f32 %v17065_v25  ;;  %v22451_v4 = vadd.f32 %v24863_v26, %v4708_v12 }
 0x70b   : > { %v17068_v17 = vmul.f32 -1.442695, %v22450_v6 }
 0x70c   : > { %v17067_v18 = vmul.f32 -1.442695, %v22451_v4  ;;  %v24883_v28 = vpop.f32.mrb[52].mxu1  ;;  %v19917_v3 = vpop.f32.mrb[68].mxu0 }
 0x70d   : > { %23060 = vpow2.f32 %v17068_v17  ;;  %v22452_v51 = vadd.f32 %v19917_v3, %v24863_v26  ;;  %v24886_v43 = vpop.f32.mrb[53].mxu1  ;;  %v4718_v7 = vpop.f32.mrb[69].mxu0 }
 0x70e   : > { %23062 = vpow2.f32 %v17067_v18  ;;  %v22453_v20 = vadd.f32 %v24863_v26, %v4718_v7 }
 0x70f   : > { %v23053_v31 = vpop.eup %23052  ;;  %v17070_v19 = vmul.f32 -1.442695, %v22452_v51 }
 0x710   : > { %v23055_v33 = vpop.eup %23054  ;;  %v4796_v16 = vadd.f32 1.0, %v23053_v31  ;;  %v17069_v21 = vmul.f32 -1.442695, %v22453_v20  ;;  %v24889_v25 = vpop.f32.mrb[54].mxu1 }
 0x711   : > { %v19920_v41 = vpop.f32.mrb[70].mxu0  ;;  %v4795_v6 = vadd.f32 1.0, %v23055_v33  ;;  %23064 = vpow2.f32 %v17070_v19  ;;  %v24892_v4 = vpop.f32.mrb[55].mxu1 }
 0x712   : > { %v22454_v12 = vadd.f32 %v19920_v41, %v24863_v26  ;;  %v4728_v17 = vpop.f32.mrb[71].mxu0  ;;  %23066 = vrcp.f32 %v4796_v16 }
 0x713   : > { %v22455_v18 = vadd.f32 %v24863_v26, %v4728_v17  ;;  %v23057_v3 = vpop.eup %23056  ;;  %23068 = vrcp.f32 %v4795_v6 }
 0x714   : > { %v17072_v51 = vmul.f32 -1.442695, %v22454_v12  ;;  %v23059_v7 = vpop.eup %23058  ;;  %v4798_v20 = vadd.f32 1.0, %v23057_v3  ;;  %23070 = vpow2.f32 %v17069_v21  ;;  %v24895_v33 = vpop.f32.mrb[56].mxu1  ;;  %v17174_v12 = vld [vmem:[%s23918_s12 + $0x1a8] sm:$0xff] }
 0x715   : > { %v17071_v31 = vmul.f32 -1.442695, %v22455_v18  ;;  %v19923_v19 = vpop.f32.mrb[72].mxu0  ;;  %v4797_v41 = vadd.f32 1.0, %v23059_v7  ;;  %v24898_v16 = vpop.f32.mrb[57].mxu1  ;;  %v24906_v53 = vpack.c.bf16 %v17174_v12, %v17173_v63 }
 0x716   : > { %23072 = vpow2.f32 %v17072_v51  ;;  %v22456_v2 = vadd.f32 %v19923_v19, %v24863_v26  ;;  %v4738_v17 = vpop.f32.mrb[73].mxu0  ;;  %v24904_v3 = vld [vmem:[%s23923_s20 + $0x7] ss:$0 sm:$0xff] }
 0x717   : > { %23074 = vrcp.f32 %v4798_v20  ;;  %v22457_v6 = vadd.f32 %v24863_v26, %v4738_v17  ;;  %v23061_v62 = vpop.eup %23060  ;;  %v22435_v20 = vadd.f32 %v24904_v3, %v24868_v50  ;;  %v22437_v12 = vadd.f32 %v24904_v3, %v24874_v38 }
 0x718   : > { %23076 = vrcp.f32 %v4797_v41  ;;  %v17074_v21 = vmul.f32 -1.442695, %v22456_v2  ;;  %v23063_v18 = vpop.eup %23062  ;;  %v4800_v57 = vadd.f32 1.0, %v23061_v62  ;;  %v19950_v51 = vpop.f32.mrb[74].mxu0  ;;  %v22434_v2 = vadd.f32 %v24865_v29, %v24904_v3 }
 0x719   : > { %23078 = vpow2.f32 %v17071_v31  ;;  %v17073_v7 = vmul.f32 -1.442695, %v22457_v6  ;;  %v4799_v56 = vadd.f32 1.0, %v23063_v18  ;;  %v4913_v19 = vpop.f32.mrb[75].mxu0 }
 0x71a   : > { %23080 = vpow2.f32 %v17074_v21  ;;  %19970 = vmatprep.mubr.msk.f32.mxu1 %vm28094_vm4, %v4913_v19  ;;  %19992 = vmatprep.mubr.msk.f32.mxu0 %vm28094_vm4, %v4913_v19 }
 0x71b   : > { %23082 = vrcp.f32 %v4800_v57  ;;  %v23065_v26 = vpop.eup %23064  ;;  %19971 = vmatmul.mubr.msk.f32.vlgmr.msra.gmra.mrb[70].mxu1 %vm28094_vm4, %v19950_v51  ;;  %19993 = vmatmul.mubr.msk.f32.vlgmr.msra.gmra.mrb[86].mxu0 %vm28094_vm4, %v19950_v51 }
 0x71c   : > { %23084 = vrcp.f32 %v4799_v56  ;;  %v23067_v62 = vpop.eup %23066  ;;  %v4802_v63 = vadd.f32 1.0, %v23065_v26  ;;  %21839 = vmatpush3.bf16.msra.mxu1 %v24854_v30  ;;  %v19953_v57 = vpop.f32.mrb[76].mxu0  ;;  %21843 = vmatpush3.bf16.msra.mxu0 %v24859_v22  ;;  %v22436_v22 = vadd.f32 %v24871_v23, %v24904_v3 }
 0x71d   : > { %23086 = vpow2.f32 %v17073_v7  ;;  %v23069_v31 = vpop.eup %23068  ;;  %v24918_v41 = vmul.f32 %v23067_v62, %v22434_v2  ;;  %21845 = vmatprep.subr.bf16.mxu1 %v24690_v49  ;;  %v4923_v56 = vpop.f32.mrb[77].mxu0  ;;  %21873 = vmatprep.subr.bf16.mxu0 %v24906_v53  ;;  %v22438_v62 = vadd.f32 %v24877_v32, %v24904_v3 }
 0x71e   : > { %v23071_v29 = vpop.eup %23070  ;;  %23088 = vrcp.f32 %v4802_v63  ;;  %19973 = vmatprep.mubr.msk.f32.mxu1 %vm28094_vm4, %v4923_v56  ;;  %19995 = vmatprep.mubr.msk.f32.mxu0 %vm28094_vm4, %v4923_v56  ;;  %v24924_v50 = vmul.f32 %v23069_v31, %v22435_v20  ;;  %v22439_v63 = vadd.f32 %v24904_v3, %v24880_v47 }
 0x71f   : > { %v4801_v17 = vadd.f32 1.0, %v23071_v29  ;;  %19974 = vmatmul.mubr.msk.f32.gmra.mrb[72].mxu1 %vm28094_vm4, %v19953_v57  ;;  %19996 = vmatmul.mubr.msk.f32.gmra.mrb[88].mxu0 %vm28094_vm4, %v19953_v57 }
 0x720   : > { %v23073_v30 = vpop.eup %23072  ;;  %v19956_v18 = vpop.f32.mrb[78].mxu0 }
 0x721   : > { %v23075_v6 = vpop.eup %23074  ;;  %v4804_v21 = vadd.f32 1.0, %v23073_v30  ;;  %23090 = vrcp.f32 %v4801_v17  ;;  %v4933_v51 = vpop.f32.mrb[79].mxu0  ;;  %v22440_v17 = vadd.f32 %v24883_v28, %v24904_v3  ;;  %v22442_v28 = vadd.f32 %v24889_v25, %v24904_v3 }
 0x722   : > { %v23077_v7 = vpop.eup %23076  ;;  %v24932_v19 = vmul.f32 %v23075_v6, %v22436_v22  ;;  %19976 = vmatprep.mubr.msk.f32.mxu1 %vm28094_vm4, %v4933_v51  ;;  %19998 = vmatprep.mubr.msk.f32.mxu0 %vm28094_vm4, %v4933_v51  ;;  %v22444_v25 = vadd.f32 %v24895_v33, %v24904_v3 }
 0x723   : > { %v23079_v26 = vpop.eup %23078  ;;  %23092 = vrcp.f32 %v4804_v21  ;;  %v24936_v23 = vmul.f32 %v23077_v7, %v22437_v12  ;;  %19977 = vmatmul.mubr.msk.f32.gmra.mrb[74].mxu1 %vm28094_vm4, %v19956_v18  ;;  %19999 = vmatmul.mubr.msk.f32.gmra.mrb[90].mxu0 %vm28094_vm4, %v19956_v18  ;;  %v22441_v7 = vadd.f32 %v24904_v3, %v24886_v43  ;;  %v22443_v43 = vadd.f32 %v24904_v3, %v24892_v4 }
 0x724   : > { %v23081_v2 = vpop.eup %23080  ;;  %v4803_v38 = vadd.f32 1.0, %v23079_v26  ;;  %v19959_v31 = vpop.f32.mrb[80].mxu0 }
 0x725   : > { %v23083_v20 = vpop.eup %23082  ;;  %v4806_v57 = vadd.f32 1.0, %v23081_v2  ;;  %v4943_v29 = vpop.f32.mrb[81].mxu0 }
 0x726   : > { %v23085_v56 = vpop.eup %23084  ;;  %23094 = vrcp.f32 %v4803_v38  ;;  %v24944_v30 = vmul.f32 %v23083_v20, %v22438_v62  ;;  %19979 = vmatprep.mubr.msk.f32.mxu1 %vm28094_vm4, %v4943_v29  ;;  %20001 = vmatprep.mubr.msk.f32.mxu0 %vm28094_vm4, %v4943_v29 }
 0x727   : > { %v23087_v22 = vpop.eup %23086  ;;  %23096 = vrcp.f32 %v4806_v57  ;;  %v24948_v32 = vmul.f32 %v23085_v56, %v22439_v63  ;;  %19980 = vmatmul.mubr.msk.f32.gmra.mrb[76].mxu1 %vm28094_vm4, %v19959_v31  ;;  %20002 = vmatmul.mubr.msk.f32.gmra.mrb[92].mxu0 %vm28094_vm4, %v19959_v31  ;;  %v22445_v56 = vadd.f32 %v24904_v3, %v24898_v16 }
 0x728   : > { %v4805_v6 = vadd.f32 1.0, %v23087_v22  ;;  %v23089_v47 = vpop.eup %23088  ;;  %v19962_v12 = vpop.f32.mrb[82].mxu0 }
 0x729   : > { %v4953_v21 = vpop.f32.mrb[83].mxu0  ;;  %v24954_v18 = vmul.f32 %v23089_v47, %v22440_v17 }
 0x72a   : > { %23098 = vrcp.f32 %v4805_v6  ;;  %19982 = vmatprep.mubr.msk.f32.mxu1 %vm28094_vm4, %v4953_v21  ;;  %20004 = vmatprep.mubr.msk.f32.mxu0 %vm28094_vm4, %v4953_v21 }
 0x72b   : > { %v23091_v51 = vpop.eup %23090  ;;  %19983 = vmatmul.mubr.msk.f32.gmra.mrb[78].mxu1 %vm28094_vm4, %v19962_v12  ;;  %20005 = vmatmul.mubr.msk.f32.gmra.mrb[94].mxu0 %vm28094_vm4, %v19962_v12 }
 0x72c   : > { %v19965_v2 = vpop.f32.mrb[84].mxu0  ;;  %v24964_v62 = vmul.f32 %v23091_v51, %v22441_v7  ;;  %v23652_v7 = vld [vmem:[%s23883_s3 + $0x120] sm:$0xff]  ;;  %v17213_v51 = vld [vmem:[%s23913_s6 + $0x1b0] sm:$0xff] }
 0x72d   : > { %v23093_v26 = vpop.eup %23092  ;;  %v4963_v38 = vpop.f32.mrb[85].mxu0 }
 0x72e   : > { %v24966_v20 = vmul.f32 %v23093_v26, %v22442_v28  ;;  %19985 = vmatprep.mubr.msk.f32.mxu1 %vm28094_vm4, %v4963_v38  ;;  %20007 = vmatprep.mubr.msk.f32.mxu0 %vm28094_vm4, %v4963_v38  ;;  %v17214_v28 = vld [vmem:[%s23913_s6 + $0x1b8] sm:$0xff] }
 0x72f   : > { %19986 = vmatmul.mubr.msk.f32.gmra.mrb[80].mxu1 %vm28094_vm4, %v19965_v2  ;;  %20008 = vmatmul.mubr.msk.f32.gmra.mrb[96].mxu0 %vm28094_vm4, %v19965_v2  ;;  %v21900_v26 = vpack.c.bf16 %v17214_v28, %v17213_v51  ;;  %v25099_v2 = vld [vmem:[%s23928_s27 + $0x8] ss:$0 sm:$0xff] }
 0x730   : > { %v23095_v63 = vpop.eup %23094  ;;  %20014 = vmatprep.mubr.msk.f32.mxu1 %vm28094_vm4, %v24677_v24  ;;  %20036 = vmatprep.mubr.msk.f32.mxu0 %vm28094_vm4, %v24677_v24 }
 0x731   : > { %v23097_v57 = vpop.eup %23096  ;;  %v24980_v4 = vmul.f32 %v23095_v63, %v22443_v43 }
 0x732   : > { %v24982_v31 = vmul.f32 %v23097_v57, %v22444_v25 }
 0x733   : > { %20015 = vmatmul.mubr.msk.f32.vlgmr.msra.gmra.mrb[70].mxu1 %vm28094_vm4, %v24673_v34  ;;  %20037 = vmatmul.mubr.msk.f32.vlgmr.msra.gmra.mrb[86].mxu0 %vm28094_vm4, %v24673_v34  ;;  %v23648_v34 = vld [vmem:[%s23883_s3 + $0x100] sm:$0xff] }
 0x734   : > { %v23099_v29 = vpop.eup %23098  ;;  %21847 = vmatpush3.bf16.msra.mxu1 %v24690_v49  ;;  %20017 = vmatprep.mubr.msk.f32.mxu1 %vm28094_vm4, %v24295_v59  ;;  %v23649_v49 = vld [vmem:[%s23883_s3 + $0x108] sm:$0xff] }
 0x735   : > { %v24993_v24 = vmul.f32 %v23099_v29, %v22445_v56  ;;  %20039 = vmatprep.mubr.msk.f32.mxu0 %vm28094_vm4, %v24295_v59  ;;  %21849 = vmatprep.subr.bf16.mxu1 %v24775_v46 }
 0x736   : > { %21875 = vmatpush3.bf16.msra.mxu0 %v24906_v53  ;;  %v17159_v53 = vld [vmem:[%s23913_s6 + $0x1a0] sm:$0xff] }
 0x737   : > { %20018 = vmatmul.mubr.msk.f32.gmra.mrb[72].mxu1 %vm28094_vm4, %v24292_v55  ;;  %20040 = vmatmul.mubr.msk.f32.gmra.mrb[88].mxu0 %vm28094_vm4, %v24292_v55  ;;  %v17160_v55 = vld [vmem:[%s23913_s6 + $0x1a8] sm:$0xff] }
 0x738   : > { %21851 = vmatpush3.bf16.msra.mxu1 %v24775_v46  ;;  %20020 = vmatprep.mubr.msk.f32.mxu1 %vm28094_vm4, %v24301_v1  ;;  %v21868_v59 = vpack.c.bf16 %v17160_v55, %v17159_v53  ;;  %v23650_v46 = vld [vmem:[%s23883_s3 + $0x110] sm:$0xff] }
 0x739   : > { %20042 = vmatprep.mubr.msk.f32.mxu0 %vm28094_vm4, %v24301_v1  ;;  %21853 = vmatprep.subr.bf16.mxu1 %v24785_v60  ;;  %v23641_v1 = vld [vmem:[%s23883_s3 + $0xc8] sm:$0xff] }
 0x73b   : > { %20021 = vmatmul.mubr.msk.f32.gmra.mrb[74].mxu1 %vm28094_vm4, %v24298_v61  ;;  %20043 = vmatmul.mubr.msk.f32.gmra.mrb[90].mxu0 %vm28094_vm4, %v24298_v61  ;;  %v23640_v61 = vld [vmem:[%s23883_s3 + $0xc0] sm:$0xff] }
 0x73c   : > { %21855 = vmatpush3.bf16.msra.mxu1 %v24785_v60  ;;  %20023 = vmatprep.mubr.msk.f32.mxu1 %vm28094_vm4, %v24307_v9  ;;  %v23651_v60 = vld [vmem:[%s23883_s3 + $0x118] sm:$0xff] }
 0x73d   : > { %20045 = vmatprep.mubr.msk.f32.mxu0 %vm28094_vm4, %v24307_v9  ;;  %21857 = vmatprep.subr.bf16.mxu1 %v24795_v10  ;;  %v23643_v9 = vld [vmem:[%s23883_s3 + $0xd8] sm:$0xff] }
 0x73f   : > { %20024 = vmatmul.mubr.msk.f32.gmra.mrb[76].mxu1 %vm28094_vm4, %v24304_v5  ;;  %20046 = vmatmul.mubr.msk.f32.gmra.mrb[92].mxu0 %vm28094_vm4, %v24304_v5  ;;  %v23642_v5 = vld [vmem:[%s23883_s3 + $0xd0] sm:$0xff] }
 0x740   : > { %21859 = vmatpush3.bf16.msra.mxu1 %v24795_v10  ;;  %20026 = vmatprep.mubr.msk.f32.mxu1 %vm28094_vm4, %v24313_v15 }
 0x741   : > { %20048 = vmatprep.mubr.msk.f32.mxu0 %vm28094_vm4, %v24313_v15  ;;  %21861 = vmatprep.subr.bf16.mxu1 %v24805_v27  ;;  %v23645_v15 = vld [vmem:[%s23883_s3 + $0xe8] sm:$0xff] }
 0x743   : > { %20027 = vmatmul.mubr.msk.f32.gmra.mrb[78].mxu1 %vm28094_vm4, %v24310_v13  ;;  %20049 = vmatmul.mubr.msk.f32.gmra.mrb[94].mxu0 %vm28094_vm4, %v24310_v13  ;;  %v23644_v13 = vld [vmem:[%s23883_s3 + $0xe0] sm:$0xff] }
 0x744   : > { %21863 = vmatpush3.bf16.msra.mxu1 %v24805_v27  ;;  %20029 = vmatprep.mubr.msk.f32.mxu1 %vm28094_vm4, %v24319_v37 }
 0x745   : > { %20051 = vmatprep.mubr.msk.f32.mxu0 %vm28094_vm4, %v24319_v37  ;;  %21865 = vmatprep.subr.bf16.mxu1 %v24815_v40  ;;  %v23647_v37 = vld [vmem:[%s23883_s3 + $0xf8] sm:$0xff] }
 0x747   : > { %20030 = vmatmul.mubr.msk.f32.gmra.mrb[80].mxu1 %vm28094_vm4, %v24316_v35  ;;  %20052 = vmatmul.mubr.msk.f32.gmra.mrb[96].mxu0 %vm28094_vm4, %v24316_v35  ;;  %v23646_v35 = vld [vmem:[%s23883_s3 + $0xf0] sm:$0xff] }
 0x748   : > { %21867 = vmatpush3.bf16.msra.mxu1 %v24815_v40  ;;  %20078 = vmatprep.mubr.msk.f32.mxu1 %vm2066_vm3, %v23640_v61 }
 0x749   : > { %21869 = vmatprep.subr.bf16.mxu1 %v21868_v59 }
 0x74b   : > { %20079 = vmatmul.mubr.msk.f32.vlgmr.msra.gmra.mrb[82].mxu1 %vm2066_vm3, %v23641_v1 }
 0x74c   : > { %20081 = vmatprep.mubr.msk.f32.mxu1 %vm2066_vm3, %v23642_v5  ;;  %21871 = vmatpush3.bf16.msra.mxu1 %v21868_v59 }
 0x74d   : > { %21901 = vmatprep.subr.bf16.mxu1 %v21900_v26 }
 0x74f   : > { %20082 = vmatmul.mubr.msk.f32.gmra.mrb[84].mxu1 %vm2066_vm3, %v23643_v9 }
 0x750   : > { %20084 = vmatprep.mubr.msk.f32.mxu1 %vm2066_vm3, %v23644_v13 }
 0x753   : > { %20085 = vmatmul.mubr.msk.f32.gmra.mrb[86].mxu1 %vm2066_vm3, %v23645_v15 }
 0x754   : > { %20087 = vmatprep.mubr.msk.f32.mxu1 %vm2066_vm3, %v23646_v35 }
 0x757   : > { %20088 = vmatmul.mubr.msk.f32.gmra.mrb[88].mxu1 %vm2066_vm3, %v23647_v37 }
 0x758   : > { %20090 = vmatprep.mubr.msk.f32.mxu1 %vm2066_vm3, %v23648_v34 }
 0x75b   : > { %20091 = vmatmul.mubr.msk.f32.gmra.mrb[90].mxu1 %vm2066_vm3, %v23649_v49 }
 0x75c   : > { %20093 = vmatprep.mubr.msk.f32.mxu1 %vm2066_vm3, %v23650_v46 }
 0x75f   : > { %20094 = vmatmul.mubr.msk.f32.gmra.mrb[92].mxu1 %vm2066_vm3, %v23651_v60 }
 0x81e   : > { %v20080_v10 = vpop.f32.mrb[82].mxu1 }
 0x81f   : > { %v5682_v27 = vpop.f32.mrb[83].mxu1 }
 0x820   : > { %20100 = vmatprep.mubr.msk.f32.mxu1 %vm28094_vm4, %v5682_v27  ;;  %20122 = vmatprep.mubr.msk.f32.mxu0 %vm28094_vm4, %v5682_v27 }
 0x821   : > { %20101 = vmatmul.mubr.msk.f32.vlgmr.msra.gmra.mrb[70].mxu1 %vm28094_vm4, %v20080_v10  ;;  %20123 = vmatmul.mubr.msk.f32.vlgmr.msra.gmra.mrb[86].mxu0 %vm28094_vm4, %v20080_v10 }
 0x822   : > { %v20083_v40 = vpop.f32.mrb[84].mxu1  ;;  %21903 = vmatpush3.bf16.msra.mxu1 %v21900_v26 }
 0x823   : > { %v5692_v33 = vpop.f32.mrb[85].mxu1 }
 0x824   : > { %20103 = vmatprep.mubr.msk.f32.mxu1 %vm28094_vm4, %v5692_v33  ;;  %20125 = vmatprep.mubr.msk.f32.mxu0 %vm28094_vm4, %v5692_v33 }
 0x825   : > { %20104 = vmatmul.mubr.msk.f32.gmra.mrb[72].mxu1 %vm28094_vm4, %v20083_v40  ;;  %20126 = vmatmul.mubr.msk.f32.gmra.mrb[88].mxu0 %vm28094_vm4, %v20083_v40 }
 0x826   : > { %v20086_v16 = vpop.f32.mrb[86].mxu1 }
 0x827   : > { %v5702_v3 = vpop.f32.mrb[87].mxu1 }
 0x828   : > { %20106 = vmatprep.mubr.msk.f32.mxu1 %vm28094_vm4, %v5702_v3  ;;  %20128 = vmatprep.mubr.msk.f32.mxu0 %vm28094_vm4, %v5702_v3 }
 0x829   : > { %20107 = vmatmul.mubr.msk.f32.gmra.mrb[74].mxu1 %vm28094_vm4, %v20086_v16  ;;  %20129 = vmatmul.mubr.msk.f32.gmra.mrb[90].mxu0 %vm28094_vm4, %v20086_v16 }
 0x82a   : > { %v20089_v22 = vpop.f32.mrb[88].mxu1 }
 0x82b   : > { %v5712_v17 = vpop.f32.mrb[89].mxu1 }
 0x82c   : > { %20109 = vmatprep.mubr.msk.f32.mxu1 %vm28094_vm4, %v5712_v17  ;;  %20131 = vmatprep.mubr.msk.f32.mxu0 %vm28094_vm4, %v5712_v17 }
 0x82d   : > { %20110 = vmatmul.mubr.msk.f32.gmra.mrb[76].mxu1 %vm28094_vm4, %v20089_v22  ;;  %20132 = vmatmul.mubr.msk.f32.gmra.mrb[92].mxu0 %vm28094_vm4, %v20089_v22 }
 0x82e   : > { %v20092_v6 = vpop.f32.mrb[90].mxu1 }
 0x82f   : > { %v5722_v47 = vpop.f32.mrb[91].mxu1 }
 0x830   : > { %20112 = vmatprep.mubr.msk.f32.mxu1 %vm28094_vm4, %v5722_v47  ;;  %20134 = vmatprep.mubr.msk.f32.mxu0 %vm28094_vm4, %v5722_v47 }
 0x831   : > { %20113 = vmatmul.mubr.msk.f32.gmra.mrb[78].mxu1 %vm28094_vm4, %v20092_v6  ;;  %20135 = vmatmul.mubr.msk.f32.gmra.mrb[94].mxu0 %vm28094_vm4, %v20092_v6 }
 0x832   : > { %v20095_v12 = vpop.f32.mrb[92].mxu1 }
 0x833   : > { %v5732_v21 = vpop.f32.mrb[93].mxu1 }
 0x834   : > { %20115 = vmatprep.mubr.msk.f32.mxu1 %vm28094_vm4, %v5732_v21  ;;  %20137 = vmatprep.mubr.msk.f32.mxu0 %vm28094_vm4, %v5732_v21 }
 0x835   : > { %20116 = vmatmul.mubr.msk.f32.gmra.mrb[80].mxu1 %vm28094_vm4, %v20095_v12  ;;  %20138 = vmatmul.mubr.msk.f32.gmra.mrb[96].mxu0 %vm28094_vm4, %v20095_v12 }
 0x836   : > { %20164 = vmatprep.mubr.msk.f32.mxu0 %vm2066_vm3, %v23652_v7 }
 0x8f4   : > { %v25101_v38 = vpop.f32.mrb[70].mxu1  ;;  %v20124_v43 = vpop.f32.mrb[86].mxu0 }
 0x8f5   : > { %v22470_v63 = vadd.f32 %v20124_v43, %v25099_v2  ;;  %v25104_v25 = vpop.f32.mrb[71].mxu1  ;;  %v5986_v57 = vpop.f32.mrb[87].mxu0 }
 0x8f6   : > { %v22471_v56 = vadd.f32 %v25099_v2, %v5986_v57 }
 0x8f7   : > { %v17188_v29 = vmul.f32 -1.442695, %v22470_v63 }
 0x8f8   : > { %v17187_v53 = vmul.f32 -1.442695, %v22471_v56  ;;  %v25107_v55 = vpop.f32.mrb[72].mxu1  ;;  %v20127_v59 = vpop.f32.mrb[88].mxu0 }
 0x8f9   : > { %23100 = vpow2.f32 %v17188_v29  ;;  %v22472_v61 = vadd.f32 %v20127_v59, %v25099_v2  ;;  %v25110_v1 = vpop.f32.mrb[73].mxu1  ;;  %v5996_v5 = vpop.f32.mrb[89].mxu0 }
 0x8fa   : > { %23102 = vpow2.f32 %v17187_v53  ;;  %v22473_v9 = vadd.f32 %v25099_v2, %v5996_v5 }
 0x8fb   : > { %v17190_v13 = vmul.f32 -1.442695, %v22472_v61 }
 0x8fc   : > { %v17189_v15 = vmul.f32 -1.442695, %v22473_v9  ;;  %v25113_v35 = vpop.f32.mrb[74].mxu1  ;;  %v20130_v37 = vpop.f32.mrb[90].mxu0 }
 0x8fd   : > { %23104 = vpow2.f32 %v17190_v13  ;;  %v22474_v34 = vadd.f32 %v20130_v37, %v25099_v2  ;;  %v25116_v49 = vpop.f32.mrb[75].mxu1  ;;  %v6006_v46 = vpop.f32.mrb[91].mxu0 }
 0x8fe   : > { %23106 = vpow2.f32 %v17189_v15  ;;  %v22475_v60 = vadd.f32 %v25099_v2, %v6006_v46 }
 0x8ff   : > { %v17192_v10 = vmul.f32 -1.442695, %v22474_v34 }
 0x900   : > { %v17191_v27 = vmul.f32 -1.442695, %v22475_v60  ;;  %v25119_v40 = vpop.f32.mrb[76].mxu1  ;;  %v20133_v33 = vpop.f32.mrb[92].mxu0 }
 0x901   : > { %23108 = vpow2.f32 %v17192_v10  ;;  %v22476_v16 = vadd.f32 %v20133_v33, %v25099_v2  ;;  %v25122_v3 = vpop.f32.mrb[77].mxu1  ;;  %v6016_v22 = vpop.f32.mrb[93].mxu0 }
 0x902   : > { %23110 = vpow2.f32 %v17191_v27  ;;  %v22477_v17 = vadd.f32 %v25099_v2, %v6016_v22 }
 0x903   : > { %v23101_v6 = vpop.eup %23100  ;;  %v17194_v47 = vmul.f32 -1.442695, %v22476_v16  ;;  %v25138_v16 = vld [vmem:[%s23923_s20 + $0x8] ss:$0 sm:$0xff] }
 0x904   : > { %v23103_v12 = vpop.eup %23102  ;;  %v6094_v21 = vadd.f32 1.0, %v23101_v6  ;;  %v17193_v7 = vmul.f32 -1.442695, %v22477_v17  ;;  %v25125_v51 = vpop.f32.mrb[78].mxu1 }
 0x905   : > { %v20136_v28 = vpop.f32.mrb[94].mxu0  ;;  %v6093_v26 = vadd.f32 1.0, %v23103_v12  ;;  %23112 = vpow2.f32 %v17194_v47  ;;  %v25128_v63 = vpop.f32.mrb[79].mxu1  ;;  %v22458_v12 = vadd.f32 %v25101_v38, %v25138_v16 }
 0x906   : > { %v22478_v43 = vadd.f32 %v20136_v28, %v25099_v2  ;;  %v6026_v57 = vpop.f32.mrb[95].mxu0  ;;  %23114 = vrcp.f32 %v6094_v21 }
 0x907   : > { %v22479_v56 = vadd.f32 %v25099_v2, %v6026_v57  ;;  %v23105_v29 = vpop.eup %23104  ;;  %23116 = vrcp.f32 %v6093_v26 }
 0x908   : > { %v17196_v53 = vmul.f32 -1.442695, %v22478_v43  ;;  %v23107_v59 = vpop.eup %23106  ;;  %v6096_v61 = vadd.f32 1.0, %v23105_v29  ;;  %23118 = vpow2.f32 %v17193_v7  ;;  %v25131_v9 = vpop.f32.mrb[80].mxu1  ;;  %v22460_v29 = vadd.f32 %v25107_v55, %v25138_v16 }
 0x909   : > { %v17195_v5 = vmul.f32 -1.442695, %v22479_v56  ;;  %v20139_v13 = vpop.f32.mrb[96].mxu0  ;;  %v6095_v15 = vadd.f32 1.0, %v23107_v59  ;;  %v25134_v34 = vpop.f32.mrb[81].mxu1  ;;  %v22461_v59 = vadd.f32 %v25138_v16, %v25110_v1 }
 0x90a   : > { %23120 = vpow2.f32 %v17196_v53  ;;  %v22480_v37 = vadd.f32 %v20139_v13, %v25099_v2  ;;  %v6036_v46 = vpop.f32.mrb[97].mxu0 }
 0x90b   : > { %23122 = vrcp.f32 %v6096_v61  ;;  %v22481_v60 = vadd.f32 %v25099_v2, %v6036_v46  ;;  %v23109_v10 = vpop.eup %23108  ;;  %v22459_v2 = vadd.f32 %v25138_v16, %v25104_v25  ;;  %v22462_v46 = vadd.f32 %v25113_v35, %v25138_v16 }
 0x90c   : > { %23124 = vrcp.f32 %v6095_v15  ;;  %v17198_v27 = vmul.f32 -1.442695, %v22480_v37  ;;  %v23111_v33 = vpop.eup %23110  ;;  %v6098_v22 = vadd.f32 1.0, %v23109_v10  ;;  %v22463_v10 = vadd.f32 %v25138_v16, %v25116_v49 }
 0x90d   : > { %23126 = vpow2.f32 %v17195_v5  ;;  %v17197_v17 = vmul.f32 -1.442695, %v22481_v60  ;;  %v6097_v6 = vadd.f32 1.0, %v23111_v33 }
 0x90e   : > { %23128 = vpow2.f32 %v17198_v27 }
 0x90f   : > { %23130 = vrcp.f32 %v6098_v22  ;;  %v23113_v47 = vpop.eup %23112 }
 0x910   : > { %23132 = vrcp.f32 %v6097_v6  ;;  %v23115_v21 = vpop.eup %23114  ;;  %v6100_v7 = vadd.f32 1.0, %v23113_v47  ;;  %v22464_v47 = vadd.f32 %v25119_v40, %v25138_v16  ;;  %v22466_v40 = vadd.f32 %v25125_v51, %v25138_v16 }
 0x911   : > { %23134 = vpow2.f32 %v17197_v17  ;;  %v23117_v28 = vpop.eup %23116  ;;  %v25144_v26 = vmul.f32 %v23115_v21, %v22458_v12  ;;  %v22468_v51 = vadd.f32 %v25131_v9, %v25138_v16  ;;  %v17228_v9 = vld [vmem:[%s23918_s12 + $0x1b0] sm:$0xff] }
 0x912   : > { %v23119_v43 = vpop.eup %23118  ;;  %23136 = vrcp.f32 %v6100_v7  ;;  %v25146_v57 = vmul.f32 %v23117_v28, %v22459_v2  ;;  %v22465_v7 = vadd.f32 %v25138_v16, %v25122_v3 }
 0x913   : > { %v6099_v53 = vadd.f32 1.0, %v23119_v43 }
 0x914   : > { %v23121_v56 = vpop.eup %23120  ;;  %v25154_v25 = vpack.c.bf16 %v25144_v26, %v25146_v57 }
 0x915   : > { %v23123_v38 = vpop.eup %23122  ;;  %v6102_v61 = vadd.f32 1.0, %v23121_v56  ;;  %23138 = vrcp.f32 %v6099_v53  ;;  %v22467_v53 = vadd.f32 %v25138_v16, %v25128_v63  ;;  %v22469_v63 = vadd.f32 %v25138_v16, %v25134_v34  ;;  %v23653_v16 = vld [vmem:[%s23883_s3 + $0x128] sm:$0xff] }
 0x916   : > { %v23125_v5 = vpop.eup %23124  ;;  %v25156_v13 = vmul.f32 %v23123_v38, %v22460_v29  ;;  %21877 = vmatprep.subr.bf16.mxu0 %v25154_v25 }
 0x917   : > { %v23127_v15 = vpop.eup %23126  ;;  %23140 = vrcp.f32 %v6102_v61  ;;  %v25159_v37 = vmul.f32 %v23125_v5, %v22461_v59  ;;  %21879 = vmatpush3.bf16.msra.mxu0 %v25154_v25 }
 0x918   : > { %v23129_v55 = vpop.eup %23128  ;;  %v6101_v1 = vadd.f32 1.0, %v23127_v15 }
 0x919   : > { %v23131_v60 = vpop.eup %23130  ;;  %v6104_v27 = vadd.f32 1.0, %v23129_v55  ;;  %v25168_v33 = vpack.c.bf16 %v25156_v13, %v25159_v37 }
 0x91a   : > { %v23133_v22 = vpop.eup %23132  ;;  %23142 = vrcp.f32 %v6101_v1  ;;  %v25170_v17 = vmul.f32 %v23131_v60, %v22462_v46  ;;  %v17229_v46 = vld [vmem:[%s23918_s12 + $0x1b8] sm:$0xff] }
 0x91b   : > { %v23135_v6 = vpop.eup %23134  ;;  %23144 = vrcp.f32 %v6104_v27  ;;  %21881 = vmatprep.subr.bf16.mxu0 %v25168_v33  ;;  %v25173_v35 = vmul.f32 %v23133_v22, %v22463_v10  ;;  %v21904_v34 = vpack.c.bf16 %v17229_v46, %v17228_v9  ;;  %v23654_v10 = vld [vmem:[%s23883_s3 + $0x130] sm:$0xff]  ;;  %v23655_v27 = vld [vmem:[%s23883_s3 + $0x138] sm:$0xff]  ;;  %v23656_v22 = vld [vmem:[%s23883_s3 + $0x140] sm:$0xff] }
 0x91c   : > { %v6103_v12 = vadd.f32 1.0, %v23135_v6  ;;  %21883 = vmatpush3.bf16.msra.mxu0 %v25168_v33  ;;  %v23137_v49 = vpop.eup %23136  ;;  %v23657_v6 = vld [vmem:[%s23883_s3 + $0x148] sm:$0xff]  ;;  %v17298_v9 = vld [vmem:[%s23918_s12 + $0x1d8] sm:$0xff] }
 0x91d   : > { %v25180_v21 = vpack.c.bf16 %v25170_v17, %v25173_v35  ;;  %v25182_v2 = vmul.f32 %v23137_v49, %v22464_v47  ;;  %v23658_v47 = vld [vmem:[%s23883_s3 + $0x150] sm:$0xff]  ;;  %v23660_v49 = vld [vmem:[%s23883_s3 + $0x160] sm:$0xff] }
 0x91e   : > { %23146 = vrcp.f32 %v6103_v12  ;;  %v23659_v12 = vld [vmem:[%s23883_s3 + $0x158] sm:$0xff] }
 0x91f   : > { %21885 = vmatprep.subr.bf16.mxu0 %v25180_v21  ;;  %v23139_v28 = vpop.eup %23138 }
 0x920   : > { %21887 = vmatpush3.bf16.msra.mxu0 %v25180_v21  ;;  %v25190_v56 = vmul.f32 %v23139_v28, %v22465_v7  ;;  %v23661_v7 = vld [vmem:[%s23883_s3 + $0x168] sm:$0xff]  ;;  %v23662_v28 = vld [vmem:[%s23883_s3 + $0x170] sm:$0xff] }
 0x921   : > { %v23141_v43 = vpop.eup %23140 }
 0x922   : > { %v25192_v29 = vmul.f32 %v23141_v43, %v22466_v40  ;;  %v25198_v3 = vpack.c.bf16 %v25182_v2, %v25190_v56  ;;  %v23663_v40 = vld [vmem:[%s23883_s3 + $0x178] sm:$0xff]  ;;  %v17243_v43 = vld [vmem:[%s23913_s6 + $0x1c0] sm:$0xff] }
 0x924   : > { %v23143_v38 = vpop.eup %23142  ;;  %21889 = vmatprep.subr.bf16.mxu0 %v25198_v3 }
 0x925   : > { %v23145_v59 = vpop.eup %23144  ;;  %v25203_v61 = vmul.f32 %v23143_v38, %v22467_v53  ;;  %21891 = vmatpush3.bf16.msra.mxu0 %v25198_v3  ;;  %v17244_v53 = vld [vmem:[%s23913_s6 + $0x1c8] sm:$0xff] }
 0x926   : > { %v25206_v5 = vmul.f32 %v23145_v59, %v22468_v51  ;;  %v21908_v38 = vpack.c.bf16 %v17244_v53, %v17243_v43  ;;  %v17257_v51 = vld [vmem:[%s23918_s12 + $0x1c0] sm:$0xff]  ;;  %v17258_v59 = vld [vmem:[%s23918_s12 + $0x1c8] sm:$0xff] }
 0x927   : > { %v25212_v15 = vpack.c.bf16 %v25192_v29, %v25203_v61  ;;  %v23664_v43 = vld [vmem:[%s23908_s30 + $0x2] ss:$0 sm:$0xff] }
 0x928   : > { %v23147_v55 = vpop.eup %23146  ;;  %21909 = vmatprep.subr.bf16.mxu1 %v21908_v38  ;;  %v25281_v53 = vadd.f32 %v23664_v43, %v24325_v44 }
 0x929   : > { %21893 = vmatprep.subr.bf16.mxu0 %v25212_v15  ;;  %v25217_v1 = vmul.f32 %v23147_v55, %v22469_v63  ;;  %v21912_v63 = vpack.c.bf16 %v17258_v59, %v17257_v51  ;;  %v17297_v55 = vld [vmem:[%s23918_s12 + $0x1d0] sm:$0xff]  ;;  %v25392_v59 = vpack.c.bf16 %v24334_v0, %v24336_v8 }
 0x92a   : > { %21895 = vmatpush3.bf16.msra.mxu0 %v25212_v15 }
 0x92b   : > { %v25222_v60 = vpack.c.bf16 %v25206_v5, %v25217_v1 }
 0x92d   : > { %21897 = vmatprep.subr.bf16.mxu0 %v25222_v60 }
 0x92e   : > { %21899 = vmatpush3.bf16.msra.mxu0 %v25222_v60 }
 0x92f   : > { %21905 = vmatprep.subr.bf16.mxu0 %v21904_v34 }
 0x931   : > { %20165 = vmatmul.mubr.msk.f32.vlgmr.msra.gmra.mrb[98].mxu0 %vm2066_vm3, %v23653_v16  ;;  %v21944_v16 = vpack.c.bf16 %v17298_v9, %v17297_v55  ;;  %v25402_v9 = vpack.c.bf16 %v24338_v14, %v24340_v36 }
 0x932   : > { %20167 = vmatprep.mubr.msk.f32.mxu0 %vm2066_vm3, %v23654_v10  ;;  %21907 = vmatpush3.bf16.msra.mxu0 %v21904_v34 }
 0x933   : > { %21913 = vmatprep.subr.bf16.mxu0 %v21912_v63 }
 0x935   : > { %20168 = vmatmul.mubr.msk.f32.gmra.mrb[100].mxu0 %vm2066_vm3, %v23655_v27 }
 0x936   : > { %20170 = vmatprep.mubr.msk.f32.mxu0 %vm2066_vm3, %v23656_v22 }
 0x939   : > { %20171 = vmatmul.mubr.msk.f32.gmra.mrb[102].mxu0 %vm2066_vm3, %v23657_v6 }
 0x93a   : > { %20173 = vmatprep.mubr.msk.f32.mxu0 %vm2066_vm3, %v23658_v47 }
 0x93d   : > { %20174 = vmatmul.mubr.msk.f32.gmra.mrb[104].mxu0 %vm2066_vm3, %v23659_v12 }
 0x93e   : > { %20176 = vmatprep.mubr.msk.f32.mxu0 %vm2066_vm3, %v23660_v49 }
 0x941   : > { %20177 = vmatmul.mubr.msk.f32.gmra.mrb[106].mxu0 %vm2066_vm3, %v23661_v7 }
 0x942   : > { %20179 = vmatprep.mubr.msk.f32.mxu0 %vm2066_vm3, %v23662_v28 }
 0x945   : > { %20180 = vmatmul.mubr.msk.f32.gmra.mrb[108].mxu0 %vm2066_vm3, %v23663_v40 }
 0xa04   : > { %v20166_v46 = vpop.f32.mrb[98].mxu0 }
 0xa05   : > { %v6211_v34 = vpop.f32.mrb[99].mxu0 }
 0xa06   : > { %20186 = vmatprep.mubr.msk.f32.mxu1 %vm28094_vm4, %v6211_v34  ;;  %20208 = vmatprep.mubr.msk.f32.mxu0 %vm28094_vm4, %v6211_v34 }
 0xa07   : > { %20187 = vmatmul.mubr.msk.f32.vlgmr.msra.gmra.mrb[94].mxu1 %vm28094_vm4, %v20166_v46  ;;  %20209 = vmatmul.mubr.msk.f32.vlgmr.msra.gmra.mrb[110].mxu0 %vm28094_vm4, %v20166_v46 }
 0xa08   : > { %21911 = vmatpush3.bf16.msra.mxu1 %v21908_v38  ;;  %v20169_v10 = vpop.f32.mrb[100].mxu0  ;;  %21915 = vmatpush3.bf16.msra.mxu0 %v21912_v63  ;;  %v25284_v38 = vadd.f32 %v23664_v43, %v24327_v45  ;;  %v17283_v45 = vld [vmem:[%s23913_s6 + $0x1d0] sm:$0xff]  ;;  %v23682_v43 = vld [vmem:[%s23883_s3 + $0x28] sm:$0xff] }
 0xa09   : > { %21917 = vmatprep.subr.bf16.mxu1 %v25154_v25  ;;  %v6221_v27 = vpop.f32.mrb[101].mxu0  ;;  %21945 = vmatprep.subr.bf16.mxu0 %v21944_v16 }
 0xa0a   : > { %20189 = vmatprep.mubr.msk.f32.mxu1 %vm28094_vm4, %v6221_v27  ;;  %20211 = vmatprep.mubr.msk.f32.mxu0 %vm28094_vm4, %v6221_v27  ;;  %v25297_v44 = vpack.c.bf16 %v25281_v53, %v25284_v38 }
 0xa0b   : > { %20190 = vmatmul.mubr.msk.f32.gmra.mrb[96].mxu1 %vm28094_vm4, %v20169_v10  ;;  %20212 = vmatmul.mubr.msk.f32.gmra.mrb[112].mxu0 %vm28094_vm4, %v20169_v10 }
 0xa0c   : > { %v20172_v22 = vpop.f32.mrb[102].mxu0 }
 0xa0d   : > { %v6231_v6 = vpop.f32.mrb[103].mxu0 }
 0xa0e   : > { %20192 = vmatprep.mubr.msk.f32.mxu1 %vm28094_vm4, %v6231_v6  ;;  %20214 = vmatprep.mubr.msk.f32.mxu0 %vm28094_vm4, %v6231_v6 }
 0xa0f   : > { %20193 = vmatmul.mubr.msk.f32.gmra.mrb[98].mxu1 %vm28094_vm4, %v20172_v22  ;;  %20215 = vmatmul.mubr.msk.f32.gmra.mrb[114].mxu0 %vm28094_vm4, %v20172_v22  ;;  %v25422_v22 = vpack.c.bf16 %v24346_v54, %v24348_v11 }
 0xa10   : > { %v20175_v47 = vpop.f32.mrb[104].mxu0 }
 0xa11   : > { %v6241_v12 = vpop.f32.mrb[105].mxu0 }
 0xa12   : > { %20195 = vmatprep.mubr.msk.f32.mxu1 %vm28094_vm4, %v6241_v12  ;;  %20217 = vmatprep.mubr.msk.f32.mxu0 %vm28094_vm4, %v6241_v12  ;;  %v23677_v12 = vld [vmem:[%s23883_s3] sm:$0xff] }
 0xa13   : > { %20196 = vmatmul.mubr.msk.f32.gmra.mrb[100].mxu1 %vm28094_vm4, %v20175_v47  ;;  %20218 = vmatmul.mubr.msk.f32.gmra.mrb[116].mxu0 %vm28094_vm4, %v20175_v47 }
 0xa14   : > { %v20178_v49 = vpop.f32.mrb[106].mxu0 }
 0xa15   : > { %v6251_v7 = vpop.f32.mrb[107].mxu0 }
 0xa16   : > { %20198 = vmatprep.mubr.msk.f32.mxu1 %vm28094_vm4, %v6251_v7  ;;  %20220 = vmatprep.mubr.msk.f32.mxu0 %vm28094_vm4, %v6251_v7  ;;  %v23679_v7 = vld [vmem:[%s23883_s3 + $0x10] sm:$0xff] }
 0xa17   : > { %20199 = vmatmul.mubr.msk.f32.gmra.mrb[102].mxu1 %vm28094_vm4, %v20178_v49  ;;  %20221 = vmatmul.mubr.msk.f32.gmra.mrb[118].mxu0 %vm28094_vm4, %v20178_v49  ;;  %v23678_v49 = vld [vmem:[%s23883_s3 + $0x8] sm:$0xff] }
 0xa18   : > { %v20181_v28 = vpop.f32.mrb[108].mxu0 }
 0xa19   : > { %v6261_v40 = vpop.f32.mrb[109].mxu0 }
 0xa1a   : > { %20201 = vmatprep.mubr.msk.f32.mxu1 %vm28094_vm4, %v6261_v40  ;;  %20223 = vmatprep.mubr.msk.f32.mxu0 %vm28094_vm4, %v6261_v40  ;;  %v23681_v40 = vld [vmem:[%s23883_s3 + $0x20] sm:$0xff] }
 0xa1b   : > { %20202 = vmatmul.mubr.msk.f32.gmra.mrb[104].mxu1 %vm28094_vm4, %v20181_v28  ;;  %20224 = vmatmul.mubr.msk.f32.gmra.mrb[120].mxu0 %vm28094_vm4, %v20181_v28  ;;  %v23680_v28 = vld [vmem:[%s23883_s3 + $0x18] sm:$0xff] }
 0xa1c   : > { %20230 = vmatprep.mubr.msk.f32.mxu1 %vm28094_vm4, %v25146_v57  ;;  %20252 = vmatprep.mubr.msk.f32.mxu0 %vm28094_vm4, %v25146_v57 }
 0xa1f   : > { %20231 = vmatmul.mubr.msk.f32.vlgmr.msra.gmra.mrb[94].mxu1 %vm28094_vm4, %v25144_v26  ;;  %20253 = vmatmul.mubr.msk.f32.vlgmr.msra.gmra.mrb[110].mxu0 %vm28094_vm4, %v25144_v26  ;;  %v17284_v26 = vld [vmem:[%s23913_s6 + $0x1d8] sm:$0xff] }
 0xa20   : > { %21919 = vmatpush3.bf16.msra.mxu1 %v25154_v25  ;;  %21947 = vmatpush3.bf16.msra.mxu0 %v21944_v16  ;;  %v21940_v57 = vpack.c.bf16 %v17284_v26, %v17283_v45  ;;  %v23665_v25 = vld [vmem:[%s23883_s3 + $0x1e0] sm:$0xff]  ;;  %v25412_v16 = vpack.c.bf16 %v24342_v39, %v24344_v42  ;;  %v23683_v45 = vld [vmem:[%s23883_s3 + $0x30] sm:$0xff]  ;;  %v23684_v26 = vld [vmem:[%s23883_s3 + $0x38] sm:$0xff] }
 0xa21   : > { %20233 = vmatprep.mubr.msk.f32.mxu1 %vm28094_vm4, %v25159_v37  ;;  %20255 = vmatprep.mubr.msk.f32.mxu0 %vm28094_vm4, %v25159_v37  ;;  %v23667_v37 = vld [vmem:[%s23883_s3 + $0x1f0] sm:$0xff] }
 0xa22   : > { %21921 = vmatprep.subr.bf16.mxu1 %v25168_v33  ;;  %21949 = vmatprep.subr.bf16.mxu0 %v25297_v44 }
 0xa23   : > { %20234 = vmatmul.mubr.msk.f32.gmra.mrb[96].mxu1 %vm28094_vm4, %v25156_v13  ;;  %20256 = vmatmul.mubr.msk.f32.gmra.mrb[112].mxu0 %vm28094_vm4, %v25156_v13  ;;  %v23666_v13 = vld [vmem:[%s23883_s3 + $0x1e8] sm:$0xff] }
 0xa24   : > { %21923 = vmatpush3.bf16.msra.mxu1 %v25168_v33  ;;  %20236 = vmatprep.mubr.msk.f32.mxu1 %vm28094_vm4, %v25173_v35  ;;  %v23668_v33 = vld [vmem:[%s23883_s3 + $0x1f8] sm:$0xff] }
 0xa25   : > { %20258 = vmatprep.mubr.msk.f32.mxu0 %vm28094_vm4, %v25173_v35  ;;  %21925 = vmatprep.subr.bf16.mxu1 %v25180_v21  ;;  %v23670_v35 = vld [vmem:[%s23883_s3 + $0x208] sm:$0xff] }
 0xa27   : > { %20237 = vmatmul.mubr.msk.f32.gmra.mrb[98].mxu1 %vm28094_vm4, %v25170_v17  ;;  %20259 = vmatmul.mubr.msk.f32.gmra.mrb[114].mxu0 %vm28094_vm4, %v25170_v17  ;;  %v23669_v17 = vld [vmem:[%s23883_s3 + $0x200] sm:$0xff] }
 0xa28   : > { %21927 = vmatpush3.bf16.msra.mxu1 %v25180_v21  ;;  %20239 = vmatprep.mubr.msk.f32.mxu1 %vm28094_vm4, %v25190_v56  ;;  %v23671_v21 = vld [vmem:[%s23883_s3 + $0x210] sm:$0xff] }
 0xa29   : > { %20261 = vmatprep.mubr.msk.f32.mxu0 %vm28094_vm4, %v25190_v56  ;;  %21929 = vmatprep.subr.bf16.mxu1 %v25198_v3  ;;  %v23673_v56 = vld [vmem:[%s23883_s3 + $0x220] sm:$0xff] }
 0xa2b   : > { %20240 = vmatmul.mubr.msk.f32.gmra.mrb[100].mxu1 %vm28094_vm4, %v25182_v2  ;;  %20262 = vmatmul.mubr.msk.f32.gmra.mrb[116].mxu0 %vm28094_vm4, %v25182_v2  ;;  %v23672_v2 = vld [vmem:[%s23883_s3 + $0x218] sm:$0xff] }
 0xa2c   : > { %21931 = vmatpush3.bf16.msra.mxu1 %v25198_v3  ;;  %20242 = vmatprep.mubr.msk.f32.mxu1 %vm28094_vm4, %v25203_v61  ;;  %v23675_v3 = vld [vmem:[%s23883_s3 + $0x230] sm:$0xff] }
 0xa2d   : > { %20264 = vmatprep.mubr.msk.f32.mxu0 %vm28094_vm4, %v25203_v61  ;;  %21933 = vmatprep.subr.bf16.mxu1 %v25212_v15  ;;  %v23676_v61 = vld [vmem:[%s23883_s3 + $0x238] sm:$0xff] }
 0xa2f   : > { %20243 = vmatmul.mubr.msk.f32.gmra.mrb[102].mxu1 %vm28094_vm4, %v25192_v29  ;;  %20265 = vmatmul.mubr.msk.f32.gmra.mrb[118].mxu0 %vm28094_vm4, %v25192_v29  ;;  %v23674_v29 = vld [vmem:[%s23883_s3 + $0x228] sm:$0xff] }
 0xa30   : > { %21935 = vmatpush3.bf16.msra.mxu1 %v25212_v15  ;;  %20245 = vmatprep.mubr.msk.f32.mxu1 %vm28094_vm4, %v25217_v1 }
 0xa31   : > { %20267 = vmatprep.mubr.msk.f32.mxu0 %vm28094_vm4, %v25217_v1  ;;  %21937 = vmatprep.subr.bf16.mxu1 %v25222_v60  ;;  %v25382_v1 = vpack.c.bf16 %v24330_v48, %v24332_v58 }
 0xa33   : > { %20246 = vmatmul.mubr.msk.f32.gmra.mrb[104].mxu1 %vm28094_vm4, %v25206_v5  ;;  %20268 = vmatmul.mubr.msk.f32.gmra.mrb[120].mxu0 %vm28094_vm4, %v25206_v5 }
 0xa34   : > { %21939 = vmatpush3.bf16.msra.mxu1 %v25222_v60  ;;  %20294 = vmatprep.mubr.msk.f32.mxu1 %vm2066_vm3, %v23665_v25  ;;  %v23686_v25 = vld [vmem:[%s23883_s3 + $0x48] sm:$0xff] }
 0xa35   : > { %21941 = vmatprep.subr.bf16.mxu1 %v21940_v57 }
 0xa37   : > { %20295 = vmatmul.mubr.msk.f32.vlgmr.msra.gmra.mrb[106].mxu1 %vm2066_vm3, %v23666_v13  ;;  %v23687_v13 = vld [vmem:[%s23883_s3 + $0x50] sm:$0xff] }
 0xa38   : > { %20297 = vmatprep.mubr.msk.f32.mxu1 %vm2066_vm3, %v23667_v37  ;;  %21943 = vmatpush3.bf16.msra.mxu1 %v21940_v57  ;;  %v23685_v57 = vld [vmem:[%s23883_s3 + $0x40] sm:$0xff]  ;;  %v23688_v37 = vld [vmem:[%s23883_s3 + $0x58] sm:$0xff] }
 0xa3b   : > { %20298 = vmatmul.mubr.msk.f32.gmra.mrb[108].mxu1 %vm2066_vm3, %v23668_v33  ;;  %v17337_v33 = vld [vmem:[%s23913_s6 + $0x1e0] sm:$0xff] }
 0xa3c   : > { %20300 = vmatprep.mubr.msk.f32.mxu1 %vm2066_vm3, %v23669_v17  ;;  %v17338_v17 = vld [vmem:[%s23913_s6 + $0x1e8] sm:$0xff] }
 0xa3f   : > { %20301 = vmatmul.mubr.msk.f32.gmra.mrb[110].mxu1 %vm2066_vm3, %v23670_v35  ;;  %v21972_v35 = vpack.c.bf16 %v17338_v17, %v17337_v33 }
 0xa40   : > { %20303 = vmatprep.mubr.msk.f32.mxu1 %vm2066_vm3, %v23671_v21  ;;  %v17352_v21 = vld [vmem:[%s23918_s12 + $0x1e0] sm:$0xff] }
 0xa41   : > { %21973 = vmatprep.subr.bf16.mxu1 %v21972_v35 }
 0xa43   : > { %20304 = vmatmul.mubr.msk.f32.gmra.mrb[112].mxu1 %vm2066_vm3, %v23672_v2  ;;  %v17353_v2 = vld [vmem:[%s23918_s12 + $0x1e8] sm:$0xff] }
 0xa44   : > { %20306 = vmatprep.mubr.msk.f32.mxu1 %vm2066_vm3, %v23673_v56  ;;  %v21976_v56 = vpack.c.bf16 %v17353_v2, %v17352_v21 }
 0xa47   : > { %20307 = vmatmul.mubr.msk.f32.gmra.mrb[114].mxu1 %vm2066_vm3, %v23674_v29  ;;  %v17367_v29 = vld [vmem:[%s23913_s6 + $0x1f0] sm:$0xff] }
 0xa48   : > { %20309 = vmatprep.mubr.msk.f32.mxu1 %vm2066_vm3, %v23675_v3  ;;  %v17368_v3 = vld [vmem:[%s23913_s6 + $0x1f8] sm:$0xff] }
 0xa4b   : > { %20310 = vmatmul.mubr.msk.f32.gmra.mrb[116].mxu1 %vm2066_vm3, %v23676_v61  ;;  %v25461_v61 = vpack.c.bf16 %v17368_v3, %v17367_v29 }
 0xb0a   : > { %v20296_v5 = vpop.f32.mrb[106].mxu1 }
 0xb0b   : > { %v6980_v15 = vpop.f32.mrb[107].mxu1 }
 0xb0c   : > { %20316 = vmatprep.mubr.msk.f32.mxu1 %vm28094_vm4, %v6980_v15  ;;  %20338 = vmatprep.mubr.msk.f32.mxu0 %vm28094_vm4, %v6980_v15  ;;  %v17382_v15 = vld [vmem:[%s23918_s12 + $0x1f8] sm:$0xff] }
 0xb0d   : > { %20317 = vmatmul.mubr.msk.f32.vlgmr.msra.gmra.mrb[94].mxu1 %vm28094_vm4, %v20296_v5  ;;  %20339 = vmatmul.mubr.msk.f32.vlgmr.msra.gmra.mrb[110].mxu0 %vm28094_vm4, %v20296_v5  ;;  %v17381_v5 = vld [vmem:[%s23918_s12 + $0x1f0] sm:$0xff] }
 0xb0e   : > { %21951 = vmatpush3.bf16.msra.mxu0 %v25297_v44  ;;  %v20299_v60 = vpop.f32.mrb[108].mxu1  ;;  %21975 = vmatpush3.bf16.msra.mxu1 %v21972_v35 }
 0xb0f   : > { %21953 = vmatprep.subr.bf16.mxu0 %v25382_v1  ;;  %v6990_v51 = vpop.f32.mrb[109].mxu1  ;;  %21981 = vmatprep.subr.bf16.mxu1 %v25461_v61 }
 0xb10   : > { %20319 = vmatprep.mubr.msk.f32.mxu1 %vm28094_vm4, %v6990_v51  ;;  %20341 = vmatprep.mubr.msk.f32.mxu0 %vm28094_vm4, %v6990_v51  ;;  %v25470_v51 = vld [vmem:[%s23928_s27 + $0x9] ss:$0 sm:$0xff] }
 0xb11   : > { %20320 = vmatmul.mubr.msk.f32.gmra.mrb[96].mxu1 %vm28094_vm4, %v20299_v60  ;;  %20342 = vmatmul.mubr.msk.f32.gmra.mrb[112].mxu0 %vm28094_vm4, %v20299_v60  ;;  %v25466_v60 = vpack.c.bf16 %v17382_v15, %v17381_v5 }
 0xb12   : > { %21955 = vmatpush3.bf16.msra.mxu0 %v25382_v1  ;;  %v20302_v63 = vpop.f32.mrb[110].mxu1 }
 0xb13   : > { %21957 = vmatprep.subr.bf16.mxu0 %v25392_v59  ;;  %v7000_v55 = vpop.f32.mrb[111].mxu1 }
 0xb14   : > { %20322 = vmatprep.mubr.msk.f32.mxu1 %vm28094_vm4, %v7000_v55  ;;  %20344 = vmatprep.mubr.msk.f32.mxu0 %vm28094_vm4, %v7000_v55 }
 0xb15   : > { %20323 = vmatmul.mubr.msk.f32.gmra.mrb[98].mxu1 %vm28094_vm4, %v20302_v63  ;;  %20345 = vmatmul.mubr.msk.f32.gmra.mrb[114].mxu0 %vm28094_vm4, %v20302_v63 }
 0xb16   : > { %21959 = vmatpush3.bf16.msra.mxu0 %v25392_v59  ;;  %v20305_v46 = vpop.f32.mrb[112].mxu1 }
 0xb17   : > { %21961 = vmatprep.subr.bf16.mxu0 %v25402_v9  ;;  %v7010_v34 = vpop.f32.mrb[113].mxu1 }
 0xb18   : > { %20325 = vmatprep.mubr.msk.f32.mxu1 %vm28094_vm4, %v7010_v34  ;;  %20347 = vmatprep.mubr.msk.f32.mxu0 %vm28094_vm4, %v7010_v34 }
 0xb19   : > { %20326 = vmatmul.mubr.msk.f32.gmra.mrb[100].mxu1 %vm28094_vm4, %v20305_v46  ;;  %20348 = vmatmul.mubr.msk.f32.gmra.mrb[116].mxu0 %vm28094_vm4, %v20305_v46 }
 0xb1a   : > { %21963 = vmatpush3.bf16.msra.mxu0 %v25402_v9  ;;  %v20308_v10 = vpop.f32.mrb[114].mxu1 }
 0xb1b   : > { %21965 = vmatprep.subr.bf16.mxu0 %v25412_v16  ;;  %v7020_v27 = vpop.f32.mrb[115].mxu1 }
 0xb1c   : > { %20328 = vmatprep.mubr.msk.f32.mxu1 %vm28094_vm4, %v7020_v27  ;;  %20350 = vmatprep.mubr.msk.f32.mxu0 %vm28094_vm4, %v7020_v27 }
 0xb1d   : > { %20329 = vmatmul.mubr.msk.f32.gmra.mrb[102].mxu1 %vm28094_vm4, %v20308_v10  ;;  %20351 = vmatmul.mubr.msk.f32.gmra.mrb[118].mxu0 %vm28094_vm4, %v20308_v10 }
 0xb1e   : > { %21967 = vmatpush3.bf16.msra.mxu0 %v25412_v16  ;;  %v20311_v6 = vpop.f32.mrb[116].mxu1 }
 0xb1f   : > { %21969 = vmatprep.subr.bf16.mxu0 %v25422_v22  ;;  %v7030_v47 = vpop.f32.mrb[117].mxu1 }
 0xb20   : > { %20331 = vmatprep.mubr.msk.f32.mxu1 %vm28094_vm4, %v7030_v47  ;;  %20353 = vmatprep.mubr.msk.f32.mxu0 %vm28094_vm4, %v7030_v47 }
 0xb21   : > { %20332 = vmatmul.mubr.msk.f32.gmra.mrb[104].mxu1 %vm28094_vm4, %v20311_v6  ;;  %20354 = vmatmul.mubr.msk.f32.gmra.mrb[120].mxu0 %vm28094_vm4, %v20311_v6 }
 0xb22   : > { %21971 = vmatpush3.bf16.msra.mxu0 %v25422_v22  ;;  %20380 = vmatprep.mubr.msk.f32.mxu0 %vm2066_vm3, %v23677_v12 }
 0xb23   : > { %21977 = vmatprep.subr.bf16.mxu0 %v21976_v56 }
 0xb25   : > { %20381 = vmatmul.mubr.msk.f32.vlgmr.msra.gmra.mrb[122].mxu0 %vm2066_vm3, %v23678_v49 }
 0xb26   : > { %20383 = vmatprep.mubr.msk.f32.mxu0 %vm2066_vm3, %v23679_v7  ;;  %21979 = vmatpush3.bf16.msra.mxu0 %v21976_v56 }
 0xb27   : > { %21985 = vmatprep.subr.bf16.mxu0 %v25466_v60 }
 0xb29   : > { %20384 = vmatmul.mubr.msk.f32.gmra.mrb[124].mxu0 %vm2066_vm3, %v23680_v28 }
 0xb2a   : > { %20386 = vmatprep.mubr.msk.f32.mxu0 %vm2066_vm3, %v23681_v40 }
 0xb2d   : > { %20387 = vmatmul.mubr.msk.f32.gmra.mrb[126].mxu0 %vm2066_vm3, %v23682_v43 }
 0xb2e   : > { %20389 = vmatprep.mubr.msk.f32.mxu0 %vm2066_vm3, %v23683_v45 }
 0xb31   : > { %20390 = vmatmul.mubr.msk.f32.gmra.mrb[128].mxu0 %vm2066_vm3, %v23684_v26 }
 0xb32   : > { %20392 = vmatprep.mubr.msk.f32.mxu0 %vm2066_vm3, %v23685_v57 }
 0xb35   : > { %20393 = vmatmul.mubr.msk.f32.gmra.mrb[130].mxu0 %vm2066_vm3, %v23686_v25 }
 0xb36   : > { %20395 = vmatprep.mubr.msk.f32.mxu0 %vm2066_vm3, %v23687_v13 }
 0xb39   : > { %20396 = vmatmul.mubr.msk.f32.gmra.mrb[132].mxu0 %vm2066_vm3, %v23688_v37 }
 0xbe0   : > { %v25472_v63 = vpop.f32.mrb[94].mxu1  ;;  %v20340_v55 = vpop.f32.mrb[110].mxu0 }
 0xbe1   : > { %v22494_v46 = vadd.f32 %v20340_v55, %v25470_v51  ;;  %v25475_v34 = vpop.f32.mrb[95].mxu1  ;;  %v7284_v10 = vpop.f32.mrb[111].mxu0 }
 0xbe2   : > { %v22495_v27 = vadd.f32 %v25470_v51, %v7284_v10 }
 0xbe3   : > { %v17312_v6 = vmul.f32 -1.442695, %v22494_v46 }
 0xbe4   : > { %v17311_v47 = vmul.f32 -1.442695, %v22495_v27  ;;  %v25478_v12 = vpop.f32.mrb[96].mxu1  ;;  %v20343_v49 = vpop.f32.mrb[112].mxu0 }
 0xbe5   : > { %23148 = vpow2.f32 %v17312_v6  ;;  %v22496_v7 = vadd.f32 %v20343_v49, %v25470_v51  ;;  %v25481_v28 = vpop.f32.mrb[97].mxu1  ;;  %v7294_v40 = vpop.f32.mrb[113].mxu0 }
 0xbe6   : > { %23150 = vpow2.f32 %v17311_v47  ;;  %v22497_v43 = vadd.f32 %v25470_v51, %v7294_v40 }
 0xbe7   : > { %v17314_v45 = vmul.f32 -1.442695, %v22496_v7 }
 0xbe8   : > { %v17313_v26 = vmul.f32 -1.442695, %v22497_v43  ;;  %v25484_v57 = vpop.f32.mrb[98].mxu1  ;;  %v20346_v25 = vpop.f32.mrb[114].mxu0 }
 0xbe9   : > { %23152 = vpow2.f32 %v17314_v45  ;;  %v22498_v13 = vadd.f32 %v20346_v25, %v25470_v51  ;;  %v25487_v37 = vpop.f32.mrb[99].mxu1  ;;  %v7304_v33 = vpop.f32.mrb[115].mxu0 }
 0xbea   : > { %23154 = vpow2.f32 %v17313_v26  ;;  %v22499_v17 = vadd.f32 %v25470_v51, %v7304_v33 }
 0xbeb   : > { %v17316_v35 = vmul.f32 -1.442695, %v22498_v13 }
 0xbec   : > { %v17315_v21 = vmul.f32 -1.442695, %v22499_v17  ;;  %v25490_v2 = vpop.f32.mrb[100].mxu1  ;;  %v20349_v56 = vpop.f32.mrb[116].mxu0 }
 0xbed   : > { %23156 = vpow2.f32 %v17316_v35  ;;  %v22500_v29 = vadd.f32 %v20349_v56, %v25470_v51  ;;  %v25493_v3 = vpop.f32.mrb[101].mxu1  ;;  %v7314_v5 = vpop.f32.mrb[117].mxu0 }
 0xbee   : > { %23158 = vpow2.f32 %v17315_v21  ;;  %v22501_v15 = vadd.f32 %v25470_v51, %v7314_v5 }
 0xbef   : > { %v23149_v55 = vpop.eup %23148  ;;  %v17318_v46 = vmul.f32 -1.442695, %v22500_v29 }
 0xbf0   : > { %v23151_v10 = vpop.eup %23150  ;;  %v7392_v27 = vadd.f32 1.0, %v23149_v55  ;;  %v17317_v6 = vmul.f32 -1.442695, %v22501_v15  ;;  %v25496_v47 = vpop.f32.mrb[102].mxu1 }
 0xbf1   : > { %v20352_v49 = vpop.f32.mrb[118].mxu0  ;;  %v7391_v7 = vadd.f32 1.0, %v23151_v10  ;;  %23160 = vpow2.f32 %v17318_v46  ;;  %v25499_v43 = vpop.f32.mrb[103].mxu1  ;;  %v17421_v10 = vld [vmem:[%s23918_s12 + $0x200] sm:$0xff] }
 0xbf2   : > { %v22502_v40 = vadd.f32 %v20352_v49, %v25470_v51  ;;  %v7324_v45 = vpop.f32.mrb[119].mxu0  ;;  %23162 = vrcp.f32 %v7392_v27  ;;  %v17422_v27 = vld [vmem:[%s23918_s12 + $0x208] sm:$0xff] }
 0xbf3   : > { %v22503_v26 = vadd.f32 %v25470_v51, %v7324_v45  ;;  %v23153_v25 = vpop.eup %23152  ;;  %23164 = vrcp.f32 %v7391_v7 }
 0xbf4   : > { %v17320_v13 = vmul.f32 -1.442695, %v22502_v40  ;;  %v23155_v33 = vpop.eup %23154  ;;  %v7394_v17 = vadd.f32 1.0, %v23153_v25  ;;  %23166 = vpow2.f32 %v17317_v6  ;;  %v25502_v21 = vpop.f32.mrb[104].mxu1  ;;  %v25511_v40 = vld [vmem:[%s23923_s20 + $0x9] ss:$0 sm:$0xff] }
 0xbf5   : > { %v17319_v35 = vmul.f32 -1.442695, %v22503_v26  ;;  %v20355_v56 = vpop.f32.mrb[120].mxu0  ;;  %v7393_v29 = vadd.f32 1.0, %v23155_v33  ;;  %v25505_v15 = vpop.f32.mrb[105].mxu1 }
 0xbf6   : > { %23168 = vpow2.f32 %v17320_v13  ;;  %v22504_v5 = vadd.f32 %v20355_v56, %v25470_v51  ;;  %v7334_v55 = vpop.f32.mrb[121].mxu0  ;;  %v25513_v56 = vpack.c.bf16 %v17422_v27, %v17421_v10 }
 0xbf7   : > { %23170 = vrcp.f32 %v7394_v17  ;;  %v22505_v46 = vadd.f32 %v25470_v51, %v7334_v55  ;;  %v23157_v49 = vpop.eup %23156  ;;  %v22482_v17 = vadd.f32 %v25472_v63, %v25511_v40 }
 0xbf8   : > { %23172 = vrcp.f32 %v7393_v29  ;;  %v17322_v6 = vmul.f32 -1.442695, %v22504_v5  ;;  %v23159_v7 = vpop.eup %23158  ;;  %v7396_v45 = vadd.f32 1.0, %v23157_v49  ;;  %v20382_v25 = vpop.f32.mrb[122].mxu0  ;;  %v22483_v29 = vadd.f32 %v25511_v40, %v25475_v34 }
 0xbf9   : > { %23174 = vpow2.f32 %v17319_v35  ;;  %v17321_v26 = vmul.f32 -1.442695, %v22505_v46  ;;  %v7395_v13 = vadd.f32 1.0, %v23159_v7  ;;  %v7509_v33 = vpop.f32.mrb[123].mxu0  ;;  %v22485_v7 = vadd.f32 %v25511_v40, %v25481_v28 }
 0xbfa   : > { %23176 = vpow2.f32 %v17322_v6  ;;  %20402 = vmatprep.mubr.msk.f32.mxu1 %vm28094_vm4, %v7509_v33  ;;  %20424 = vmatprep.mubr.msk.f32.mxu0 %vm28094_vm4, %v7509_v33 }
 0xbfb   : > { %23178 = vrcp.f32 %v7396_v45  ;;  %v23161_v51 = vpop.eup %23160  ;;  %20403 = vmatmul.mubr.msk.f32.vlgmr.msra.gmra.mrb[118].mxu1 %vm28094_vm4, %v20382_v25  ;;  %20425 = vmatmul.mubr.msk.f32.vlgmr.msra.gmra.mrb[134].mxu0 %vm28094_vm4, %v20382_v25 }
 0xbfc   : > { %23180 = vrcp.f32 %v7395_v13  ;;  %v23163_v35 = vpop.eup %23162  ;;  %v7398_v5 = vadd.f32 1.0, %v23161_v51  ;;  %21983 = vmatpush3.bf16.msra.mxu1 %v25461_v61  ;;  %v20385_v55 = vpop.f32.mrb[124].mxu0  ;;  %21987 = vmatpush3.bf16.msra.mxu0 %v25466_v60  ;;  %v22484_v60 = vadd.f32 %v25478_v12, %v25511_v40 }
 0xbfd   : > { %23182 = vpow2.f32 %v17321_v26  ;;  %v23165_v46 = vpop.eup %23164  ;;  %v25525_v10 = vmul.f32 %v23163_v35, %v22482_v17  ;;  %21989 = vmatprep.subr.bf16.mxu1 %v25297_v44  ;;  %v7519_v63 = vpop.f32.mrb[125].mxu0  ;;  %22017 = vmatprep.subr.bf16.mxu0 %v25513_v56  ;;  %v22486_v35 = vadd.f32 %v25484_v57, %v25511_v40 }
 0xbfe   : > { %v23167_v27 = vpop.eup %23166  ;;  %23184 = vrcp.f32 %v7398_v5  ;;  %20405 = vmatprep.mubr.msk.f32.mxu1 %vm28094_vm4, %v7519_v63  ;;  %20427 = vmatprep.mubr.msk.f32.mxu0 %vm28094_vm4, %v7519_v63  ;;  %v25531_v34 = vmul.f32 %v23165_v46, %v22483_v29  ;;  %v22487_v5 = vadd.f32 %v25511_v40, %v25487_v37 }
 0xbff   : > { %v7397_v49 = vadd.f32 1.0, %v23167_v27  ;;  %20406 = vmatmul.mubr.msk.f32.gmra.mrb[120].mxu1 %vm28094_vm4, %v20385_v55  ;;  %20428 = vmatmul.mubr.msk.f32.gmra.mrb[136].mxu0 %vm28094_vm4, %v20385_v55 }
 0xc00   : > { %v23169_v61 = vpop.eup %23168  ;;  %v20388_v26 = vpop.f32.mrb[126].mxu0 }
 0xc01   : > { %v23171_v6 = vpop.eup %23170  ;;  %v7400_v45 = vadd.f32 1.0, %v23169_v61  ;;  %23186 = vrcp.f32 %v7397_v49  ;;  %v7529_v13 = vpop.f32.mrb[127].mxu0  ;;  %v22488_v49 = vadd.f32 %v25490_v2, %v25511_v40  ;;  %v22490_v2 = vadd.f32 %v25496_v47, %v25511_v40 }
 0xc02   : > { %v23173_v25 = vpop.eup %23172  ;;  %v25539_v33 = vmul.f32 %v23171_v6, %v22484_v60  ;;  %20408 = vmatprep.mubr.msk.f32.mxu1 %vm28094_vm4, %v7529_v13  ;;  %20430 = vmatprep.mubr.msk.f32.mxu0 %vm28094_vm4, %v7529_v13  ;;  %v22492_v47 = vadd.f32 %v25502_v21, %v25511_v40 }
 0xc03   : > { %v23175_v51 = vpop.eup %23174  ;;  %23188 = vrcp.f32 %v7400_v45  ;;  %v25543_v12 = vmul.f32 %v23173_v25, %v22485_v7  ;;  %20409 = vmatmul.mubr.msk.f32.gmra.mrb[122].mxu1 %vm28094_vm4, %v20388_v26  ;;  %20431 = vmatmul.mubr.msk.f32.gmra.mrb[138].mxu0 %vm28094_vm4, %v20388_v26  ;;  %v22489_v25 = vadd.f32 %v25511_v40, %v25493_v3  ;;  %v22491_v3 = vadd.f32 %v25511_v40, %v25499_v43 }
 0xc04   : > { %v23177_v17 = vpop.eup %23176  ;;  %v7399_v28 = vadd.f32 1.0, %v23175_v51  ;;  %v20391_v46 = vpop.f32.mrb[128].mxu0 }
 0xc05   : > { %v23179_v29 = vpop.eup %23178  ;;  %v7402_v55 = vadd.f32 1.0, %v23177_v17  ;;  %v7539_v27 = vpop.f32.mrb[129].mxu0 }
 0xc06   : > { %v23181_v63 = vpop.eup %23180  ;;  %23190 = vrcp.f32 %v7399_v28  ;;  %v25551_v61 = vmul.f32 %v23179_v29, %v22486_v35  ;;  %20411 = vmatprep.mubr.msk.f32.mxu1 %vm28094_vm4, %v7539_v27  ;;  %20433 = vmatprep.mubr.msk.f32.mxu0 %vm28094_vm4, %v7539_v27 }
 0xc07   : > { %v23183_v60 = vpop.eup %23182  ;;  %23192 = vrcp.f32 %v7402_v55  ;;  %v25555_v57 = vmul.f32 %v23181_v63, %v22487_v5  ;;  %20412 = vmatmul.mubr.msk.f32.gmra.mrb[124].mxu1 %vm28094_vm4, %v20391_v46  ;;  %20434 = vmatmul.mubr.msk.f32.gmra.mrb[140].mxu0 %vm28094_vm4, %v20391_v46  ;;  %v22493_v63 = vadd.f32 %v25511_v40, %v25505_v15 }
 0xc08   : > { %v7401_v6 = vadd.f32 1.0, %v23183_v60  ;;  %v23185_v37 = vpop.eup %23184  ;;  %v20394_v7 = vpop.f32.mrb[130].mxu0 }
 0xc09   : > { %v7549_v45 = vpop.f32.mrb[131].mxu0  ;;  %v25561_v26 = vmul.f32 %v23185_v37, %v22488_v49 }
 0xc0a   : > { %23194 = vrcp.f32 %v7401_v6  ;;  %20414 = vmatprep.mubr.msk.f32.mxu1 %vm28094_vm4, %v7549_v45  ;;  %20436 = vmatprep.mubr.msk.f32.mxu0 %vm28094_vm4, %v7549_v45 }
 0xc0b   : > { %v23187_v13 = vpop.eup %23186  ;;  %20415 = vmatmul.mubr.msk.f32.gmra.mrb[126].mxu1 %vm28094_vm4, %v20394_v7  ;;  %20437 = vmatmul.mubr.msk.f32.gmra.mrb[142].mxu0 %vm28094_vm4, %v20394_v7 }
 0xc0c   : > { %v20397_v17 = vpop.f32.mrb[132].mxu0  ;;  %v25571_v35 = vmul.f32 %v23187_v13, %v22489_v25  ;;  %v23701_v25 = vld [vmem:[%s23883_s3 + $0x120] sm:$0xff]  ;;  %v17461_v13 = vld [vmem:[%s23913_s6 + $0x210] sm:$0xff] }
 0xc0d   : > { %v23189_v51 = vpop.eup %23188  ;;  %v7559_v28 = vpop.f32.mrb[133].mxu0 }
 0xc0e   : > { %v25573_v29 = vmul.f32 %v23189_v51, %v22490_v2  ;;  %20417 = vmatprep.mubr.msk.f32.mxu1 %vm28094_vm4, %v7559_v28  ;;  %20439 = vmatprep.mubr.msk.f32.mxu0 %vm28094_vm4, %v7559_v28  ;;  %v17462_v2 = vld [vmem:[%s23913_s6 + $0x218] sm:$0xff] }
 0xc0f   : > { %20418 = vmatmul.mubr.msk.f32.gmra.mrb[128].mxu1 %vm28094_vm4, %v20397_v17  ;;  %20440 = vmatmul.mubr.msk.f32.gmra.mrb[144].mxu0 %vm28094_vm4, %v20397_v17  ;;  %v22044_v51 = vpack.c.bf16 %v17462_v2, %v17461_v13  ;;  %v25706_v17 = vld [vmem:[%s23928_s27 + $0xa] ss:$0 sm:$0xff] }
 0xc10   : > { %v23191_v5 = vpop.eup %23190  ;;  %20446 = vmatprep.mubr.msk.f32.mxu1 %vm28094_vm4, %v25284_v38  ;;  %20468 = vmatprep.mubr.msk.f32.mxu0 %vm28094_vm4, %v25284_v38 }
 0xc11   : > { %v23193_v55 = vpop.eup %23192  ;;  %v25587_v43 = vmul.f32 %v23191_v5, %v22491_v3 }
 0xc12   : > { %v25589_v46 = vmul.f32 %v23193_v55, %v22492_v47 }
 0xc13   : > { %20447 = vmatmul.mubr.msk.f32.vlgmr.msra.gmra.mrb[118].mxu1 %vm28094_vm4, %v25281_v53  ;;  %20469 = vmatmul.mubr.msk.f32.vlgmr.msra.gmra.mrb[134].mxu0 %vm28094_vm4, %v25281_v53  ;;  %v23696_v53 = vld [vmem:[%s23883_s3 + $0xf8] sm:$0xff] }
 0xc14   : > { %v23195_v27 = vpop.eup %23194  ;;  %21991 = vmatpush3.bf16.msra.mxu1 %v25297_v44  ;;  %20449 = vmatprep.mubr.msk.f32.mxu1 %vm28094_vm4, %v24332_v58  ;;  %v23697_v44 = vld [vmem:[%s23883_s3 + $0x100] sm:$0xff] }
 0xc15   : > { %v25600_v38 = vmul.f32 %v23195_v27, %v22493_v63  ;;  %20471 = vmatprep.mubr.msk.f32.mxu0 %vm28094_vm4, %v24332_v58  ;;  %21993 = vmatprep.subr.bf16.mxu1 %v25382_v1  ;;  %v17408_v58 = vld [vmem:[%s23913_s6 + $0x208] sm:$0xff] }
 0xc16   : > { %22019 = vmatpush3.bf16.msra.mxu0 %v25513_v56 }
 0xc17   : > { %20450 = vmatmul.mubr.msk.f32.gmra.mrb[120].mxu1 %vm28094_vm4, %v24330_v48  ;;  %20472 = vmatmul.mubr.msk.f32.gmra.mrb[136].mxu0 %vm28094_vm4, %v24330_v48  ;;  %v17407_v48 = vld [vmem:[%s23913_s6 + $0x200] sm:$0xff] }
 0xc18   : > { %21995 = vmatpush3.bf16.msra.mxu1 %v25382_v1  ;;  %20452 = vmatprep.mubr.msk.f32.mxu1 %vm28094_vm4, %v24336_v8  ;;  %v23698_v1 = vld [vmem:[%s23883_s3 + $0x108] sm:$0xff] }
 0xc19   : > { %20474 = vmatprep.mubr.msk.f32.mxu0 %vm28094_vm4, %v24336_v8  ;;  %21997 = vmatprep.subr.bf16.mxu1 %v25392_v59  ;;  %v23689_v8 = vld [vmem:[%s23883_s3 + $0xc0] sm:$0xff] }
 0xc1b   : > { %20453 = vmatmul.mubr.msk.f32.gmra.mrb[122].mxu1 %vm28094_vm4, %v24334_v0  ;;  %20475 = vmatmul.mubr.msk.f32.gmra.mrb[138].mxu0 %vm28094_vm4, %v24334_v0  ;;  %v22012_v0 = vpack.c.bf16 %v17408_v58, %v17407_v48 }
 0xc1c   : > { %21999 = vmatpush3.bf16.msra.mxu1 %v25392_v59  ;;  %20455 = vmatprep.mubr.msk.f32.mxu1 %vm28094_vm4, %v24340_v36  ;;  %v23699_v59 = vld [vmem:[%s23883_s3 + $0x110] sm:$0xff] }
 0xc1d   : > { %20477 = vmatprep.mubr.msk.f32.mxu0 %vm28094_vm4, %v24340_v36  ;;  %22001 = vmatprep.subr.bf16.mxu1 %v25402_v9  ;;  %v23692_v36 = vld [vmem:[%s23883_s3 + $0xd8] sm:$0xff] }
 0xc1f   : > { %20456 = vmatmul.mubr.msk.f32.gmra.mrb[124].mxu1 %vm28094_vm4, %v24338_v14  ;;  %20478 = vmatmul.mubr.msk.f32.gmra.mrb[140].mxu0 %vm28094_vm4, %v24338_v14  ;;  %v23691_v14 = vld [vmem:[%s23883_s3 + $0xd0] sm:$0xff] }
 0xc20   : > { %22003 = vmatpush3.bf16.msra.mxu1 %v25402_v9  ;;  %20458 = vmatprep.mubr.msk.f32.mxu1 %vm28094_vm4, %v24344_v42  ;;  %v23700_v9 = vld [vmem:[%s23883_s3 + $0x118] sm:$0xff] }
 0xc21   : > { %20480 = vmatprep.mubr.msk.f32.mxu0 %vm28094_vm4, %v24344_v42  ;;  %22005 = vmatprep.subr.bf16.mxu1 %v25412_v16  ;;  %v23694_v42 = vld [vmem:[%s23883_s3 + $0xe8] sm:$0xff] }
 0xc23   : > { %20459 = vmatmul.mubr.msk.f32.gmra.mrb[126].mxu1 %vm28094_vm4, %v24342_v39  ;;  %20481 = vmatmul.mubr.msk.f32.gmra.mrb[142].mxu0 %vm28094_vm4, %v24342_v39  ;;  %v23693_v39 = vld [vmem:[%s23883_s3 + $0xe0] sm:$0xff] }
 0xc24   : > { %22007 = vmatpush3.bf16.msra.mxu1 %v25412_v16  ;;  %20461 = vmatprep.mubr.msk.f32.mxu1 %vm28094_vm4, %v24348_v11 }
 0xc25   : > { %20483 = vmatprep.mubr.msk.f32.mxu0 %vm28094_vm4, %v24348_v11  ;;  %22009 = vmatprep.subr.bf16.mxu1 %v25422_v22  ;;  %v23690_v11 = vld [vmem:[%s23883_s3 + $0xc8] sm:$0xff] }
 0xc27   : > { %20462 = vmatmul.mubr.msk.f32.gmra.mrb[128].mxu1 %vm28094_vm4, %v24346_v54  ;;  %20484 = vmatmul.mubr.msk.f32.gmra.mrb[144].mxu0 %vm28094_vm4, %v24346_v54  ;;  %v23695_v54 = vld [vmem:[%s23883_s3 + $0xf0] sm:$0xff] }
 0xc28   : > { %22011 = vmatpush3.bf16.msra.mxu1 %v25422_v22  ;;  %20510 = vmatprep.mubr.msk.f32.mxu1 %vm2066_vm3, %v23689_v8 }
 0xc29   : > { %22013 = vmatprep.subr.bf16.mxu1 %v22012_v0 }
 0xc2b   : > { %20511 = vmatmul.mubr.msk.f32.vlgmr.msra.gmra.mrb[130].mxu1 %vm2066_vm3, %v23690_v11 }
 0xc2c   : > { %20513 = vmatprep.mubr.msk.f32.mxu1 %vm2066_vm3, %v23691_v14  ;;  %22015 = vmatpush3.bf16.msra.mxu1 %v22012_v0 }
 0xc2d   : > { %22045 = vmatprep.subr.bf16.mxu1 %v22044_v51 }
 0xc2f   : > { %20514 = vmatmul.mubr.msk.f32.gmra.mrb[132].mxu1 %vm2066_vm3, %v23692_v36 }
 0xc30   : > { %20516 = vmatprep.mubr.msk.f32.mxu1 %vm2066_vm3, %v23693_v39 }
 0xc33   : > { %20517 = vmatmul.mubr.msk.f32.gmra.mrb[134].mxu1 %vm2066_vm3, %v23694_v42 }
 0xc34   : > { %20519 = vmatprep.mubr.msk.f32.mxu1 %vm2066_vm3, %v23695_v54 }
 0xc37   : > { %20520 = vmatmul.mubr.msk.f32.gmra.mrb[136].mxu1 %vm2066_vm3, %v23696_v53 }
 0xc38   : > { %20522 = vmatprep.mubr.msk.f32.mxu1 %vm2066_vm3, %v23697_v44 }
 0xc3b   : > { %20523 = vmatmul.mubr.msk.f32.gmra.mrb[138].mxu1 %vm2066_vm3, %v23698_v1 }
 0xc3c   : > { %20525 = vmatprep.mubr.msk.f32.mxu1 %vm2066_vm3, %v23699_v59 }
 0xc3f   : > { %20526 = vmatmul.mubr.msk.f32.gmra.mrb[140].mxu1 %vm2066_vm3, %v23700_v9 }
 0xcfe   : > { %v20512_v16 = vpop.f32.mrb[130].mxu1 }
 0xcff   : > { %v8278_v22 = vpop.f32.mrb[131].mxu1 }
 0xd00   : > { %20532 = vmatprep.mubr.msk.f32.mxu1 %vm28094_vm4, %v8278_v22  ;;  %20554 = vmatprep.mubr.msk.f32.mxu0 %vm28094_vm4, %v8278_v22 }
 0xd01   : > { %20533 = vmatmul.mubr.msk.f32.vlgmr.msra.gmra.mrb[118].mxu1 %vm28094_vm4, %v20512_v16  ;;  %20555 = vmatmul.mubr.msk.f32.vlgmr.msra.gmra.mrb[134].mxu0 %vm28094_vm4, %v20512_v16 }
 0xd02   : > { %v20515_v21 = vpop.f32.mrb[132].mxu1  ;;  %22047 = vmatpush3.bf16.msra.mxu1 %v22044_v51 }
 0xd03   : > { %v8288_v15 = vpop.f32.mrb[133].mxu1 }
 0xd04   : > { %20535 = vmatprep.mubr.msk.f32.mxu1 %vm28094_vm4, %v8288_v15  ;;  %20557 = vmatprep.mubr.msk.f32.mxu0 %vm28094_vm4, %v8288_v15 }
 0xd05   : > { %20536 = vmatmul.mubr.msk.f32.gmra.mrb[120].mxu1 %vm28094_vm4, %v20515_v21  ;;  %20558 = vmatmul.mubr.msk.f32.gmra.mrb[136].mxu0 %vm28094_vm4, %v20515_v21 }
 0xd06   : > { %v20518_v40 = vpop.f32.mrb[134].mxu1 }
 0xd07   : > { %v8298_v56 = vpop.f32.mrb[135].mxu1 }
 0xd08   : > { %20538 = vmatprep.mubr.msk.f32.mxu1 %vm28094_vm4, %v8298_v56  ;;  %20560 = vmatprep.mubr.msk.f32.mxu0 %vm28094_vm4, %v8298_v56 }
 0xd09   : > { %20539 = vmatmul.mubr.msk.f32.gmra.mrb[122].mxu1 %vm28094_vm4, %v20518_v40  ;;  %20561 = vmatmul.mubr.msk.f32.gmra.mrb[138].mxu0 %vm28094_vm4, %v20518_v40 }
 0xd0a   : > { %v20521_v60 = vpop.f32.mrb[136].mxu1 }
 0xd0b   : > { %v8308_v49 = vpop.f32.mrb[137].mxu1 }
 0xd0c   : > { %20541 = vmatprep.mubr.msk.f32.mxu1 %vm28094_vm4, %v8308_v49  ;;  %20563 = vmatprep.mubr.msk.f32.mxu0 %vm28094_vm4, %v8308_v49 }
 0xd0d   : > { %20542 = vmatmul.mubr.msk.f32.gmra.mrb[124].mxu1 %vm28094_vm4, %v20521_v60  ;;  %20564 = vmatmul.mubr.msk.f32.gmra.mrb[140].mxu0 %vm28094_vm4, %v20521_v60 }
 0xd0e   : > { %v20524_v6 = vpop.f32.mrb[138].mxu1 }
 0xd0f   : > { %v8318_v37 = vpop.f32.mrb[139].mxu1 }
 0xd10   : > { %20544 = vmatprep.mubr.msk.f32.mxu1 %vm28094_vm4, %v8318_v37  ;;  %20566 = vmatprep.mubr.msk.f32.mxu0 %vm28094_vm4, %v8318_v37 }
 0xd11   : > { %20545 = vmatmul.mubr.msk.f32.gmra.mrb[126].mxu1 %vm28094_vm4, %v20524_v6  ;;  %20567 = vmatmul.mubr.msk.f32.gmra.mrb[142].mxu0 %vm28094_vm4, %v20524_v6 }
 0xd12   : > { %v20527_v7 = vpop.f32.mrb[140].mxu1 }
 0xd13   : > { %v8328_v45 = vpop.f32.mrb[141].mxu1 }
 0xd14   : > { %20547 = vmatprep.mubr.msk.f32.mxu1 %vm28094_vm4, %v8328_v45  ;;  %20569 = vmatprep.mubr.msk.f32.mxu0 %vm28094_vm4, %v8328_v45 }
 0xd15   : > { %20548 = vmatmul.mubr.msk.f32.gmra.mrb[128].mxu1 %vm28094_vm4, %v20527_v7  ;;  %20570 = vmatmul.mubr.msk.f32.gmra.mrb[144].mxu0 %vm28094_vm4, %v20527_v7 }
 0xd16   : > { %20596 = vmatprep.mubr.msk.f32.mxu0 %vm2066_vm3, %v23701_v25 }
 0xdd4   : > { %v25708_v28 = vpop.f32.mrb[118].mxu1  ;;  %v20556_v3 = vpop.f32.mrb[134].mxu0 }
 0xdd5   : > { %v22518_v5 = vadd.f32 %v20556_v3, %v25706_v17  ;;  %v25711_v47 = vpop.f32.mrb[119].mxu1  ;;  %v8582_v55 = vpop.f32.mrb[135].mxu0 }
 0xdd6   : > { %v22519_v63 = vadd.f32 %v25706_v17, %v8582_v55 }
 0xdd7   : > { %v17436_v27 = vmul.f32 -1.442695, %v22518_v5 }
 0xdd8   : > { %v17435_v48 = vmul.f32 -1.442695, %v22519_v63  ;;  %v25714_v58 = vpop.f32.mrb[120].mxu1  ;;  %v20559_v0 = vpop.f32.mrb[136].mxu0 }
 0xdd9   : > { %23196 = vpow2.f32 %v17436_v27  ;;  %v22520_v8 = vadd.f32 %v20559_v0, %v25706_v17  ;;  %v25717_v11 = vpop.f32.mrb[121].mxu1  ;;  %v8592_v14 = vpop.f32.mrb[137].mxu0 }
 0xdda   : > { %23198 = vpow2.f32 %v17435_v48  ;;  %v22521_v36 = vadd.f32 %v25706_v17, %v8592_v14 }
 0xddb   : > { %v17438_v39 = vmul.f32 -1.442695, %v22520_v8 }
 0xddc   : > { %v17437_v42 = vmul.f32 -1.442695, %v22521_v36  ;;  %v25720_v54 = vpop.f32.mrb[122].mxu1  ;;  %v20562_v53 = vpop.f32.mrb[138].mxu0 }
 0xddd   : > { %23200 = vpow2.f32 %v17438_v39  ;;  %v22522_v44 = vadd.f32 %v20562_v53, %v25706_v17  ;;  %v25723_v1 = vpop.f32.mrb[123].mxu1  ;;  %v8602_v59 = vpop.f32.mrb[139].mxu0 }
 0xdde   : > { %23202 = vpow2.f32 %v17437_v42  ;;  %v22523_v9 = vadd.f32 %v25706_v17, %v8602_v59 }
 0xddf   : > { %v17440_v16 = vmul.f32 -1.442695, %v22522_v44 }
 0xde0   : > { %v17439_v22 = vmul.f32 -1.442695, %v22523_v9  ;;  %v25726_v21 = vpop.f32.mrb[124].mxu1  ;;  %v20565_v15 = vpop.f32.mrb[140].mxu0 }
 0xde1   : > { %23204 = vpow2.f32 %v17440_v16  ;;  %v22524_v40 = vadd.f32 %v20565_v15, %v25706_v17  ;;  %v25729_v56 = vpop.f32.mrb[125].mxu1  ;;  %v8612_v60 = vpop.f32.mrb[141].mxu0 }
 0xde2   : > { %23206 = vpow2.f32 %v17439_v22  ;;  %v22525_v49 = vadd.f32 %v25706_v17, %v8612_v60 }
 0xde3   : > { %v23197_v6 = vpop.eup %23196  ;;  %v17442_v37 = vmul.f32 -1.442695, %v22524_v40  ;;  %v25745_v40 = vld [vmem:[%s23923_s20 + $0xa] ss:$0 sm:$0xff] }
 0xde4   : > { %v23199_v7 = vpop.eup %23198  ;;  %v8690_v45 = vadd.f32 1.0, %v23197_v6  ;;  %v17441_v25 = vmul.f32 -1.442695, %v22525_v49  ;;  %v25732_v13 = vpop.f32.mrb[126].mxu1 }
 0xde5   : > { %v20568_v2 = vpop.f32.mrb[142].mxu0  ;;  %v8689_v51 = vadd.f32 1.0, %v23199_v7  ;;  %23208 = vpow2.f32 %v17442_v37  ;;  %v25735_v5 = vpop.f32.mrb[127].mxu1  ;;  %v22506_v7 = vadd.f32 %v25708_v28, %v25745_v40 }
 0xde6   : > { %v22526_v3 = vadd.f32 %v20568_v2, %v25706_v17  ;;  %v8622_v55 = vpop.f32.mrb[143].mxu0  ;;  %23210 = vrcp.f32 %v8690_v45 }
 0xde7   : > { %v22527_v63 = vadd.f32 %v25706_v17, %v8622_v55  ;;  %v23201_v27 = vpop.eup %23200  ;;  %23212 = vrcp.f32 %v8689_v51 }
 0xde8   : > { %v17444_v48 = vmul.f32 -1.442695, %v22526_v3  ;;  %v23203_v0 = vpop.eup %23202  ;;  %v8692_v8 = vadd.f32 1.0, %v23201_v27  ;;  %23214 = vpow2.f32 %v17441_v25  ;;  %v25738_v36 = vpop.f32.mrb[128].mxu1  ;;  %v22508_v27 = vadd.f32 %v25714_v58, %v25745_v40 }
 0xde9   : > { %v17443_v14 = vmul.f32 -1.442695, %v22527_v63  ;;  %v20571_v39 = vpop.f32.mrb[144].mxu0  ;;  %v8691_v42 = vadd.f32 1.0, %v23203_v0  ;;  %v25741_v44 = vpop.f32.mrb[129].mxu1  ;;  %v22509_v0 = vadd.f32 %v25745_v40, %v25717_v11 }
 0xdea   : > { %23216 = vpow2.f32 %v17444_v48  ;;  %v22528_v53 = vadd.f32 %v20571_v39, %v25706_v17  ;;  %v8632_v59 = vpop.f32.mrb[145].mxu0 }
 0xdeb   : > { %23218 = vrcp.f32 %v8692_v8  ;;  %v22529_v9 = vadd.f32 %v25706_v17, %v8632_v59  ;;  %v23205_v16 = vpop.eup %23204  ;;  %v22507_v17 = vadd.f32 %v25745_v40, %v25711_v47  ;;  %v22510_v59 = vadd.f32 %v25720_v54, %v25745_v40 }
 0xdec   : > { %23220 = vrcp.f32 %v8691_v42  ;;  %v17446_v22 = vmul.f32 -1.442695, %v22528_v53  ;;  %v23207_v15 = vpop.eup %23206  ;;  %v8694_v60 = vadd.f32 1.0, %v23205_v16  ;;  %v22511_v16 = vadd.f32 %v25745_v40, %v25723_v1 }
 0xded   : > { %23222 = vpow2.f32 %v17443_v14  ;;  %v17445_v49 = vmul.f32 -1.442695, %v22529_v9  ;;  %v8693_v6 = vadd.f32 1.0, %v23207_v15 }
 0xdee   : > { %23224 = vpow2.f32 %v17446_v22 }
 0xdef   : > { %23226 = vrcp.f32 %v8694_v60  ;;  %v23209_v37 = vpop.eup %23208 }
 0xdf0   : > { %23228 = vrcp.f32 %v8693_v6  ;;  %v23211_v45 = vpop.eup %23210  ;;  %v8696_v25 = vadd.f32 1.0, %v23209_v37  ;;  %v22512_v37 = vadd.f32 %v25726_v21, %v25745_v40  ;;  %v22514_v21 = vadd.f32 %v25732_v13, %v25745_v40 }
 0xdf1   : > { %23230 = vpow2.f32 %v17445_v49  ;;  %v23213_v2 = vpop.eup %23212  ;;  %v25751_v51 = vmul.f32 %v23211_v45, %v22506_v7  ;;  %v22516_v13 = vadd.f32 %v25738_v36, %v25745_v40  ;;  %v17476_v36 = vld [vmem:[%s23918_s12 + $0x210] sm:$0xff] }
 0xdf2   : > { %v23215_v3 = vpop.eup %23214  ;;  %23232 = vrcp.f32 %v8696_v25  ;;  %v25753_v55 = vmul.f32 %v23213_v2, %v22507_v17  ;;  %v22513_v25 = vadd.f32 %v25745_v40, %v25729_v56 }
 0xdf3   : > { %v8695_v48 = vadd.f32 1.0, %v23215_v3 }
 0xdf4   : > { %v23217_v63 = vpop.eup %23216  ;;  %v25761_v47 = vpack.c.bf16 %v25751_v51, %v25753_v55 }
 0xdf5   : > { %v23219_v28 = vpop.eup %23218  ;;  %v8698_v8 = vadd.f32 1.0, %v23217_v63  ;;  %23234 = vrcp.f32 %v8695_v48  ;;  %v22515_v48 = vadd.f32 %v25745_v40, %v25735_v5  ;;  %v22517_v5 = vadd.f32 %v25745_v40, %v25741_v44  ;;  %v23702_v40 = vld [vmem:[%s23883_s3 + $0x128] sm:$0xff] }
 0xdf6   : > { %v23221_v14 = vpop.eup %23220  ;;  %v25763_v39 = vmul.f32 %v23219_v28, %v22508_v27  ;;  %22021 = vmatprep.subr.bf16.mxu0 %v25761_v47 }
 0xdf7   : > { %v23223_v42 = vpop.eup %23222  ;;  %23236 = vrcp.f32 %v8698_v8  ;;  %v25766_v53 = vmul.f32 %v23221_v14, %v22509_v0  ;;  %22023 = vmatpush3.bf16.msra.mxu0 %v25761_v47 }
 0xdf8   : > { %v23225_v58 = vpop.eup %23224  ;;  %v8697_v11 = vadd.f32 1.0, %v23223_v42 }
 0xdf9   : > { %v23227_v9 = vpop.eup %23226  ;;  %v8700_v22 = vadd.f32 1.0, %v23225_v58  ;;  %v25775_v15 = vpack.c.bf16 %v25763_v39, %v25766_v53 }
 0xdfa   : > { %v23229_v60 = vpop.eup %23228  ;;  %23238 = vrcp.f32 %v8697_v11  ;;  %v25777_v49 = vmul.f32 %v23227_v9, %v22510_v59  ;;  %v17477_v59 = vld [vmem:[%s23918_s12 + $0x218] sm:$0xff] }
 0xdfb   : > { %v23231_v6 = vpop.eup %23230  ;;  %23240 = vrcp.f32 %v8700_v22  ;;  %22025 = vmatprep.subr.bf16.mxu0 %v25775_v15  ;;  %v25780_v54 = vmul.f32 %v23229_v60, %v22511_v16  ;;  %v22048_v44 = vpack.c.bf16 %v17477_v59, %v17476_v36  ;;  %v23703_v16 = vld [vmem:[%s23883_s3 + $0x130] sm:$0xff]  ;;  %v23704_v22 = vld [vmem:[%s23883_s3 + $0x138] sm:$0xff]  ;;  %v23705_v60 = vld [vmem:[%s23883_s3 + $0x140] sm:$0xff] }
 0xdfc   : > { %v8699_v7 = vadd.f32 1.0, %v23231_v6  ;;  %22027 = vmatpush3.bf16.msra.mxu0 %v25775_v15  ;;  %v23233_v1 = vpop.eup %23232  ;;  %v23706_v6 = vld [vmem:[%s23883_s3 + $0x148] sm:$0xff]  ;;  %v17546_v36 = vld [vmem:[%s23918_s12 + $0x238] sm:$0xff] }
 0xdfd   : > { %v25787_v45 = vpack.c.bf16 %v25777_v49, %v25780_v54  ;;  %v25789_v17 = vmul.f32 %v23233_v1, %v22512_v37  ;;  %v23707_v37 = vld [vmem:[%s23883_s3 + $0x150] sm:$0xff]  ;;  %v23709_v1 = vld [vmem:[%s23883_s3 + $0x160] sm:$0xff] }
 0xdfe   : > { %23242 = vrcp.f32 %v8699_v7  ;;  %v23708_v7 = vld [vmem:[%s23883_s3 + $0x158] sm:$0xff] }
 0xdff   : > { %22029 = vmatprep.subr.bf16.mxu0 %v25787_v45  ;;  %v23235_v2 = vpop.eup %23234 }
 0xe00   : > { %22031 = vmatpush3.bf16.msra.mxu0 %v25787_v45  ;;  %v25797_v63 = vmul.f32 %v23235_v2, %v22513_v25  ;;  %v23710_v25 = vld [vmem:[%s23883_s3 + $0x168] sm:$0xff]  ;;  %v23711_v2 = vld [vmem:[%s23883_s3 + $0x170] sm:$0xff] }
 0xe01   : > { %v23237_v3 = vpop.eup %23236 }
 0xe02   : > { %v25799_v27 = vmul.f32 %v23237_v3, %v22514_v21  ;;  %v25805_v56 = vpack.c.bf16 %v25789_v17, %v25797_v63  ;;  %v23712_v21 = vld [vmem:[%s23883_s3 + $0x178] sm:$0xff]  ;;  %v17491_v3 = vld [vmem:[%s23913_s6 + $0x220] sm:$0xff] }
 0xe04   : > { %v23239_v28 = vpop.eup %23238  ;;  %22033 = vmatprep.subr.bf16.mxu0 %v25805_v56 }
 0xe05   : > { %v23241_v0 = vpop.eup %23240  ;;  %v25810_v8 = vmul.f32 %v23239_v28, %v22515_v48  ;;  %22035 = vmatpush3.bf16.msra.mxu0 %v25805_v56  ;;  %v17492_v48 = vld [vmem:[%s23913_s6 + $0x228] sm:$0xff] }
 0xe06   : > { %v25813_v14 = vmul.f32 %v23241_v0, %v22516_v13  ;;  %v22052_v28 = vpack.c.bf16 %v17492_v48, %v17491_v3  ;;  %v17505_v13 = vld [vmem:[%s23918_s12 + $0x220] sm:$0xff]  ;;  %v17506_v0 = vld [vmem:[%s23918_s12 + $0x228] sm:$0xff] }
 0xe07   : > { %v25819_v42 = vpack.c.bf16 %v25799_v27, %v25810_v8  ;;  %v17587_v3 = vld [vmem:[%s23933_s4 + $0x40] sm:$0xff]  ;;  %v17588_v48 = vld [vmem:[%s23933_s4 + $0x48] sm:$0xff] }
 0xe08   : > { %v23243_v58 = vpop.eup %23242  ;;  %22053 = vmatprep.subr.bf16.mxu1 %v22052_v28 }
 0xe09   : > { %22037 = vmatprep.subr.bf16.mxu0 %v25819_v42  ;;  %v25824_v11 = vmul.f32 %v23243_v58, %v22517_v5  ;;  %v22056_v5 = vpack.c.bf16 %v17506_v0, %v17505_v13  ;;  %v17545_v58 = vld [vmem:[%s23918_s12 + $0x230] sm:$0xff]  ;;  %v22096_v0 = vpack.c.bf16 %v17588_v48, %v17587_v3 }
 0xe0a   : > { %22039 = vmatpush3.bf16.msra.mxu0 %v25819_v42 }
 0xe0b   : > { %v25829_v9 = vpack.c.bf16 %v25813_v14, %v25824_v11 }
 0xe0d   : > { %22041 = vmatprep.subr.bf16.mxu0 %v25829_v9 }
 0xe0e   : > { %22043 = vmatpush3.bf16.msra.mxu0 %v25829_v9 }
 0xe0f   : > { %22049 = vmatprep.subr.bf16.mxu0 %v22048_v44 }
 0xe11   : > { %20597 = vmatmul.mubr.msk.f32.vlgmr.msra.gmra.mrb[146].mxu0 %vm2066_vm3, %v23702_v40  ;;  %v22088_v40 = vpack.c.bf16 %v17546_v36, %v17545_v58 }
 0xe12   : > { %20599 = vmatprep.mubr.msk.f32.mxu0 %vm2066_vm3, %v23703_v16  ;;  %22051 = vmatpush3.bf16.msra.mxu0 %v22048_v44 }
 0xe13   : > { %22057 = vmatprep.subr.bf16.mxu0 %v22056_v5 }
 0xe15   : > { %20600 = vmatmul.mubr.msk.f32.gmra.mrb[148].mxu0 %vm2066_vm3, %v23704_v22 }
 0xe16   : > { %20602 = vmatprep.mubr.msk.f32.mxu0 %vm2066_vm3, %v23705_v60 }
 0xe19   : > { %20603 = vmatmul.mubr.msk.f32.gmra.mrb[150].mxu0 %vm2066_vm3, %v23706_v6 }
 0xe1a   : > { %20605 = vmatprep.mubr.msk.f32.mxu0 %vm2066_vm3, %v23707_v37 }
 0xe1d   : > { %20606 = vmatmul.mubr.msk.f32.gmra.mrb[152].mxu0 %vm2066_vm3, %v23708_v7 }
 0xe1e   : > { %20608 = vmatprep.mubr.msk.f32.mxu0 %vm2066_vm3, %v23709_v1 }
 0xe21   : > { %20609 = vmatmul.mubr.msk.f32.gmra.mrb[154].mxu0 %vm2066_vm3, %v23710_v25 }
 0xe22   : > { %20611 = vmatprep.mubr.msk.f32.mxu0 %vm2066_vm3, %v23711_v2 }
 0xe25   : > { %20612 = vmatmul.mubr.msk.f32.gmra.mrb[156].mxu0 %vm2066_vm3, %v23712_v21 }
 0xee4   : > { %v20598_v59 = vpop.f32.mrb[146].mxu0 }
 0xee5   : > { %v8807_v44 = vpop.f32.mrb[147].mxu0 }
 0xee6   : > { %20618 = vmatprep.mubr.msk.f32.mxu1 %vm28094_vm4, %v8807_v44  ;;  %20640 = vmatprep.mubr.msk.f32.mxu0 %vm28094_vm4, %v8807_v44 }
 0xee7   : > { %20619 = vmatmul.mubr.msk.f32.vlgmr.msra.gmra.mrb[142].mxu1 %vm28094_vm4, %v20598_v59  ;;  %20641 = vmatmul.mubr.msk.f32.vlgmr.msra.gmra.mrb[158].mxu0 %vm28094_vm4, %v20598_v59 }
 0xee8   : > { %22055 = vmatpush3.bf16.msra.mxu1 %v22052_v28  ;;  %v20601_v16 = vpop.f32.mrb[148].mxu0  ;;  %22059 = vmatpush3.bf16.msra.mxu0 %v22056_v5 }
 0xee9   : > { %22061 = vmatprep.subr.bf16.mxu1 %v25761_v47  ;;  %v8817_v22 = vpop.f32.mrb[149].mxu0  ;;  %22089 = vmatprep.subr.bf16.mxu0 %v22088_v40 }
 0xeea   : > { %20621 = vmatprep.mubr.msk.f32.mxu1 %vm28094_vm4, %v8817_v22  ;;  %20643 = vmatprep.mubr.msk.f32.mxu0 %vm28094_vm4, %v8817_v22 }
 0xeeb   : > { %20622 = vmatmul.mubr.msk.f32.gmra.mrb[144].mxu1 %vm28094_vm4, %v20601_v16  ;;  %20644 = vmatmul.mubr.msk.f32.gmra.mrb[160].mxu0 %vm28094_vm4, %v20601_v16 }
 0xeec   : > { %v20604_v60 = vpop.f32.mrb[150].mxu0 }
 0xeed   : > { %v8827_v6 = vpop.f32.mrb[151].mxu0 }
 0xeee   : > { %20624 = vmatprep.mubr.msk.f32.mxu1 %vm28094_vm4, %v8827_v6  ;;  %20646 = vmatprep.mubr.msk.f32.mxu0 %vm28094_vm4, %v8827_v6 }
 0xeef   : > { %20625 = vmatmul.mubr.msk.f32.gmra.mrb[146].mxu1 %vm28094_vm4, %v20604_v60  ;;  %20647 = vmatmul.mubr.msk.f32.gmra.mrb[162].mxu0 %vm28094_vm4, %v20604_v60 }
 0xef0   : > { %v20607_v37 = vpop.f32.mrb[152].mxu0 }
 0xef1   : > { %v8837_v7 = vpop.f32.mrb[153].mxu0 }
 0xef2   : > { %20627 = vmatprep.mubr.msk.f32.mxu1 %vm28094_vm4, %v8837_v7  ;;  %20649 = vmatprep.mubr.msk.f32.mxu0 %vm28094_vm4, %v8837_v7 }
 0xef3   : > { %20628 = vmatmul.mubr.msk.f32.gmra.mrb[148].mxu1 %vm28094_vm4, %v20607_v37  ;;  %20650 = vmatmul.mubr.msk.f32.gmra.mrb[164].mxu0 %vm28094_vm4, %v20607_v37 }
 0xef4   : > { %v20610_v1 = vpop.f32.mrb[154].mxu0 }
 0xef5   : > { %v8847_v25 = vpop.f32.mrb[155].mxu0 }
 0xef6   : > { %20630 = vmatprep.mubr.msk.f32.mxu1 %vm28094_vm4, %v8847_v25  ;;  %20652 = vmatprep.mubr.msk.f32.mxu0 %vm28094_vm4, %v8847_v25 }
 0xef7   : > { %20631 = vmatmul.mubr.msk.f32.gmra.mrb[150].mxu1 %vm28094_vm4, %v20610_v1  ;;  %20653 = vmatmul.mubr.msk.f32.gmra.mrb[166].mxu0 %vm28094_vm4, %v20610_v1 }
 0xef8   : > { %v20613_v2 = vpop.f32.mrb[156].mxu0 }
 0xef9   : > { %v8857_v21 = vpop.f32.mrb[157].mxu0 }
 0xefa   : > { %20633 = vmatprep.mubr.msk.f32.mxu1 %vm28094_vm4, %v8857_v21  ;;  %20655 = vmatprep.mubr.msk.f32.mxu0 %vm28094_vm4, %v8857_v21 }
 0xefb   : > { %20634 = vmatmul.mubr.msk.f32.gmra.mrb[152].mxu1 %vm28094_vm4, %v20613_v2  ;;  %20656 = vmatmul.mubr.msk.f32.gmra.mrb[168].mxu0 %vm28094_vm4, %v20613_v2 }
 0xefc   : > { %20662 = vmatprep.mubr.msk.f32.mxu1 %vm28094_vm4, %v25753_v55  ;;  %20684 = vmatprep.mubr.msk.f32.mxu0 %vm28094_vm4, %v25753_v55  ;;  %v17532_v55 = vld [vmem:[%s23913_s6 + $0x238] sm:$0xff] }
 0xeff   : > { %20663 = vmatmul.mubr.msk.f32.vlgmr.msra.gmra.mrb[142].mxu1 %vm28094_vm4, %v25751_v51  ;;  %20685 = vmatmul.mubr.msk.f32.vlgmr.msra.gmra.mrb[158].mxu0 %vm28094_vm4, %v25751_v51  ;;  %v17531_v51 = vld [vmem:[%s23913_s6 + $0x230] sm:$0xff] }
 0xf00   : > { %22063 = vmatpush3.bf16.msra.mxu1 %v25761_v47  ;;  %20665 = vmatprep.mubr.msk.f32.mxu1 %vm28094_vm4, %v25766_v53  ;;  %v22084_v47 = vpack.c.bf16 %v17532_v55, %v17531_v51 }
 0xf01   : > { %20687 = vmatprep.mubr.msk.f32.mxu0 %vm28094_vm4, %v25766_v53  ;;  %22065 = vmatprep.subr.bf16.mxu1 %v25775_v15  ;;  %v23714_v53 = vld [vmem:[%s23883_s3 + $0x1e8] sm:$0xff] }
 0xf02   : > { %22091 = vmatpush3.bf16.msra.mxu0 %v22088_v40 }
 0xf03   : > { %20666 = vmatmul.mubr.msk.f32.gmra.mrb[144].mxu1 %vm28094_vm4, %v25763_v39  ;;  %20688 = vmatmul.mubr.msk.f32.gmra.mrb[160].mxu0 %vm28094_vm4, %v25763_v39  ;;  %v23713_v39 = vld [vmem:[%s23883_s3 + $0x1e0] sm:$0xff] }
 0xf04   : > { %22067 = vmatpush3.bf16.msra.mxu1 %v25775_v15  ;;  %20668 = vmatprep.mubr.msk.f32.mxu1 %vm28094_vm4, %v25780_v54  ;;  %v23715_v15 = vld [vmem:[%s23883_s3 + $0x1f0] sm:$0xff] }
 0xf05   : > { %20690 = vmatprep.mubr.msk.f32.mxu0 %vm28094_vm4, %v25780_v54  ;;  %22069 = vmatprep.subr.bf16.mxu1 %v25787_v45  ;;  %v23717_v54 = vld [vmem:[%s23883_s3 + $0x200] sm:$0xff] }
 0xf07   : > { %20669 = vmatmul.mubr.msk.f32.gmra.mrb[146].mxu1 %vm28094_vm4, %v25777_v49  ;;  %20691 = vmatmul.mubr.msk.f32.gmra.mrb[162].mxu0 %vm28094_vm4, %v25777_v49  ;;  %v23716_v49 = vld [vmem:[%s23883_s3 + $0x1f8] sm:$0xff] }
 0xf08   : > { %22071 = vmatpush3.bf16.msra.mxu1 %v25787_v45  ;;  %20671 = vmatprep.mubr.msk.f32.mxu1 %vm28094_vm4, %v25797_v63  ;;  %v23718_v45 = vld [vmem:[%s23883_s3 + $0x208] sm:$0xff] }
 0xf09   : > { %20693 = vmatprep.mubr.msk.f32.mxu0 %vm28094_vm4, %v25797_v63  ;;  %22073 = vmatprep.subr.bf16.mxu1 %v25805_v56  ;;  %v23720_v63 = vld [vmem:[%s23883_s3 + $0x218] sm:$0xff] }
 0xf0b   : > { %20672 = vmatmul.mubr.msk.f32.gmra.mrb[148].mxu1 %vm28094_vm4, %v25789_v17  ;;  %20694 = vmatmul.mubr.msk.f32.gmra.mrb[164].mxu0 %vm28094_vm4, %v25789_v17  ;;  %v23719_v17 = vld [vmem:[%s23883_s3 + $0x210] sm:$0xff] }
 0xf0c   : > { %22075 = vmatpush3.bf16.msra.mxu1 %v25805_v56  ;;  %20674 = vmatprep.mubr.msk.f32.mxu1 %vm28094_vm4, %v25810_v8  ;;  %v23722_v56 = vld [vmem:[%s23883_s3 + $0x228] sm:$0xff] }
 0xf0d   : > { %20696 = vmatprep.mubr.msk.f32.mxu0 %vm28094_vm4, %v25810_v8  ;;  %22077 = vmatprep.subr.bf16.mxu1 %v25819_v42  ;;  %v23723_v8 = vld [vmem:[%s23883_s3 + $0x230] sm:$0xff] }
 0xf0f   : > { %20675 = vmatmul.mubr.msk.f32.gmra.mrb[150].mxu1 %vm28094_vm4, %v25799_v27  ;;  %20697 = vmatmul.mubr.msk.f32.gmra.mrb[166].mxu0 %vm28094_vm4, %v25799_v27  ;;  %v23721_v27 = vld [vmem:[%s23883_s3 + $0x220] sm:$0xff] }
 0xf10   : > { %22079 = vmatpush3.bf16.msra.mxu1 %v25819_v42  ;;  %20677 = vmatprep.mubr.msk.f32.mxu1 %vm28094_vm4, %v25824_v11  ;;  %v17572_v42 = vld [vmem:[%s23933_s4 + $0x30] sm:$0xff] }
 0xf11   : > { %20699 = vmatprep.mubr.msk.f32.mxu0 %vm28094_vm4, %v25824_v11  ;;  %22081 = vmatprep.subr.bf16.mxu1 %v25829_v9  ;;  %v17573_v11 = vld [vmem:[%s23933_s4 + $0x38] sm:$0xff] }
 0xf13   : > { %20678 = vmatmul.mubr.msk.f32.gmra.mrb[152].mxu1 %vm28094_vm4, %v25813_v14  ;;  %20700 = vmatmul.mubr.msk.f32.gmra.mrb[168].mxu0 %vm28094_vm4, %v25813_v14  ;;  %v23724_v14 = vld [vmem:[%s23883_s3 + $0x238] sm:$0xff] }
 0xf14   : > { %22083 = vmatpush3.bf16.msra.mxu1 %v25829_v9  ;;  %20726 = vmatprep.mubr.msk.f32.mxu1 %vm2066_vm3, %v23713_v39  ;;  %v22092_v9 = vpack.c.bf16 %v17573_v11, %v17572_v42 }
 0xf15   : > { %22085 = vmatprep.subr.bf16.mxu1 %v22084_v47 }
 0xf16   : > { %22093 = vmatprep.subr.bf16.mxu0 %v22092_v9 }
 0xf17   : > { %20727 = vmatmul.mubr.msk.f32.vlgmr.msra.gmra.mrb[154].mxu1 %vm2066_vm3, %v23714_v53 }
 0xf18   : > { %20729 = vmatprep.mubr.msk.f32.mxu1 %vm2066_vm3, %v23715_v15  ;;  %22087 = vmatpush3.bf16.msra.mxu1 %v22084_v47 }
 0xf1b   : > { %20730 = vmatmul.mubr.msk.f32.gmra.mrb[156].mxu1 %vm2066_vm3, %v23716_v49 }
 0xf1c   : > { %20732 = vmatprep.mubr.msk.f32.mxu1 %vm2066_vm3, %v23717_v54 }
 0xf1f   : > { %20733 = vmatmul.mubr.msk.f32.gmra.mrb[158].mxu1 %vm2066_vm3, %v23718_v45 }
 0xf20   : > { %20735 = vmatprep.mubr.msk.f32.mxu1 %vm2066_vm3, %v23719_v17 }
 0xf23   : > { %20736 = vmatmul.mubr.msk.f32.gmra.mrb[160].mxu1 %vm2066_vm3, %v23720_v63 }
 0xf24   : > { %20738 = vmatprep.mubr.msk.f32.mxu1 %vm2066_vm3, %v23721_v27 }
 0xf27   : > { %20739 = vmatmul.mubr.msk.f32.gmra.mrb[162].mxu1 %vm2066_vm3, %v23722_v56 }
 0xf28   : > { %20741 = vmatprep.mubr.msk.f32.mxu1 %vm2066_vm3, %v23723_v8 }
 0xf2b   : > { %20742 = vmatmul.mubr.msk.f32.gmra.mrb[164].mxu1 %vm2066_vm3, %v23724_v14 }
 0xfea   : > { %v20728_v28 = vpop.f32.mrb[154].mxu1 }
 0xfeb   : > { %v9576_v13 = vpop.f32.mrb[155].mxu1 }
 0xfec   : > { %20748 = vmatprep.mubr.msk.f32.mxu1 %vm28094_vm4, %v9576_v13  ;;  %20770 = vmatprep.mubr.msk.f32.mxu0 %vm28094_vm4, %v9576_v13 }
 0xfed   : > { %20749 = vmatmul.mubr.msk.f32.vlgmr.msra.gmra.mrb[142].mxu1 %vm28094_vm4, %v20728_v28  ;;  %20771 = vmatmul.mubr.msk.f32.vlgmr.msra.gmra.mrb[158].mxu0 %vm28094_vm4, %v20728_v28 }
 0xfee   : > { %v20731_v5 = vpop.f32.mrb[156].mxu1  ;;  %22095 = vmatpush3.bf16.msra.mxu0 %v22092_v9 }
 0xfef   : > { %v9586_v58 = vpop.f32.mrb[157].mxu1  ;;  %22097 = vmatprep.subr.bf16.mxu0 %v22096_v0 }
 0xff0   : > { %20751 = vmatprep.mubr.msk.f32.mxu1 %vm28094_vm4, %v9586_v58  ;;  %20773 = vmatprep.mubr.msk.f32.mxu0 %vm28094_vm4, %v9586_v58 }
 0xff1   : > { %20752 = vmatmul.mubr.msk.f32.gmra.mrb[144].mxu1 %vm28094_vm4, %v20731_v5  ;;  %20774 = vmatmul.mubr.msk.f32.gmra.mrb[160].mxu0 %vm28094_vm4, %v20731_v5 }
 0xff2   : > { %v20734_v36 = vpop.f32.mrb[158].mxu1 }
 0xff3   : > { %v9596_v59 = vpop.f32.mrb[159].mxu1 }
 0xff4   : > { %20754 = vmatprep.mubr.msk.f32.mxu1 %vm28094_vm4, %v9596_v59  ;;  %20776 = vmatprep.mubr.msk.f32.mxu0 %vm28094_vm4, %v9596_v59 }
 0xff5   : > { %20755 = vmatmul.mubr.msk.f32.gmra.mrb[146].mxu1 %vm28094_vm4, %v20734_v36  ;;  %20777 = vmatmul.mubr.msk.f32.gmra.mrb[162].mxu0 %vm28094_vm4, %v20734_v36 }
 0xff6   : > { %v20737_v44 = vpop.f32.mrb[160].mxu1 }
 0xff7   : > { %v9606_v40 = vpop.f32.mrb[161].mxu1 }
 0xff8   : > { %20757 = vmatprep.mubr.msk.f32.mxu1 %vm28094_vm4, %v9606_v40  ;;  %20779 = vmatprep.mubr.msk.f32.mxu0 %vm28094_vm4, %v9606_v40 }
 0xff9   : > { %20758 = vmatmul.mubr.msk.f32.gmra.mrb[148].mxu1 %vm28094_vm4, %v20737_v44  ;;  %20780 = vmatmul.mubr.msk.f32.gmra.mrb[164].mxu0 %vm28094_vm4, %v20737_v44 }
 0xffa   : > { %v20740_v16 = vpop.f32.mrb[162].mxu1 }
 0xffb   : > { %v9616_v22 = vpop.f32.mrb[163].mxu1 }
 0xffc   : > { %20760 = vmatprep.mubr.msk.f32.mxu1 %vm28094_vm4, %v9616_v22  ;;  %20782 = vmatprep.mubr.msk.f32.mxu0 %vm28094_vm4, %v9616_v22 }
 0xffd   : > { %20761 = vmatmul.mubr.msk.f32.gmra.mrb[150].mxu1 %vm28094_vm4, %v20740_v16  ;;  %20783 = vmatmul.mubr.msk.f32.gmra.mrb[166].mxu0 %vm28094_vm4, %v20740_v16 }
 0xffe   : > { %v20743_v60 = vpop.f32.mrb[164].mxu1 }
 0xfff   : > { %v9626_v6 = vpop.f32.mrb[165].mxu1 }
0x1000   : > { %20763 = vmatprep.mubr.msk.f32.mxu1 %vm28094_vm4, %v9626_v6  ;;  %20785 = vmatprep.mubr.msk.f32.mxu0 %vm28094_vm4, %v9626_v6 }
0x1001   : > { %20764 = vmatmul.mubr.msk.f32.gmra.mrb[152].mxu1 %vm28094_vm4, %v20743_v60  ;;  %20786 = vmatmul.mubr.msk.f32.gmra.mrb[168].mxu0 %vm28094_vm4, %v20743_v60  ;;  %v26089_v60 = vld [vmem:[%s23923_s20 + $0xb] ss:$0 sm:$0xff] }
0x1002   : > { %20792 = vmatprep.mubr.msk.f32.mxu0 %vm28094_vm4, %v24924_v50  ;;  %v17602_v50 = vld [vmem:[%s23933_s4 + $0x58] sm:$0xff] }
0x1005   : > { %20793 = vmatmul.mubr.msk.f32.vlgmr.msra.gmra.mrb[170].mxu0 %vm28094_vm4, %v24918_v41  ;;  %v17601_v41 = vld [vmem:[%s23933_s4 + $0x50] sm:$0xff] }
0x1006   : > { %20795 = vmatprep.mubr.msk.f32.mxu0 %vm28094_vm4, %v24936_v23  ;;  %22099 = vmatpush3.bf16.msra.mxu0 %v22096_v0  ;;  %v26050_v23 = vld [vmem:[%s23928_s27 + $0xb] ss:$0 sm:$0xff] }
0x1009   : > { %20796 = vmatmul.mubr.msk.f32.gmra.mrb[172].mxu0 %vm28094_vm4, %v24932_v19  ;;  %v22100_v19 = vpack.c.bf16 %v17602_v50, %v17601_v41 }
0x100a   : > { %20798 = vmatprep.mubr.msk.f32.mxu0 %vm28094_vm4, %v24948_v32 }
0x100b   : > { %22101 = vmatprep.subr.bf16.mxu0 %v22100_v19 }
0x100d   : > { %20799 = vmatmul.mubr.msk.f32.gmra.mrb[174].mxu0 %vm28094_vm4, %v24944_v30 }
0x100e   : > { %20801 = vmatprep.mubr.msk.f32.mxu0 %vm28094_vm4, %v24964_v62 }
0x1011   : > { %20802 = vmatmul.mubr.msk.f32.gmra.mrb[176].mxu0 %vm28094_vm4, %v24954_v18 }
0x1012   : > { %20804 = vmatprep.mubr.msk.f32.mxu0 %vm28094_vm4, %v24980_v4 }
0x1015   : > { %20805 = vmatmul.mubr.msk.f32.gmra.mrb[178].mxu0 %vm28094_vm4, %v24966_v20 }
0x1016   : > { %20807 = vmatprep.mubr.msk.f32.mxu0 %vm28094_vm4, %v24993_v24 }
0x1019   : > { %20808 = vmatmul.mubr.msk.f32.gmra.mrb[180].mxu0 %vm28094_vm4, %v24982_v31 }
0x101a   : > { %20814 = vmatprep.mubr.msk.f32.mxu0 %vm28094_vm4, %v25531_v34 }
0x101d   : > { %20815 = vmatmul.mubr.msk.f32.vlgmr.msra.gmra.mrb[170].mxu0 %vm28094_vm4, %v25525_v10 }
0x101e   : > { %20817 = vmatprep.mubr.msk.f32.mxu0 %vm28094_vm4, %v25543_v12  ;;  %22103 = vmatpush3.bf16.msra.mxu0 %v22100_v19 }
0x1021   : > { %20818 = vmatmul.mubr.msk.f32.gmra.mrb[172].mxu0 %vm28094_vm4, %v25539_v33 }
0x1022   : > { %20820 = vmatprep.mubr.msk.f32.mxu0 %vm28094_vm4, %v25555_v57 }
0x1025   : > { %20821 = vmatmul.mubr.msk.f32.gmra.mrb[174].mxu0 %vm28094_vm4, %v25551_v61 }
0x1026   : > { %20823 = vmatprep.mubr.msk.f32.mxu0 %vm28094_vm4, %v25571_v35 }
0x1029   : > { %20824 = vmatmul.mubr.msk.f32.gmra.mrb[176].mxu0 %vm28094_vm4, %v25561_v26 }
0x102a   : > { %20826 = vmatprep.mubr.msk.f32.mxu0 %vm28094_vm4, %v25587_v43 }
0x102d   : > { %20827 = vmatmul.mubr.msk.f32.gmra.mrb[178].mxu0 %vm28094_vm4, %v25573_v29 }
0x102e   : > { %20829 = vmatprep.mubr.msk.f32.mxu0 %vm28094_vm4, %v25600_v38 }
0x1031   : > { %20830 = vmatmul.mubr.msk.f32.gmra.mrb[180].mxu0 %vm28094_vm4, %v25589_v46 }
0x10c0   : > { %v26052_v30 = vpop.f32.mrb[142].mxu1  ;;  %v20772_v32 = vpop.f32.mrb[158].mxu0 }
0x10c1   : > { %v22542_v18 = vadd.f32 %v20772_v32, %v26050_v23  ;;  %v26055_v62 = vpop.f32.mrb[143].mxu1  ;;  %v9880_v20 = vpop.f32.mrb[159].mxu0  ;;  %v22530_v32 = vadd.f32 %v26052_v30, %v26089_v60 }
0x10c2   : > { %v22543_v4 = vadd.f32 %v26050_v23, %v9880_v20 }
0x10c3   : > { %v17560_v31 = vmul.f32 -1.442695, %v22542_v18 }
0x10c4   : > { %v17559_v24 = vmul.f32 -1.442695, %v22543_v4  ;;  %v26058_v10 = vpop.f32.mrb[144].mxu1  ;;  %v20775_v34 = vpop.f32.mrb[160].mxu0 }
0x10c5   : > { %23244 = vpow2.f32 %v17560_v31  ;;  %v22544_v33 = vadd.f32 %v20775_v34, %v26050_v23  ;;  %v26061_v12 = vpop.f32.mrb[145].mxu1  ;;  %v9890_v61 = vpop.f32.mrb[161].mxu0 }
0x10c6   : > { %23246 = vpow2.f32 %v17559_v24  ;;  %v22545_v57 = vadd.f32 %v26050_v23, %v9890_v61  ;;  %v22532_v61 = vadd.f32 %v26058_v10, %v26089_v60  ;;  %v22533_v30 = vadd.f32 %v26089_v60, %v26061_v12 }
0x10c7   : > { %v17562_v26 = vmul.f32 -1.442695, %v22544_v33 }
0x10c8   : > { %v17561_v35 = vmul.f32 -1.442695, %v22545_v57  ;;  %v26064_v29 = vpop.f32.mrb[146].mxu1  ;;  %v20778_v43 = vpop.f32.mrb[162].mxu0 }
0x10c9   : > { %23248 = vpow2.f32 %v17562_v26  ;;  %v22546_v46 = vadd.f32 %v20778_v43, %v26050_v23  ;;  %v26067_v38 = vpop.f32.mrb[147].mxu1  ;;  %v9900_v37 = vpop.f32.mrb[163].mxu0  ;;  %v22534_v10 = vadd.f32 %v26064_v29, %v26089_v60 }
0x10ca   : > { %23250 = vpow2.f32 %v17561_v35  ;;  %v22547_v7 = vadd.f32 %v26050_v23, %v9900_v37  ;;  %v22535_v12 = vadd.f32 %v26089_v60, %v26067_v38 }
0x10cb   : > { %v17564_v1 = vmul.f32 -1.442695, %v22546_v46 }
0x10cc   : > { %v17563_v25 = vmul.f32 -1.442695, %v22547_v7  ;;  %v26070_v2 = vpop.f32.mrb[148].mxu1  ;;  %v20781_v21 = vpop.f32.mrb[164].mxu0 }
0x10cd   : > { %23252 = vpow2.f32 %v17564_v1  ;;  %v22548_v51 = vadd.f32 %v20781_v21, %v26050_v23  ;;  %v26073_v55 = vpop.f32.mrb[149].mxu1  ;;  %v9910_v47 = vpop.f32.mrb[165].mxu0 }
0x10ce   : > { %23254 = vpow2.f32 %v17563_v25  ;;  %v22549_v39 = vadd.f32 %v26050_v23, %v9910_v47 }
0x10cf   : > { %v23245_v53 = vpop.eup %23244  ;;  %v17566_v15 = vmul.f32 -1.442695, %v22548_v51 }
0x10d0   : > { %v23247_v49 = vpop.eup %23246  ;;  %v9988_v54 = vadd.f32 1.0, %v23245_v53  ;;  %v17565_v45 = vmul.f32 -1.442695, %v22549_v39  ;;  %v26076_v17 = vpop.f32.mrb[150].mxu1 }
0x10d1   : > { %v20784_v63 = vpop.f32.mrb[166].mxu0  ;;  %v9987_v27 = vadd.f32 1.0, %v23247_v49  ;;  %23256 = vpow2.f32 %v17566_v15  ;;  %v26079_v8 = vpop.f32.mrb[151].mxu1  ;;  %v22536_v15 = vadd.f32 %v26070_v2, %v26089_v60 }
0x10d2   : > { %v22550_v56 = vadd.f32 %v20784_v63, %v26050_v23  ;;  %v9920_v14 = vpop.f32.mrb[167].mxu0  ;;  %23258 = vrcp.f32 %v9988_v54  ;;  %v22537_v54 = vadd.f32 %v26089_v60, %v26073_v55  ;;  %v22538_v63 = vadd.f32 %v26076_v17, %v26089_v60 }
0x10d3   : > { %v22551_v42 = vadd.f32 %v26050_v23, %v9920_v14  ;;  %v23249_v11 = vpop.eup %23248  ;;  %23260 = vrcp.f32 %v9987_v27  ;;  %v22539_v2 = vadd.f32 %v26089_v60, %v26079_v8 }
0x10d4   : > { %v17568_v9 = vmul.f32 -1.442695, %v22550_v56  ;;  %v23251_v3 = vpop.eup %23250  ;;  %v9990_v48 = vadd.f32 1.0, %v23249_v11  ;;  %23262 = vpow2.f32 %v17565_v45  ;;  %v26082_v13 = vpop.f32.mrb[152].mxu1 }
0x10d5   : > { %v17567_v28 = vmul.f32 -1.442695, %v22551_v42  ;;  %v20787_v0 = vpop.f32.mrb[168].mxu0  ;;  %v9989_v5 = vadd.f32 1.0, %v23251_v3  ;;  %v26085_v36 = vpop.f32.mrb[153].mxu1  ;;  %v22540_v11 = vadd.f32 %v26082_v13, %v26089_v60 }
0x10d6   : > { %23264 = vpow2.f32 %v17568_v9  ;;  %v22552_v58 = vadd.f32 %v20787_v0, %v26050_v23  ;;  %v9930_v59 = vpop.f32.mrb[169].mxu0  ;;  %v22541_v17 = vadd.f32 %v26089_v60, %v26085_v36  ;;  %v17586_v13 = vld [vmem:[%s28148_s18 + $0x1] ss:$0 sm:$0xff]  ;;  %s28206_s18 = sld [smem:[#allocation3_spill]] }
0x10d7   : > { %23266 = vrcp.f32 %v9990_v48  ;;  %v22553_v44 = vadd.f32 %v26050_v23, %v9930_v59  ;;  %v23253_v40 = vpop.eup %23252  ;;  %v22531_v23 = vadd.f32 %v26089_v60, %v26055_v62 }
0x10d8   : > { %23268 = vrcp.f32 %v9989_v5  ;;  %v17570_v16 = vmul.f32 -1.442695, %v22552_v58  ;;  %v23255_v22 = vpop.eup %23254  ;;  %v9992_v6 = vadd.f32 1.0, %v23253_v40 }
0x10d9   : > { %23270 = vpow2.f32 %v17567_v28  ;;  %v17569_v41 = vmul.f32 -1.442695, %v22553_v44  ;;  %v9991_v50 = vadd.f32 1.0, %v23255_v22  ;;  %v26128_v28 = vld [vmem:[%s23863_s17] sm:$0xff] }
0x10da   : > { %23272 = vpow2.f32 %v17570_v16  ;;  %20878 = vmatprep.mubr.msk.f32.mxu1 %vm2066_vm3, %v26128_v28 }
0x10db   : > { %23274 = vrcp.f32 %v9992_v6  ;;  %v23257_v19 = vpop.eup %23256 }
0x10dc   : > { %23276 = vrcp.f32 %v9991_v50  ;;  %v23259_v18 = vpop.eup %23258  ;;  %v9994_v20 = vadd.f32 1.0, %v23257_v19 }
0x10dd   : > { %23278 = vpow2.f32 %v17569_v41  ;;  %v23261_v4 = vpop.eup %23260  ;;  %v10024_v31 = vmul.f32 %v23259_v18, %v22530_v32 }
0x10de   : > { %v23263_v24 = vpop.eup %23262  ;;  %23280 = vrcp.f32 %v9994_v20  ;;  %v10023_v34 = vmul.f32 %v23261_v4, %v22531_v23 }
0x10df   : > { %v9993_v57 = vadd.f32 1.0, %v23263_v24 }
0x10e0   : > { %v23265_v33 = vpop.eup %23264  ;;  %20836 = vmatprep.mubr.msk.f32.mxu0 %vm28094_vm4, %v10023_v34 }
0x10e1   : > { %v23267_v26 = vpop.eup %23266  ;;  %v9996_v35 = vadd.f32 1.0, %v23265_v33  ;;  %23282 = vrcp.f32 %v9993_v57  ;;  %20837 = vmatmul.mubr.msk.f32.vlgmr.msra.gmra.mrb[170].mxu0 %vm28094_vm4, %v10024_v31 }
0x10e2   : > { %v23269_v62 = vpop.eup %23268  ;;  %v10026_v43 = vmul.f32 %v23267_v26, %v22532_v61 }
0x10e3   : > { %v23271_v46 = vpop.eup %23270  ;;  %23284 = vrcp.f32 %v9996_v35  ;;  %v10025_v37 = vmul.f32 %v23269_v62, %v22533_v30 }
0x10e4   : > { %v23273_v7 = vpop.eup %23272  ;;  %v9995_v1 = vadd.f32 1.0, %v23271_v46  ;;  %v17627_v46 = vld [vmem:[%s28149_s22 + $0x10] sm:$0xff] }
0x10e5   : > { %v23275_v25 = vpop.eup %23274  ;;  %v9998_v21 = vadd.f32 1.0, %v23273_v7  ;;  %20839 = vmatprep.mubr.msk.f32.mxu0 %vm28094_vm4, %v10025_v37  ;;  %v17628_v37 = vld [vmem:[%s28149_s22 + $0x18] sm:$0x3]  ;;  %v26196_v7 = vld [vmem:[%s23863_s17 + $0x8] sm:$0xff] }
0x10e6   : > { %v23277_v51 = vpop.eup %23276  ;;  %23286 = vrcp.f32 %v9995_v1  ;;  %20840 = vmatmul.mubr.msk.f32.gmra.mrb[172].mxu0 %vm28094_vm4, %v10026_v43  ;;  %v10028_v47 = vmul.f32 %v23275_v25, %v22534_v10  ;;  %v22129_v10 = vpack.c.bf16 %v17628_v37, %v17627_v46  ;;  %v28072_v1 = vmov 0.0|0.0   ;;  %v26200_v25 = vld [vmem:[%s23863_s17 + $0x10] sm:$0xff]  ;;  %v26358_v37 = vld [vmem:[%s23873_s25 + $0x58] sm:$0xff] }
0x10e7   : > { %v23279_v39 = vpop.eup %23278  ;;  %23288 = vrcp.f32 %v9998_v21  ;;  %v10027_v53 = vmul.f32 %v23277_v51, %v22535_v12  ;;  %v28150_v12 = vmov 0  ;;  %v26214_v21 = vld [vmem:[%s23863_s17 + $0x18] sm:$0xff]  ;;  %v26217_v51 = vld [vmem:[%s23863_s17 + $0x20] sm:$0xff] }
0x10e8   : > { %v9997_v29 = vadd.f32 1.0, %v23279_v39  ;;  %v23281_v49 = vpop.eup %23280  ;;  %v28151_v12 = vsel %vm26203_vm6, 4294967295, %v28150_v12  ;;  %v26227_v39 = vld [vmem:[%s23863_s17 + $0x30] sm:$0xff] }
0x10e9   : > { %20842 = vmatprep.mubr.msk.f32.mxu0 %vm28094_vm4, %v10027_v53  ;;  %v10030_v38 = vmul.f32 %v23281_v49, %v22536_v15  ;;  %28152 = vst [vmem:[#allocation37_spill] sm:$0xff] %v28151_v12  ;;  %v26234_v53 = vld [vmem:[%s23863_s17 + $0x38] sm:$0xff]  ;;  %v26237_v15 = vld [vmem:[%s23863_s17 + $0x40] sm:$0xff]  ;;  %v26247_v49 = vld [vmem:[%s23863_s17 + $0x50] sm:$0xff] }
0x10ea   : > { %23290 = vrcp.f32 %v9997_v29  ;;  %20843 = vmatmul.mubr.msk.f32.gmra.mrb[174].mxu0 %vm28094_vm4, %v10028_v47  ;;  %v26224_v47 = vld [vmem:[%s23863_s17 + $0x28] sm:$0xff] }
0x10eb   : > { %v23283_v45 = vpop.eup %23282  ;;  %v26244_v29 = vld [vmem:[%s23863_s17 + $0x48] sm:$0xff] }
0x10ec   : > { %v10029_v56 = vmul.f32 %v23283_v45, %v22537_v54  ;;  %v28071_v54 = vmov 0.0   ;;  %v1328_v45 = vld [vmem:[%s28153_s23] sm:$0xff] }
0x10ed   : > { %v23285_v27 = vpop.eup %23284 }
0x10ee   : > { %v10032_v14 = vmul.f32 %v23285_v27, %v22538_v63  ;;  %20845 = vmatprep.mubr.msk.f32.mxu0 %vm28094_vm4, %v10029_v56  ;;  %v26263_v63 = vld [vmem:[%s23873_s25] sm:$0xff] }
0x10ef   : > { %20846 = vmatmul.mubr.msk.f32.gmra.mrb[176].mxu0 %vm28094_vm4, %v10030_v38  ;;  %v26254_v38 = vld [vmem:[%s23863_s17 + $0x58] sm:$0xff]  ;;  %v1316_v27 = vld [vmem:[%s28154_s26] sm:$0xff] }
0x10f0   : > { %v23287_v42 = vpop.eup %23286 }
0x10f1   : > { %v23289_v55 = vpop.eup %23288  ;;  %v10031_v9 = vmul.f32 %v23287_v42, %v22539_v2 }
0x10f2   : > { %v10034_v3 = vmul.f32 %v23289_v55, %v22540_v11 }
0x10f3   : > { %20848 = vmatprep.mubr.msk.f32.mxu0 %vm28094_vm4, %v10031_v9 }
0x10f4   : > { %v23291_v48 = vpop.eup %23290  ;;  %20849 = vmatmul.mubr.msk.f32.gmra.mrb[178].mxu0 %vm28094_vm4, %v10032_v14 }
0x10f5   : > { %v10033_v8 = vmul.f32 %v23291_v48, %v22541_v17 }
0x10f7   : > { %20851 = vmatprep.mubr.msk.f32.mxu0 %vm28094_vm4, %v10033_v8 }
0x10f8   : > { %20852 = vmatmul.mubr.msk.f32.gmra.mrb[180].mxu0 %vm28094_vm4, %v10034_v3 }
0x10f9   : > { %20989 = vmatprep.mubr.msk.f32.mxu0 %vm2066_vm3, %v1316_v27 }
0x11b4   : > { %v20838_v0 = vpop.f32.mrb[170].mxu0 }
0x11b5   : > { %v26133_v5 = vadd.f32 %v20838_v0, %v17586_v13  ;;  %v10500_v58 = vpop.f32.mrb[171].mxu0  ;;  %v17630_v0 = vld [vmem:[%s28155_s28 + $0x1] ss:$0 sm:$0xff]  ;;  %s28211_s28 = sld [smem:[#allocation16_spill]] }
0x11b6   : > { %v26135_v36 = vadd.f32 %v17586_v13, %v10500_v58 }
0x11b8   : > { %v26139_v59 = vpack.c.bf16 %v26133_v5, %v26135_v36 }
0x11b9   : > { %v20841_v44 = vpop.f32.mrb[172].mxu0 }
0x11ba   : > { %v26141_v40 = vadd.f32 %v20841_v44, %v17586_v13  ;;  %v10510_v16 = vpop.f32.mrb[173].mxu0  ;;  %22105 = vmatprep.subr.bf16.mxu1 %v26139_v59 }
0x11bb   : > { %v26143_v22 = vadd.f32 %v17586_v13, %v10510_v16  ;;  %22107 = vmatpush3.bf16.msra.mxu1 %v26139_v59 }
0x11bd   : > { %v26149_v60 = vpack.c.bf16 %v26141_v40, %v26143_v22  ;;  %v20844_v6 = vpop.f32.mrb[174].mxu0 }
0x11be   : > { %v26151_v41 = vadd.f32 %v20844_v6, %v17586_v13  ;;  %v10520_v50 = vpop.f32.mrb[175].mxu0  ;;  %v26295_v6 = vld [vmem:[%s23873_s25 + $0x8] sm:$0xff] }
0x11bf   : > { %v26153_v19 = vadd.f32 %v17586_v13, %v10520_v50  ;;  %22109 = vmatprep.subr.bf16.mxu1 %v26149_v60  ;;  %v26302_v50 = vld [vmem:[%s23873_s25 + $0x10] sm:$0xff] }
0x11c0   : > { %22111 = vmatpush3.bf16.msra.mxu1 %v26149_v60 }
0x11c1   : > { %v26159_v32 = vpack.c.bf16 %v26151_v41, %v26153_v19 }
0x11c2   : > { %v20847_v18 = vpop.f32.mrb[176].mxu0 }
0x11c3   : > { %22113 = vmatprep.subr.bf16.mxu1 %v26159_v32  ;;  %v26162_v23 = vadd.f32 %v20847_v18, %v17586_v13  ;;  %v10530_v20 = vpop.f32.mrb[177].mxu0  ;;  %v26308_v18 = vld [vmem:[%s23873_s25 + $0x18] sm:$0xff] }
0x11c4   : > { %22115 = vmatpush3.bf16.msra.mxu1 %v26159_v32  ;;  %v26165_v4 = vadd.f32 %v17586_v13, %v10530_v20  ;;  %v26314_v20 = vld [vmem:[%s23873_s25 + $0x20] sm:$0xff] }
0x11c6   : > { %v26169_v31 = vpack.c.bf16 %v26162_v23, %v26165_v4 }
0x11c7   : > { %v20850_v24 = vpop.f32.mrb[178].mxu0 }
0x11c8   : > { %v26171_v34 = vadd.f32 %v20850_v24, %v17586_v13  ;;  %v10540_v33 = vpop.f32.mrb[179].mxu0  ;;  %22117 = vmatprep.subr.bf16.mxu1 %v26169_v31  ;;  %v26326_v24 = vld [vmem:[%s23873_s25 + $0x30] sm:$0xff] }
0x11c9   : > { %v26173_v61 = vadd.f32 %v17586_v13, %v10540_v33  ;;  %22119 = vmatpush3.bf16.msra.mxu1 %v26169_v31  ;;  %v26338_v33 = vld [vmem:[%s23873_s25 + $0x40] sm:$0xff] }
0x11cb   : > { %v26179_v57 = vpack.c.bf16 %v26171_v34, %v26173_v61  ;;  %v20853_v26 = vpop.f32.mrb[180].mxu0 }
0x11cc   : > { %v26181_v30 = vadd.f32 %v20853_v26, %v17586_v13  ;;  %v10550_v35 = vpop.f32.mrb[181].mxu0  ;;  %v17671_v26 = vld [vmem:[%s28168_s1 + $0x38] sm:$0xff] }
0x11cd   : > { %v26183_v62 = vadd.f32 %v17586_v13, %v10550_v35  ;;  %22121 = vmatprep.subr.bf16.mxu1 %v26179_v57  ;;  %v26346_v35 = vld [vmem:[%s23873_s25 + $0x48] sm:$0xff] }
0x11ce   : > { %22123 = vmatpush3.bf16.msra.mxu1 %v26179_v57 }
0x11cf   : > { %v26189_v43 = vpack.c.bf16 %v26181_v30, %v26183_v62 }
0x11d1   : > { %22125 = vmatprep.subr.bf16.mxu1 %v26189_v43 }
0x11d2   : > { %22127 = vmatpush3.bf16.msra.mxu1 %v26189_v43 }
0x11d3   : > { %22128 = vmatprep.subr.bf16.mxu1 %v28072_v1 }
0x11d5   : > { %20879 = vmatmul.mubr.msk.f32.vlgmr.msra.gmra.mrb[166].mxu1 %vm2066_vm3, %v26196_v7 }
0x11d6   : > { %20881 = vmatprep.mubr.msk.f32.mxu1 %vm2066_vm3, %v26200_v25  ;;  %22131 = vmatpush3.bf16.msk.msra.mxu1 %vm26203_vm6, %v22129_v10  ;;  %v26368_v10 = vld [vmem:[%s28154_s26 + $0x10] sm:$0xff] }
0x11d9   : > { %20882 = vmatmul.mubr.msk.f32.gmra.mrb[168].mxu1 %vm2066_vm3, %v26214_v21 }
0x11da   : > { %20884 = vmatprep.mubr.msk.f32.mxu1 %vm2066_vm3, %v26217_v51 }
0x11dd   : > { %20885 = vmatmul.mubr.msk.f32.gmra.mrb[170].mxu1 %vm2066_vm3, %v26224_v47 }
0x11de   : > { %20887 = vmatprep.mubr.msk.f32.mxu1 %vm2066_vm3, %v26227_v39 }
0x11e1   : > { %20888 = vmatmul.mubr.msk.f32.gmra.mrb[172].mxu1 %vm2066_vm3, %v26234_v53 }
0x11e2   : > { %20890 = vmatprep.mubr.msk.f32.mxu1 %vm2066_vm3, %v26237_v15 }
0x11e5   : > { %20891 = vmatmul.mubr.msk.f32.gmra.mrb[174].mxu1 %vm2066_vm3, %v26244_v29 }
0x11e6   : > { %20893 = vmatprep.mubr.msk.f32.mxu1 %vm2066_vm3, %v26247_v49 }
0x11e9   : > { %20894 = vmatmul.mubr.msk.f32.gmra.mrb[176].mxu1 %vm2066_vm3, %v26254_v38 }
0x11ea   : > { %20900 = vmatprep.mubr.msk.f32.mxu1 %vm28086_vm7, %v28071_v54 }
0x11ed   : > { %20901 = vmatmul.mubr.msk.f32.vlgmr.msra.gmra.mrb[178].mxu1 %vm28085_vm8, %v1328_v45  ;;  %v26375_v45 = vld [vmem:[%s28154_s26 + $0x18] sm:$0xff] }
0x11ee   : > { %20905 = vmatprep.mubr.msk.f32.mxu1 %vm1330_vm0, %v26263_v63 }
0x12a8   : > { %v26269_v56 = vpop.f32.mrb[166].mxu1 }
0x12a9   : > { %28156 = vst [vmem:[#allocation38_spill] sm:$0xff] %v26269_v56  ;;  %v26271_v14 = vpop.f32.mrb[167].mxu1 }
0x12aa   : > { %28157 = vst [vmem:[#allocation39_spill] sm:$0xff] %v26271_v14 }
0x12ac   : > { %v26273_v2 = vpop.f32.mrb[168].mxu1 }
0x12ad   : > { %28158 = vst [vmem:[#allocation40_spill] sm:$0xff] %v26273_v2  ;;  %v26275_v42 = vpop.f32.mrb[169].mxu1 }
0x12ae   : > { %28159 = vst [vmem:[#allocation41_spill] sm:$0xff] %v26275_v42 }
0x12b0   : > { %v26277_v11 = vpop.f32.mrb[170].mxu1 }
0x12b1   : > { %28160 = vst [vmem:[#allocation42_spill] sm:$0xff] %v26277_v11  ;;  %v26279_v55 = vpop.f32.mrb[171].mxu1 }
0x12b2   : > { %28161 = vst [vmem:[#allocation43_spill] sm:$0xff] %v26279_v55 }
0x12b4   : > { %v26281_v9 = vpop.f32.mrb[172].mxu1 }
0x12b5   : > { %28162 = vst [vmem:[#allocation44_spill] sm:$0xff] %v26281_v9  ;;  %v26283_v3 = vpop.f32.mrb[173].mxu1 }
0x12b6   : > { %28163 = vst [vmem:[#allocation45_spill] sm:$0xff] %v26283_v3 }
0x12b8   : > { %v26285_v17 = vpop.f32.mrb[174].mxu1 }
0x12b9   : > { %28164 = vst [vmem:[#allocation46_spill] sm:$0xff] %v26285_v17  ;;  %v26287_v48 = vpop.f32.mrb[175].mxu1 }
0x12ba   : > { %28165 = vst [vmem:[#allocation47_spill] sm:$0xff] %v26287_v48 }
0x12bc   : > { %v26289_v8 = vpop.f32.mrb[176].mxu1 }
0x12bd   : > { %28166 = vst [vmem:[#allocation48_spill] sm:$0xff] %v26289_v8  ;;  %v26291_v13 = vpop.f32.mrb[177].mxu1 }
0x12be   : > { %28167 = vst [vmem:[#allocation49_spill] sm:$0xff] %v26291_v13 }
0x12c0   : > { %v10816_v58 = vpop.f32.mrb[178].mxu1 }
0x12c1   : > { %v10817_v44 = vadd.f32 %v17630_v0, %v10816_v58  ;;  %v20902_v16 = vpop.f32.mrb[179].mxu1  ;;  %v26388_v0 = vld [vmem:[%s28154_s26 + $0x30] sm:$0xff]  ;;  %v26395_v58 = vld [vmem:[%s28154_s26 + $0x38] sm:$0xff] }
0x12c2   : > { %v26405_v16 = vld [vmem:[%s28154_s26 + $0x48] sm:$0xff] }
0x12c3   : > { %20903 = vmatprep.subr.mxu1 %v10817_v44 }
0x12c4   : > { %20904 = vmatpush3.msra.mxu1 %v10817_v44  ;;  %v26398_v44 = vld [vmem:[%s28154_s26 + $0x40] sm:$0xff] }
0x12c5   : > { %20906 = vmatmul.mubr.msk.f32.vlgmr.msra.gmra.mrb[180].mxu1 %vm1330_vm0, %v26295_v6  ;;  %22133 = vmatprep.subr.bf16.mxu1 %v26139_v59 }
0x12c6   : > { %22135 = vmatpush3.bf16.msra.mxu1 %v26139_v59  ;;  %20908 = vmatprep.mubr.msk.f32.mxu1 %vm1330_vm0, %v26302_v50  ;;  %v26320_v59 = vld [vmem:[%s23873_s25 + $0x28] sm:$0xff] }
0x12c7   : > { %22137 = vmatprep.subr.bf16.mxu1 %v26149_v60 }
0x12c9   : > { %20909 = vmatmul.mubr.msk.f32.gmra.mrb[182].mxu1 %vm1330_vm0, %v26308_v18 }
0x12ca   : > { %22139 = vmatpush3.bf16.msra.mxu1 %v26149_v60  ;;  %20911 = vmatprep.mubr.msk.f32.mxu1 %vm1330_vm0, %v26314_v20  ;;  %v26332_v60 = vld [vmem:[%s23873_s25 + $0x38] sm:$0xff] }
0x12cb   : > { %22141 = vmatprep.subr.bf16.mxu1 %v26159_v32 }
0x12cd   : > { %20912 = vmatmul.mubr.msk.f32.gmra.mrb[184].mxu1 %vm1330_vm0, %v26320_v59 }
0x12ce   : > { %22143 = vmatpush3.bf16.msra.mxu1 %v26159_v32  ;;  %20914 = vmatprep.mubr.msk.f32.mxu1 %vm1330_vm0, %v26326_v24  ;;  %v17670_v32 = vld [vmem:[%s28168_s1 + $0x30] sm:$0xff] }
0x12cf   : > { %22145 = vmatprep.subr.bf16.mxu1 %v26169_v31  ;;  %v22180_v46 = vpack.c.bf16 %v17671_v26, %v17670_v32  ;;  %v26408_v32 = vld [vmem:[%s28154_s26 + $0x50] sm:$0xff]  ;;  %v26415_v26 = vld [vmem:[%s28154_s26 + $0x58] sm:$0xff] }
0x12d1   : > { %20915 = vmatmul.mubr.msk.f32.gmra.mrb[186].mxu1 %vm1330_vm0, %v26332_v60 }
0x12d2   : > { %22147 = vmatpush3.bf16.msra.mxu1 %v26169_v31  ;;  %20917 = vmatprep.mubr.msk.f32.mxu1 %vm1330_vm0, %v26338_v33  ;;  %v26352_v31 = vld [vmem:[%s23873_s25 + $0x50] sm:$0xff] }
0x12d3   : > { %22149 = vmatprep.subr.bf16.mxu1 %v26179_v57 }
0x12d5   : > { %20918 = vmatmul.mubr.msk.f32.gmra.mrb[188].mxu1 %vm1330_vm0, %v26346_v35 }
0x12d6   : > { %22151 = vmatpush3.bf16.msra.mxu1 %v26179_v57  ;;  %20920 = vmatprep.mubr.msk.f32.mxu1 %vm1330_vm0, %v26352_v31  ;;  %v26365_v57 = vld [vmem:[%s28154_s26 + $0x8] sm:$0xff] }
0x12d7   : > { %22153 = vmatprep.subr.bf16.mxu1 %v26189_v43 }
0x12d9   : > { %20921 = vmatmul.mubr.msk.f32.gmra.mrb[190].mxu1 %vm1330_vm0, %v26358_v37 }
0x12da   : > { %22155 = vmatpush3.bf16.msra.mxu1 %v26189_v43  ;;  %20947 = vmatprep.mubr.msk.f32.mxu1 %vm2066_vm3, %v1316_v27  ;;  %v26378_v43 = vld [vmem:[%s28154_s26 + $0x20] sm:$0xff]  ;;  %v26385_v27 = vld [vmem:[%s28154_s26 + $0x28] sm:$0xff] }
0x12db   : > { %22181 = vmatprep.subr.bf16.mxu1 %v22180_v46 }
0x12dd   : > { %20948 = vmatmul.mubr.msk.f32.vlgmr.msra.gmra.mrb[192].mxu1 %vm2066_vm3, %v26365_v57 }
0x12de   : > { %20950 = vmatprep.mubr.msk.f32.mxu1 %vm2066_vm3, %v26368_v10  ;;  %22183 = vmatpush3.bf16.msra.mxu1 %v22180_v46 }
0x12e1   : > { %20951 = vmatmul.mubr.msk.f32.gmra.mrb[194].mxu1 %vm2066_vm3, %v26375_v45 }
0x12e2   : > { %20953 = vmatprep.mubr.msk.f32.mxu1 %vm2066_vm3, %v26378_v43 }
0x12e5   : > { %20954 = vmatmul.mubr.msk.f32.gmra.mrb[196].mxu1 %vm2066_vm3, %v26385_v27 }
0x12e6   : > { %20956 = vmatprep.mubr.msk.f32.mxu1 %vm2066_vm3, %v26388_v0 }
0x12e9   : > { %20957 = vmatmul.mubr.msk.f32.gmra.mrb[198].mxu1 %vm2066_vm3, %v26395_v58 }
0x12ea   : > { %20959 = vmatprep.mubr.msk.f32.mxu1 %vm2066_vm3, %v26398_v44 }
0x12ed   : > { %20960 = vmatmul.mubr.msk.f32.gmra.mrb[200].mxu1 %vm2066_vm3, %v26405_v16 }
0x12ee   : > { %20962 = vmatprep.mubr.msk.f32.mxu1 %vm2066_vm3, %v26408_v32 }
0x12f1   : > { %20963 = vmatmul.mubr.msk.f32.gmra.mrb[202].mxu1 %vm2066_vm3, %v26415_v26 }
0x12f2   : > { %21011 = vmatprep.mubr.msk.f32.mxu1 %vm28094_vm4, %v26135_v36  ;;  %v17686_v36 = vld [vmem:[%s28168_s1 + $0x48] sm:$0xff] }
0x12f5   : > { %21012 = vmatmul.mubr.msk.f32.vlgmr.msra.gmra.mrb[204].mxu1 %vm28094_vm4, %v26133_v5  ;;  %v17685_v5 = vld [vmem:[%s28168_s1 + $0x40] sm:$0xff] }
0x12f6   : > { %21014 = vmatprep.mubr.msk.f32.mxu1 %vm28094_vm4, %v26143_v22  ;;  %v17699_v22 = vld [vmem:[%s28168_s1 + $0x50] sm:$0xff] }
0x12f9   : > { %21015 = vmatmul.mubr.msk.f32.gmra.mrb[206].mxu1 %vm28094_vm4, %v26141_v40  ;;  %v22184_v40 = vpack.c.bf16 %v17686_v36, %v17685_v5 }
0x12fa   : > { %21017 = vmatprep.mubr.msk.f32.mxu1 %vm28094_vm4, %v26153_v19 }
0x12fb   : > { %22185 = vmatprep.subr.bf16.mxu1 %v22184_v40 }
0x12fc   : > { %22187 = vmatpush3.bf16.msra.mxu1 %v22184_v40 }
0x12fd   : > { %21018 = vmatmul.mubr.msk.f32.gmra.mrb[208].mxu1 %vm28094_vm4, %v26151_v41  ;;  %v17700_v41 = vld [vmem:[%s28168_s1 + $0x58] sm:$0xff]  ;;  %s28287_s1 = sld [smem:[#allocation21_spill]] }
0x12fe   : > { %21020 = vmatprep.mubr.msk.f32.mxu1 %vm28094_vm4, %v26165_v4  ;;  %v22188_v19 = vpack.c.bf16 %v17700_v41, %v17699_v22 }
0x1300   : > { %22189 = vmatprep.subr.bf16.mxu1 %v22188_v19 }
0x1301   : > { %21021 = vmatmul.mubr.msk.f32.gmra.mrb[210].mxu1 %vm28094_vm4, %v26162_v23 }
0x1302   : > { %21023 = vmatprep.mubr.msk.f32.mxu1 %vm28094_vm4, %v26173_v61 }
0x1305   : > { %21024 = vmatmul.mubr.msk.f32.gmra.mrb[212].mxu1 %vm28094_vm4, %v26171_v34 }
0x1306   : > { %21026 = vmatprep.mubr.msk.f32.mxu1 %vm28094_vm4, %v26183_v62 }
0x1309   : > { %21027 = vmatmul.mubr.msk.f32.gmra.mrb[214].mxu1 %vm28094_vm4, %v26181_v30 }
0x1398   : > { %v20907_v23 = vpop.f32.mrb[180].mxu1 }
0x1399   : > { %v26448_v4 = vmul.f32 %v20907_v23, %v26269_v56  ;;  %v10886_v34 = vpop.f32.mrb[181].mxu1 }
0x139a   : > { %v26451_v61 = vmul.f32 %v10886_v34, %v26271_v14 }
0x139b   : > { %28169 = vst [vmem:[#allocation50_spill] sm:$0xff] %v26448_v4 }
0x139c   : > { %v20910_v62 = vpop.f32.mrb[182].mxu1 }
0x139d   : > { %v26454_v30 = vmul.f32 %v20910_v62, %v26273_v2  ;;  %v10896_v46 = vpop.f32.mrb[183].mxu1 }
0x139e   : > { %v26457_v5 = vmul.f32 %v10896_v46, %v26275_v42 }
0x139f   : > { %28170 = vst [vmem:[#allocation51_spill] sm:$0xff] %v26454_v30 }
0x13a0   : > { %28171 = vst [vmem:[#allocation52_spill] sm:$0xff] %v26457_v5  ;;  %v20913_v36 = vpop.f32.mrb[184].mxu1 }
0x13a1   : > { %v26460_v40 = vmul.f32 %v20913_v36, %v26277_v11  ;;  %v10906_v22 = vpop.f32.mrb[185].mxu1 }
0x13a2   : > { %v26463_v41 = vmul.f32 %v10906_v22, %v26279_v55 }
0x13a3   : > { %28172 = vst [vmem:[#allocation53_spill] sm:$0xff] %v26460_v40 }
0x13a4   : > { %28173 = vst [vmem:[#allocation54_spill] sm:$0xff] %v26463_v41  ;;  %v20916_v23 = vpop.f32.mrb[186].mxu1 }
0x13a5   : > { %v26466_v34 = vmul.f32 %v20916_v23, %v26281_v9  ;;  %v10916_v54 = vpop.f32.mrb[187].mxu1 }
0x13a6   : > { %v26469_v62 = vmul.f32 %v10916_v54, %v26283_v3 }
0x13a7   : > { %28174 = vst [vmem:[#allocation55_spill] sm:$0xff] %v26466_v34 }
0x13a8   : > { %28175 = vst [vmem:[#allocation56_spill] sm:$0xff] %v26469_v62  ;;  %v20919_v1 = vpop.f32.mrb[188].mxu1 }
0x13a9   : > { %v26472_v46 = vmul.f32 %v20919_v1, %v26285_v17  ;;  %v10926_v12 = vpop.f32.mrb[189].mxu1 }
0x13aa   : > { %v26475_v36 = vmul.f32 %v10926_v12, %v26287_v48 }
0x13ab   : > { %28176 = vst [vmem:[#allocation57_spill] sm:$0xff] %v26472_v46 }
0x13ac   : > { %28177 = vst [vmem:[#allocation58_spill] sm:$0xff] %v26475_v36  ;;  %v20922_v40 = vpop.f32.mrb[190].mxu1 }
0x13ad   : > { %v26478_v22 = vmul.f32 %v20922_v40, %v26289_v8  ;;  %v10936_v41 = vpop.f32.mrb[191].mxu1 }
0x13ae   : > { %v26481_v23 = vmul.f32 %v10936_v41, %v26291_v13 }
0x13af   : > { %28178 = vst [vmem:[#allocation59_spill] sm:$0xff] %v26478_v22 }
0x13b0   : > { %28179 = vst [vmem:[#allocation60_spill] sm:$0xff] %v26481_v23  ;;  %v20949_v34 = vpop.f32.mrb[192].mxu1 }
0x13b1   : > { %v11095_v30 = vpop.f32.mrb[193].mxu1 }
0x13b2   : > { %v22156_v54 = vpack.c.bf16 %v20949_v34, %v11095_v30  ;;  %21033 = vmatprep.mubr.msk.f32.mxu1 %vm28094_vm4, %v11095_v30 }
0x13b3   : > { %21034 = vmatmul.mubr.msk.f32.vlgmr.msra.gmra.mrb[204].mxu1 %vm28094_vm4, %v20949_v34 }
0x13b4   : > { %v20952_v1 = vpop.f32.mrb[194].mxu1  ;;  %22157 = vmatprep.subr.bf16.mxu0 %v22156_v54  ;;  %22191 = vmatpush3.bf16.msra.mxu1 %v22188_v19 }
0x13b5   : > { %v11105_v12 = vpop.f32.mrb[195].mxu1  ;;  %22159 = vmatpush3.bf16.msra.mxu0 %v22156_v54 }
0x13b6   : > { %v22160_v46 = vpack.c.bf16 %v20952_v1, %v11105_v12  ;;  %21036 = vmatprep.mubr.msk.f32.mxu1 %vm28094_vm4, %v11105_v12 }
0x13b7   : > { %21037 = vmatmul.mubr.msk.f32.gmra.mrb[206].mxu1 %vm28094_vm4, %v20952_v1 }
0x13b8   : > { %v20955_v40 = vpop.f32.mrb[196].mxu1  ;;  %22161 = vmatprep.subr.bf16.mxu0 %v22160_v46 }
0x13b9   : > { %v11115_v41 = vpop.f32.mrb[197].mxu1  ;;  %22163 = vmatpush3.bf16.msra.mxu0 %v22160_v46 }
0x13ba   : > { %v22164_v22 = vpack.c.bf16 %v20955_v40, %v11115_v41  ;;  %21039 = vmatprep.mubr.msk.f32.mxu1 %vm28094_vm4, %v11115_v41 }
0x13bb   : > { %21040 = vmatmul.mubr.msk.f32.gmra.mrb[208].mxu1 %vm28094_vm4, %v20955_v40 }
0x13bc   : > { %v20958_v30 = vpop.f32.mrb[198].mxu1  ;;  %22165 = vmatprep.subr.bf16.mxu0 %v22164_v22 }
0x13bd   : > { %v11125_v34 = vpop.f32.mrb[199].mxu1  ;;  %22167 = vmatpush3.bf16.msra.mxu0 %v22164_v22  ;;  %v17684_v22 = vld [vmem:[%s28180_s2 + $0x1] ss:$0 sm:$0xff]  ;;  %s28228_s2 = sld [smem:[#allocation18_spill]] }
0x13be   : > { %v22168_v19 = vpack.c.bf16 %v20958_v30, %v11125_v34  ;;  %21042 = vmatprep.mubr.msk.f32.mxu1 %vm28094_vm4, %v11125_v34 }
0x13bf   : > { %21043 = vmatmul.mubr.msk.f32.gmra.mrb[210].mxu1 %vm28094_vm4, %v20958_v30 }
0x13c0   : > { %v20961_v54 = vpop.f32.mrb[200].mxu1  ;;  %22169 = vmatprep.subr.bf16.mxu0 %v22168_v19 }
0x13c1   : > { %v11135_v1 = vpop.f32.mrb[201].mxu1  ;;  %22171 = vmatpush3.bf16.msra.mxu0 %v22168_v19 }
0x13c2   : > { %v22172_v12 = vpack.c.bf16 %v20961_v54, %v11135_v1  ;;  %21045 = vmatprep.mubr.msk.f32.mxu1 %vm28094_vm4, %v11135_v1 }
0x13c3   : > { %21046 = vmatmul.mubr.msk.f32.gmra.mrb[212].mxu1 %vm28094_vm4, %v20961_v54 }
0x13c4   : > { %v20964_v46 = vpop.f32.mrb[202].mxu1  ;;  %22173 = vmatprep.subr.bf16.mxu0 %v22172_v12 }
0x13c5   : > { %v11145_v40 = vpop.f32.mrb[203].mxu1  ;;  %22175 = vmatpush3.bf16.msra.mxu0 %v22172_v12 }
0x13c6   : > { %v22176_v41 = vpack.c.bf16 %v20964_v46, %v11145_v40  ;;  %21048 = vmatprep.mubr.msk.f32.mxu1 %vm28094_vm4, %v11145_v40 }
0x13c7   : > { %21049 = vmatmul.mubr.msk.f32.gmra.mrb[214].mxu1 %vm28094_vm4, %v20964_v46 }
0x13c8   : > { %22177 = vmatprep.subr.bf16.mxu0 %v22176_v41 }
0x13c9   : > { %22179 = vmatpush3.bf16.msra.mxu0 %v22176_v41 }
0x13cc   : > { %20990 = vmatmul.mubr.msk.f32.vlgmr.msra.gmra.mrb[182].mxu0 %vm2066_vm3, %v26365_v57 }
0x13cd   : > { %20992 = vmatprep.mubr.msk.f32.mxu0 %vm2066_vm3, %v26368_v10 }
0x13d0   : > { %20993 = vmatmul.mubr.msk.f32.gmra.mrb[184].mxu0 %vm2066_vm3, %v26375_v45 }
0x13d1   : > { %20995 = vmatprep.mubr.msk.f32.mxu0 %vm2066_vm3, %v26378_v43 }
0x13d4   : > { %20996 = vmatmul.mubr.msk.f32.gmra.mrb[186].mxu0 %vm2066_vm3, %v26385_v27 }
0x13d5   : > { %20998 = vmatprep.mubr.msk.f32.mxu0 %vm2066_vm3, %v26388_v0 }
0x13d8   : > { %20999 = vmatmul.mubr.msk.f32.gmra.mrb[188].mxu0 %vm2066_vm3, %v26395_v58 }
0x13d9   : > { %21001 = vmatprep.mubr.msk.f32.mxu0 %vm2066_vm3, %v26398_v44 }
0x13dc   : > { %21002 = vmatmul.mubr.msk.f32.gmra.mrb[190].mxu0 %vm2066_vm3, %v26405_v16 }
0x13dd   : > { %21004 = vmatprep.mubr.msk.f32.mxu0 %vm2066_vm3, %v26408_v32 }
0x13e0   : > { %21005 = vmatmul.mubr.msk.f32.gmra.mrb[192].mxu0 %vm2066_vm3, %v26415_v26 }
0x13e1   : > { %21097 = vmatprep.mubr.msk.f32.mxu0 %vm2066_vm3, %v26128_v28 }
0x149f   : > { %v20991_v57 = vpop.f32.mrb[182].mxu0 }
0x14a0   : > { %v11220_v10 = vpop.f32.mrb[183].mxu0 }
0x14a1   : > { %21055 = vmatprep.mubr.msk.f32.mxu1 %vm28094_vm4, %v11220_v10 }
0x14a2   : > { %21056 = vmatmul.mubr.msk.f32.vlgmr.msra.gmra.mrb[204].mxu1 %vm28094_vm4, %v20991_v57 }
0x14a3   : > { %v20994_v45 = vpop.f32.mrb[184].mxu0 }
0x14a4   : > { %v11230_v43 = vpop.f32.mrb[185].mxu0 }
0x14a5   : > { %21058 = vmatprep.mubr.msk.f32.mxu1 %vm28094_vm4, %v11230_v43 }
0x14a6   : > { %21059 = vmatmul.mubr.msk.f32.gmra.mrb[206].mxu1 %vm28094_vm4, %v20994_v45 }
0x14a7   : > { %v20997_v27 = vpop.f32.mrb[186].mxu0 }
0x14a8   : > { %v11240_v0 = vpop.f32.mrb[187].mxu0 }
0x14a9   : > { %21061 = vmatprep.mubr.msk.f32.mxu1 %vm28094_vm4, %v11240_v0 }
0x14aa   : > { %21062 = vmatmul.mubr.msk.f32.gmra.mrb[208].mxu1 %vm28094_vm4, %v20997_v27 }
0x14ab   : > { %v21000_v28 = vpop.f32.mrb[188].mxu0 }
0x14ac   : > { %v11250_v58 = vpop.f32.mrb[189].mxu0 }
0x14ad   : > { %21064 = vmatprep.mubr.msk.f32.mxu1 %vm28094_vm4, %v11250_v58 }
0x14ae   : > { %21065 = vmatmul.mubr.msk.f32.gmra.mrb[210].mxu1 %vm28094_vm4, %v21000_v28 }
0x14af   : > { %v21003_v44 = vpop.f32.mrb[190].mxu0 }
0x14b0   : > { %v11260_v16 = vpop.f32.mrb[191].mxu0 }
0x14b1   : > { %21067 = vmatprep.mubr.msk.f32.mxu1 %vm28094_vm4, %v11260_v16 }
0x14b2   : > { %21068 = vmatmul.mubr.msk.f32.gmra.mrb[212].mxu1 %vm28094_vm4, %v21003_v44 }
0x14b3   : > { %v21006_v32 = vpop.f32.mrb[192].mxu0 }
0x14b4   : > { %v11270_v26 = vpop.f32.mrb[193].mxu0 }
0x14b5   : > { %21070 = vmatprep.mubr.msk.f32.mxu1 %vm28094_vm4, %v11270_v26 }
0x14b6   : > { %21071 = vmatmul.mubr.msk.f32.gmra.mrb[214].mxu1 %vm28094_vm4, %v21006_v32 }
0x1575   : > { %v21057_v30 = vpop.f32.mrb[204].mxu1 }
0x1576   : > { %v22566_v34 = vadd.f32 %v21057_v30, %v17684_v22  ;;  %v11744_v19 = vpop.f32.mrb[205].mxu1 }
0x1577   : > { %v22567_v54 = vadd.f32 %v17684_v22, %v11744_v19 }
0x1579   : > { %v22192_v1 = vpack.c.bf16 %v22566_v34, %v22567_v54  ;;  %v21060_v12 = vpop.f32.mrb[206].mxu1 }
0x157a   : > { %v22568_v46 = vadd.f32 %v21060_v12, %v17684_v22  ;;  %v11754_v40 = vpop.f32.mrb[207].mxu1 }
0x157b   : > { %v22569_v41 = vadd.f32 %v17684_v22, %v11754_v40  ;;  %22193 = vmatprep.subr.bf16.mxu0 %v22192_v1  ;;  %v17725_v40 = vld [vmem:[%s28181_s10 + $0x20] sm:$0xff] }
0x157c   : > { %22195 = vmatpush3.bf16.msra.mxu0 %v22192_v1 }
0x157d   : > { %v22196_v57 = vpack.c.bf16 %v22568_v46, %v22569_v41  ;;  %v21063_v10 = vpop.f32.mrb[208].mxu1  ;;  %v17726_v41 = vld [vmem:[%s28181_s10 + $0x28] sm:$0xff] }
0x157e   : > { %v22570_v45 = vadd.f32 %v21063_v10, %v17684_v22  ;;  %v11764_v43 = vpop.f32.mrb[209].mxu1 }
0x157f   : > { %v22571_v27 = vadd.f32 %v17684_v22, %v11764_v43  ;;  %22197 = vmatprep.subr.bf16.mxu0 %v22196_v57  ;;  %v17742_v43 = vld [vmem:[%s28182_s11 + $0x2] ss:$0 sm:$0xff] }
0x1580   : > { %22199 = vmatpush3.bf16.msra.mxu0 %v22196_v57 }
0x1581   : > { %v22200_v0 = vpack.c.bf16 %v22570_v45, %v22571_v27  ;;  %v21066_v28 = vpop.f32.mrb[210].mxu1  ;;  %v22216_v45 = vpack.c.bf16 %v17726_v41, %v17725_v40 }
0x1582   : > { %v22572_v58 = vadd.f32 %v21066_v28, %v17684_v22  ;;  %v11774_v44 = vpop.f32.mrb[211].mxu1 }
0x1583   : > { %v22573_v16 = vadd.f32 %v17684_v22, %v11774_v44  ;;  %22201 = vmatprep.subr.bf16.mxu0 %v22200_v0 }
0x1584   : > { %22203 = vmatpush3.bf16.msra.mxu0 %v22200_v0 }
0x1585   : > { %v22204_v32 = vpack.c.bf16 %v22572_v58, %v22573_v16  ;;  %v21069_v26 = vpop.f32.mrb[212].mxu1 }
0x1586   : > { %v22574_v30 = vadd.f32 %v21069_v26, %v17684_v22  ;;  %v11784_v34 = vpop.f32.mrb[213].mxu1 }
0x1587   : > { %v22575_v19 = vadd.f32 %v17684_v22, %v11784_v34  ;;  %22205 = vmatprep.subr.bf16.mxu0 %v22204_v32 }
0x1588   : > { %22207 = vmatpush3.bf16.msra.mxu0 %v22204_v32 }
0x1589   : > { %v22208_v54 = vpack.c.bf16 %v22574_v30, %v22575_v19  ;;  %v21072_v1 = vpop.f32.mrb[214].mxu1 }
0x158a   : > { %v22576_v12 = vadd.f32 %v21072_v1, %v17684_v22  ;;  %v11794_v46 = vpop.f32.mrb[215].mxu1 }
0x158b   : > { %v22577_v57 = vadd.f32 %v17684_v22, %v11794_v46  ;;  %22209 = vmatprep.subr.bf16.mxu0 %v22208_v54 }
0x158c   : > { %22211 = vmatpush3.bf16.msra.mxu0 %v22208_v54 }
0x158d   : > { %v22212_v10 = vpack.c.bf16 %v22576_v12, %v22577_v57 }
0x158f   : > { %22213 = vmatprep.subr.bf16.mxu0 %v22212_v10 }
0x1590   : > { %22215 = vmatpush3.bf16.msra.mxu0 %v22212_v10 }
0x1591   : > { %22217 = vmatprep.subr.bf16.mxu0 %v22216_v45 }
0x1593   : > { %21098 = vmatmul.mubr.msk.f32.vlgmr.msra.gmra.mrb[194].mxu0 %vm2066_vm3, %v26196_v7 }
0x1594   : > { %21100 = vmatprep.mubr.msk.f32.mxu0 %vm2066_vm3, %v26200_v25  ;;  %22219 = vmatpush3.bf16.msra.mxu0 %v22216_v45 }
0x1597   : > { %21101 = vmatmul.mubr.msk.f32.gmra.mrb[196].mxu0 %vm2066_vm3, %v26214_v21 }
0x1598   : > { %21103 = vmatprep.mubr.msk.f32.mxu0 %vm2066_vm3, %v26217_v51 }
0x159b   : > { %21104 = vmatmul.mubr.msk.f32.gmra.mrb[198].mxu0 %vm2066_vm3, %v26224_v47 }
0x159c   : > { %21106 = vmatprep.mubr.msk.f32.mxu0 %vm2066_vm3, %v26227_v39 }
0x159f   : > { %21107 = vmatmul.mubr.msk.f32.gmra.mrb[200].mxu0 %vm2066_vm3, %v26234_v53 }
0x15a0   : > { %21109 = vmatprep.mubr.msk.f32.mxu0 %vm2066_vm3, %v26237_v15 }
0x15a3   : > { %21110 = vmatmul.mubr.msk.f32.gmra.mrb[202].mxu0 %vm2066_vm3, %v26244_v29 }
0x15a4   : > { %21112 = vmatprep.mubr.msk.f32.mxu0 %vm2066_vm3, %v26247_v49 }
0x15a7   : > { %21113 = vmatmul.mubr.msk.f32.gmra.mrb[204].mxu0 %vm2066_vm3, %v26254_v38 }
0x15a8   : > { %21119 = vmatprep.mubr.msk.f32.mxu0 %vm28094_vm4, %v26271_v14 }
0x15ab   : > { %21120 = vmatmul.mubr.msk.f32.vlgmr.msra.gmra.mrb[206].mxu0 %vm28094_vm4, %v26269_v56 }
0x15ac   : > { %21122 = vmatprep.mubr.msk.f32.mxu0 %vm28094_vm4, %v26275_v42 }
0x15af   : > { %21123 = vmatmul.mubr.msk.f32.gmra.mrb[208].mxu0 %vm28094_vm4, %v26273_v2 }
0x15b0   : > { %21125 = vmatprep.mubr.msk.f32.mxu0 %vm28094_vm4, %v26279_v55 }
0x15b3   : > { %21126 = vmatmul.mubr.msk.f32.gmra.mrb[210].mxu0 %vm28094_vm4, %v26277_v11 }
0x15b4   : > { %21128 = vmatprep.mubr.msk.f32.mxu0 %vm28094_vm4, %v26283_v3 }
0x15b7   : > { %21129 = vmatmul.mubr.msk.f32.gmra.mrb[212].mxu0 %vm28094_vm4, %v26281_v9 }
0x15b8   : > { %21131 = vmatprep.mubr.msk.f32.mxu0 %vm28094_vm4, %v26287_v48 }
0x15bb   : > { %21132 = vmatmul.mubr.msk.f32.gmra.mrb[214].mxu0 %vm28094_vm4, %v26285_v17 }
0x15bc   : > { %21134 = vmatprep.mubr.msk.f32.mxu0 %vm28094_vm4, %v26291_v13 }
0x15bf   : > { %21135 = vmatmul.mubr.msk.f32.gmra.mrb[216].mxu0 %vm28094_vm4, %v26289_v8 }
0x1666   : > { %v26580_v7 = vpop.f32.mrb[194].mxu0 }
0x1667   : > { %28183 = vst [vmem:[#allocation61_spill] sm:$0xff] %v26580_v7  ;;  %v26582_v25 = vpop.f32.mrb[195].mxu0 }
0x1668   : > { %28184 = vst [vmem:[#allocation62_spill] sm:$0xff] %v26582_v25 }
0x166a   : > { %v26584_v21 = vpop.f32.mrb[196].mxu0 }
0x166b   : > { %28185 = vst [vmem:[#allocation63_spill] sm:$0xff] %v26584_v21  ;;  %v26586_v51 = vpop.f32.mrb[197].mxu0 }
0x166c   : > { %28186 = vst [vmem:[#allocation64_spill] sm:$0xff] %v26586_v51 }
0x166e   : > { %v26588_v47 = vpop.f32.mrb[198].mxu0 }
0x166f   : > { %28187 = vst [vmem:[#allocation65_spill] sm:$0xff] %v26588_v47  ;;  %v26590_v39 = vpop.f32.mrb[199].mxu0 }
0x1670   : > { %28188 = vst [vmem:[#allocation66_spill] sm:$0xff] %v26590_v39 }
0x1672   : > { %v26592_v53 = vpop.f32.mrb[200].mxu0 }
0x1673   : > { %28189 = vst [vmem:[#allocation67_spill] sm:$0xff] %v26592_v53  ;;  %v26594_v15 = vpop.f32.mrb[201].mxu0 }
0x1674   : > { %28190 = vst [vmem:[#allocation68_spill] sm:$0xff] %v26594_v15  ;;  %v17741_v15 = vld [vmem:[%s28195_s15 + $0x2] ss:$0 sm:$0xff] }
0x1676   : > { %v26596_v29 = vpop.f32.mrb[202].mxu0 }
0x1677   : > { %28191 = vst [vmem:[#allocation69_spill] sm:$0xff] %v26596_v29  ;;  %v26598_v49 = vpop.f32.mrb[203].mxu0 }
0x1678   : > { %28192 = vst [vmem:[#allocation70_spill] sm:$0xff] %v26598_v49 }
0x167a   : > { %v26600_v38 = vpop.f32.mrb[204].mxu0 }
0x167b   : > { %28193 = vst [vmem:[#allocation71_spill] sm:$0xff] %v26600_v38  ;;  %v26602_v22 = vpop.f32.mrb[205].mxu0 }
0x167c   : > { %28194 = vst [vmem:[#allocation72_spill] sm:$0xff] %v26602_v22 }
0x167e   : > { %v21121_v27 = vpop.f32.mrb[206].mxu0 }
0x167f   : > { %v12045_v0 = vpop.f32.mrb[207].mxu0  ;;  %v12169_v32 = vmul.f32 %v21121_v27, %v17742_v43 }
0x1680   : > { %v26605_v28 = vpack.c.bf16 %v21121_v27, %v12045_v0  ;;  %v12168_v58 = vmul.f32 %v17742_v43, %v12045_v0  ;;  %v12114_v21 = vmul.f32 %v17741_v15, %v12045_v0 }
0x1681   : > { %v12183_v12 = vsel %vm28094_vm4, %v12169_v32, 0.0 }
0x1682   : > { %v21124_v44 = vpop.f32.mrb[208].mxu0  ;;  %v12180_v16 = vsel %vm28094_vm4, %v12168_v58, 0.0 }
0x1683   : > { %12181 = vadd.xlane.f32.xlu0 %v12180_v16  ;;  %v12055_v26 = vpop.f32.mrb[209].mxu0  ;;  %v12171_v30 = vmul.f32 %v21124_v44, %v17742_v43  ;;  %v12117_v7 = vmul.f32 %v21124_v44, %v17741_v15 }
0x1684   : > { %v26608_v34 = vpack.c.bf16 %v21124_v44, %v12055_v26  ;;  %v12170_v54 = vmul.f32 %v17742_v43, %v12055_v26 }
0x1685   : > { %v12189_v19 = vsel %vm28094_vm4, %v12171_v30, 0.0 }
0x1686   : > { %12190 = vadd.xlane.f32.xlu1 %v12189_v19  ;;  %v21127_v1 = vpop.f32.mrb[210].mxu0  ;;  %v12186_v57 = vsel %vm28094_vm4, %v12170_v54, 0.0 }
0x1687   : > { %12184 = vadd.xlane.f32.xlu0 %v12183_v12  ;;  %v12065_v46 = vpop.f32.mrb[211].mxu0  ;;  %v12173_v10 = vmul.f32 %v21127_v1, %v17742_v43  ;;  %v12119_v0 = vmul.f32 %v21127_v1, %v17741_v15 }
0x1688   : > { %v26612_v40 = vpack.c.bf16 %v21127_v1, %v12065_v46  ;;  %v12172_v41 = vmul.f32 %v17742_v43, %v12065_v46 }
0x1689   : > { %v12195_v38 = vsel %vm28094_vm4, %v12173_v10, 0.0 }
0x168a   : > { %12187 = vadd.xlane.f32.xlu1 %v12186_v57  ;;  %v21130_v45 = vpop.f32.mrb[212].mxu0  ;;  %v12192_v58 = vsel %vm28094_vm4, %v12172_v41, 0.0 }
0x168b   : > { %12193 = vadd.xlane.f32.xlu0 %v12192_v58  ;;  %v12075_v16 = vpop.f32.mrb[213].mxu0  ;;  %v12175_v32 = vmul.f32 %v21130_v45, %v17742_v43 }
0x168c   : > { %v26616_v30 = vpack.c.bf16 %v21130_v45, %v12075_v16  ;;  %v12174_v19 = vmul.f32 %v17742_v43, %v12075_v16 }
0x168d   : > { %v12201_v41 = vsel %vm28094_vm4, %v12175_v32, 0.0 }
0x168e   : > { %12196 = vadd.xlane.f32.xlu1 %v12195_v38  ;;  %v21133_v12 = vpop.f32.mrb[214].mxu0  ;;  %v12198_v22 = vsel %vm28094_vm4, %v12174_v19, 0.0 }
0x168f   : > { %12199 = vadd.xlane.f32.xlu0 %v12198_v22  ;;  %v12085_v54 = vpop.f32.mrb[215].mxu0  ;;  %v12177_v58 = vmul.f32 %v21133_v12, %v17742_v43 }
0x1690   : > { %v26620_v29 = vpack.c.bf16 %v21133_v12, %v12085_v54  ;;  %v12176_v57 = vmul.f32 %v17742_v43, %v12085_v54 }
0x1691   : > { %v12207_v19 = vsel %vm28094_vm4, %v12177_v58, 0.0 }
0x1692   : > { %12202 = vadd.xlane.f32.xlu1 %v12201_v41  ;;  %v21136_v49 = vpop.f32.mrb[216].mxu0  ;;  %v12204_v53 = vsel %vm28094_vm4, %v12176_v57, 0.0  ;;  %v12115_v41 = vmul.f32 %v21121_v27, %v17741_v15  ;;  %v12126_v57 = vsel %vm28094_vm4, %v12114_v21, 0.0  ;;  %v12120_v27 = vmul.f32 %v17741_v15, %v12075_v16 }
0x1693   : > { %12205 = vadd.xlane.f32.xlu0 %v12204_v53  ;;  %v12095_v10 = vpop.f32.mrb[217].mxu0  ;;  %v12179_v22 = vmul.f32 %v21136_v49, %v17742_v43  ;;  %v12116_v53 = vmul.f32 %v17741_v15, %v12055_v26  ;;  %v12141_v21 = vsel %vm28094_vm4, %v12119_v0, 0.0  ;;  %v12121_v26 = vmul.f32 %v21130_v45, %v17741_v15 }
0x1694   : > { %v26625_v47 = vpack.c.bf16 %v21136_v49, %v12095_v10  ;;  %v12178_v38 = vmul.f32 %v17742_v43, %v12095_v10  ;;  %v12129_v51 = vsel %vm28094_vm4, %v12115_v41, 0.0  ;;  %v12118_v43 = vmul.f32 %v17741_v15, %v12065_v46 }
0x1695   : > { %v12213_v32 = vsel %vm28094_vm4, %v12179_v22, 0.0  ;;  %v12132_v58 = vsel %vm28094_vm4, %v12116_v53, 0.0  ;;  %v12144_v44 = vsel %vm28094_vm4, %v12120_v27, 0.0  ;;  %v12147_v46 = vsel %vm28094_vm4, %v12121_v26, 0.0 }
0x1696   : > { %12208 = vadd.xlane.f32.xlu1 %v12207_v19  ;;  %v12210_v39 = vsel %vm28094_vm4, %v12178_v38, 0.0  ;;  %v12135_v38 = vsel %vm28094_vm4, %v12117_v7, 0.0  ;;  %v12123_v19 = vmul.f32 %v21133_v12, %v17741_v15  ;;  %v12124_v1 = vmul.f32 %v17741_v15, %v12095_v10 }
0x1697   : > { %12211 = vadd.xlane.f32.xlu0 %v12210_v39  ;;  %v12138_v39 = vsel %vm28094_vm4, %v12118_v43, 0.0  ;;  %v12125_v22 = vmul.f32 %v21136_v49, %v17741_v15 }
0x1698   : > { %v12153_v16 = vsel %vm28094_vm4, %v12123_v19, 0.0  ;;  %v12156_v45 = vsel %vm28094_vm4, %v12124_v1, 0.0 }
0x169a   : > { %12214 = vadd.xlane.f32.xlu1 %v12213_v32  ;;  %v26642_v32 = vld [vmem:[%s28196_s16] sm:$0xff] }
0x169b   : > { %12127 = vadd.xlane.f32.xlu0 %v12126_v57  ;;  %21161 = vmatprep.mubr.msk.f32.mxu0 %vm2066_vm3, %v26642_v32 }
0x169e   : > { %12130 = vadd.xlane.f32.xlu1 %v12129_v51  ;;  %v12122_v51 = vmul.f32 %v17741_v15, %v12085_v54  ;;  %v12159_v54 = vsel %vm28094_vm4, %v12125_v22, 0.0  ;;  %v26688_v22 = vld [vmem:[%s28196_s16 + $0x30] sm:$0xff] }
0x169f   : > { %12133 = vadd.xlane.f32.xlu0 %v12132_v58 }
0x16a0   : > { %v12150_v7 = vsel %vm28094_vm4, %v12122_v51, 0.0 }
0x16a2   : > { %12136 = vadd.xlane.f32.xlu1 %v12135_v38 }
0x16a3   : > { %12139 = vadd.xlane.f32.xlu0 %v12138_v39 }
0x16a6   : > { %12142 = vadd.xlane.f32.xlu1 %v12141_v21 }
0x16a7   : > { %12145 = vadd.xlane.f32.xlu0 %v12144_v44 }
0x16aa   : > { %12148 = vadd.xlane.f32.xlu1 %v12147_v46 }
0x16ab   : > { %12151 = vadd.xlane.f32.xlu0 %v12150_v7 }
0x16ae   : > { %12154 = vadd.xlane.f32.xlu1 %v12153_v16 }
0x16af   : > { %12157 = vadd.xlane.f32.xlu0 %v12156_v45  ;;  %v26700_v45 = vld [vmem:[%s28196_s16 + $0x40] sm:$0xff] }
0x16b2   : > { %12160 = vadd.xlane.f32.xlu1 %v12159_v54  ;;  %v26708_v54 = vld [vmem:[%s28196_s16 + $0x48] sm:$0xff] }
0x1710   : > { %v12182_v12 = vpop.xlane.xlu0 %12181 }
0x1711   : > { %v12216_v10 = vmul.f32 %v26263_v63, %v12182_v12  ;;  %v26720_v12 = vld [vmem:[%s28196_s16 + $0x58] sm:$0xff] }
0x1713   : > { %v12191_v41 = vpop.xlane.xlu1 %12190 }
0x1714   : > { %v12185_v57 = vpop.xlane.xlu0 %12184  ;;  %v12219_v58 = vmul.f32 %v26308_v18, %v12191_v41 }
0x1715   : > { %v12217_v53 = vmul.f32 %v26295_v6, %v12185_v57 }
0x1717   : > { %v22220_v15 = vpack.c.bf16 %v12217_v53, %v12216_v10  ;;  %v12188_v49 = vpop.xlane.xlu1 %12187 }
0x1718   : > { %v12218_v43 = vmul.f32 %v26302_v50, %v12188_v49  ;;  %v12194_v38 = vpop.xlane.xlu0 %12193 }
0x1719   : > { %22221 = vmatprep.subr.bf16.mxu0 %v22220_v15  ;;  %v12220_v27 = vmul.f32 %v26314_v20, %v12194_v38 }
0x171a   : > { %v22224_v0 = vpack.c.bf16 %v12219_v58, %v12218_v43  ;;  %22223 = vmatpush3.bf16.msra.mxu0 %v22220_v15 }
0x171b   : > { %v12197_v39 = vpop.xlane.xlu1 %12196 }
0x171c   : > { %v12221_v21 = vmul.f32 %v26320_v59, %v12197_v39  ;;  %22225 = vmatprep.subr.bf16.mxu0 %v22224_v0  ;;  %v12200_v26 = vpop.xlane.xlu0 %12199 }
0x171d   : > { %v12222_v44 = vmul.f32 %v26326_v24, %v12200_v26  ;;  %v28197_v26 = vld [vmem:[#allocation26_spill] sm:$0xff] }
0x171e   : > { %v22228_v63 = vpack.c.bf16 %v12221_v21, %v12220_v27  ;;  %22227 = vmatpush3.bf16.msra.mxu0 %v22224_v0  ;;  %vm12437_vm12 = vcmp.gt.f32.partialorder %v28197_v26, 0.0 }
0x171f   : > { %v12203_v6 = vpop.xlane.xlu1 %12202 }
0x1720   : > { %v12223_v18 = vmul.f32 %v26332_v60, %v12203_v6  ;;  %22229 = vmatprep.subr.bf16.mxu0 %v22228_v63  ;;  %v12206_v50 = vpop.xlane.xlu0 %12205 }
0x1721   : > { %v12224_v19 = vmul.f32 %v26338_v33, %v12206_v50  ;;  %v26660_v33 = vld [vmem:[%s28196_s16 + $0x8] sm:$0xff] }
0x1722   : > { %v22232_v51 = vpack.c.bf16 %v12223_v18, %v12222_v44  ;;  %22231 = vmatpush3.bf16.msra.mxu0 %v22228_v63 }
0x1723   : > { %v12209_v46 = vpop.xlane.xlu1 %12208 }
0x1724   : > { %v12225_v20 = vmul.f32 %v26346_v35, %v12209_v46  ;;  %22233 = vmatprep.subr.bf16.mxu0 %v22232_v51  ;;  %v12212_v59 = vpop.xlane.xlu0 %12211  ;;  %v26664_v35 = vld [vmem:[%s28196_s16 + $0x10] sm:$0xff] }
0x1725   : > { %v12226_v24 = vmul.f32 %v26352_v31, %v12212_v59  ;;  %v26672_v31 = vld [vmem:[%s28196_s16 + $0x18] sm:$0xff] }
0x1726   : > { %v22236_v7 = vpack.c.bf16 %v12225_v20, %v12224_v19  ;;  %22235 = vmatpush3.bf16.msra.mxu0 %v22232_v51 }
0x1727   : > { %v12215_v1 = vpop.xlane.xlu1 %12214 }
0x1728   : > { %v12227_v60 = vmul.f32 %v26358_v37, %v12215_v1  ;;  %22237 = vmatprep.subr.bf16.mxu0 %v22236_v7  ;;  %v26676_v37 = vld [vmem:[%s28196_s16 + $0x20] sm:$0xff]  ;;  %v12128_v41 = vpop.xlane.xlu0 %12127 }
0x172a   : > { %v22240_v16 = vpack.c.bf16 %v12227_v60, %v12226_v24  ;;  %22239 = vmatpush3.bf16.msra.mxu0 %v22236_v7  ;;  %v28198_v7 = vld [vmem:[#allocation27_spill] sm:$0xff] }
0x172b   : > { %vm12440_vm15 = vcmp.gt.f32.partialorder %v28198_v7, 0.0 }
0x172c   : > { %22241 = vmatprep.subr.bf16.mxu0 %v22240_v16  ;;  %v12134_v10 = vpop.xlane.xlu0 %12133 }
0x172e   : > { %22243 = vmatpush3.bf16.msra.mxu0 %v22240_v16 }
0x172f   : > { %22245 = vmatprep.subr.bf16.mxu0 %v26605_v28 }
0x1730   : > { %v12140_v43 = vpop.xlane.xlu0 %12139 }
0x1731   : > { %21162 = vmatmul.mubr.msk.f32.vlgmr.msra.gmra.mrb[218].mxu0 %vm2066_vm3, %v26660_v33 }
0x1732   : > { %22247 = vmatpush3.bf16.msra.mxu0 %v26605_v28  ;;  %21164 = vmatprep.mubr.msk.f32.mxu0 %vm2066_vm3, %v26664_v35  ;;  %v26684_v28 = vld [vmem:[%s28196_s16 + $0x28] sm:$0xff] }
0x1733   : > { %22249 = vmatprep.subr.bf16.mxu0 %v26608_v34 }
0x1734   : > { %v12146_v1 = vpop.xlane.xlu0 %12145 }
0x1735   : > { %21165 = vmatmul.mubr.msk.f32.gmra.mrb[220].mxu0 %vm2066_vm3, %v26672_v31 }
0x1736   : > { %22251 = vmatpush3.bf16.msra.mxu0 %v26608_v34  ;;  %21167 = vmatprep.mubr.msk.f32.mxu0 %vm2066_vm3, %v26676_v37  ;;  %v26696_v34 = vld [vmem:[%s28196_s16 + $0x38] sm:$0xff] }
0x1737   : > { %22253 = vmatprep.subr.bf16.mxu0 %v26612_v40 }
0x1739   : > { %21168 = vmatmul.mubr.msk.f32.gmra.mrb[222].mxu0 %vm2066_vm3, %v26684_v28 }
0x173a   : > { %22255 = vmatpush3.bf16.msra.mxu0 %v26612_v40  ;;  %21170 = vmatprep.mubr.msk.f32.mxu0 %vm2066_vm3, %v26688_v22  ;;  %v26712_v40 = vld [vmem:[%s28196_s16 + $0x50] sm:$0xff] }
0x173b   : > { %22257 = vmatprep.subr.bf16.mxu0 %v26616_v30 }
0x173d   : > { %21171 = vmatmul.mubr.msk.f32.gmra.mrb[224].mxu0 %vm2066_vm3, %v26696_v34 }
0x173e   : > { %22259 = vmatpush3.bf16.msra.mxu0 %v26616_v30  ;;  %21173 = vmatprep.mubr.msk.f32.mxu0 %vm2066_vm3, %v26700_v45  ;;  %v12131_v30 = vpop.xlane.xlu1 %12130 }
0x173f   : > { %22261 = vmatprep.subr.bf16.mxu0 %v26620_v29 }
0x1741   : > { %21174 = vmatmul.mubr.msk.f32.gmra.mrb[226].mxu0 %vm2066_vm3, %v26708_v54 }
0x1742   : > { %22263 = vmatpush3.bf16.msra.mxu0 %v26620_v29  ;;  %21176 = vmatprep.mubr.msk.f32.mxu0 %vm2066_vm3, %v26712_v40  ;;  %v12137_v57 = vpop.xlane.xlu1 %12136 }
0x1743   : > { %22265 = vmatprep.subr.bf16.mxu0 %v26625_v47 }
0x1745   : > { %21177 = vmatmul.mubr.msk.f32.gmra.mrb[228].mxu0 %vm2066_vm3, %v26720_v12 }
0x1746   : > { %22267 = vmatpush3.bf16.msra.mxu0 %v26625_v47  ;;  %v12143_v29 = vpop.xlane.xlu1 %12142 }
0x174a   : > { %v12149_v46 = vpop.xlane.xlu1 %12148 }
0x1804   : > { %v21163_v53 = vpop.f32.mrb[218].mxu0 }
0x1805   : > { %v12390_v15 = vadd.f32 %v21163_v53, %v12131_v30  ;;  %v12330_v49 = vpop.f32.mrb[219].mxu0  ;;  %v28199_v30 = vld [vmem:[#allocation28_spill] sm:$0xff] }
0x1806   : > { %v12389_v58 = vadd.f32 %v12330_v49, %v12128_v41  ;;  %vm12439_vm1 = vcmp.gt.f32.partialorder %v28199_v30, 0.0 }
0x1807   : > { %v12414_v38 = vmul.f32 0.1, %v12390_v15  ;;  %vm12402_vm9 = vcmp.gt.f32.partialorder %v12390_v15, 0.0 }
0x1808   : > { %v12413_v0 = vmul.f32 0.1, %v12389_v58  ;;  %v21166_v39 = vpop.f32.mrb[220].mxu0  ;;  %vm12401_vm10 = vcmp.gt.f32.partialorder %v12389_v58, 0.0 }
0x1809   : > { %v12392_v27 = vadd.f32 %v21166_v39, %v12137_v57  ;;  %v12340_v21 = vpop.f32.mrb[221].mxu0  ;;  %v12426_v47 = vsel %vm12402_vm9, %v12390_v15, %v12414_v38  ;;  %v28200_v38 = vld [vmem:[#allocation29_spill] sm:$0xff] }
0x180a   : > { %v12391_v63 = vadd.f32 %v12340_v21, %v12134_v10  ;;  %v26730_v6 = vsel %vm12438_vm11, %v12426_v47, -3.4028235e+38  ;;  %v12425_v44 = vsel %vm12401_vm10, %v12389_v58, %v12413_v0  ;;  %vm12442_vm9 = vcmp.gt.f32.partialorder %v28200_v38, 0.0  ;;  %v28201_v21 = vld [vmem:[#allocation30_spill] sm:$0xff]  ;;  %v12155_v47 = vpop.xlane.xlu1 %12154 }
0x180b   : > { %v12416_v18 = vmul.f32 0.1, %v12392_v27  ;;  %v12464_v50 = vsel %vm1330_vm0, %v26730_v6, -inf  ;;  %v26736_v51 = vsel %vm12437_vm12, %v12425_v44, -3.4028235e+38  ;;  %vm12404_vm13 = vcmp.gt.f32.partialorder %v12392_v27, 0.0 }
0x180c   : > { %v12415_v19 = vmul.f32 0.1, %v12391_v63  ;;  %12465 = vmax.xlane.f32.xlu1 %v12464_v50  ;;  %v21169_v20 = vpop.f32.mrb[222].mxu0  ;;  %v12461_v59 = vsel %vm1330_vm0, %v26736_v51, -inf  ;;  %vm12403_vm14 = vcmp.gt.f32.partialorder %v12391_v63, 0.0  ;;  %vm28095_vm10 = vcmp.gt.f32.partialorder %v28201_v21, 0.0  ;;  %v12152_v50 = vpop.xlane.xlu0 %12151 }
0x180d   : > { %v12394_v24 = vadd.f32 %v21169_v20, %v12143_v29  ;;  %v12350_v60 = vpop.f32.mrb[223].mxu0  ;;  %12462 = vmax.xlane.f32.xlu0 %v12461_v59  ;;  %v12428_v16 = vsel %vm12404_vm13, %v12392_v27, %v12416_v18 }
0x180e   : > { %v12393_v41 = vadd.f32 %v12350_v60, %v12140_v43  ;;  %v26744_v57 = vsel %vm12440_vm15, %v12428_v16, -3.4028235e+38  ;;  %v12427_v10 = vsel %vm12403_vm14, %v12391_v63, %v12415_v19  ;;  %v28202_v60 = vld [vmem:[#allocation31_spill] sm:$0xff] }
0x180f   : > { %v12418_v53 = vmul.f32 0.1, %v12394_v24  ;;  %v12470_v15 = vsel %vm1330_vm0, %v26744_v57, -inf  ;;  %v26750_v49 = vsel %vm12439_vm1, %v12427_v10, -3.4028235e+38  ;;  %vm12406_vm2 = vcmp.gt.f32.partialorder %v12394_v24, 0.0 }
0x1810   : > { %v12417_v29 = vmul.f32 0.1, %v12393_v41  ;;  %12471 = vmax.xlane.f32.xlu1 %v12470_v15  ;;  %v21172_v58 = vpop.f32.mrb[224].mxu0  ;;  %v12467_v43 = vsel %vm1330_vm0, %v26750_v49, -inf  ;;  %vm12405_vm5 = vcmp.gt.f32.partialorder %v12393_v41, 0.0 }
0x1811   : > { %v12396_v0 = vadd.f32 %v21172_v58, %v12149_v46  ;;  %v12360_v39 = vpop.f32.mrb[225].mxu0  ;;  %12468 = vmax.xlane.f32.xlu0 %v12467_v43  ;;  %v12430_v27 = vsel %vm12406_vm2, %v12394_v24, %v12418_v53  ;;  %vm28096_vm2 = vcmp.gt.f32.partialorder %v28202_v60, 0.0  ;;  %v28203_v53 = vld [vmem:[#allocation32_spill] sm:$0xff] }
0x1812   : > { %v12395_v63 = vadd.f32 %v12360_v39, %v12146_v1  ;;  %v26758_v44 = vsel %vm12442_vm9, %v12430_v27, -3.4028235e+38  ;;  %v12429_v18 = vsel %vm12405_vm5, %v12393_v41, %v12417_v29  ;;  %vm28088_vm5 = vcmp.gt.f32.partialorder %v28203_v53, 0.0 }
0x1813   : > { %v12420_v19 = vmul.f32 0.1, %v12396_v0  ;;  %v12476_v20 = vsel %vm1330_vm0, %v26758_v44, -inf  ;;  %v26764_v46 = vsel %vm28095_vm10, %v12429_v18, -3.4028235e+38  ;;  %vm12408_vm13 = vcmp.gt.f32.partialorder %v12396_v0, 0.0 }
0x1814   : > { %v12419_v59 = vmul.f32 0.1, %v12395_v63  ;;  %12477 = vmax.xlane.f32.xlu1 %v12476_v20  ;;  %v21175_v24 = vpop.f32.mrb[226].mxu0  ;;  %v12473_v1 = vsel %vm1330_vm0, %v26764_v46, -inf  ;;  %vm12407_vm14 = vcmp.gt.f32.partialorder %v12395_v63, 0.0 }
0x1815   : > { %v12398_v16 = vadd.f32 %v21175_v24, %v12155_v47  ;;  %v12370_v41 = vpop.f32.mrb[227].mxu0  ;;  %12474 = vmax.xlane.f32.xlu0 %v12473_v1  ;;  %v12432_v10 = vsel %vm12408_vm13, %v12396_v0, %v12420_v19  ;;  %v12161_v47 = vpop.xlane.xlu1 %12160  ;;  %v28204_v19 = vld [vmem:[#allocation33_spill] sm:$0xff]  ;;  %v28205_v1 = vld [vmem:[#allocation34_spill] sm:$0xff] }
0x1816   : > { %v12397_v15 = vadd.f32 %v12370_v41, %v12152_v50  ;;  %v26772_v29 = vsel %vm28096_vm2, %v12432_v10, -3.4028235e+38  ;;  %v12431_v58 = vsel %vm12407_vm14, %v12395_v63, %v12419_v59  ;;  %vm28089_vm7 = vcmp.gt.f32.partialorder %v28204_v19, 0.0  ;;  %v12158_v63 = vpop.xlane.xlu0 %12157 }
0x1817   : > { %v12422_v43 = vmul.f32 0.1, %v12398_v16  ;;  %v12482_v39 = vsel %vm1330_vm0, %v26772_v29, -inf  ;;  %v26778_v27 = vsel %vm28088_vm5, %v12431_v58, -3.4028235e+38  ;;  %vm12410_vm8 = vcmp.gt.f32.partialorder %v12398_v16, 0.0 }
0x1818   : > { %v12421_v18 = vmul.f32 0.1, %v12397_v15  ;;  %12483 = vmax.xlane.f32.xlu1 %v12482_v39  ;;  %v21178_v0 = vpop.f32.mrb[228].mxu0  ;;  %v12479_v50 = vsel %vm1330_vm0, %v26778_v27, -inf  ;;  %vm12409_vm13 = vcmp.gt.f32.partialorder %v12397_v15, 0.0  ;;  %vm28107_vm14 = vcmp.gt.f32.partialorder %v28205_v1, 0.0 }
0x1819   : > { %v12400_v20 = vadd.f32 %v21178_v0, %v12161_v47  ;;  %v12380_v59 = vpop.f32.mrb[229].mxu0  ;;  %12480 = vmax.xlane.f32.xlu0 %v12479_v50  ;;  %v12434_v24 = vsel %vm12410_vm8, %v12398_v16, %v12422_v43  ;;  %v28207_v43 = vld [vmem:[#allocation35_spill] sm:$0xff] }
0x181a   : > { %v12399_v41 = vadd.f32 %v12380_v59, %v12158_v63  ;;  %v26786_v10 = vsel %vm28089_vm7, %v12434_v24, -3.4028235e+38  ;;  %v12433_v58 = vsel %vm12409_vm13, %v12397_v15, %v12421_v18  ;;  %vm28106_vm7 = vcmp.gt.f32.partialorder %v28207_v43, 0.0  ;;  %v28208_v18 = vld [vmem:[#allocation36_spill] sm:$0xff] }
0x181b   : > { %v12424_v39 = vmul.f32 0.1, %v12400_v20  ;;  %v12488_v25 = vsel %vm1330_vm0, %v26786_v10, -inf  ;;  %v26792_v23 = vsel %vm28107_vm14, %v12433_v58, -3.4028235e+38  ;;  %vm12412_vm5 = vcmp.gt.f32.partialorder %v12400_v20, 0.0 }
0x181c   : > { %v12423_v47 = vmul.f32 0.1, %v12399_v41  ;;  %12489 = vmax.xlane.f32.xlu1 %v12488_v25  ;;  %v12485_v16 = vsel %vm1330_vm0, %v26792_v23, -inf  ;;  %vm12411_vm8 = vcmp.gt.f32.partialorder %v12399_v41, 0.0  ;;  %vm28105_vm13 = vcmp.gt.f32.partialorder %v28208_v18, 0.0 }
0x181d   : > { %12486 = vmax.xlane.f32.xlu0 %v12485_v16  ;;  %v12436_v15 = vsel %vm12412_vm5, %v12400_v20, %v12424_v39  ;;  %v26811_v20 = vld [vmem:[%s28206_s18] sm:$0xff] }
0x181e   : > { %v26800_v0 = vsel %vm28106_vm7, %v12436_v15, -3.4028235e+38  ;;  %v12435_v50 = vsel %vm12411_vm8, %v12399_v41, %v12423_v47  ;;  %21179 = vmatprep.subr.mxu1 %v26811_v20 }
0x181f   : > { %v12494_v63 = vsel %vm1330_vm0, %v26800_v0, -inf  ;;  %v26806_v25 = vsel %vm28105_vm13, %v12435_v50, -3.4028235e+38  ;;  %21180 = vmatpush3.msra.mxu1 %v26811_v20 }
0x1820   : > { %12495 = vmax.xlane.f32.xlu1 %v12494_v63  ;;  %v12491_v59 = vsel %vm1330_vm0, %v26806_v25, -inf }
0x1821   : > { %12492 = vmax.xlane.f32.xlu0 %v12491_v59 }
0x1899   : > { %v12466_v24 = vpop.xlane.xlu1 %12465 }
0x189a   : > { %v12498_v41 = vsub.f32 %v26730_v6, %v12466_v24  ;;  %v12463_v58 = vpop.xlane.xlu0 %12462 }
0x189b   : > { %v12497_v39 = vsub.f32 %v26736_v51, %v12463_v58 }
0x189c   : > { %v12511_v47 = vmul.f32 1.442695, %v12498_v41 }
0x189d   : > { %v12509_v16 = vmul.f32 1.442695, %v12497_v39  ;;  %v12472_v15 = vpop.xlane.xlu1 %12471 }
0x189e   : > { %23292 = vpow2.f32 %v12511_v47  ;;  %v12500_v50 = vsub.f32 %v26744_v57, %v12472_v15  ;;  %v12469_v63 = vpop.xlane.xlu0 %12468 }
0x189f   : > { %23294 = vpow2.f32 %v12509_v16  ;;  %v12499_v59 = vsub.f32 %v26750_v49, %v12469_v63 }
0x18a0   : > { %v12515_v36 = vmul.f32 1.442695, %v12500_v50 }
0x18a1   : > { %v12513_v62 = vmul.f32 1.442695, %v12499_v59  ;;  %v12478_v5 = vpop.xlane.xlu1 %12477 }
0x18a2   : > { %23296 = vpow2.f32 %v12515_v36  ;;  %v12502_v4 = vsub.f32 %v26758_v44, %v12478_v5  ;;  %v12475_v6 = vpop.xlane.xlu0 %12474 }
0x18a3   : > { %23298 = vpow2.f32 %v12513_v62  ;;  %v12501_v51 = vsub.f32 %v26764_v46, %v12475_v6 }
0x18a4   : > { %v12519_v24 = vmul.f32 1.442695, %v12502_v4 }
0x18a5   : > { %v12517_v41 = vmul.f32 1.442695, %v12501_v51  ;;  %v12484_v58 = vpop.xlane.xlu1 %12483 }
0x18a6   : > { %23300 = vpow2.f32 %v12519_v24  ;;  %v12504_v57 = vsub.f32 %v26772_v29, %v12484_v58  ;;  %v12481_v39 = vpop.xlane.xlu0 %12480 }
0x18a7   : > { %23302 = vpow2.f32 %v12517_v41  ;;  %v12503_v49 = vsub.f32 %v26778_v27, %v12481_v39 }
0x18a8   : > { %v26823_v47 = vpop.eup %23292  ;;  %v12523_v16 = vmul.f32 1.442695, %v12504_v57 }
0x18a9   : > { %v26825_v36 = vpop.eup %23294  ;;  %v12521_v5 = vmul.f32 1.442695, %v12503_v49  ;;  %v12490_v44 = vpop.xlane.xlu1 %12489  ;;  %v12536_v62 = vsel %vm1330_vm0, %v26823_v47, 0.0 }
0x18aa   : > { %23304 = vpow2.f32 %v12523_v16  ;;  %v12506_v4 = vsub.f32 %v26786_v10, %v12490_v44  ;;  %12537 = vadd.xlane.f32.xlu1 %v12536_v62  ;;  %v12487_v46 = vpop.xlane.xlu0 %12486  ;;  %v12533_v29 = vsel %vm1330_vm0, %v26825_v36, 0.0 }
0x18ab   : > { %23306 = vpow2.f32 %v12521_v5  ;;  %v12505_v27 = vsub.f32 %v26792_v23, %v12487_v46  ;;  %12534 = vadd.xlane.f32.xlu0 %v12533_v29 }
0x18ac   : > { %v26833_v15 = vpop.eup %23296  ;;  %v12527_v50 = vmul.f32 1.442695, %v12506_v4 }
0x18ad   : > { %v26835_v63 = vpop.eup %23298  ;;  %v12525_v59 = vmul.f32 1.442695, %v12505_v27  ;;  %v12496_v6 = vpop.xlane.xlu1 %12495  ;;  %v12542_v51 = vsel %vm1330_vm0, %v26833_v15, 0.0 }
0x18ae   : > { %23308 = vpow2.f32 %v12527_v50  ;;  %v12508_v10 = vsub.f32 %v26800_v0, %v12496_v6  ;;  %12543 = vadd.xlane.f32.xlu1 %v12542_v51  ;;  %v12493_v24 = vpop.xlane.xlu0 %12492  ;;  %v12539_v41 = vsel %vm1330_vm0, %v26835_v63, 0.0 }
0x18af   : > { %23310 = vpow2.f32 %v12525_v59  ;;  %v12507_v23 = vsub.f32 %v26806_v25, %v12493_v24  ;;  %12540 = vadd.xlane.f32.xlu0 %v12539_v41  ;;  %v17792_v24 = vld [vmem:[%s28181_s10 + $0x38] sm:$0xff] }
0x18b0   : > { %v26843_v58 = vpop.eup %23300  ;;  %v12531_v57 = vmul.f32 1.442695, %v12508_v10  ;;  %v17791_v10 = vld [vmem:[%s28181_s10 + $0x30] sm:$0xff] }
0x18b1   : > { %v26845_v39 = vpop.eup %23302  ;;  %v12529_v49 = vmul.f32 1.442695, %v12507_v23  ;;  %v12548_v16 = vsel %vm1330_vm0, %v26843_v58, 0.0  ;;  %v22268_v41 = vpack.c.bf16 %v17792_v24, %v17791_v10 }
0x18b2   : > { %23312 = vpow2.f32 %v12531_v57  ;;  %12549 = vadd.xlane.f32.xlu1 %v12548_v16  ;;  %v12545_v0 = vsel %vm1330_vm0, %v26845_v39, 0.0 }
0x18b3   : > { %23314 = vpow2.f32 %v12529_v49  ;;  %12546 = vadd.xlane.f32.xlu0 %v12545_v0  ;;  %22269 = vmatprep.subr.bf16.mxu1 %v22268_v41 }
0x18b4   : > { %v26851_v5 = vpop.eup %23304 }
0x18b5   : > { %v26853_v25 = vpop.eup %23306  ;;  %v12554_v44 = vsel %vm1330_vm0, %v26851_v5, 0.0 }
0x18b6   : > { %12555 = vadd.xlane.f32.xlu1 %v12554_v44  ;;  %v12551_v62 = vsel %vm1330_vm0, %v26853_v25, 0.0 }
0x18b7   : > { %12552 = vadd.xlane.f32.xlu0 %v12551_v62 }
0x18b8   : > { %v26859_v4 = vpop.eup %23308 }
0x18b9   : > { %v26861_v46 = vpop.eup %23310  ;;  %v12560_v29 = vsel %vm1330_vm0, %v26859_v4, 0.0 }
0x18ba   : > { %12561 = vadd.xlane.f32.xlu1 %v12560_v29  ;;  %v12557_v27 = vsel %vm1330_vm0, %v26861_v46, 0.0 }
0x18bb   : > { %12558 = vadd.xlane.f32.xlu0 %v12557_v27 }
0x18bc   : > { %v26867_v50 = vpop.eup %23312 }
0x18bd   : > { %v26869_v59 = vpop.eup %23314  ;;  %v12566_v6 = vsel %vm1330_vm0, %v26867_v50, 0.0 }
0x18be   : > { %12567 = vadd.xlane.f32.xlu1 %v12566_v6  ;;  %v12563_v51 = vsel %vm1330_vm0, %v26869_v59, 0.0 }
0x18bf   : > { %12564 = vadd.xlane.f32.xlu0 %v12563_v51 }
0x1937   : > { %v12538_v23 = vpop.xlane.xlu1 %12537 }
0x1938   : > { %23316 = vrcp.f32 %v12538_v23  ;;  %v12535_v57 = vpop.xlane.xlu0 %12534 }
0x1939   : > { %23318 = vrcp.f32 %v12535_v57 }
0x193b   : > { %v12544_v49 = vpop.xlane.xlu1 %12543 }
0x193c   : > { %23320 = vrcp.f32 %v12544_v49  ;;  %v12541_v16 = vpop.xlane.xlu0 %12540 }
0x193d   : > { %23322 = vrcp.f32 %v12541_v16 }
0x193f   : > { %v12550_v0 = vpop.xlane.xlu1 %12549 }
0x1940   : > { %23324 = vrcp.f32 %v12550_v0  ;;  %v12547_v44 = vpop.xlane.xlu0 %12546 }
0x1941   : > { %23326 = vrcp.f32 %v12547_v44 }
0x1942   : > { %v23317_v62 = vpop.eup %23316 }
0x1943   : > { %v23319_v29 = vpop.eup %23318  ;;  %v12556_v27 = vpop.xlane.xlu1 %12555  ;;  %v12582_v10 = vmul.f32 %v23317_v62, %v26823_v47 }
0x1944   : > { %23328 = vrcp.f32 %v12556_v27  ;;  %v12553_v6 = vpop.xlane.xlu0 %12552  ;;  %v12581_v51 = vmul.f32 %v23319_v29, %v26825_v36 }
0x1945   : > { %23330 = vrcp.f32 %v12553_v6 }
0x1946   : > { %v23321_v24 = vpop.eup %23320  ;;  %21181 = vmatprep.mubr.msk.f32.mxu1 %vm1330_vm0, %v12581_v51 }
0x1947   : > { %v23323_v23 = vpop.eup %23322  ;;  %v12562_v57 = vpop.xlane.xlu1 %12561  ;;  %21182 = vmatmul.mubr.msk.f32.vlgmr.msra.gmra.mrb[216].mxu1 %vm1330_vm0, %v12582_v10  ;;  %v12584_v0 = vmul.f32 %v23321_v24, %v26833_v15 }
0x1948   : > { %23332 = vrcp.f32 %v12562_v57  ;;  %v12559_v49 = vpop.xlane.xlu0 %12558  ;;  %v12583_v16 = vmul.f32 %v23323_v23, %v26835_v63  ;;  %22271 = vmatpush3.bf16.msra.mxu1 %v22268_v41 }
0x1949   : > { %23334 = vrcp.f32 %v12559_v49  ;;  %21305 = vmatprep.subr.mxu1 %v26811_v20 }
0x194a   : > { %v23325_v36 = vpop.eup %23324  ;;  %21184 = vmatprep.mubr.msk.f32.mxu1 %vm1330_vm0, %v12583_v16 }
0x194b   : > { %v23327_v47 = vpop.eup %23326  ;;  %v12568_v44 = vpop.xlane.xlu1 %12567  ;;  %21185 = vmatmul.mubr.msk.f32.gmra.mrb[218].mxu1 %vm1330_vm0, %v12584_v0  ;;  %v12586_v63 = vmul.f32 %v23325_v36, %v26843_v58 }
0x194c   : > { %23336 = vrcp.f32 %v12568_v44  ;;  %v12565_v62 = vpop.xlane.xlu0 %12564  ;;  %v12585_v29 = vmul.f32 %v23327_v47, %v26845_v39 }
0x194d   : > { %23338 = vrcp.f32 %v12565_v62 }
0x194e   : > { %v23329_v41 = vpop.eup %23328  ;;  %21187 = vmatprep.mubr.msk.f32.mxu1 %vm1330_vm0, %v12585_v29 }
0x194f   : > { %v23331_v15 = vpop.eup %23330  ;;  %21188 = vmatmul.mubr.msk.f32.gmra.mrb[220].mxu1 %vm1330_vm0, %v12586_v63  ;;  %v12588_v6 = vmul.f32 %v23329_v41, %v26851_v5 }
0x1950   : > { %v12587_v27 = vmul.f32 %v23331_v15, %v26853_v25 }
0x1952   : > { %v23333_v51 = vpop.eup %23332  ;;  %21190 = vmatprep.mubr.msk.f32.mxu1 %vm1330_vm0, %v12587_v27 }
0x1953   : > { %v23335_v10 = vpop.eup %23334  ;;  %21191 = vmatmul.mubr.msk.f32.gmra.mrb[222].mxu1 %vm1330_vm0, %v12588_v6  ;;  %v12590_v58 = vmul.f32 %v23333_v51, %v26859_v4 }
0x1954   : > { %v12589_v39 = vmul.f32 %v23335_v10, %v26861_v46 }
0x1956   : > { %v23337_v24 = vpop.eup %23336  ;;  %21193 = vmatprep.mubr.msk.f32.mxu1 %vm1330_vm0, %v12589_v39 }
0x1957   : > { %v23339_v23 = vpop.eup %23338  ;;  %21194 = vmatmul.mubr.msk.f32.gmra.mrb[224].mxu1 %vm1330_vm0, %v12590_v58  ;;  %v12592_v5 = vmul.f32 %v23337_v24, %v26867_v50  ;;  %v17808_v24 = vld [vmem:[%s28182_s11 + $0x3] ss:$0 sm:$0xff] }
0x1958   : > { %v12591_v25 = vmul.f32 %v23339_v23, %v26869_v59 }
0x195a   : > { %21196 = vmatprep.mubr.msk.f32.mxu1 %vm1330_vm0, %v12591_v25 }
0x195b   : > { %21197 = vmatmul.mubr.msk.f32.gmra.mrb[226].mxu1 %vm1330_vm0, %v12592_v5 }
0x195c   : > { %21245 = vmatprep.mubr.msk.f32.mxu1 %vm28094_vm4, %v26271_v14 }
0x195f   : > { %21246 = vmatmul.mubr.msk.f32.vlgmr.msra.gmra.mrb[228].mxu1 %vm28094_vm4, %v26269_v56 }
0x1960   : > { %21248 = vmatprep.mubr.msk.f32.mxu1 %vm28094_vm4, %v26275_v42  ;;  %21306 = vmatpush3.msra.mxu1 %v26811_v20 }
0x1963   : > { %21249 = vmatmul.mubr.msk.f32.gmra.mrb[230].mxu1 %vm28094_vm4, %v26273_v2 }
0x1964   : > { %21251 = vmatprep.mubr.msk.f32.mxu1 %vm28094_vm4, %v26279_v55 }
0x1967   : > { %21252 = vmatmul.mubr.msk.f32.gmra.mrb[232].mxu1 %vm28094_vm4, %v26277_v11 }
0x1968   : > { %21254 = vmatprep.mubr.msk.f32.mxu1 %vm28094_vm4, %v26283_v3 }
0x196b   : > { %21255 = vmatmul.mubr.msk.f32.gmra.mrb[234].mxu1 %vm28094_vm4, %v26281_v9 }
0x196c   : > { %21257 = vmatprep.mubr.msk.f32.mxu1 %vm28094_vm4, %v26287_v48 }
0x196f   : > { %21258 = vmatmul.mubr.msk.f32.gmra.mrb[236].mxu1 %vm28094_vm4, %v26285_v17 }
0x1970   : > { %21260 = vmatprep.mubr.msk.f32.mxu1 %vm28094_vm4, %v26291_v13 }
0x1973   : > { %21261 = vmatmul.mubr.msk.f32.gmra.mrb[238].mxu1 %vm28094_vm4, %v26289_v8 }
0x1a1a   : > { %v21183_v20 = vpop.f32.mrb[216].mxu1 }
0x1a1b   : > { %v12695_v4 = vpop.f32.mrb[217].mxu1  ;;  %v12755_v50 = vmul.f32 %v21183_v20, %v26660_v33 }
0x1a1c   : > { %v12754_v46 = vmul.f32 %v12695_v4, %v26642_v32 }
0x1a1e   : > { %v21186_v59 = vpop.f32.mrb[218].mxu1  ;;  %21223 = vmatprep.mubr.msk.f32.mxu0 %vm2066_vm3, %v12754_v46 }
0x1a1f   : > { %v12705_v57 = vpop.f32.mrb[219].mxu1  ;;  %21224 = vmatmul.mubr.msk.f32.vlgmr.msra.gmra.mrb[230].mxu0 %vm2066_vm3, %v12755_v50  ;;  %v12757_v16 = vmul.f32 %v21186_v59, %v26672_v31 }
0x1a20   : > { %v12756_v49 = vmul.f32 %v12705_v57, %v26664_v35 }
0x1a22   : > { %v21189_v0 = vpop.f32.mrb[220].mxu1  ;;  %21226 = vmatprep.mubr.msk.f32.mxu0 %vm2066_vm3, %v12756_v49 }
0x1a23   : > { %v12715_v36 = vpop.f32.mrb[221].mxu1  ;;  %21227 = vmatmul.mubr.msk.f32.gmra.mrb[232].mxu0 %vm2066_vm3, %v12757_v16  ;;  %v12759_v44 = vmul.f32 %v21189_v0, %v26684_v28 }
0x1a24   : > { %v12758_v47 = vmul.f32 %v12715_v36, %v26676_v37 }
0x1a26   : > { %v21192_v62 = vpop.f32.mrb[222].mxu1  ;;  %21229 = vmatprep.mubr.msk.f32.mxu0 %vm2066_vm3, %v12758_v47 }
0x1a27   : > { %v12725_v29 = vpop.f32.mrb[223].mxu1  ;;  %21230 = vmatmul.mubr.msk.f32.gmra.mrb[234].mxu0 %vm2066_vm3, %v12759_v44  ;;  %v12761_v41 = vmul.f32 %v21192_v62, %v26696_v34 }
0x1a28   : > { %v12760_v63 = vmul.f32 %v12725_v29, %v26688_v22 }
0x1a2a   : > { %v21195_v15 = vpop.f32.mrb[224].mxu1  ;;  %21232 = vmatprep.mubr.msk.f32.mxu0 %vm2066_vm3, %v12760_v63 }
0x1a2b   : > { %v12735_v27 = vpop.f32.mrb[225].mxu1  ;;  %21233 = vmatmul.mubr.msk.f32.gmra.mrb[236].mxu0 %vm2066_vm3, %v12761_v41  ;;  %v12763_v51 = vmul.f32 %v21195_v15, %v26708_v54 }
0x1a2c   : > { %v12762_v6 = vmul.f32 %v12735_v27, %v26700_v45 }
0x1a2e   : > { %v21198_v10 = vpop.f32.mrb[226].mxu1  ;;  %21235 = vmatprep.mubr.msk.f32.mxu0 %vm2066_vm3, %v12762_v6 }
0x1a2f   : > { %v12745_v39 = vpop.f32.mrb[227].mxu1  ;;  %21236 = vmatmul.mubr.msk.f32.gmra.mrb[238].mxu0 %vm2066_vm3, %v12763_v51  ;;  %v12765_v23 = vmul.f32 %v21198_v10, %v26720_v12 }
0x1a30   : > { %v12764_v58 = vmul.f32 %v12745_v39, %v26712_v40 }
0x1a32   : > { %21238 = vmatprep.mubr.msk.f32.mxu0 %vm2066_vm3, %v12764_v58  ;;  %v21247_v25 = vpop.f32.mrb[228].mxu1 }
0x1a33   : > { %21239 = vmatmul.mubr.msk.f32.gmra.mrb[240].mxu0 %vm2066_vm3, %v12765_v23  ;;  %v13068_v5 = vpop.f32.mrb[229].mxu1  ;;  %v13192_v20 = vmul.f32 %v21247_v25, %v17808_v24 }
0x1a34   : > { %v26952_v4 = vpack.c.bf16 %v21247_v25, %v13068_v5  ;;  %v13191_v46 = vmul.f32 %v17808_v24, %v13068_v5  ;;  %21287 = vmatprep.mubr.msk.f32.mxu0 %vm2066_vm3, %v26642_v32 }
0x1a35   : > { %v13206_v50 = vsel %vm28094_vm4, %v13192_v20, 0.0 }
0x1a36   : > { %13207 = vadd.xlane.f32.xlu1 %v13206_v50  ;;  %v21250_v59 = vpop.f32.mrb[230].mxu1  ;;  %v13203_v57 = vsel %vm28094_vm4, %v13191_v46, 0.0 }
0x1a37   : > { %13204 = vadd.xlane.f32.xlu0 %v13203_v57  ;;  %v13078_v49 = vpop.f32.mrb[231].mxu1  ;;  %v13194_v16 = vmul.f32 %v21250_v59, %v17808_v24 }
0x1a38   : > { %v26958_v0 = vpack.c.bf16 %v21250_v59, %v13078_v49  ;;  %v13193_v36 = vmul.f32 %v17808_v24, %v13078_v49 }
0x1a39   : > { %v13212_v47 = vsel %vm28094_vm4, %v13194_v16, 0.0 }
0x1a3a   : > { %13213 = vadd.xlane.f32.xlu1 %v13212_v47  ;;  %v21253_v44 = vpop.f32.mrb[232].mxu1  ;;  %v13209_v62 = vsel %vm28094_vm4, %v13193_v36, 0.0 }
0x1a3b   : > { %13210 = vadd.xlane.f32.xlu0 %v13209_v62  ;;  %v13088_v32 = vpop.f32.mrb[233].mxu1  ;;  %v13196_v29 = vmul.f32 %v21253_v44, %v17808_v24 }
0x1a3c   : > { %v26962_v63 = vpack.c.bf16 %v21253_v44, %v13088_v32  ;;  %v13195_v41 = vmul.f32 %v17808_v24, %v13088_v32 }
0x1a3d   : > { %v13218_v15 = vsel %vm28094_vm4, %v13196_v29, 0.0 }
0x1a3e   : > { %13219 = vadd.xlane.f32.xlu1 %v13218_v15  ;;  %v21256_v27 = vpop.f32.mrb[234].mxu1  ;;  %v13215_v6 = vsel %vm28094_vm4, %v13195_v41, 0.0  ;;  %v17807_v41 = vld [vmem:[%s28195_s15 + $0x3] ss:$0 sm:$0xff] }
0x1a3f   : > { %13216 = vadd.xlane.f32.xlu0 %v13215_v6  ;;  %v13098_v51 = vpop.f32.mrb[235].mxu1  ;;  %v13198_v10 = vmul.f32 %v21256_v27, %v17808_v24  ;;  %v13137_v13 = vmul.f32 %v17807_v41, %v13068_v5  ;;  %v13142_v17 = vmul.f32 %v21253_v44, %v17807_v41  ;;  %v13144_v5 = vmul.f32 %v21256_v27, %v17807_v41 }
0x1a40   : > { %v26966_v39 = vpack.c.bf16 %v21256_v27, %v13098_v51  ;;  %v13197_v58 = vmul.f32 %v17808_v24, %v13098_v51 }
0x1a41   : > { %v13224_v23 = vsel %vm28094_vm4, %v13198_v10, 0.0 }
0x1a42   : > { %13225 = vadd.xlane.f32.xlu1 %v13224_v23  ;;  %v21259_v20 = vpop.f32.mrb[236].mxu1  ;;  %v13221_v46 = vsel %vm28094_vm4, %v13197_v58, 0.0 }
0x1a43   : > { %13222 = vadd.xlane.f32.xlu0 %v13221_v46  ;;  %v13108_v50 = vpop.f32.mrb[237].mxu1  ;;  %v13200_v57 = vmul.f32 %v21259_v20, %v17808_v24  ;;  %v13138_v46 = vmul.f32 %v21247_v25, %v17807_v41  ;;  %v13141_v25 = vmul.f32 %v17807_v41, %v13088_v32 }
0x1a44   : > { %v26970_v16 = vpack.c.bf16 %v21259_v20, %v13108_v50  ;;  %v13199_v36 = vmul.f32 %v17808_v24, %v13108_v50 }
0x1a45   : > { %v13230_v47 = vsel %vm28094_vm4, %v13200_v57, 0.0  ;;  %v13152_v57 = vsel %vm28094_vm4, %v13138_v46, 0.0 }
0x1a46   : > { %13231 = vadd.xlane.f32.xlu1 %v13230_v47  ;;  %v21262_v62 = vpop.f32.mrb[238].mxu1  ;;  %v13227_v29 = vsel %vm28094_vm4, %v13199_v36, 0.0  ;;  %v13140_v47 = vmul.f32 %v21250_v59, %v17807_v41  ;;  %v13149_v36 = vsel %vm28094_vm4, %v13137_v13, 0.0  ;;  %v13143_v59 = vmul.f32 %v17807_v41, %v13098_v51 }
0x1a47   : > { %13228 = vadd.xlane.f32.xlu0 %v13227_v29  ;;  %v13118_v15 = vpop.f32.mrb[239].mxu1  ;;  %v13202_v6 = vmul.f32 %v21262_v62, %v17808_v24  ;;  %v13139_v29 = vmul.f32 %v17807_v41, %v13078_v49  ;;  %v13170_v13 = vsel %vm28094_vm4, %v13144_v5, 0.0  ;;  %v13146_v49 = vmul.f32 %v21259_v20, %v17807_v41 }
0x1a48   : > { %v26975_v10 = vpack.c.bf16 %v21262_v62, %v13118_v15  ;;  %v13201_v23 = vmul.f32 %v17808_v24, %v13118_v15  ;;  %v13158_v48 = vsel %vm28094_vm4, %v13140_v47, 0.0  ;;  %v13167_v44 = vsel %vm28094_vm4, %v13143_v59, 0.0  ;;  %v23738_v47 = vld [vmem:[%s23873_s25] sm:$0xff]  ;;  %v23741_v59 = vld [vmem:[%s23873_s25 + $0x28] sm:$0xff] }
0x1a49   : > { %v13236_v58 = vsel %vm28094_vm4, %v13202_v6, 0.0  ;;  %v13155_v24 = vsel %vm28094_vm4, %v13139_v29, 0.0  ;;  %v13164_v6 = vsel %vm28094_vm4, %v13142_v17, 0.0  ;;  %v13176_v32 = vsel %vm28094_vm4, %v13146_v49, 0.0 }
0x1a4a   : > { %13237 = vadd.xlane.f32.xlu1 %v13236_v58  ;;  %v13233_v8 = vsel %vm28094_vm4, %v13201_v23, 0.0  ;;  %v13148_v23 = vmul.f32 %v21262_v62, %v17807_v41  ;;  %v13147_v27 = vmul.f32 %v17807_v41, %v13118_v15 }
0x1a4b   : > { %13234 = vadd.xlane.f32.xlu0 %v13233_v8  ;;  %v13161_v8 = vsel %vm28094_vm4, %v13141_v25, 0.0  ;;  %v23740_v25 = vld [vmem:[%s23873_s25 + $0x10] sm:$0xff] }
0x1a4c   : > { %v13182_v51 = vsel %vm28094_vm4, %v13148_v23, 0.0  ;;  %v13179_v20 = vsel %vm28094_vm4, %v13147_v27, 0.0 }
0x1a4e   : > { %13153 = vadd.xlane.f32.xlu1 %v13152_v57 }
0x1a4f   : > { %13150 = vadd.xlane.f32.xlu0 %v13149_v36 }
0x1a52   : > { %13159 = vadd.xlane.f32.xlu1 %v13158_v48  ;;  %v13145_v48 = vmul.f32 %v17807_v41, %v13108_v50  ;;  %v23737_v50 = vld [vmem:[%s23873_s25 + $0x8] sm:$0xff] }
0x1a53   : > { %13156 = vadd.xlane.f32.xlu0 %v13155_v24  ;;  %v23739_v24 = vld [vmem:[%s23873_s25 + $0x18] sm:$0xff] }
0x1a54   : > { %v13173_v17 = vsel %vm28094_vm4, %v13145_v48, 0.0 }
0x1a56   : > { %13165 = vadd.xlane.f32.xlu1 %v13164_v6 }
0x1a57   : > { %13162 = vadd.xlane.f32.xlu0 %v13161_v8 }
0x1a5a   : > { %13171 = vadd.xlane.f32.xlu1 %v13170_v13 }
0x1a5b   : > { %13168 = vadd.xlane.f32.xlu0 %v13167_v44  ;;  %v23742_v44 = vld [vmem:[%s23873_s25 + $0x20] sm:$0xff] }
0x1a5e   : > { %13177 = vadd.xlane.f32.xlu1 %v13176_v32 }
0x1a5f   : > { %13174 = vadd.xlane.f32.xlu0 %v13173_v17  ;;  %v23743_v17 = vld [vmem:[%s23873_s25 + $0x38] sm:$0xff] }
0x1a62   : > { %13183 = vadd.xlane.f32.xlu1 %v13182_v51 }
0x1a63   : > { %13180 = vadd.xlane.f32.xlu0 %v13179_v20  ;;  %v23744_v20 = vld [vmem:[%s23873_s25 + $0x30] sm:$0xff] }
0x1ac3   : > { %v13208_v58 = vpop.xlane.xlu1 %13207 }
0x1ac4   : > { %v13240_v46 = vmul.f32 %v23737_v50, %v13208_v58  ;;  %v13205_v57 = vpop.xlane.xlu0 %13204 }
0x1ac5   : > { %v13239_v62 = vmul.f32 %v23738_v47, %v13205_v57  ;;  %v23745_v57 = vld [vmem:[%s23873_s25 + $0x48] sm:$0xff] }
0x1ac7   : > { %v22272_v36 = vpack.c.bf16 %v13240_v46, %v13239_v62  ;;  %v13214_v29 = vpop.xlane.xlu1 %13213 }
0x1ac8   : > { %v13242_v41 = vmul.f32 %v23739_v24, %v13214_v29  ;;  %v13211_v15 = vpop.xlane.xlu0 %13210 }
0x1ac9   : > { %v13241_v6 = vmul.f32 %v23740_v25, %v13211_v15  ;;  %22273 = vmatprep.subr.bf16.mxu0 %v22272_v36  ;;  %v23747_v15 = vld [vmem:[%s23873_s25 + $0x58] sm:$0xff] }
0x1aca   : > { %22275 = vmatpush3.bf16.msra.mxu0 %v22272_v36  ;;  %v23746_v36 = vld [vmem:[%s23873_s25 + $0x40] sm:$0xff] }
0x1acb   : > { %v22276_v5 = vpack.c.bf16 %v13242_v41, %v13241_v6  ;;  %v13220_v8 = vpop.xlane.xlu1 %13219 }
0x1acc   : > { %v13244_v13 = vmul.f32 %v23741_v59, %v13220_v8  ;;  %v13217_v49 = vpop.xlane.xlu0 %13216 }
0x1acd   : > { %v13243_v48 = vmul.f32 %v23742_v44, %v13217_v49  ;;  %22277 = vmatprep.subr.bf16.mxu0 %v22276_v5 }
0x1ace   : > { %22279 = vmatpush3.bf16.msra.mxu0 %v22276_v5  ;;  %v23748_v5 = vld [vmem:[%s23873_s25 + $0x50] sm:$0xff] }
0x1acf   : > { %v22280_v32 = vpack.c.bf16 %v13244_v13, %v13243_v48  ;;  %v13226_v23 = vpop.xlane.xlu1 %13225 }
0x1ad0   : > { %v13246_v27 = vmul.f32 %v23743_v17, %v13226_v23  ;;  %v13223_v51 = vpop.xlane.xlu0 %13222 }
0x1ad1   : > { %v13245_v58 = vmul.f32 %v23744_v20, %v13223_v51  ;;  %22281 = vmatprep.subr.bf16.mxu0 %v22280_v32 }
0x1ad2   : > { %22283 = vmatpush3.bf16.msra.mxu0 %v22280_v32 }
0x1ad3   : > { %v22284_v50 = vpack.c.bf16 %v13246_v27, %v13245_v58  ;;  %v13232_v46 = vpop.xlane.xlu1 %13231 }
0x1ad4   : > { %v13248_v47 = vmul.f32 %v23745_v57, %v13232_v46  ;;  %v13229_v62 = vpop.xlane.xlu0 %13228 }
0x1ad5   : > { %v13247_v29 = vmul.f32 %v23746_v36, %v13229_v62  ;;  %22285 = vmatprep.subr.bf16.mxu0 %v22284_v50 }
0x1ad6   : > { %22287 = vmatpush3.bf16.msra.mxu0 %v22284_v50 }
0x1ad7   : > { %v22288_v24 = vpack.c.bf16 %v13248_v47, %v13247_v29  ;;  %v13238_v41 = vpop.xlane.xlu1 %13237 }
0x1ad8   : > { %v13250_v25 = vmul.f32 %v23747_v15, %v13238_v41  ;;  %v13235_v6 = vpop.xlane.xlu0 %13234 }
0x1ad9   : > { %v13249_v8 = vmul.f32 %v23748_v5, %v13235_v6  ;;  %22289 = vmatprep.subr.bf16.mxu0 %v22288_v24 }
0x1ada   : > { %22291 = vmatpush3.bf16.msra.mxu0 %v22288_v24 }
0x1adb   : > { %v22292_v59 = vpack.c.bf16 %v13250_v25, %v13249_v8 }
0x1add   : > { %22293 = vmatprep.subr.bf16.mxu0 %v22292_v59 }
0x1ade   : > { %22295 = vmatpush3.bf16.msra.mxu0 %v22292_v59 }
0x1adf   : > { %22297 = vmatprep.subr.bf16.mxu0 %v26952_v4 }
0x1ae1   : > { %21288 = vmatmul.mubr.msk.f32.vlgmr.msra.gmra.mrb[242].mxu0 %vm2066_vm3, %v26660_v33 }
0x1ae2   : > { %22299 = vmatpush3.bf16.msra.mxu0 %v26952_v4  ;;  %21290 = vmatprep.mubr.msk.f32.mxu0 %vm2066_vm3, %v26664_v35 }
0x1ae3   : > { %22301 = vmatprep.subr.bf16.mxu0 %v26958_v0 }
0x1ae5   : > { %21291 = vmatmul.mubr.msk.f32.gmra.mrb[244].mxu0 %vm2066_vm3, %v26672_v31 }
0x1ae6   : > { %22303 = vmatpush3.bf16.msra.mxu0 %v26958_v0  ;;  %21293 = vmatprep.mubr.msk.f32.mxu0 %vm2066_vm3, %v26676_v37  ;;  %v13154_v0 = vpop.xlane.xlu1 %13153 }
0x1ae7   : > { %22305 = vmatprep.subr.bf16.mxu0 %v26962_v63 }
0x1ae9   : > { %21294 = vmatmul.mubr.msk.f32.gmra.mrb[246].mxu0 %vm2066_vm3, %v26684_v28 }
0x1aea   : > { %22307 = vmatpush3.bf16.msra.mxu0 %v26962_v63  ;;  %21296 = vmatprep.mubr.msk.f32.mxu0 %vm2066_vm3, %v26688_v22  ;;  %v13151_v63 = vpop.xlane.xlu0 %13150 }
0x1aeb   : > { %22309 = vmatprep.subr.bf16.mxu0 %v26966_v39 }
0x1aed   : > { %21297 = vmatmul.mubr.msk.f32.gmra.mrb[248].mxu0 %vm2066_vm3, %v26696_v34 }
0x1aee   : > { %22311 = vmatpush3.bf16.msra.mxu0 %v26966_v39  ;;  %21299 = vmatprep.mubr.msk.f32.mxu0 %vm2066_vm3, %v26700_v45  ;;  %v13160_v39 = vpop.xlane.xlu1 %13159 }
0x1aef   : > { %22313 = vmatprep.subr.bf16.mxu0 %v26970_v16 }
0x1af1   : > { %21300 = vmatmul.mubr.msk.f32.gmra.mrb[250].mxu0 %vm2066_vm3, %v26708_v54 }
0x1af2   : > { %v27030_v33 = vpop.f32.mrb[230].mxu0  ;;  %22315 = vmatpush3.bf16.msra.mxu0 %v26970_v16  ;;  %21302 = vmatprep.mubr.msk.f32.mxu0 %vm2066_vm3, %v26712_v40  ;;  %v13157_v16 = vpop.xlane.xlu0 %13156 }
0x1af3   : > { %v27035_v35 = vpop.f32.mrb[231].mxu0  ;;  %22317 = vmatprep.subr.bf16.mxu0 %v26975_v10  ;;  %v13166_v44 = vpop.xlane.xlu1 %13165 }
0x1af5   : > { %21303 = vmatmul.mubr.msk.f32.gmra.mrb[252].mxu0 %vm2066_vm3, %v26720_v12 }
0x1af6   : > { %v27040_v31 = vpop.f32.mrb[232].mxu0  ;;  %22319 = vmatpush3.bf16.msra.mxu0 %v26975_v10  ;;  %v13163_v32 = vpop.xlane.xlu0 %13162 }
0x1af7   : > { %v27043_v37 = vpop.f32.mrb[233].mxu0  ;;  %v13172_v29 = vpop.xlane.xlu1 %13171 }
0x1afa   : > { %v27045_v28 = vpop.f32.mrb[234].mxu0  ;;  %v13169_v25 = vpop.xlane.xlu0 %13168 }
0x1afb   : > { %v27047_v22 = vpop.f32.mrb[235].mxu0 }
0x1afe   : > { %v27049_v34 = vpop.f32.mrb[236].mxu0 }
0x1aff   : > { %v27051_v45 = vpop.f32.mrb[237].mxu0 }
0x1b02   : > { %v27053_v54 = vpop.f32.mrb[238].mxu0 }
0x1b03   : > { %v27055_v40 = vpop.f32.mrb[239].mxu0 }
0x1b06   : > { %v27057_v4 = vpop.f32.mrb[240].mxu0 }
0x1b07   : > { %v27059_v12 = vpop.f32.mrb[241].mxu0 }
0x1bb4   : > { %v21289_v10 = vpop.f32.mrb[242].mxu0 }
0x1bb5   : > { %v13377_v13 = vadd.f32 %v21289_v10, %v13154_v0  ;;  %v13317_v49 = vpop.f32.mrb[243].mxu0 }
0x1bb6   : > { %v13376_v48 = vadd.f32 %v13317_v49, %v13151_v63 }
0x1bb7   : > { %v13401_v23 = vmul.f32 0.1, %v13377_v13  ;;  %vm13389_vm5 = vcmp.gt.f32.partialorder %v13377_v13, 0.0 }
0x1bb8   : > { %v13400_v17 = vmul.f32 0.1, %v13376_v48  ;;  %v21292_v27 = vpop.f32.mrb[244].mxu0  ;;  %vm13388_vm8 = vcmp.gt.f32.partialorder %v13376_v48, 0.0 }
0x1bb9   : > { %v13379_v51 = vadd.f32 %v21292_v27, %v13160_v39  ;;  %v13327_v20 = vpop.f32.mrb[245].mxu0  ;;  %v13413_v58 = vsel %vm13389_vm5, %v13377_v13, %v13401_v23 }
0x1bba   : > { %v13378_v50 = vadd.f32 %v13327_v20, %v13157_v16  ;;  %v27063_v46 = vsel %vm12438_vm11, %v13413_v58, -3.4028235e+38  ;;  %v13412_v57 = vsel %vm13388_vm8, %v13376_v48, %v13400_v17  ;;  %v13178_v17 = vpop.xlane.xlu1 %13177  ;;  %v13175_v58 = vpop.xlane.xlu0 %13174 }
0x1bbb   : > { %v13403_v47 = vmul.f32 0.1, %v13379_v51  ;;  %v13439_v62 = vsel %vm1330_vm0, %v27063_v46, -inf  ;;  %v27069_v36 = vsel %vm12437_vm12, %v13412_v57, -3.4028235e+38  ;;  %vm13391_vm4 = vcmp.gt.f32.partialorder %v13379_v51, 0.0 }
0x1bbc   : > { %v13402_v24 = vmul.f32 0.1, %v13378_v50  ;;  %13440 = vmax.xlane.f32.xlu1 %v13439_v62  ;;  %v21295_v41 = vpop.f32.mrb[246].mxu0  ;;  %v13436_v15 = vsel %vm1330_vm0, %v27069_v36, -inf  ;;  %vm13390_vm5 = vcmp.gt.f32.partialorder %v13378_v50, 0.0 }
0x1bbd   : > { %v13381_v6 = vadd.f32 %v21295_v41, %v13166_v44  ;;  %13437 = vmax.xlane.f32.xlu0 %v13436_v15  ;;  %v13337_v5 = vpop.f32.mrb[247].mxu0  ;;  %v13415_v8 = vsel %vm13391_vm4, %v13379_v51, %v13403_v47 }
0x1bbe   : > { %v13380_v59 = vadd.f32 %v13337_v5, %v13163_v32  ;;  %v27075_v0 = vsel %vm12440_vm15, %v13415_v8, -3.4028235e+38  ;;  %v13414_v63 = vsel %vm13390_vm5, %v13378_v50, %v13402_v24 }
0x1bbf   : > { %v13405_v39 = vmul.f32 0.1, %v13381_v6  ;;  %v13445_v16 = vsel %vm1330_vm0, %v27075_v0, -inf  ;;  %v27081_v10 = vsel %vm12439_vm1, %v13414_v63, -3.4028235e+38  ;;  %vm13393_vm8 = vcmp.gt.f32.partialorder %v13381_v6, 0.0 }
0x1bc0   : > { %v13404_v13 = vmul.f32 0.1, %v13380_v59  ;;  %13446 = vmax.xlane.f32.xlu1 %v13445_v16  ;;  %v21298_v49 = vpop.f32.mrb[248].mxu0  ;;  %v13442_v44 = vsel %vm1330_vm0, %v27081_v10, -inf  ;;  %vm13392_vm4 = vcmp.gt.f32.partialorder %v13380_v59, 0.0  ;;  %v13184_v16 = vpop.xlane.xlu1 %13183 }
0x1bc1   : > { %v13383_v48 = vadd.f32 %v21298_v49, %v13172_v29  ;;  %13443 = vmax.xlane.f32.xlu0 %v13442_v44  ;;  %v13347_v32 = vpop.f32.mrb[249].mxu0  ;;  %v13417_v23 = vsel %vm13393_vm8, %v13381_v6, %v13405_v39 }
0x1bc2   : > { %v13382_v27 = vadd.f32 %v13347_v32, %v13169_v25  ;;  %v27087_v51 = vsel %vm12442_vm9, %v13417_v23, -3.4028235e+38  ;;  %v13416_v20 = vsel %vm13392_vm4, %v13380_v59, %v13404_v13  ;;  %vm28209_vm4 = vcmp.gt.f32.partialorder %v28203_v53, 0.0 }
0x1bc3   : > { %v13407_v50 = vmul.f32 0.1, %v13383_v48  ;;  %v13451_v57 = vsel %vm1330_vm0, %v27087_v51, -inf  ;;  %v27093_v47 = vsel %vm28095_vm10, %v13416_v20, -3.4028235e+38  ;;  %vm13395_vm5 = vcmp.gt.f32.partialorder %v13383_v48, 0.0 }
0x1bc4   : > { %v13406_v62 = vmul.f32 0.1, %v13382_v27  ;;  %13452 = vmax.xlane.f32.xlu1 %v13451_v57  ;;  %v21301_v29 = vpop.f32.mrb[250].mxu0  ;;  %v13448_v24 = vsel %vm1330_vm0, %v27093_v47, -inf  ;;  %vm13394_vm8 = vcmp.gt.f32.partialorder %v13382_v27, 0.0 }
0x1bc5   : > { %v13385_v41 = vadd.f32 %v21301_v29, %v13178_v17  ;;  %13449 = vmax.xlane.f32.xlu0 %v13448_v24  ;;  %v13357_v15 = vpop.f32.mrb[251].mxu0  ;;  %v13419_v25 = vsel %vm13395_vm5, %v13383_v48, %v13407_v50  ;;  %v13181_v48 = vpop.xlane.xlu0 %13180 }
0x1bc6   : > { %v13384_v6 = vadd.f32 %v13357_v15, %v13175_v58  ;;  %v27099_v5 = vsel %vm28096_vm2, %v13419_v25, -3.4028235e+38  ;;  %v13418_v8 = vsel %vm13394_vm8, %v13382_v27, %v13406_v62  ;;  %vm28210_vm8 = vcmp.gt.f32.partialorder %v28204_v19, 0.0 }
0x1bc7   : > { %v13409_v59 = vmul.f32 0.1, %v13385_v41  ;;  %v13457_v63 = vsel %vm1330_vm0, %v27099_v5, -inf  ;;  %v27105_v39 = vsel %vm28209_vm4, %v13418_v8, -3.4028235e+38  ;;  %vm13397_vm10 = vcmp.gt.f32.partialorder %v13385_v41, 0.0 }
0x1bc8   : > { %v13408_v13 = vmul.f32 0.1, %v13384_v6  ;;  %13458 = vmax.xlane.f32.xlu1 %v13457_v63  ;;  %v21304_v49 = vpop.f32.mrb[252].mxu0  ;;  %v13454_v44 = vsel %vm1330_vm0, %v27105_v39, -inf  ;;  %vm13396_vm5 = vcmp.gt.f32.partialorder %v13384_v6, 0.0 }
0x1bc9   : > { %v13387_v32 = vadd.f32 %v21304_v49, %v13184_v16  ;;  %13455 = vmax.xlane.f32.xlu0 %v13454_v44  ;;  %v13367_v23 = vpop.f32.mrb[253].mxu0  ;;  %v13421_v17 = vsel %vm13397_vm10, %v13385_v41, %v13409_v59 }
0x1bca   : > { %v13386_v27 = vadd.f32 %v13367_v23, %v13181_v48  ;;  %v13433_v20 = vsel %vm28210_vm8, %v13421_v17, -3.4028235e+38  ;;  %v13420_v58 = vsel %vm13396_vm5, %v13384_v6, %v13408_v13  ;;  %vm28212_vm5 = vcmask 130048  }
0x1bcb   : > { %v13411_v50 = vmul.f32 0.1, %v13387_v32  ;;  %v13463_v57 = vsel %vm1330_vm0, %v13433_v20, -inf  ;;  %v13432_v62 = vsel %vm28107_vm14, %v13420_v58, -3.4028235e+38  ;;  %vm13399_vm4 = vcmp.gt.f32.partialorder %v13387_v32, 0.0  ;;  %vm28213_vm8 = vmmov %vm28212_vm5 }
0x1bcc   : > { %v13410_v29 = vmul.f32 0.1, %v13386_v27  ;;  %13464 = vmax.xlane.f32.xlu1 %v13463_v57  ;;  %v13460_v24 = vsel %vm1330_vm0, %v13432_v62, -inf  ;;  %vm13398_vm2 = vcmp.gt.f32.partialorder %v13386_v27, 0.0  ;;  %vm12938_vm14 = vcmp.gt.f32.partialorder %v27057_v4, 0.0 }
0x1bcd   : > { %13461 = vmax.xlane.f32.xlu0 %v13460_v24  ;;  %v13423_v15 = vsel %vm13399_vm4, %v13387_v32, %v13411_v50 }
0x1bce   : > { %v27117_v41 = vsel %vm28106_vm7, %v13423_v15, -3.4028235e+38  ;;  %v13422_v25 = vsel %vm13398_vm2, %v13386_v27, %v13410_v29  ;;  %vm12928_vm7 = vcmp.gt.f32.partialorder %v27030_v33, 0.0 }
0x1bcf   : > { %v13469_v6 = vsel %vm1330_vm0, %v27117_v41, -inf  ;;  %v27123_v8 = vsel %vm28105_vm13, %v13422_v25, -3.4028235e+38 }
0x1bd0   : > { %13470 = vmax.xlane.f32.xlu1 %v13469_v6  ;;  %v13466_v59 = vsel %vm1330_vm0, %v27123_v8, -inf }
0x1bd1   : > { %13467 = vmax.xlane.f32.xlu0 %v13466_v59 }
0x1c49   : > { %v13441_v63 = vpop.xlane.xlu1 %13440 }
0x1c4a   : > { %v13473_v16 = vsub.f32 %v27063_v46, %v13441_v63  ;;  %v13438_v13 = vpop.xlane.xlu0 %13437 }
0x1c4b   : > { %v13472_v49 = vsub.f32 %v27069_v36, %v13438_v13 }
0x1c4c   : > { %v13486_v44 = vmul.f32 1.442695, %v13473_v16 }
0x1c4d   : > { %v13484_v48 = vmul.f32 1.442695, %v13472_v49  ;;  %v13447_v32 = vpop.xlane.xlu1 %13446 }
0x1c4e   : > { %23340 = vpow2.f32 %v13486_v44  ;;  %v13475_v23 = vsub.f32 %v27075_v0, %v13447_v32  ;;  %v13444_v17 = vpop.xlane.xlu0 %13443 }
0x1c4f   : > { %23342 = vpow2.f32 %v13484_v48  ;;  %v13474_v27 = vsub.f32 %v27081_v10, %v13444_v17 }
0x1c50   : > { %v13490_v58 = vmul.f32 1.442695, %v13475_v23 }
0x1c51   : > { %v13488_v50 = vmul.f32 1.442695, %v13474_v27  ;;  %v13453_v57 = vpop.xlane.xlu1 %13452 }
0x1c52   : > { %23344 = vpow2.f32 %v13490_v58  ;;  %v13477_v29 = vsub.f32 %v27087_v51, %v13453_v57  ;;  %v13450_v46 = vpop.xlane.xlu0 %13449 }
0x1c53   : > { %23346 = vpow2.f32 %v13488_v50  ;;  %v13476_v36 = vsub.f32 %v27093_v47, %v13450_v46 }
0x1c54   : > { %v13494_v24 = vmul.f32 1.442695, %v13477_v29 }
0x1c55   : > { %v13492_v15 = vmul.f32 1.442695, %v13476_v36  ;;  %v13459_v25 = vpop.xlane.xlu1 %13458 }
0x1c56   : > { %23348 = vpow2.f32 %v13494_v24  ;;  %v13479_v0 = vsub.f32 %v27099_v5, %v13459_v25  ;;  %v13456_v6 = vpop.xlane.xlu0 %13455 }
0x1c57   : > { %23350 = vpow2.f32 %v13492_v15  ;;  %v13478_v10 = vsub.f32 %v27105_v39, %v13456_v6 }
0x1c58   : > { %v27135_v59 = vpop.eup %23340  ;;  %v13498_v63 = vmul.f32 1.442695, %v13479_v0 }
0x1c59   : > { %v27137_v16 = vpop.eup %23342  ;;  %v13496_v51 = vmul.f32 1.442695, %v13478_v10  ;;  %v13465_v13 = vpop.xlane.xlu1 %13464  ;;  %v13511_v47 = vsel %vm1330_vm0, %v27135_v59, 0.0 }
0x1c5a   : > { %23352 = vpow2.f32 %v13498_v63  ;;  %v13481_v49 = vsub.f32 %v13433_v20, %v13465_v13  ;;  %v13462_v44 = vpop.xlane.xlu0 %13461  ;;  %13512 = vadd.xlane.f32.xlu1 %v13511_v47  ;;  %v13508_v5 = vsel %vm1330_vm0, %v27137_v16, 0.0 }
0x1c5b   : > { %23354 = vpow2.f32 %v13496_v51  ;;  %v13480_v48 = vsub.f32 %v13432_v62, %v13462_v44  ;;  %13509 = vadd.xlane.f32.xlu0 %v13508_v5 }
0x1c5c   : > { %v27143_v39 = vpop.eup %23344  ;;  %v13502_v32 = vmul.f32 1.442695, %v13481_v49 }
0x1c5d   : > { %v27145_v23 = vpop.eup %23346  ;;  %v13500_v17 = vmul.f32 1.442695, %v13480_v48  ;;  %v13471_v27 = vpop.xlane.xlu1 %13470  ;;  %v13517_v58 = vsel %vm1330_vm0, %v27143_v39, 0.0 }
0x1c5e   : > { %23356 = vpow2.f32 %v13502_v32  ;;  %v13483_v20 = vsub.f32 %v27117_v41, %v13471_v27  ;;  %13518 = vadd.xlane.f32.xlu1 %v13517_v58  ;;  %v13468_v50 = vpop.xlane.xlu0 %13467  ;;  %v13514_v57 = vsel %vm1330_vm0, %v27145_v23, 0.0 }
0x1c5f   : > { %23358 = vpow2.f32 %v13500_v17  ;;  %v13482_v62 = vsub.f32 %v27123_v8, %v13468_v50  ;;  %13515 = vadd.xlane.f32.xlu0 %v13514_v57 }
0x1c60   : > { %v27153_v29 = vpop.eup %23348  ;;  %v13506_v46 = vmul.f32 1.442695, %v13483_v20 }
0x1c61   : > { %v27155_v36 = vpop.eup %23350  ;;  %v13504_v24 = vmul.f32 1.442695, %v13482_v62  ;;  %v13523_v15 = vsel %vm1330_vm0, %v27153_v29, 0.0 }
0x1c62   : > { %23360 = vpow2.f32 %v13506_v46  ;;  %13524 = vadd.xlane.f32.xlu1 %v13523_v15  ;;  %v13520_v41 = vsel %vm1330_vm0, %v27155_v36, 0.0 }
0x1c63   : > { %23362 = vpow2.f32 %v13504_v24  ;;  %13521 = vadd.xlane.f32.xlu0 %v13520_v41 }
0x1c64   : > { %v27161_v25 = vpop.eup %23352 }
0x1c65   : > { %v23355_v8 = vpop.eup %23354  ;;  %v13529_v0 = vsel %vm1330_vm0, %v27161_v25, 0.0 }
0x1c66   : > { %13530 = vadd.xlane.f32.xlu1 %v13529_v0  ;;  %v13526_v6 = vsel %vm1330_vm0, %v23355_v8, 0.0 }
0x1c67   : > { %13527 = vadd.xlane.f32.xlu0 %v13526_v6 }
0x1c68   : > { %v27166_v10 = vpop.eup %23356 }
0x1c69   : > { %v23359_v63 = vpop.eup %23358  ;;  %v13535_v51 = vsel %vm1330_vm0, %v27166_v10, 0.0 }
0x1c6a   : > { %13536 = vadd.xlane.f32.xlu1 %v13535_v51  ;;  %v13532_v13 = vsel %vm1330_vm0, %v23359_v63, 0.0 }
0x1c6b   : > { %13533 = vadd.xlane.f32.xlu0 %v13532_v13 }
0x1c6c   : > { %v27171_v47 = vpop.eup %23360 }
0x1c6d   : > { %v23363_v49 = vpop.eup %23362  ;;  %v13541_v44 = vsel %vm1330_vm0, %v27171_v47, 0.0 }
0x1c6e   : > { %13542 = vadd.xlane.f32.xlu1 %v13541_v44  ;;  %v13538_v5 = vsel %vm1330_vm0, %v23363_v49, 0.0 }
0x1c6f   : > { %13539 = vadd.xlane.f32.xlu0 %v13538_v5 }
0x1ce7   : > { %v13513_v48 = vpop.xlane.xlu1 %13512 }
0x1ce8   : > { %23364 = vrcp.f32 %v13513_v48  ;;  %v13510_v32 = vpop.xlane.xlu0 %13509 }
0x1ce9   : > { %23366 = vrcp.f32 %v13510_v32 }
0x1ceb   : > { %v13519_v17 = vpop.xlane.xlu1 %13518 }
0x1cec   : > { %23368 = vrcp.f32 %v13519_v17  ;;  %v13516_v27 = vpop.xlane.xlu0 %13515 }
0x1ced   : > { %23370 = vrcp.f32 %v13516_v27 }
0x1cef   : > { %v13525_v58 = vpop.xlane.xlu1 %13524 }
0x1cf0   : > { %23372 = vrcp.f32 %v13525_v58  ;;  %v13522_v20 = vpop.xlane.xlu0 %13521 }
0x1cf1   : > { %23374 = vrcp.f32 %v13522_v20 }
0x1cf2   : > { %v23365_v50 = vpop.eup %23364 }
0x1cf3   : > { %v23367_v57 = vpop.eup %23366  ;;  %v13531_v62 = vpop.xlane.xlu1 %13530  ;;  %v13557_v15 = vmul.f32 %v23365_v50, %v27135_v59 }
0x1cf4   : > { %23376 = vrcp.f32 %v13531_v62  ;;  %v13528_v46 = vpop.xlane.xlu0 %13527  ;;  %v13556_v24 = vmul.f32 %v23367_v57, %v27137_v16 }
0x1cf5   : > { %23378 = vrcp.f32 %v13528_v46  ;;  %v17859_v46 = vld [vmem:[%s28211_s28 + $0x30] sm:$0xff] }
0x1cf6   : > { %v23369_v41 = vpop.eup %23368  ;;  %21307 = vmatprep.mubr.msk.f32.mxu1 %vm1330_vm0, %v13556_v24 }
0x1cf7   : > { %v23371_v0 = vpop.eup %23370  ;;  %v13537_v6 = vpop.xlane.xlu1 %13536  ;;  %21308 = vmatmul.mubr.msk.f32.vlgmr.msra.gmra.mrb[240].mxu1 %vm1330_vm0, %v13557_v15  ;;  %v13559_v44 = vmul.f32 %v23369_v41, %v27143_v39  ;;  %v23749_v41 = vld [vmem:[%s28196_s16] sm:$0xff] }
0x1cf8   : > { %23380 = vrcp.f32 %v13537_v6  ;;  %v13534_v51 = vpop.xlane.xlu0 %13533  ;;  %v13558_v13 = vmul.f32 %v23371_v0, %v27145_v23  ;;  %v27201_v6 = vld [vmem:[%s28196_s16 + $0x8] sm:$0xff] }
0x1cf9   : > { %23382 = vrcp.f32 %v13534_v51 }
0x1cfa   : > { %v23373_v5 = vpop.eup %23372  ;;  %21310 = vmatprep.mubr.msk.f32.mxu1 %vm1330_vm0, %v13558_v13  ;;  %v27207_v13 = vld [vmem:[%s28196_s16 + $0x10] sm:$0xff] }
0x1cfb   : > { %v23375_v16 = vpop.eup %23374  ;;  %v13543_v59 = vpop.xlane.xlu1 %13542  ;;  %21311 = vmatmul.mubr.msk.f32.gmra.mrb[242].mxu1 %vm1330_vm0, %v13559_v44  ;;  %v13561_v17 = vmul.f32 %v23373_v5, %v27153_v29  ;;  %v27211_v5 = vld [vmem:[%s28196_s16 + $0x18] sm:$0xff] }
0x1cfc   : > { %23384 = vrcp.f32 %v13543_v59  ;;  %v13540_v48 = vpop.xlane.xlu0 %13539  ;;  %v13560_v32 = vmul.f32 %v23375_v16, %v27155_v36 }
0x1cfd   : > { %23386 = vrcp.f32 %v13540_v48 }
0x1cfe   : > { %v23377_v27 = vpop.eup %23376  ;;  %21313 = vmatprep.mubr.msk.f32.mxu1 %vm1330_vm0, %v13560_v32  ;;  %v27217_v32 = vld [vmem:[%s28196_s16 + $0x20] sm:$0xff] }
0x1cff   : > { %v23379_v23 = vpop.eup %23378  ;;  %21314 = vmatmul.mubr.msk.f32.gmra.mrb[244].mxu1 %vm1330_vm0, %v13561_v17  ;;  %v13563_v58 = vmul.f32 %v23377_v27, %v27161_v25  ;;  %v27221_v27 = vld [vmem:[%s28196_s16 + $0x28] sm:$0xff] }
0x1d00   : > { %v13562_v39 = vmul.f32 %v23379_v23, %v23355_v8 }
0x1d02   : > { %v23381_v20 = vpop.eup %23380  ;;  %21316 = vmatprep.mubr.msk.f32.mxu1 %vm1330_vm0, %v13562_v39 }
0x1d03   : > { %v23383_v50 = vpop.eup %23382  ;;  %21317 = vmatmul.mubr.msk.f32.gmra.mrb[246].mxu1 %vm1330_vm0, %v13563_v58  ;;  %v13565_v29 = vmul.f32 %v23381_v20, %v27166_v10  ;;  %v27227_v20 = vld [vmem:[%s28196_s16 + $0x30] sm:$0xff] }
0x1d04   : > { %v13564_v36 = vmul.f32 %v23383_v50, %v23359_v63  ;;  %v17860_v63 = vld [vmem:[%s28211_s28 + $0x38] sm:$0xff] }
0x1d05   : > { %v22320_v10 = vpack.c.bf16 %v17860_v63, %v17859_v46  ;;  %v27241_v46 = vld [vmem:[%s28196_s16 + $0x48] sm:$0xff] }
0x1d06   : > { %v23385_v57 = vpop.eup %23384  ;;  %21319 = vmatprep.mubr.msk.f32.mxu1 %vm1330_vm0, %v13564_v36  ;;  %v27231_v36 = vld [vmem:[%s28196_s16 + $0x38] sm:$0xff] }
0x1d07   : > { %v23387_v62 = vpop.eup %23386  ;;  %21320 = vmatmul.mubr.msk.f32.gmra.mrb[248].mxu1 %vm1330_vm0, %v13565_v29  ;;  %v13567_v25 = vmul.f32 %v23385_v57, %v27171_v47  ;;  %22321 = vmatprep.subr.bf16.mxu1 %v22320_v10 }
0x1d08   : > { %v13566_v8 = vmul.f32 %v23387_v62, %v23363_v49  ;;  %22323 = vmatpush3.bf16.msra.mxu1 %v22320_v10 }
0x1d0a   : > { %21322 = vmatprep.mubr.msk.f32.mxu1 %vm1330_vm0, %v13566_v8  ;;  %v27237_v8 = vld [vmem:[%s28196_s16 + $0x40] sm:$0xff] }
0x1d0b   : > { %21323 = vmatmul.mubr.msk.f32.gmra.mrb[250].mxu1 %vm1330_vm0, %v13567_v25 }
0x1dca   : > { %v21309_v24 = vpop.f32.mrb[240].mxu1 }
0x1dcb   : > { %v13670_v15 = vpop.f32.mrb[241].mxu1  ;;  %v13730_v47 = vmul.f32 %v27201_v6, %v21309_v24 }
0x1dcc   : > { %v13729_v0 = vmul.f32 %v23749_v41, %v13670_v15  ;;  %v27247_v15 = vld [vmem:[%s28196_s16 + $0x50] sm:$0xff] }
0x1dce   : > { %v21312_v49 = vpop.f32.mrb[242].mxu1  ;;  %21349 = vmatprep.mubr.msk.f32.mxu0 %vm2066_vm3, %v13729_v0 }
0x1dcf   : > { %v13680_v51 = vpop.f32.mrb[243].mxu1  ;;  %21350 = vmatmul.mubr.msk.f32.vlgmr.msra.gmra.mrb[254].mxu0 %vm2066_vm3, %v13730_v47  ;;  %v13732_v16 = vmul.f32 %v27211_v5, %v21312_v49  ;;  %v27251_v47 = vld [vmem:[%s28196_s16 + $0x58] sm:$0xff] }
0x1dd0   : > { %v13731_v44 = vmul.f32 %v27207_v13, %v13680_v51  ;;  %v17857_v51 = vld [vmem:[%s28211_s28 + $0x20] sm:$0xff] }
0x1dd2   : > { %v21315_v59 = vpop.f32.mrb[244].mxu1  ;;  %21352 = vmatprep.mubr.msk.f32.mxu0 %vm2066_vm3, %v13731_v44  ;;  %v17858_v44 = vld [vmem:[%s28211_s28 + $0x28] sm:$0xff] }
0x1dd3   : > { %v13690_v48 = vpop.f32.mrb[245].mxu1  ;;  %21353 = vmatmul.mubr.msk.f32.gmra.mrb[0].mxu0 %vm2066_vm3, %v13732_v16  ;;  %v13734_v23 = vmul.f32 %v27221_v27, %v21315_v59  ;;  %v27259_v16 = vpack.c.bf16 %v17858_v44, %v17857_v51 }
0x1dd4   : > { %v13733_v17 = vmul.f32 %v27217_v32, %v13690_v48 }
0x1dd5   : > { %22325 = vmatprep.subr.bf16.mxu1 %v27259_v16 }
0x1dd6   : > { %v21318_v39 = vpop.f32.mrb[246].mxu1  ;;  %21355 = vmatprep.mubr.msk.f32.mxu0 %vm2066_vm3, %v13733_v17 }
0x1dd7   : > { %v13700_v58 = vpop.f32.mrb[247].mxu1  ;;  %21356 = vmatmul.mubr.msk.f32.gmra.mrb[2].mxu0 %vm2066_vm3, %v13734_v23  ;;  %v13736_v29 = vmul.f32 %v27231_v36, %v21318_v39 }
0x1dd8   : > { %v13735_v50 = vmul.f32 %v27227_v20, %v13700_v58 }
0x1dda   : > { %v21321_v57 = vpop.f32.mrb[248].mxu1  ;;  %21358 = vmatprep.mubr.msk.f32.mxu0 %vm2066_vm3, %v13735_v50 }
0x1ddb   : > { %v13710_v62 = vpop.f32.mrb[249].mxu1  ;;  %21359 = vmatmul.mubr.msk.f32.gmra.mrb[4].mxu0 %vm2066_vm3, %v13736_v29  ;;  %v13738_v63 = vmul.f32 %v27241_v46, %v21321_v57 }
0x1ddc   : > { %v13737_v25 = vmul.f32 %v27237_v8, %v13710_v62 }
0x1dde   : > { %v21324_v10 = vpop.f32.mrb[250].mxu1  ;;  %21361 = vmatprep.mubr.msk.f32.mxu0 %vm2066_vm3, %v13737_v25  ;;  %v12940_v25 = vmin.f32 %v27030_v33, 0.0 }
0x1ddf   : > { %v13720_v24 = vpop.f32.mrb[251].mxu1  ;;  %21362 = vmatmul.mubr.msk.f32.gmra.mrb[6].mxu0 %vm2066_vm3, %v13738_v63  ;;  %v13740_v49 = vmul.f32 %v27251_v47, %v21324_v10 }
0x1de0   : > { %v13739_v0 = vmul.f32 %v27247_v15, %v13720_v24  ;;  %v12953_v44 = vmul.f32 1.442695, %v12940_v25 }
0x1de2   : > { %21364 = vmatprep.mubr.msk.f32.mxu0 %vm2066_vm3, %v13739_v0 }
0x1de3   : > { %21365 = vmatmul.mubr.msk.f32.gmra.mrb[8].mxu0 %vm2066_vm3, %v13740_v49 }
0x1de4   : > { %21435 = vmatprep.mubr.msk.f32.mxu0 %vm2066_vm3, %v23749_v41 }
0x1ea2   : > { %v21351_v59 = vpop.f32.mrb[254].mxu0 }
0x1ea3   : > { %v13915_v48 = vmin.f32 %v21351_v59, 0.0  ;;  %v13843_v17 = vpop.f32.mrb[255].mxu0  ;;  %vm13903_vm2 = vcmp.gt.f32.partialorder %v21351_v59, 0.0 }
0x1ea4   : > { %v13914_v23 = vmin.f32 %v13843_v17, 0.0  ;;  %vm13902_vm10 = vcmp.gt.f32.partialorder %v13843_v17, 0.0 }
0x1ea5   : > { %v13928_v39 = vmul.f32 1.442695, %v13915_v48  ;;  %v12939_v48 = vmin.f32 %v27035_v35, 0.0 }
0x1ea6   : > { %v13926_v58 = vmul.f32 1.442695, %v13914_v23  ;;  %v27262_v50 = vpop.f32.mrb[0].mxu0 }
0x1ea7   : > { %23388 = vpow2.f32 %v13928_v39  ;;  %v13917_v29 = vmin.f32 %v27262_v50, 0.0  ;;  %v27265_v57 = vpop.f32.mrb[1].mxu0  ;;  %v12951_v9 = vmul.f32 1.442695, %v12939_v48 }
0x1ea8   : > { %23390 = vpow2.f32 %v13926_v58  ;;  %v13916_v41 = vmin.f32 %v27265_v57, 0.0  ;;  %vm13904_vm4 = vcmp.gt.f32.partialorder %v27265_v57, 0.0 }
0x1ea9   : > { %v13932_v62 = vmul.f32 1.442695, %v13917_v29 }
0x1eaa   : > { %v13930_v63 = vmul.f32 1.442695, %v13916_v41  ;;  %v27269_v10 = vpop.f32.mrb[2].mxu0 }
0x1eab   : > { %23392 = vpow2.f32 %v13932_v62  ;;  %v13919_v24 = vmin.f32 %v27269_v10, 0.0  ;;  %v27272_v0 = vpop.f32.mrb[3].mxu0 }
0x1eac   : > { %23394 = vpow2.f32 %v13930_v63  ;;  %v13918_v49 = vmin.f32 %v27272_v0, 0.0 }
0x1ead   : > { %v13936_v51 = vmul.f32 1.442695, %v13919_v24 }
0x1eae   : > { %v13934_v23 = vmul.f32 1.442695, %v13918_v49  ;;  %v27276_v39 = vpop.f32.mrb[4].mxu0 }
0x1eaf   : > { %23396 = vpow2.f32 %v13936_v51  ;;  %v13921_v58 = vmin.f32 %v27276_v39, 0.0  ;;  %v27279_v29 = vpop.f32.mrb[5].mxu0 }
0x1eb0   : > { %23398 = vpow2.f32 %v13934_v23  ;;  %v13920_v41 = vmin.f32 %v27279_v29, 0.0 }
0x1eb1   : > { %v23389_v62 = vpop.eup %23388  ;;  %v13940_v3 = vmul.f32 1.442695, %v13921_v58  ;;  %23400 = vpow2.f32 %v12953_v44  ;;  %v12941_v58 = vmin.f32 %v27043_v37, 0.0 }
0x1eb2   : > { %v23391_v63 = vpop.eup %23390  ;;  %v17846_v24 = vadd.f32 -1.0, %v23389_v62  ;;  %v13938_v25 = vmul.f32 1.442695, %v13920_v41  ;;  %v27282_v55 = vpop.f32.mrb[6].mxu0 }
0x1eb3   : > { %v17845_v49 = vadd.f32 -1.0, %v23391_v63  ;;  %23402 = vpow2.f32 %v13940_v3  ;;  %v13923_v51 = vmin.f32 %v27282_v55, 0.0  ;;  %v27285_v11 = vpop.f32.mrb[7].mxu0 }
0x1eb4   : > { %23404 = vpow2.f32 %v13938_v25  ;;  %v13922_v23 = vmin.f32 %v27285_v11, 0.0  ;;  %v13963_v41 = vsel %vm13903_vm2, %v21351_v59, %v17846_v24  ;;  %v12955_v59 = vmul.f32 1.442695, %v12941_v58  ;;  %vm28214_vm2 = vmmov %vm28212_vm5 }
0x1eb5   : > { %v23393_v42 = vpop.eup %23392  ;;  %v13944_v44 = vmul.f32 1.442695, %v13923_v51  ;;  %v13962_v48 = vsel %vm13902_vm10, %v13843_v17, %v17845_v49  ;;  %23406 = vpow2.f32 %v12951_v9  ;;  %v12942_v51 = vmin.f32 %v27040_v31, 0.0 }
0x1eb6   : > { %v23395_v62 = vpop.eup %23394  ;;  %v17848_v2 = vadd.f32 -1.0, %v23393_v42  ;;  %v13942_v63 = vmul.f32 1.442695, %v13922_v23  ;;  %v27289_v3 = vpop.f32.mrb[8].mxu0  ;;  %21371 = vmatprep.mubr.msk.f32.mxu1 %vm28212_vm5, %v13962_v48  ;;  %vm13905_vm10 = vcmp.gt.f32.partialorder %v27262_v50, 0.0  ;;  %v12943_v23 = vmin.f32 %v27047_v22, 0.0  ;;  %vm28215_vm5 = vmmov %vm28214_vm2 }
0x1eb7   : > { %v17847_v14 = vadd.f32 -1.0, %v23395_v62  ;;  %23408 = vpow2.f32 %v13944_v44  ;;  %v13925_v25 = vmin.f32 %v27289_v3, 0.0  ;;  %v27293_v56 = vpop.f32.mrb[9].mxu0  ;;  %21372 = vmatmul.mubr.msk.f32.vlgmr.msra.gmra.mrb[252].mxu1 %vm28213_vm8, %v13963_v41  ;;  %v12944_v58 = vmin.f32 %v27045_v28, 0.0 }
0x1eb8   : > { %23410 = vpow2.f32 %v13942_v63  ;;  %v13924_v42 = vmin.f32 %v27293_v56, 0.0  ;;  %22327 = vmatpush3.bf16.msra.mxu1 %v27259_v16  ;;  %v13965_v62 = vsel %vm13905_vm10, %v27262_v50, %v17848_v2  ;;  %vm13906_vm8 = vcmp.gt.f32.partialorder %v27272_v0, 0.0  ;;  %vm28216_vm10 = vmmov %vm28214_vm2 }
0x1eb9   : > { %v23397_v9 = vpop.eup %23396  ;;  %v13948_v17 = vmul.f32 1.442695, %v13925_v25  ;;  %v13964_v24 = vsel %vm13904_vm4, %v27265_v57, %v17847_v14  ;;  %v12957_v57 = vmul.f32 1.442695, %v12942_v51  ;;  %v12945_v63 = vmin.f32 %v27051_v45, 0.0 }
0x1eba   : > { %v23399_v49 = vpop.eup %23398  ;;  %v17850_v44 = vadd.f32 -1.0, %v23397_v9  ;;  %v13946_v48 = vmul.f32 1.442695, %v13924_v42  ;;  %21374 = vmatprep.mubr.msk.f32.mxu1 %vm28214_vm2, %v13964_v24  ;;  %vm13907_vm4 = vcmp.gt.f32.partialorder %v27269_v10, 0.0  ;;  %v12959_v2 = vmul.f32 1.442695, %v12943_v23 }
0x1ebb   : > { %v17849_v41 = vadd.f32 -1.0, %v23399_v49  ;;  %23412 = vpow2.f32 %v13948_v17  ;;  %21375 = vmatmul.mubr.msk.f32.gmra.mrb[254].mxu1 %vm28215_vm5, %v13965_v62  ;;  %v23401_v16 = vpop.eup %23400  ;;  %v12961_v49 = vmul.f32 1.442695, %v12944_v58  ;;  %v12946_v51 = vmin.f32 %v27049_v34, 0.0 }
0x1ebc   : > { %23414 = vpow2.f32 %v13946_v48  ;;  %v13967_v50 = vsel %vm13907_vm4, %v27269_v10, %v17850_v44  ;;  %vm13908_vm5 = vcmp.gt.f32.partialorder %v27279_v29, 0.0  ;;  %v12947_v23 = vmin.f32 %v27055_v40, 0.0  ;;  %vm28217_vm4 = vmmov %vm28214_vm2 }
0x1ebd   : > { %v23403_v14 = vpop.eup %23402  ;;  %v13966_v25 = vsel %vm13906_vm8, %v27272_v0, %v17849_v41  ;;  %23416 = vpow2.f32 %v12955_v59  ;;  %v12963_v0 = vmul.f32 1.442695, %v12945_v63  ;;  %vm13909_vm8 = vcmp.gt.f32.partialorder %v27276_v39, 0.0 }
0x1ebe   : > { %v23405_v42 = vpop.eup %23404  ;;  %v17852_v9 = vadd.f32 -1.0, %v23403_v14  ;;  %21377 = vmatprep.mubr.msk.f32.mxu1 %vm28216_vm10, %v13966_v25  ;;  %23418 = vpow2.f32 %v12957_v57  ;;  %vm28218_vm10 = vmmov %vm28214_vm2  ;;  %v12965_v58 = vmul.f32 1.442695, %v12946_v51  ;;  %v12949_v25 = vmin.f32 %v27059_v12, 0.0 }
0x1ebf   : > { %v17851_v17 = vadd.f32 -1.0, %v23405_v42  ;;  %21378 = vmatmul.mubr.msk.f32.gmra.mrb[0].mxu1 %vm28214_vm2, %v13967_v50  ;;  %v23407_v24 = vpop.eup %23406  ;;  %23420 = vpow2.f32 %v12959_v2  ;;  %vm13910_vm2 = vcmp.gt.f32.partialorder %v27285_v11, 0.0  ;;  %vm13912_vm13 = vcmp.gt.f32.partialorder %v27293_v56, 0.0 }
0x1ec0   : > { %v13969_v44 = vsel %vm13909_vm8, %v27276_v39, %v17852_v9  ;;  %23422 = vpow2.f32 %v12961_v49  ;;  %v12967_v39 = vmul.f32 1.442695, %v12947_v23  ;;  %vm28219_vm8 = vmmov %vm28217_vm4  ;;  %v17779_v50 = vadd.f32 -1.0, %v23407_v24 }
0x1ec1   : > { %v23409_v48 = vpop.eup %23408  ;;  %v13968_v59 = vsel %vm13908_vm5, %v27279_v29, %v17851_v17  ;;  %23424 = vpow2.f32 %v12963_v0  ;;  %v12948_v29 = vmin.f32 %v27053_v54, 0.0  ;;  %vm13911_vm5 = vcmp.gt.f32.partialorder %v27282_v55, 0.0 }
0x1ec2   : > { %v23411_v10 = vpop.eup %23410  ;;  %v17854_v62 = vadd.f32 -1.0, %v23409_v48  ;;  %21380 = vmatprep.mubr.msk.f32.mxu1 %vm28217_vm4, %v13968_v59  ;;  %23426 = vpow2.f32 %v12965_v58  ;;  %v12950_v49 = vmin.f32 %v27057_v4, 0.0  ;;  %v17780_v51 = vadd.f32 -1.0, %v23401_v16 }
0x1ec3   : > { %v17853_v41 = vadd.f32 -1.0, %v23411_v10  ;;  %21381 = vmatmul.mubr.msk.f32.gmra.mrb[2].mxu1 %vm28218_vm10, %v13969_v44  ;;  %vm12927_vm10 = vcmp.gt.f32.partialorder %v27035_v35, 0.0  ;;  %23428 = vpow2.f32 %v12967_v39  ;;  %v12971_v48 = vmul.f32 1.442695, %v12949_v25 }
0x1ec4   : > { %v13971_v42 = vsel %vm13911_vm5, %v27282_v55, %v17854_v62  ;;  %vm28220_vm5 = vmmov %vm28217_vm4  ;;  %v12987_v10 = vsel %vm12927_vm10, %v27035_v35, %v17779_v50  ;;  %v12988_v44 = vsel %vm12928_vm7, %v27030_v33, %v17780_v51 }
0x1ec5   : > { %v23413_v14 = vpop.eup %23412  ;;  %v13970_v57 = vsel %vm13910_vm2, %v27285_v11, %v17853_v41  ;;  %v12969_v11 = vmul.f32 1.442695, %v12948_v29  ;;  %vm13913_vm2 = vcmp.gt.f32.partialorder %v27289_v3, 0.0 }
0x1ec6   : > { %v23415_v63 = vpop.eup %23414  ;;  %v17856_v2 = vadd.f32 -1.0, %v23413_v14  ;;  %21383 = vmatprep.mubr.msk.f32.mxu1 %vm28219_vm8, %v13970_v57  ;;  %vm28221_vm8 = vmmov %vm28217_vm4 }
0x1ec7   : > { %v17855_v9 = vadd.f32 -1.0, %v23415_v63  ;;  %21384 = vmatmul.mubr.msk.f32.gmra.mrb[4].mxu1 %vm28217_vm4, %v13971_v42  ;;  %v23417_v17 = vpop.eup %23416  ;;  %23430 = vpow2.f32 %v12969_v11 }
0x1ec8   : > { %v13973_v24 = vsel %vm13913_vm2, %v27289_v3, %v17856_v2  ;;  %v23419_v0 = vpop.eup %23418  ;;  %v17781_v59 = vadd.f32 -1.0, %v23417_v17  ;;  %23432 = vpow2.f32 %v12971_v48  ;;  %vm28222_vm2 = vmmov %vm28217_vm4 }
0x1ec9   : > { %v13972_v55 = vsel %vm13912_vm13, %v27293_v56, %v17855_v9  ;;  %v23421_v23 = vpop.eup %23420  ;;  %v12973_v56 = vmul.f32 1.442695, %v12950_v49  ;;  %v17782_v62 = vadd.f32 -1.0, %v23419_v0  ;;  %vm12929_vm13 = vcmp.gt.f32.partialorder %v27043_v37, 0.0  ;;  %vm28223_vm10 = vmmov %vm28222_vm2 }
0x1eca   : > { %21386 = vmatprep.mubr.msk.f32.mxu1 %vm28220_vm5, %v13972_v55  ;;  %v23423_v16 = vpop.eup %23422  ;;  %v17783_v41 = vadd.f32 -1.0, %v23421_v23  ;;  %v12989_v35 = vsel %vm12929_vm13, %v27043_v37, %v17781_v59  ;;  %vm12930_vm5 = vcmp.gt.f32.partialorder %v27040_v31, 0.0  ;;  %vm28224_vm7 = vmmov %vm28222_vm2  ;;  %vm12932_vm13 = vcmp.gt.f32.partialorder %v27045_v28, 0.0 }
0x1ecb   : > { %21387 = vmatmul.mubr.msk.f32.gmra.mrb[6].mxu1 %vm28221_vm8, %v13973_v24  ;;  %v23425_v3 = vpop.eup %23424  ;;  %23434 = vpow2.f32 %v12973_v56  ;;  %v17784_v14 = vadd.f32 -1.0, %v23423_v16  ;;  %vm12931_vm8 = vcmp.gt.f32.partialorder %v27047_v22, 0.0  ;;  %v12990_v33 = vsel %vm12930_vm5, %v27040_v31, %v17782_v62 }
0x1ecc   : > { %21393 = vmatprep.mubr.msk.f32.mxu1 %vm28217_vm4, %v12987_v10  ;;  %v23427_v58 = vpop.eup %23426  ;;  %v17785_v29 = vadd.f32 -1.0, %v23425_v3  ;;  %v12991_v57 = vsel %vm12931_vm8, %v27047_v22, %v17783_v41  ;;  %vm28225_vm4 = vmmov %vm28222_vm2  ;;  %vm12934_vm8 = vcmp.gt.f32.partialorder %v27049_v34, 0.0 }
0x1ecd   : > { %v23429_v63 = vpop.eup %23428  ;;  %v12992_v37 = vsel %vm12932_vm13, %v27045_v28, %v17784_v14  ;;  %v17786_v39 = vadd.f32 -1.0, %v23427_v58  ;;  %vm28227_vm5 = vmmov %vm28225_vm4 }
0x1ece   : > { %v17787_v42 = vadd.f32 -1.0, %v23429_v63  ;;  %vm28229_vm13 = vmmov %vm28225_vm4 }
0x1ecf   : > { %21394 = vmatmul.mubr.msk.f32.vlgmr.msra.gmra.mrb[252].mxu1 %vm28222_vm2, %v12988_v44  ;;  %vm12933_vm2 = vcmp.gt.f32.partialorder %v27051_v45, 0.0  ;;  %v12994_v22 = vsel %vm12934_vm8, %v27049_v34, %v17786_v39  ;;  %vm28231_vm8 = vmmov %vm28225_vm4 }
0x1ed0   : > { %21396 = vmatprep.mubr.msk.f32.mxu1 %vm28223_vm10, %v12989_v35  ;;  %vm28226_vm10 = vmmov %vm28225_vm4  ;;  %v12993_v31 = vsel %vm12933_vm2, %v27051_v45, %v17785_v29  ;;  %vm12936_vm2 = vcmp.gt.f32.partialorder %v27053_v54, 0.0 }
0x1ed1   : > { %v23431_v25 = vpop.eup %23430 }
0x1ed2   : > { %v23433_v2 = vpop.eup %23432  ;;  %v17788_v50 = vadd.f32 -1.0, %v23431_v25 }
0x1ed3   : > { %21397 = vmatmul.mubr.msk.f32.gmra.mrb[254].mxu1 %vm28224_vm7, %v12990_v33  ;;  %vm12935_vm7 = vcmp.gt.f32.partialorder %v27055_v40, 0.0  ;;  %v17789_v9 = vadd.f32 -1.0, %v23433_v2 }
0x1ed4   : > { %21399 = vmatprep.mubr.msk.f32.mxu1 %vm28225_vm4, %v12991_v57  ;;  %v12995_v17 = vsel %vm12935_vm7, %v27055_v40, %v17787_v42  ;;  %v12996_v45 = vsel %vm12936_vm2, %v27053_v54, %v17788_v50  ;;  %vm28232_vm7 = vmmov %vm28225_vm4  ;;  %v17888_v40 = vld [vmem:[%s28228_s2 + $0x1] ss:$0 sm:$0xff]  ;;  %s28238_s2 = sld [smem:[#allocation17_spill]] }
0x1ed5   : > { %v23435_v28 = vpop.eup %23434  ;;  %vm28235_vm2 = vmmov %vm28225_vm4 }
0x1ed6   : > { %v17790_v11 = vadd.f32 -1.0, %v23435_v28 }
0x1ed7   : > { %21400 = vmatmul.mubr.msk.f32.gmra.mrb[0].mxu1 %vm28226_vm10, %v12992_v37  ;;  %vm12937_vm10 = vcmp.gt.f32.partialorder %v27059_v12, 0.0 }
0x1ed8   : > { %21402 = vmatprep.mubr.msk.f32.mxu1 %vm28227_vm5, %v12993_v31  ;;  %vm28230_vm5 = vmmov %vm28225_vm4  ;;  %v12997_v34 = vsel %vm12937_vm10, %v27059_v12, %v17789_v9  ;;  %v12998_v49 = vsel %vm12938_vm14, %v27057_v4, %v17790_v11 }
0x1ed9   : > { %vm28234_vm14 = vmmov %vm28225_vm4 }
0x1eda   : > { %vm28236_vm10 = vmmov %vm28235_vm2 }
0x1edb   : > { %21403 = vmatmul.mubr.msk.f32.gmra.mrb[2].mxu1 %vm28225_vm4, %v12994_v22 }
0x1edc   : > { %21405 = vmatprep.mubr.msk.f32.mxu1 %vm28229_vm13, %v12995_v17  ;;  %vm28233_vm13 = vmmov %vm28225_vm4  ;;  %v17887_v17 = vld [vmem:[%s28238_s2 + $0x1] ss:$0 sm:$0xff]  ;;  %s28263_s2 = sld [smem:[#allocation19_spill]] }
0x1edf   : > { %21406 = vmatmul.mubr.msk.f32.gmra.mrb[4].mxu1 %vm28230_vm5, %v12996_v45  ;;  %vm28237_vm5 = vmmov %vm28235_vm2 }
0x1ee0   : > { %21408 = vmatprep.mubr.msk.f32.mxu1 %vm28231_vm8, %v12997_v34  ;;  %vm28239_vm8 = vmmov %vm28235_vm2 }
0x1ee3   : > { %21409 = vmatmul.mubr.msk.f32.gmra.mrb[6].mxu1 %vm28232_vm7, %v12998_v49  ;;  %vm28240_vm7 = vmmov %vm28235_vm2 }
0x1fa2   : > { %v21395_v55 = vpop.f32.mrb[252].mxu1 }
0x1fa3   : > { %v14243_v51 = vpop.f32.mrb[253].mxu1  ;;  %v14367_v48 = vmul.f32 %v21395_v55, %v17888_v40 }
0x1fa4   : > { %v22352_v54 = vpack.c.bf16 %v21395_v55, %v14243_v51  ;;  %v14366_v24 = vmul.f32 %v17888_v40, %v14243_v51 }
0x1fa5   : > { %v14381_v0 = vsel %vm28225_vm4, %v14367_v48, 0.0  ;;  %vm28241_vm4 = vmmov %vm28235_vm2 }
0x1fa6   : > { %14382 = vadd.xlane.f32.xlu1 %v14381_v0  ;;  %v27375_v59 = vpop.f32.mrb[254].mxu1  ;;  %22353 = vmatprep.subr.bf16.mxu1 %v22352_v54  ;;  %v14378_v12 = vsel %vm28233_vm13, %v14366_v24, 0.0  ;;  %vm28242_vm13 = vmmov %vm28235_vm2  ;;  %v14313_v24 = vmul.f32 %v21395_v55, %v17887_v17 }
0x1fa7   : > { %v14369_v10 = vmul.f32 %v27375_v59, %v17888_v40  ;;  %22355 = vmatpush3.bf16.msra.mxu1 %v22352_v54  ;;  %14379 = vadd.xlane.f32.xlu0 %v14378_v12  ;;  %v14253_v4 = vpop.f32.mrb[255].mxu1  ;;  %v14312_v12 = vmul.f32 %v17887_v17, %v14243_v51 }
0x1fa8   : > { %v14368_v23 = vmul.f32 %v17888_v40, %v14253_v4  ;;  %v22356_v56 = vpack.c.bf16 %v27375_v59, %v14253_v4 }
0x1fa9   : > { %v14387_v16 = vsel %vm28234_vm14, %v14369_v10, 0.0  ;;  %vm28243_vm14 = vmmov %vm28235_vm2 }
0x1faa   : > { %14388 = vadd.xlane.f32.xlu1 %v14387_v16  ;;  %v21401_v44 = vpop.f32.mrb[0].mxu1  ;;  %22357 = vmatprep.subr.bf16.mxu1 %v22356_v56  ;;  %v14384_v62 = vsel %vm28235_vm2, %v14368_v23, 0.0  ;;  %v28244_v23 = vmov 0.0|0.0  }
0x1fab   : > { %v14371_v3 = vmul.f32 %v21401_v44, %v17888_v40  ;;  %22359 = vmatpush3.bf16.msra.mxu1 %v22356_v56  ;;  %14385 = vadd.xlane.f32.xlu0 %v14384_v62  ;;  %v14263_v41 = vpop.f32.mrb[1].mxu1  ;;  %v14315_v56 = vmul.f32 %v27375_v59, %v17887_v17  ;;  %v14314_v62 = vmul.f32 %v17887_v17, %v14253_v4 }
0x1fac   : > { %v14370_v35 = vmul.f32 %v17888_v40, %v14263_v41  ;;  %v22360_v58 = vpack.c.bf16 %v21401_v44, %v14263_v41  ;;  %v14317_v55 = vmul.f32 %v21401_v44, %v17887_v17 }
0x1fad   : > { %v14393_v14 = vsel %vm28236_vm10, %v14371_v3, 0.0  ;;  %vm28245_vm10 = vmmov %vm28235_vm2  ;;  %v14316_v3 = vmul.f32 %v17887_v17, %v14263_v41 }
0x1fae   : > { %14394 = vadd.xlane.f32.xlu1 %v14393_v14  ;;  %v21404_v33 = vpop.f32.mrb[2].mxu1  ;;  %22361 = vmatprep.subr.bf16.mxu1 %v22360_v58  ;;  %v14390_v29 = vsel %vm28237_vm5, %v14370_v35, 0.0  ;;  %v14327_v16 = vsel %vm28245_vm10, %v14313_v24, 0.0  ;;  %vm28246_vm5 = vmmov %vm28235_vm2 }
0x1faf   : > { %v14373_v57 = vmul.f32 %v21404_v33, %v17888_v40  ;;  %22363 = vmatpush3.bf16.msra.mxu1 %v22360_v58  ;;  %14391 = vadd.xlane.f32.xlu0 %v14390_v29  ;;  %v14273_v63 = vpop.f32.mrb[3].mxu1  ;;  %v14319_v58 = vmul.f32 %v21404_v33, %v17887_v17  ;;  %vm28252_vm10 = vmmov %vm28235_vm2 }
0x1fb0   : > { %v14372_v37 = vmul.f32 %v17888_v40, %v14273_v63  ;;  %v22364_v39 = vpack.c.bf16 %v21404_v33, %v14273_v63  ;;  %v14318_v29 = vmul.f32 %v17887_v17, %v14273_v63 }
0x1fb1   : > { %v14399_v25 = vsel %vm28239_vm8, %v14373_v57, 0.0  ;;  %vm28247_vm8 = vmmov %vm28235_vm2 }
0x1fb2   : > { %14400 = vadd.xlane.f32.xlu1 %v14399_v25  ;;  %v21407_v42 = vpop.f32.mrb[4].mxu1  ;;  %22365 = vmatprep.subr.bf16.mxu1 %v22364_v39  ;;  %v14396_v31 = vsel %vm28240_vm7, %v14372_v37, 0.0  ;;  %v14333_v51 = vsel %vm28247_vm8, %v14315_v56, 0.0  ;;  %vm28248_vm7 = vmmov %vm28235_vm2  ;;  %v14342_v41 = vsel %vm28235_vm2, %v14318_v29, 0.0  ;;  %v27426_v56 = vld [vmem:[%s23873_s25 + $0x20] sm:$0xff] }
0x1fb3   : > { %v14375_v2 = vmul.f32 %v21407_v42, %v17888_v40  ;;  %22367 = vmatpush3.bf16.msra.mxu1 %v22364_v39  ;;  %14397 = vadd.xlane.f32.xlu0 %v14396_v31  ;;  %v14283_v22 = vpop.f32.mrb[5].mxu1  ;;  %v14330_v35 = vsel %vm28248_vm7, %v14314_v62, 0.0  ;;  %v14321_v4 = vmul.f32 %v21407_v42, %v17887_v17  ;;  %vm28254_vm8 = vmmov %vm28235_vm2 }
0x1fb4   : > { %v14374_v50 = vmul.f32 %v17888_v40, %v14283_v22  ;;  %v22368_v28 = vpack.c.bf16 %v21407_v42, %v14283_v22  ;;  %v14320_v44 = vmul.f32 %v17887_v17, %v14283_v22  ;;  %vm28255_vm7 = vmmov %vm28235_vm2 }
0x1fb5   : > { %v14405_v9 = vsel %vm28241_vm4, %v14375_v2, 0.0  ;;  %vm28249_vm4 = vmmov %vm28235_vm2  ;;  %v14351_v33 = vsel %vm28252_vm10, %v14321_v4, 0.0  ;;  %v27406_v2 = vld [vmem:[%s23873_s25 + $0x8] sm:$0xff] }
0x1fb6   : > { %14406 = vadd.xlane.f32.xlu1 %v14405_v9  ;;  %v21410_v45 = vpop.f32.mrb[6].mxu1  ;;  %22369 = vmatprep.subr.bf16.mxu1 %v22368_v28  ;;  %v14402_v11 = vsel %vm28242_vm13, %v14374_v50, 0.0  ;;  %v14339_v14 = vsel %vm28249_vm4, %v14317_v55, 0.0  ;;  %vm28250_vm13 = vmmov %vm28235_vm2  ;;  %v27430_v55 = vld [vmem:[%s23873_s25 + $0x38] sm:$0xff] }
0x1fb7   : > { %v14377_v34 = vmul.f32 %v21410_v45, %v17888_v40  ;;  %22371 = vmatpush3.bf16.msra.mxu1 %v22368_v28  ;;  %14403 = vadd.xlane.f32.xlu0 %v14402_v11  ;;  %v14293_v49 = vpop.f32.mrb[7].mxu1  ;;  %v14336_v59 = vsel %vm28250_vm13, %v14316_v3, 0.0  ;;  %v14323_v37 = vmul.f32 %v21410_v45, %v17887_v17  ;;  %v27410_v28 = vld [vmem:[%s23873_s25] sm:$0xff]  ;;  %v27414_v11 = vld [vmem:[%s23873_s25 + $0x18] sm:$0xff] }
0x1fb8   : > { %v14376_v48 = vmul.f32 %v17888_v40, %v14293_v49  ;;  %v22372_v54 = vpack.c.bf16 %v21410_v45, %v14293_v49  ;;  %v14324_v40 = vsel %vm28246_vm5, %v14312_v12, 0.0  ;;  %v14322_v39 = vmul.f32 %v17887_v17, %v14293_v49  ;;  %vm28253_vm5 = vmmov %vm28235_vm2  ;;  %v27422_v12 = vld [vmem:[%s23873_s25 + $0x28] sm:$0xff] }
0x1fb9   : > { %v14411_v0 = vsel %vm28243_vm14, %v14377_v34, 0.0  ;;  %vm28251_vm14 = vmmov %vm28235_vm2  ;;  %v14348_v63 = vsel %vm28253_vm5, %v14320_v44, 0.0  ;;  %v14357_v25 = vsel %vm28254_vm8, %v14323_v37, 0.0  ;;  %v27442_v44 = vld [vmem:[%s23873_s25 + $0x40] sm:$0xff]  ;;  %vm28258_vm8 = vcmp.gt.f32.partialorder %v28203_v53, 0.0 }
0x1fba   : > { %14412 = vadd.xlane.f32.xlu1 %v14411_v0  ;;  %22373 = vmatprep.subr.bf16.mxu1 %v22372_v54  ;;  %v14408_v10 = vsel %vm28235_vm2, %v14376_v48, 0.0  ;;  %v14345_v57 = vsel %vm28251_vm14, %v14319_v58, 0.0  ;;  %v14354_v42 = vsel %vm28255_vm7, %v14322_v39, 0.0  ;;  %v27418_v48 = vld [vmem:[%s23873_s25 + $0x10] sm:$0xff]  ;;  %v27446_v39 = vld [vmem:[%s23873_s25 + $0x58] sm:$0xff] }
0x1fbb   : > { %22375 = vmatpush3.bf16.msra.mxu1 %v22372_v54  ;;  %14409 = vadd.xlane.f32.xlu0 %v14408_v10 }
0x1fbc   : > { %22384 = vmatprep.subr.bf16.mxu1 %v28244_v23 }
0x1fbe   : > { %14328 = vadd.xlane.f32.xlu1 %v14327_v16 }
0x1fbf   : > { %14325 = vadd.xlane.f32.xlu0 %v14324_v40 }
0x1fc2   : > { %14334 = vadd.xlane.f32.xlu1 %v14333_v51 }
0x1fc3   : > { %14331 = vadd.xlane.f32.xlu0 %v14330_v35  ;;  %v27434_v35 = vld [vmem:[%s23873_s25 + $0x30] sm:$0xff] }
0x1fc6   : > { %14340 = vadd.xlane.f32.xlu1 %v14339_v14 }
0x1fc7   : > { %14337 = vadd.xlane.f32.xlu0 %v14336_v59  ;;  %v27438_v59 = vld [vmem:[%s23873_s25 + $0x48] sm:$0xff] }
0x1fca   : > { %14346 = vadd.xlane.f32.xlu1 %v14345_v57 }
0x1fcb   : > { %14343 = vadd.xlane.f32.xlu0 %v14342_v41 }
0x1fce   : > { %14352 = vadd.xlane.f32.xlu1 %v14351_v33 }
0x1fcf   : > { %14349 = vadd.xlane.f32.xlu0 %v14348_v63 }
0x1fd2   : > { %14358 = vadd.xlane.f32.xlu1 %v14357_v25 }
0x1fd3   : > { %14355 = vadd.xlane.f32.xlu0 %v14354_v42  ;;  %v27450_v42 = vld [vmem:[%s23873_s25 + $0x50] sm:$0xff] }
0x2033   : > { %v14383_v31 = vpop.xlane.xlu1 %14382 }
0x2034   : > { %v14415_v22 = vmul.f32 %v27406_v2, %v14383_v31  ;;  %v14380_v50 = vpop.xlane.xlu0 %14379 }
0x2035   : > { %v14414_v9 = vmul.f32 %v27410_v28, %v14380_v50  ;;  %v23773_v50 = vld [vmem:[%s28206_s18] sm:$0xff] }
0x2037   : > { %v22328_v17 = vpack.c.bf16 %v14415_v22, %v14414_v9  ;;  %v14389_v45 = vpop.xlane.xlu1 %14388 }
0x2038   : > { %v14417_v34 = vmul.f32 %v27414_v11, %v14389_v45  ;;  %v14386_v49 = vpop.xlane.xlu0 %14385 }
0x2039   : > { %v14416_v54 = vmul.f32 %v27418_v48, %v14386_v49  ;;  %22329 = vmatprep.subr.bf16.mxu0 %v22328_v17 }
0x203a   : > { %22331 = vmatpush3.bf16.msra.mxu0 %v22328_v17 }
0x203b   : > { %v22332_v24 = vpack.c.bf16 %v14417_v34, %v14416_v54  ;;  %v14395_v0 = vpop.xlane.xlu1 %14394 }
0x203c   : > { %v14419_v10 = vmul.f32 %v27422_v12, %v14395_v0  ;;  %v14392_v23 = vpop.xlane.xlu0 %14391 }
0x203d   : > { %v14418_v16 = vmul.f32 %v27426_v56, %v14392_v23  ;;  %22333 = vmatprep.subr.bf16.mxu0 %v22332_v24 }
0x203e   : > { %22335 = vmatpush3.bf16.msra.mxu0 %v22332_v24 }
0x203f   : > { %v22336_v62 = vpack.c.bf16 %v14419_v10, %v14418_v16  ;;  %v14401_v40 = vpop.xlane.xlu1 %14400 }
0x2040   : > { %v14421_v51 = vmul.f32 %v27430_v55, %v14401_v40  ;;  %v14398_v3 = vpop.xlane.xlu0 %14397 }
0x2041   : > { %v14420_v58 = vmul.f32 %v27434_v35, %v14398_v3  ;;  %22337 = vmatprep.subr.bf16.mxu0 %v22336_v62 }
0x2042   : > { %22339 = vmatpush3.bf16.msra.mxu0 %v22336_v62 }
0x2043   : > { %v22340_v14 = vpack.c.bf16 %v14421_v51, %v14420_v58  ;;  %v14407_v29 = vpop.xlane.xlu1 %14406 }
0x2044   : > { %v14423_v4 = vmul.f32 %v27438_v59, %v14407_v29  ;;  %v14404_v57 = vpop.xlane.xlu0 %14403 }
0x2045   : > { %v14422_v41 = vmul.f32 %v27442_v44, %v14404_v57  ;;  %22341 = vmatprep.subr.bf16.mxu0 %v22340_v14 }
0x2046   : > { %22343 = vmatpush3.bf16.msra.mxu0 %v22340_v14 }
0x2047   : > { %v22344_v37 = vpack.c.bf16 %v14423_v4, %v14422_v41  ;;  %v14413_v33 = vpop.xlane.xlu1 %14412 }
0x2048   : > { %v14425_v63 = vmul.f32 %v27446_v39, %v14413_v33  ;;  %v14410_v25 = vpop.xlane.xlu0 %14409 }
0x2049   : > { %v14424_v31 = vmul.f32 %v27450_v42, %v14410_v25  ;;  %22345 = vmatprep.subr.bf16.mxu0 %v22344_v37 }
0x204a   : > { %22347 = vmatpush3.bf16.msra.mxu0 %v22344_v37 }
0x204b   : > { %v22348_v22 = vpack.c.bf16 %v14425_v63, %v14424_v31 }
0x204d   : > { %22349 = vmatprep.subr.bf16.mxu0 %v22348_v22 }
0x204e   : > { %22351 = vmatpush3.bf16.msra.mxu0 %v22348_v22 }
0x204f   : > { %21453 = vmatprep.subr.mxu0 %v23773_v50 }
0x2051   : > { %21436 = vmatmul.mubr.msk.f32.vlgmr.msra.gmra.mrb[10].mxu0 %vm2066_vm3, %v27201_v6  ;;  %v14329_v6 = vpop.xlane.xlu1 %14328 }
0x2052   : > { %21438 = vmatprep.mubr.msk.f32.mxu0 %vm2066_vm3, %v27207_v13  ;;  %21454 = vmatpush3.msra.mxu0 %v23773_v50  ;;  %v14326_v13 = vpop.xlane.xlu0 %14325 }
0x2055   : > { %21439 = vmatmul.mubr.msk.f32.gmra.mrb[12].mxu0 %vm2066_vm3, %v27211_v5  ;;  %v14335_v5 = vpop.xlane.xlu1 %14334 }
0x2056   : > { %21441 = vmatprep.mubr.msk.f32.mxu0 %vm2066_vm3, %v27217_v32  ;;  %v14332_v32 = vpop.xlane.xlu0 %14331 }
0x2059   : > { %21442 = vmatmul.mubr.msk.f32.gmra.mrb[14].mxu0 %vm2066_vm3, %v27221_v27 }
0x205a   : > { %21444 = vmatprep.mubr.msk.f32.mxu0 %vm2066_vm3, %v27227_v20  ;;  %v14338_v45 = vpop.xlane.xlu0 %14337 }
0x205d   : > { %21445 = vmatmul.mubr.msk.f32.gmra.mrb[16].mxu0 %vm2066_vm3, %v27231_v36  ;;  %v14341_v36 = vpop.xlane.xlu1 %14340 }
0x205e   : > { %21447 = vmatprep.mubr.msk.f32.mxu0 %vm2066_vm3, %v27237_v8  ;;  %v14344_v3 = vpop.xlane.xlu0 %14343 }
0x2061   : > { %21448 = vmatmul.mubr.msk.f32.gmra.mrb[18].mxu0 %vm2066_vm3, %v27241_v46  ;;  %v14347_v62 = vpop.xlane.xlu1 %14346 }
0x2062   : > { %21450 = vmatprep.mubr.msk.f32.mxu0 %vm2066_vm3, %v27247_v15 }
0x2065   : > { %21451 = vmatmul.mubr.msk.f32.gmra.mrb[20].mxu0 %vm2066_vm3, %v27251_v47 }
0x2124   : > { %v21437_v27 = vpop.f32.mrb[10].mxu0 }
0x2125   : > { %v14552_v20 = vadd.f32 %v21437_v27, %v14329_v6  ;;  %v14492_v9 = vpop.f32.mrb[11].mxu0  ;;  %v14353_v6 = vpop.xlane.xlu1 %14352 }
0x2126   : > { %v14551_v17 = vadd.f32 %v14492_v9, %v14326_v13 }
0x2127   : > { %vm14564_vm4 = vcmp.gt.f32.partialorder %v14552_v20, 0.0  ;;  %v14576_v8 = vmul.f32 0.1, %v14552_v20 }
0x2128   : > { %vm14563_vm13 = vcmp.gt.f32.partialorder %v14551_v17, 0.0  ;;  %v14575_v46 = vmul.f32 0.1, %v14551_v17  ;;  %v21440_v34 = vpop.f32.mrb[12].mxu0 }
0x2129   : > { %v14554_v49 = vadd.f32 %v21440_v34, %v14335_v5  ;;  %v14502_v15 = vpop.f32.mrb[13].mxu0  ;;  %v14588_v54 = vsel %vm14564_vm4, %v14552_v20, %v14576_v8  ;;  %vm28259_vm4 = vcmp.gt.f32.partialorder %v28204_v19, 0.0 }
0x212a   : > { %v14553_v24 = vadd.f32 %v14502_v15, %v14332_v32  ;;  %v27478_v47 = vsel %vm12438_vm11, %v14588_v54, -3.4028235e+38  ;;  %v14587_v0 = vsel %vm14563_vm13, %v14551_v17, %v14575_v46  ;;  %v14350_v32 = vpop.xlane.xlu0 %14349 }
0x212b   : > { %vm14566_vm14 = vcmp.gt.f32.partialorder %v14554_v49, 0.0  ;;  %v14578_v10 = vmul.f32 0.1, %v14554_v49  ;;  %v14614_v23 = vsel %vm1330_vm0, %v27478_v47, -inf  ;;  %v27484_v16 = vsel %vm12437_vm12, %v14587_v0, -3.4028235e+38  ;;  %v14359_v0 = vpop.xlane.xlu1 %14358 }
0x212c   : > { %vm14565_vm2 = vcmp.gt.f32.partialorder %v14553_v24, 0.0  ;;  %v14577_v40 = vmul.f32 0.1, %v14553_v24  ;;  %14615 = vmax.xlane.f32.xlu1 %v14614_v23  ;;  %v21443_v51 = vpop.f32.mrb[14].mxu0  ;;  %v14611_v52 = vsel %vm1330_vm0, %v27484_v16, -inf }
0x212d   : > { %v14556_v58 = vadd.f32 %v21443_v51, %v14341_v36  ;;  %v14512_v14 = vpop.f32.mrb[15].mxu0  ;;  %14612 = vmax.xlane.f32.xlu0 %v14611_v52  ;;  %v14590_v29 = vsel %vm14566_vm14, %v14554_v49, %v14578_v10  ;;  %vm28260_vm14 = vcmp.gt.f32.partialorder %v28205_v1, 0.0 }
0x212e   : > { %v14555_v4 = vadd.f32 %v14512_v14, %v14338_v45  ;;  %v27490_v57 = vsel %vm12440_vm15, %v14590_v29, -3.4028235e+38  ;;  %v14589_v26 = vsel %vm14565_vm2, %v14553_v24, %v14577_v40 }
0x212f   : > { %vm14568_vm11 = vcmp.gt.f32.partialorder %v14556_v58, 0.0  ;;  %v14580_v41 = vmul.f32 0.1, %v14556_v58  ;;  %v14620_v37 = vsel %vm1330_vm0, %v27490_v57, -inf  ;;  %v27496_v33 = vsel %vm12439_vm1, %v14589_v26, -3.4028235e+38 }
0x2130   : > { %vm14567_vm12 = vcmp.gt.f32.partialorder %v14555_v4, 0.0  ;;  %v14579_v63 = vmul.f32 0.1, %v14555_v4  ;;  %14621 = vmax.xlane.f32.xlu1 %v14620_v37  ;;  %v21446_v25 = vpop.f32.mrb[16].mxu0  ;;  %v14617_v31 = vsel %vm1330_vm0, %v27496_v33, -inf  ;;  %vm28256_vm1 = vcmp.gt.f32.partialorder %v28201_v21, 0.0 }
0x2131   : > { %v14558_v7 = vadd.f32 %v21446_v25, %v14347_v62  ;;  %v14522_v22 = vpop.f32.mrb[17].mxu0  ;;  %14618 = vmax.xlane.f32.xlu0 %v14617_v31  ;;  %v14592_v50 = vsel %vm14568_vm11, %v14556_v58, %v14580_v41  ;;  %v14356_v62 = vpop.xlane.xlu0 %14355  ;;  %vm28261_vm11 = vcmp.gt.f32.partialorder %v28207_v43, 0.0 }
0x2132   : > { %v14557_v13 = vadd.f32 %v14522_v22, %v14344_v3  ;;  %v27502_v5 = vsel %vm12442_vm9, %v14592_v50, -3.4028235e+38  ;;  %v14591_v30 = vsel %vm14567_vm12, %v14555_v4, %v14579_v63  ;;  %vm28257_vm9 = vcmp.gt.f32.partialorder %v28202_v60, 0.0 }
0x2133   : > { %vm14570_vm15 = vcmp.gt.f32.partialorder %v14558_v7, 0.0  ;;  %v14582_v27 = vmul.f32 0.1, %v14558_v7  ;;  %v14626_v20 = vsel %vm1330_vm0, %v27502_v5, -inf  ;;  %v27508_v9 = vsel %vm28256_vm1, %v14591_v30, -3.4028235e+38 }
0x2134   : > { %vm14569_vm10 = vcmp.gt.f32.partialorder %v14557_v13, 0.0  ;;  %v14581_v36 = vmul.f32 0.1, %v14557_v13  ;;  %14627 = vmax.xlane.f32.xlu1 %v14626_v20  ;;  %v21449_v17 = vpop.f32.mrb[18].mxu0  ;;  %v14623_v38 = vsel %vm1330_vm0, %v27508_v9, -inf  ;;  %vm28262_vm12 = vcmp.gt.f32.partialorder %v28208_v18, 0.0 }
0x2135   : > { %v14560_v45 = vadd.f32 %v21449_v17, %v14353_v6  ;;  %v14532_v8 = vpop.f32.mrb[19].mxu0  ;;  %14624 = vmax.xlane.f32.xlu0 %v14623_v38  ;;  %v14594_v46 = vsel %vm14570_vm15, %v14558_v7, %v14582_v27  ;;  %vm28264_vm15 = vcmask 130048  }
0x2136   : > { %v14559_v34 = vadd.f32 %v14532_v8, %v14350_v32  ;;  %v27514_v49 = vsel %vm28257_vm9, %v14594_v46, -3.4028235e+38  ;;  %v14593_v15 = vsel %vm14569_vm10, %v14557_v13, %v14581_v36  ;;  %vm28266_vm1 = vmmov %vm28264_vm15 }
0x2137   : > { %vm14572_vm5 = vcmp.gt.f32.partialorder %v14560_v45, 0.0  ;;  %v14584_v21 = vmul.f32 0.1, %v14560_v45  ;;  %v14632_v54 = vsel %vm1330_vm0, %v27514_v49, -inf  ;;  %v27520_v24 = vsel %vm28258_vm8, %v14593_v15, -3.4028235e+38  ;;  %vm28268_vm10 = vmmov %vm28266_vm1 }
0x2138   : > { %vm14571_vm7 = vcmp.gt.f32.partialorder %v14559_v34, 0.0  ;;  %v14583_v10 = vmul.f32 0.1, %v14559_v34  ;;  %14633 = vmax.xlane.f32.xlu1 %v14632_v54  ;;  %v21452_v23 = vpop.f32.mrb[20].mxu0  ;;  %v14629_v60 = vsel %vm1330_vm0, %v27520_v24, -inf  ;;  %vm28270_vm9 = vmmov %vm28266_vm1 }
0x2139   : > { %v14562_v40 = vadd.f32 %v21452_v23, %v14359_v0  ;;  %v14542_v51 = vpop.f32.mrb[21].mxu0  ;;  %14630 = vmax.xlane.f32.xlu0 %v14629_v60  ;;  %v14596_v52 = vsel %vm14572_vm5, %v14560_v45, %v14584_v21  ;;  %vm28272_vm5 = vmmov %vm28266_vm1 }
0x213a   : > { %v14561_v3 = vadd.f32 %v14542_v51, %v14356_v62  ;;  %v14608_v58 = vsel %vm28259_vm4, %v14596_v52, -3.4028235e+38  ;;  %v14595_v53 = vsel %vm14571_vm7, %v14559_v34, %v14583_v10  ;;  %vm28274_vm8 = vmmov %vm28266_vm1 }
0x213b   : > { %vm14574_vm13 = vcmp.gt.f32.partialorder %v14562_v40, 0.0  ;;  %v14586_v14 = vmul.f32 0.1, %v14562_v40  ;;  %v14638_v29 = vsel %vm1330_vm0, %v14608_v58, -inf  ;;  %v14607_v4 = vsel %vm28260_vm14, %v14595_v53, -3.4028235e+38  ;;  %vm28276_vm7 = vmmov %vm28266_vm1 }
0x213c   : > { %vm14573_vm2 = vcmp.gt.f32.partialorder %v14561_v3, 0.0  ;;  %v14585_v26 = vmul.f32 0.1, %v14561_v3  ;;  %14639 = vmax.xlane.f32.xlu1 %v14638_v29  ;;  %v14635_v41 = vsel %vm1330_vm0, %v14607_v4, -inf  ;;  %vm28278_vm4 = vmmov %vm28266_vm1 }
0x213d   : > { %14636 = vmax.xlane.f32.xlu0 %v14635_v41  ;;  %v14598_v37 = vsel %vm14574_vm13, %v14562_v40, %v14586_v14  ;;  %vm28280_vm13 = vmmov %vm28266_vm1 }
0x213e   : > { %v27532_v63 = vsel %vm28261_vm11, %v14598_v37, -3.4028235e+38  ;;  %v14597_v19 = vsel %vm14573_vm2, %v14561_v3, %v14585_v26  ;;  %vm28282_vm14 = vmmov %vm28266_vm1 }
0x213f   : > { %v14644_v25 = vsel %vm1330_vm0, %v27532_v63, -inf  ;;  %v27538_v31 = vsel %vm28262_vm12, %v14597_v19, -3.4028235e+38  ;;  %vm28284_vm2 = vmmov %vm28266_vm1 }
0x2140   : > { %14645 = vmax.xlane.f32.xlu1 %v14644_v25  ;;  %v14641_v1 = vsel %vm1330_vm0, %v27538_v31, -inf  ;;  %vm28286_vm11 = vmmov %vm28266_vm1 }
0x2141   : > { %14642 = vmax.xlane.f32.xlu0 %v14641_v1  ;;  %vm28289_vm12 = vmmov %vm28266_vm1 }
0x21b9   : > { %v14616_v7 = vpop.xlane.xlu1 %14615 }
0x21ba   : > { %v14648_v22 = vsub.f32 %v27478_v47, %v14616_v7  ;;  %v14613_v50 = vpop.xlane.xlu0 %14612 }
0x21bb   : > { %v14647_v43 = vsub.f32 %v27484_v16, %v14613_v50 }
0x21bc   : > { %v14661_v6 = vmul.f32 1.442695, %v14648_v22 }
0x21bd   : > { %v14659_v13 = vmul.f32 1.442695, %v14647_v43  ;;  %v14622_v30 = vpop.xlane.xlu1 %14621 }
0x21be   : > { %23436 = vpow2.f32 %v14661_v6  ;;  %v14650_v32 = vsub.f32 %v27490_v57, %v14622_v30  ;;  %v14619_v18 = vpop.xlane.xlu0 %14618 }
0x21bf   : > { %23438 = vpow2.f32 %v14659_v13  ;;  %v14649_v27 = vsub.f32 %v27496_v33, %v14619_v18 }
0x21c0   : > { %v14665_v20 = vmul.f32 1.442695, %v14650_v32 }
0x21c1   : > { %v14663_v36 = vmul.f32 1.442695, %v14649_v27  ;;  %v14628_v17 = vpop.xlane.xlu1 %14627  ;;  %v10957_v27 = vsel %vm28264_vm15, %v26451_v61, 0.0  ;;  %vm28291_vm15 = vmmov %vm28266_vm1 }
0x21c2   : > { %23440 = vpow2.f32 %v14665_v20  ;;  %v14652_v38 = vsub.f32 %v27502_v5, %v14628_v17  ;;  %v14625_v47 = vpop.xlane.xlu0 %14624  ;;  %v28265_v20 = vld [vmem:[#allocation50_spill] sm:$0xff]  ;;  %v28267_v17 = vld [vmem:[#allocation52_spill] sm:$0xff] }
0x21c3   : > { %23442 = vpow2.f32 %v14663_v36  ;;  %v14651_v16 = vsub.f32 %v27508_v9, %v14625_v47  ;;  %v10960_v36 = vsel %vm28266_vm1, %v28265_v20, 0.0  ;;  %v28269_v47 = vld [vmem:[#allocation51_spill] sm:$0xff] }
0x21c4   : > { %v14669_v45 = vmul.f32 1.442695, %v14652_v38  ;;  %v10963_v38 = vsel %vm28268_vm10, %v28267_v17, 0.0  ;;  %vm28295_vm10 = vmmov %vm28266_vm1 }
0x21c5   : > { %v14667_v8 = vmul.f32 1.442695, %v14651_v16  ;;  %v14634_v46 = vpop.xlane.xlu1 %14633  ;;  %v10966_v16 = vsel %vm28270_vm9, %v28269_v47, 0.0  ;;  %vm28297_vm9 = vmmov %vm28266_vm1 }
0x21c6   : > { %23444 = vpow2.f32 %v14669_v45  ;;  %v14654_v57 = vsub.f32 %v27514_v49, %v14634_v46  ;;  %v14631_v34 = vpop.xlane.xlu0 %14630  ;;  %v28271_v45 = vld [vmem:[#allocation54_spill] sm:$0xff]  ;;  %v28273_v46 = vld [vmem:[#allocation53_spill] sm:$0xff] }
0x21c7   : > { %23446 = vpow2.f32 %v14667_v8  ;;  %v14653_v33 = vsub.f32 %v27520_v24, %v14631_v34  ;;  %v10969_v8 = vsel %vm28272_vm5, %v28271_v45, 0.0  ;;  %v10972_v61 = vsel %vm28274_vm8, %v28273_v46, 0.0  ;;  %v17938_v34 = vld [vmem:[%s28263_s2 + $0x18] sm:$0xff]  ;;  %vm28299_vm5 = vmmov %vm28266_vm1 }
0x21c8   : > { %v27550_v15 = vpop.eup %23436  ;;  %v14673_v21 = vmul.f32 1.442695, %v14654_v57  ;;  %v17937_v57 = vld [vmem:[%s28263_s2 + $0x10] sm:$0xff]  ;;  %s28293_s2 = sld [smem:[#allocation11_spill]]  ;;  %vm28301_vm8 = vmmov %vm28266_vm1 }
0x21c9   : > { %v27552_v54 = vpop.eup %23438  ;;  %v14671_v5 = vmul.f32 1.442695, %v14653_v33  ;;  %v14640_v0 = vpop.xlane.xlu1 %14639  ;;  %v14686_v9 = vsel %vm1330_vm0, %v27550_v15, 0.0  ;;  %v22376_v33 = vpack.c.bf16 %v17938_v34, %v17937_v57 }
0x21ca   : > { %23448 = vpow2.f32 %v14673_v21  ;;  %v14656_v10 = vsub.f32 %v14608_v58, %v14640_v0  ;;  %14687 = vadd.xlane.f32.xlu1 %v14686_v9  ;;  %v14637_v23 = vpop.xlane.xlu0 %14636  ;;  %v14683_v49 = vsel %vm1330_vm0, %v27552_v54, 0.0  ;;  %v28275_v21 = vld [vmem:[#allocation56_spill] sm:$0xff]  ;;  %v28277_v0 = vld [vmem:[#allocation55_spill] sm:$0xff] }
0x21cb   : > { %23450 = vpow2.f32 %v14671_v5  ;;  %v14655_v60 = vsub.f32 %v14607_v4, %v14637_v23  ;;  %14684 = vadd.xlane.f32.xlu0 %v14683_v49  ;;  %v10975_v5 = vsel %vm28276_vm7, %v28275_v21, 0.0  ;;  %22377 = vmatprep.subr.bf16.mxu0 %v22376_v33  ;;  %v10978_v9 = vsel %vm28278_vm4, %v28277_v0, 0.0  ;;  %v28281_v49 = vld [vmem:[#allocation57_spill] sm:$0xff]  ;;  %v28288_v21 = vld [vmem:[#allocation62_spill] sm:$0xff]  ;;  %v28300_v0 = vld [vmem:[#allocation68_spill] sm:$0xff] }
0x21cc   : > { %v27558_v24 = vpop.eup %23440  ;;  %v14677_v62 = vmul.f32 1.442695, %v14656_v10  ;;  %v28279_v10 = vld [vmem:[#allocation58_spill] sm:$0xff]  ;;  %vm28303_vm7 = vmmov %vm28266_vm1 }
0x21cd   : > { %v27560_v40 = vpop.eup %23442  ;;  %v14675_v51 = vmul.f32 1.442695, %v14655_v60  ;;  %v14646_v52 = vpop.xlane.xlu1 %14645  ;;  %v14692_v3 = vsel %vm1330_vm0, %v27558_v24, 0.0  ;;  %v10981_v23 = vsel %vm28280_vm13, %v28279_v10, 0.0  ;;  %v10984_v60 = vsel %vm28282_vm14, %v28281_v49, 0.0  ;;  %v28304_v10 = vld [vmem:[#allocation70_spill] sm:$0xff]  ;;  %vm28305_vm4 = vmmov %vm28266_vm1 }
0x21ce   : > { %23452 = vpow2.f32 %v14677_v62  ;;  %v14658_v58 = vsub.f32 %v27532_v63, %v14646_v52  ;;  %14693 = vadd.xlane.f32.xlu1 %v14692_v3  ;;  %v14643_v53 = vpop.xlane.xlu0 %14642  ;;  %v14689_v14 = vsel %vm1330_vm0, %v27560_v40, 0.0  ;;  %v28283_v62 = vld [vmem:[#allocation60_spill] sm:$0xff]  ;;  %v28285_v52 = vld [vmem:[#allocation59_spill] sm:$0xff]  ;;  %vm28307_vm13 = vmmov %vm28266_vm1 }
0x21cf   : > { %23454 = vpow2.f32 %v14675_v51  ;;  %v14657_v29 = vsub.f32 %v27538_v31, %v14643_v53  ;;  %14690 = vadd.xlane.f32.xlu0 %v14689_v14  ;;  %v10987_v51 = vsel %vm28284_vm2, %v28283_v62, 0.0  ;;  %v10990_v3 = vsel %vm28286_vm11, %v28285_v52, 0.0  ;;  %v28308_v49 = vld [vmem:[#allocation72_spill] sm:$0xff]  ;;  %vm28309_vm14 = vmmov %vm28266_vm1 }
0x21d0   : > { %v27568_v4 = vpop.eup %23444  ;;  %v14681_v26 = vmul.f32 1.442695, %v14658_v58  ;;  %vm28311_vm2 = vmmov %vm28266_vm1  ;;  %v17953_v62 = vld [vmem:[%s28287_s1 + $0x10] sm:$0xff]  ;;  %vm28315_vm11 = vcmask 80896  }
0x21d1   : > { %v27570_v41 = vpop.eup %23446  ;;  %v14679_v37 = vmul.f32 1.442695, %v14657_v29  ;;  %v14698_v19 = vsel %vm1330_vm0, %v27568_v4, 0.0 }
0x21d2   : > { %23456 = vpow2.f32 %v14681_v26  ;;  %14699 = vadd.xlane.f32.xlu1 %v14698_v19  ;;  %v14695_v63 = vsel %vm1330_vm0, %v27570_v41, 0.0 }
0x21d3   : > { %23458 = vpow2.f32 %v14679_v37  ;;  %14696 = vadd.xlane.f32.xlu0 %v14695_v63 }
0x21d4   : > { %v27576_v25 = vpop.eup %23448 }
0x21d5   : > { %v27578_v31 = vpop.eup %23450  ;;  %v14704_v1 = vsel %vm1330_vm0, %v27576_v25, 0.0 }
0x21d6   : > { %14705 = vadd.xlane.f32.xlu1 %v14704_v1  ;;  %v14701_v7 = vsel %vm1330_vm0, %v27578_v31, 0.0 }
0x21d7   : > { %14702 = vadd.xlane.f32.xlu0 %v14701_v7 }
0x21d8   : > { %v27584_v22 = vpop.eup %23452 }
0x21d9   : > { %v27586_v50 = vpop.eup %23454  ;;  %v14710_v43 = vsel %vm1330_vm0, %v27584_v22, 0.0 }
0x21da   : > { %14711 = vadd.xlane.f32.xlu1 %v14710_v43  ;;  %v14707_v6 = vsel %vm1330_vm0, %v27586_v50, 0.0 }
0x21db   : > { %14708 = vadd.xlane.f32.xlu0 %v14707_v6 }
0x21dc   : > { %v27592_v13 = vpop.eup %23456 }
0x21dd   : > { %v27594_v30 = vpop.eup %23458  ;;  %v14716_v32 = vsel %vm1330_vm0, %v27592_v13, 0.0 }
0x21de   : > { %14717 = vadd.xlane.f32.xlu1 %v14716_v32  ;;  %v14713_v18 = vsel %vm1330_vm0, %v27594_v30, 0.0 }
0x21df   : > { %14714 = vadd.xlane.f32.xlu0 %v14713_v18 }
0x21e3   : > { %10958 = vadd.xlane.f32.xlu0 %v10957_v27 }
0x21e7   : > { %10961 = vadd.xlane.f32.xlu0 %v10960_v36 }
0x21eb   : > { %10964 = vadd.xlane.f32.xlu0 %v10963_v38 }
0x21ef   : > { %10967 = vadd.xlane.f32.xlu0 %v10966_v16 }
0x21f3   : > { %10970 = vadd.xlane.f32.xlu0 %v10969_v8 }
0x21f7   : > { %10973 = vadd.xlane.f32.xlu0 %v10972_v61 }
0x21fb   : > { %10976 = vadd.xlane.f32.xlu0 %v10975_v5  ;;  %v28294_v5 = vld [vmem:[#allocation63_spill] sm:$0xff] }
0x21ff   : > { %10979 = vadd.xlane.f32.xlu0 %v10978_v9  ;;  %v28302_v9 = vld [vmem:[#allocation67_spill] sm:$0xff] }
0x2203   : > { %10982 = vadd.xlane.f32.xlu0 %v10981_v23  ;;  %v28306_v23 = vld [vmem:[#allocation69_spill] sm:$0xff] }
0x2207   : > { %10985 = vadd.xlane.f32.xlu0 %v10984_v60  ;;  %v28310_v60 = vld [vmem:[#allocation71_spill] sm:$0xff] }
0x220b   : > { %10988 = vadd.xlane.f32.xlu0 %v10987_v51  ;;  %v17954_v51 = vld [vmem:[%s28287_s1 + $0x18] sm:$0xff]  ;;  %s28316_s1 = sld [smem:[#allocation12_spill]] }
0x220c   : > { %v22380_v52 = vpack.c.bf16 %v17954_v51, %v17953_v62  ;;  %v23785_v51 = vld [vmem:[%s28196_s16 + $0x58] sm:$0xff] }
0x220f   : > { %10991 = vadd.xlane.f32.xlu0 %v10990_v3  ;;  %v17981_v3 = vld [vmem:[%s28293_s2 + $0x10] sm:$0xff] }
0x2257   : > { %v14688_v58 = vpop.xlane.xlu1 %14687 }
0x2258   : > { %23460 = vrcp.f32 %v14688_v58  ;;  %v14685_v53 = vpop.xlane.xlu0 %14684  ;;  %v17982_v58 = vld [vmem:[%s28293_s2 + $0x18] sm:$0x3]  ;;  %s28326_s2 = sld [smem:[#allocation22_spill]] }
0x2259   : > { %23462 = vrcp.f32 %v14685_v53 }
0x225b   : > { %v14694_v14 = vpop.xlane.xlu1 %14693 }
0x225c   : > { %23464 = vrcp.f32 %v14694_v14  ;;  %v14691_v29 = vpop.xlane.xlu0 %14690 }
0x225d   : > { %23466 = vrcp.f32 %v14691_v29  ;;  %v23774_v29 = vld [vmem:[%s28196_s16] sm:$0xff] }
0x225f   : > { %v14700_v26 = vpop.xlane.xlu1 %14699 }
0x2260   : > { %23468 = vrcp.f32 %v14700_v26  ;;  %v14697_v37 = vpop.xlane.xlu0 %14696 }
0x2261   : > { %23470 = vrcp.f32 %v14697_v37  ;;  %v22385_v37 = vpack.c.bf16 %v17982_v58, %v17981_v3  ;;  %v28313_v3 = vmov 0.0   ;;  %v23786_v58 = vld [vmem:[%s28153_s23] sm:$0xff] }
0x2262   : > { %v23461_v19 = vpop.eup %23460 }
0x2263   : > { %v23463_v63 = vpop.eup %23462  ;;  %v14706_v1 = vpop.xlane.xlu1 %14705  ;;  %v14732_v6 = vmul.f32 %v23461_v19, %v27550_v15  ;;  %v23775_v19 = vld [vmem:[%s28196_s16 + $0x8] sm:$0xff] }
0x2264   : > { %23472 = vrcp.f32 %v14706_v1  ;;  %v14703_v7 = vpop.xlane.xlu0 %14702  ;;  %v14731_v43 = vmul.f32 %v23463_v63, %v27552_v54 }
0x2265   : > { %23474 = vrcp.f32 %v14703_v7 }
0x2266   : > { %v23465_v32 = vpop.eup %23464  ;;  %21455 = vmatprep.mubr.msk.f32.mxu0 %vm1330_vm0, %v14731_v43  ;;  %v23776_v43 = vld [vmem:[%s28196_s16 + $0x10] sm:$0xff] }
0x2267   : > { %v23467_v18 = vpop.eup %23466  ;;  %v14712_v27 = vpop.xlane.xlu1 %14711  ;;  %21456 = vmatmul.mubr.msk.f32.vlgmr.msra.gmra.mrb[22].mxu0 %vm1330_vm0, %v14732_v6  ;;  %v14734_v17 = vmul.f32 %v23465_v32, %v27558_v24 }
0x2268   : > { %23476 = vrcp.f32 %v14712_v27  ;;  %v14709_v20 = vpop.xlane.xlu0 %14708  ;;  %v14733_v36 = vmul.f32 %v23467_v18, %v27560_v40  ;;  %22379 = vmatpush3.bf16.msra.mxu0 %v22376_v33  ;;  %v23777_v18 = vld [vmem:[%s28196_s16 + $0x18] sm:$0xff] }
0x2269   : > { %23478 = vrcp.f32 %v14709_v20  ;;  %22381 = vmatprep.subr.bf16.mxu0 %v22380_v52 }
0x226a   : > { %v23469_v38 = vpop.eup %23468  ;;  %21458 = vmatprep.mubr.msk.f32.mxu0 %vm1330_vm0, %v14733_v36 }
0x226b   : > { %v23471_v15 = vpop.eup %23470  ;;  %v14718_v54 = vpop.xlane.xlu1 %14717  ;;  %21459 = vmatmul.mubr.msk.f32.gmra.mrb[24].mxu0 %vm1330_vm0, %v14734_v17  ;;  %v14736_v45 = vmul.f32 %v23469_v38, %v27568_v4  ;;  %v23778_v17 = vld [vmem:[%s28196_s16 + $0x20] sm:$0xff] }
0x226c   : > { %23480 = vrcp.f32 %v14718_v54  ;;  %v14715_v47 = vpop.xlane.xlu0 %14714  ;;  %v14735_v16 = vmul.f32 %v23471_v15, %v27570_v41  ;;  %v23779_v15 = vld [vmem:[%s28196_s16 + $0x28] sm:$0xff] }
0x226d   : > { %23482 = vrcp.f32 %v14715_v47 }
0x226e   : > { %v23473_v8 = vpop.eup %23472  ;;  %21461 = vmatprep.mubr.msk.f32.mxu0 %vm1330_vm0, %v14735_v16 }
0x226f   : > { %v23475_v40 = vpop.eup %23474  ;;  %21462 = vmatmul.mubr.msk.f32.gmra.mrb[26].mxu0 %vm1330_vm0, %v14736_v45  ;;  %v14738_v46 = vmul.f32 %v23473_v8, %v27576_v25  ;;  %v23780_v45 = vld [vmem:[%s28196_s16 + $0x30] sm:$0xff] }
0x2270   : > { %v14737_v24 = vmul.f32 %v23475_v40, %v27578_v31  ;;  %v23781_v40 = vld [vmem:[%s28196_s16 + $0x38] sm:$0xff] }
0x2272   : > { %v23477_v61 = vpop.eup %23476  ;;  %21464 = vmatprep.mubr.msk.f32.mxu0 %vm1330_vm0, %v14737_v24 }
0x2273   : > { %v23479_v57 = vpop.eup %23478  ;;  %21465 = vmatmul.mubr.msk.f32.gmra.mrb[28].mxu0 %vm1330_vm0, %v14738_v46  ;;  %v14740_v4 = vmul.f32 %v23477_v61, %v27584_v22  ;;  %v28290_v22 = vld [vmem:[#allocation61_spill] sm:$0xff] }
0x2274   : > { %v14739_v41 = vmul.f32 %v23479_v57, %v27586_v50  ;;  %v28292_v50 = vld [vmem:[#allocation64_spill] sm:$0xff]  ;;  %v23782_v57 = vld [vmem:[%s28196_s16 + $0x40] sm:$0xff] }
0x2276   : > { %v23481_v34 = vpop.eup %23480  ;;  %21467 = vmatprep.mubr.msk.f32.mxu0 %vm1330_vm0, %v14739_v41 }
0x2277   : > { %v23483_v33 = vpop.eup %23482  ;;  %21468 = vmatmul.mubr.msk.f32.gmra.mrb[30].mxu0 %vm1330_vm0, %v14740_v4  ;;  %v14742_v25 = vmul.f32 %v23481_v34, %v27592_v13  ;;  %v28296_v13 = vld [vmem:[#allocation66_spill] sm:$0xff]  ;;  %v23783_v4 = vld [vmem:[%s28196_s16 + $0x48] sm:$0xff] }
0x2278   : > { %v14741_v31 = vmul.f32 %v23483_v33, %v27594_v30  ;;  %v28298_v30 = vld [vmem:[#allocation65_spill] sm:$0xff] }
0x227a   : > { %21470 = vmatprep.mubr.msk.f32.mxu0 %vm1330_vm0, %v14741_v31 }
0x227b   : > { %21471 = vmatmul.mubr.msk.f32.gmra.mrb[32].mxu0 %vm1330_vm0, %v14742_v25  ;;  %v23784_v25 = vld [vmem:[%s28196_s16 + $0x50] sm:$0xff] }
0x227c   : > { %21519 = vmatprep.mubr.msk.f32.mxu0 %vm28289_vm12, %v28288_v21 }
0x227f   : > { %21520 = vmatmul.mubr.msk.f32.vlgmr.msra.gmra.mrb[34].mxu0 %vm28291_vm15, %v28290_v22  ;;  %vm28317_vm15 = vmmov %vm28266_vm1 }
0x2280   : > { %21522 = vmatprep.mubr.msk.f32.mxu0 %vm28266_vm1, %v28292_v50  ;;  %22383 = vmatpush3.bf16.msra.mxu0 %v22380_v52 }
0x2283   : > { %21523 = vmatmul.mubr.msk.f32.gmra.mrb[36].mxu0 %vm28295_vm10, %v28294_v5 }
0x2284   : > { %21525 = vmatprep.mubr.msk.f32.mxu0 %vm28297_vm9, %v28296_v13 }
0x2287   : > { %21526 = vmatmul.mubr.msk.f32.gmra.mrb[38].mxu0 %vm28299_vm5, %v28298_v30  ;;  %vm28318_vm5 = vmmov %vm28266_vm1 }
0x2288   : > { %21528 = vmatprep.mubr.msk.f32.mxu0 %vm28301_vm8, %v28300_v0  ;;  %vm28319_vm8 = vmmov %vm28266_vm1 }
0x228b   : > { %21529 = vmatmul.mubr.msk.f32.gmra.mrb[40].mxu0 %vm28303_vm7, %v28302_v9 }
0x228c   : > { %21531 = vmatprep.mubr.msk.f32.mxu0 %vm28305_vm4, %v28304_v10 }
0x228f   : > { %21532 = vmatmul.mubr.msk.f32.gmra.mrb[42].mxu0 %vm28307_vm13, %v28306_v23  ;;  %vm28320_vm13 = vmmov %vm28266_vm1 }
0x2290   : > { %21534 = vmatprep.mubr.msk.f32.mxu0 %vm28309_vm14, %v28308_v49  ;;  %vm28321_vm14 = vmmov %vm28266_vm1 }
0x2293   : > { %21535 = vmatmul.mubr.msk.f32.gmra.mrb[44].mxu0 %vm28311_vm2, %v28310_v60 }
0x233a   : > { %v21457_v53 = vpop.f32.mrb[22].mxu0 }
0x233b   : > { %v14845_v14 = vpop.f32.mrb[23].mxu0  ;;  %v14905_v63 = vmul.f32 %v23775_v19, %v21457_v53 }
0x233c   : > { %v14904_v26 = vmul.f32 %v23774_v29, %v14845_v14 }
0x233e   : > { %v21460_v1 = vpop.f32.mrb[24].mxu0  ;;  %21497 = vmatprep.mubr.msk.f32.mxu1 %vm2066_vm3, %v14904_v26 }
0x233f   : > { %v14855_v7 = vpop.f32.mrb[25].mxu0  ;;  %21498 = vmatmul.mubr.msk.f32.vlgmr.msra.gmra.mrb[8].mxu1 %vm2066_vm3, %v14905_v63  ;;  %v14907_v27 = vmul.f32 %v23777_v18, %v21460_v1 }
0x2340   : > { %v14906_v6 = vmul.f32 %v23776_v43, %v14855_v7  ;;  %22387 = vmatpush3.bf16.msk.msra.mxu1 %vm26203_vm6, %v22385_v37  ;;  %vm28314_vm6 = vmmov 0  }
0x2342   : > { %v21463_v20 = vpop.f32.mrb[26].mxu0  ;;  %21500 = vmatprep.mubr.msk.f32.mxu1 %vm2066_vm3, %v14906_v6 }
0x2343   : > { %v14865_v36 = vpop.f32.mrb[27].mxu0  ;;  %21501 = vmatmul.mubr.msk.f32.gmra.mrb[10].mxu1 %vm2066_vm3, %v14907_v27  ;;  %v14909_v54 = vmul.f32 %v23779_v15, %v21463_v20 }
0x2344   : > { %v14908_v38 = vmul.f32 %v23778_v17, %v14865_v36 }
0x2346   : > { %v21466_v47 = vpop.f32.mrb[28].mxu0  ;;  %21503 = vmatprep.mubr.msk.f32.mxu1 %vm2066_vm3, %v14908_v38 }
0x2347   : > { %v14875_v16 = vpop.f32.mrb[29].mxu0  ;;  %21504 = vmatmul.mubr.msk.f32.gmra.mrb[12].mxu1 %vm2066_vm3, %v14909_v54  ;;  %v14911_v24 = vmul.f32 %v23781_v40, %v21466_v47 }
0x2348   : > { %v14910_v8 = vmul.f32 %v23780_v45, %v14875_v16 }
0x234a   : > { %v21469_v46 = vpop.f32.mrb[30].mxu0  ;;  %21506 = vmatprep.mubr.msk.f32.mxu1 %vm2066_vm3, %v14910_v8 }
0x234b   : > { %v14885_v61 = vpop.f32.mrb[31].mxu0  ;;  %21507 = vmatmul.mubr.msk.f32.gmra.mrb[14].mxu1 %vm2066_vm3, %v14911_v24  ;;  %v14913_v34 = vmul.f32 %v23783_v4, %v21469_v46 }
0x234c   : > { %v14912_v41 = vmul.f32 %v23782_v57, %v14885_v61 }
0x234e   : > { %v21472_v33 = vpop.f32.mrb[32].mxu0  ;;  %21509 = vmatprep.mubr.msk.f32.mxu1 %vm2066_vm3, %v14912_v41 }
0x234f   : > { %v14895_v31 = vpop.f32.mrb[33].mxu0  ;;  %21510 = vmatmul.mubr.msk.f32.gmra.mrb[16].mxu1 %vm2066_vm3, %v14913_v34  ;;  %v14915_v52 = vmul.f32 %v23785_v51, %v21472_v33 }
0x2350   : > { %v14914_v62 = vmul.f32 %v23784_v25, %v14895_v31 }
0x2352   : > { %21512 = vmatprep.mubr.msk.f32.mxu1 %vm2066_vm3, %v14914_v62 }
0x2353   : > { %21513 = vmatmul.mubr.msk.f32.gmra.mrb[18].mxu1 %vm2066_vm3, %v14915_v52 }
0x2354   : > { %21563 = vmatprep.mubr.msk.f32.mxu1 %vm28314_vm6, %v28313_v3 }
0x2357   : > { %21564 = vmatmul.mubr.msk.f32.vlgmr.msra.gmra.mrb[20].mxu1 %vm28315_vm11, %v23786_v58  ;;  %vm28322_vm11 = vmmov %vm28266_vm1 }
0x2358   : > { %21568 = vmatprep.mubr.msk.f32.mxu1 %vm1330_vm0, %v27410_v28 }
0x2412   : > { %v21499_v53 = vpop.f32.mrb[8].mxu1 }
0x2413   : > { %v15090_v14 = vmin.f32 %v21499_v53, 0.0  ;;  %v15018_v29 = vpop.f32.mrb[9].mxu1  ;;  %vm15078_vm12 = vcmp.gt.f32.partialorder %v21499_v53, 0.0 }
0x2414   : > { %v15089_v26 = vmin.f32 %v15018_v29, 0.0  ;;  %vm15077_vm3 = vcmp.gt.f32.partialorder %v15018_v29, 0.0 }
0x2415   : > { %v15103_v37 = vmul.f32 1.442695, %v15090_v14 }
0x2416   : > { %v15101_v19 = vmul.f32 1.442695, %v15089_v26  ;;  %v21502_v63 = vpop.f32.mrb[10].mxu1 }
0x2417   : > { %23484 = vpow2.f32 %v15103_v37  ;;  %v15092_v1 = vmin.f32 %v21502_v63, 0.0  ;;  %v15028_v7 = vpop.f32.mrb[11].mxu1  ;;  %vm15080_vm9 = vcmp.gt.f32.partialorder %v21502_v63, 0.0 }
0x2418   : > { %23486 = vpow2.f32 %v15101_v19  ;;  %v15091_v43 = vmin.f32 %v15028_v7, 0.0  ;;  %vm15079_vm10 = vcmp.gt.f32.partialorder %v15028_v7, 0.0 }
0x2419   : > { %v15107_v6 = vmul.f32 1.442695, %v15092_v1 }
0x241a   : > { %v15105_v32 = vmul.f32 1.442695, %v15091_v43  ;;  %v27710_v18 = vpop.f32.mrb[12].mxu1 }
0x241b   : > { %23488 = vpow2.f32 %v15107_v6  ;;  %v15094_v27 = vmin.f32 %v27710_v18, 0.0  ;;  %v27713_v28 = vpop.f32.mrb[13].mxu1  ;;  %vm15082_vm4 = vcmp.gt.f32.partialorder %v27710_v18, 0.0 }
0x241c   : > { %23490 = vpow2.f32 %v15105_v32  ;;  %v15093_v20 = vmin.f32 %v27713_v28, 0.0  ;;  %vm15081_vm7 = vcmp.gt.f32.partialorder %v27713_v28, 0.0 }
0x241d   : > { %v15111_v36 = vmul.f32 1.442695, %v15094_v27 }
0x241e   : > { %v15109_v17 = vmul.f32 1.442695, %v15093_v20  ;;  %v27716_v38 = vpop.f32.mrb[14].mxu1 }
0x241f   : > { %23492 = vpow2.f32 %v15111_v36  ;;  %v15096_v15 = vmin.f32 %v27716_v38, 0.0  ;;  %v27719_v54 = vpop.f32.mrb[15].mxu1  ;;  %vm15084_vm6 = vcmp.gt.f32.partialorder %v27716_v38, 0.0 }
0x2420   : > { %23494 = vpow2.f32 %v15109_v17  ;;  %v15095_v47 = vmin.f32 %v27719_v54, 0.0  ;;  %vm15083_vm2 = vcmp.gt.f32.partialorder %v27719_v54, 0.0 }
0x2421   : > { %v23485_v16 = vpop.eup %23484  ;;  %v15115_v45 = vmul.f32 1.442695, %v15096_v15 }
0x2422   : > { %v23487_v8 = vpop.eup %23486  ;;  %v17926_v40 = vadd.f32 -1.0, %v23485_v16  ;;  %v15113_v24 = vmul.f32 1.442695, %v15095_v47  ;;  %v27722_v46 = vpop.f32.mrb[16].mxu1 }
0x2423   : > { %v17925_v61 = vadd.f32 -1.0, %v23487_v8  ;;  %23496 = vpow2.f32 %v15115_v45  ;;  %v15098_v57 = vmin.f32 %v27722_v46, 0.0  ;;  %v27725_v41 = vpop.f32.mrb[17].mxu1 }
0x2424   : > { %23498 = vpow2.f32 %v15113_v24  ;;  %v15097_v4 = vmin.f32 %v27725_v41, 0.0  ;;  %v27730_v62 = vsel %vm15078_vm12, %v21499_v53, %v17926_v40  ;;  %vm15085_vm12 = vcmp.gt.f32.partialorder %v27725_v41, 0.0 }
0x2425   : > { %v23489_v34 = vpop.eup %23488  ;;  %v15119_v33 = vmul.f32 1.442695, %v15098_v57  ;;  %v27728_v31 = vsel %vm15077_vm3, %v15018_v29, %v17925_v61  ;;  %v17984_v29 = vld [vmem:[%s28316_s1 + $0x1] ss:$0 sm:$0xff]  ;;  %vm28323_vm3 = vmmov %vm28266_vm1  ;;  %s28324_s1 = sld [smem:[#allocation20_spill]] }
0x2426   : > { %v23491_v25 = vpop.eup %23490  ;;  %v17928_v51 = vadd.f32 -1.0, %v23489_v34  ;;  %v15117_v52 = vmul.f32 1.442695, %v15097_v4  ;;  %v27732_v3 = vpop.f32.mrb[18].mxu1  ;;  %21541 = vmatprep.mubr.msk.f32.mxu0 %vm28317_vm15, %v27728_v31  ;;  %vm15086_vm15 = vcmp.gt.f32.partialorder %v27722_v46, 0.0 }
0x2427   : > { %v17927_v58 = vadd.f32 -1.0, %v23491_v25  ;;  %23500 = vpow2.f32 %v15119_v33  ;;  %v15100_v14 = vmin.f32 %v27732_v3, 0.0  ;;  %v27737_v26 = vpop.f32.mrb[19].mxu1  ;;  %21542 = vmatmul.mubr.msk.f32.vlgmr.msra.gmra.mrb[34].mxu0 %vm28266_vm1, %v27730_v62 }
0x2428   : > { %23502 = vpow2.f32 %v15117_v52  ;;  %v15099_v53 = vmin.f32 %v27737_v26, 0.0  ;;  %v27745_v6 = vsel %vm15080_vm9, %v21502_v63, %v17928_v51  ;;  %vm15087_vm9 = vcmp.gt.f32.partialorder %v27737_v26, 0.0 }
0x2429   : > { %v23493_v37 = vpop.eup %23492  ;;  %v15123_v19 = vmul.f32 1.442695, %v15100_v14  ;;  %v27743_v1 = vsel %vm15079_vm10, %v15028_v7, %v17927_v58  ;;  %vm28325_vm10 = vmmov %vm28266_vm1 }
0x242a   : > { %v23495_v43 = vpop.eup %23494  ;;  %v17930_v32 = vadd.f32 -1.0, %v23493_v37  ;;  %v15121_v27 = vmul.f32 1.442695, %v15099_v53  ;;  %21544 = vmatprep.mubr.msk.f32.mxu0 %vm28318_vm5, %v27743_v1  ;;  %v15717_v20 = vpop.f32.mrb[20].mxu1  ;;  %vm15088_vm5 = vcmp.gt.f32.partialorder %v27732_v3, 0.0 }
0x242b   : > { %v17929_v36 = vadd.f32 -1.0, %v23495_v43  ;;  %23504 = vpow2.f32 %v15123_v19  ;;  %21545 = vmatmul.mubr.msk.f32.gmra.mrb[36].mxu0 %vm28319_vm8, %v27745_v6  ;;  %v15718_v17 = vadd.f32 %v17984_v29, %v15717_v20  ;;  %v21565_v15 = vpop.f32.mrb[21].mxu1  ;;  %vm28327_vm8 = vmmov %vm28266_vm1 }
0x242c   : > { %23506 = vpow2.f32 %v15121_v27  ;;  %v27757_v16 = vsel %vm15082_vm4, %v27710_v18, %v17930_v32 }
0x242d   : > { %v23497_v7 = vpop.eup %23496  ;;  %v27754_v63 = vsel %vm15081_vm7, %v27713_v28, %v17929_v36  ;;  %21566 = vmatprep.subr.mxu1 %v15718_v17  ;;  %vm28328_vm7 = vmmov %vm28266_vm1 }
0x242e   : > { %v23499_v47 = vpop.eup %23498  ;;  %v17932_v45 = vadd.f32 -1.0, %v23497_v7  ;;  %21547 = vmatprep.mubr.msk.f32.mxu0 %vm28320_vm13, %v27754_v63  ;;  %21567 = vmatpush3.msra.mxu1 %v15718_v17 }
0x242f   : > { %v17931_v8 = vadd.f32 -1.0, %v23499_v47  ;;  %21548 = vmatmul.mubr.msk.f32.gmra.mrb[38].mxu0 %vm28321_vm14, %v27757_v16  ;;  %21569 = vmatmul.mubr.msk.f32.vlgmr.msra.gmra.mrb[34].mxu1 %vm1330_vm0, %v27406_v2 }
0x2430   : > { %21571 = vmatprep.mubr.msk.f32.mxu1 %vm1330_vm0, %v27418_v48  ;;  %v27773_v24 = vsel %vm15084_vm6, %v27716_v38, %v17932_v45 }
0x2431   : > { %v23501_v28 = vpop.eup %23500  ;;  %v27770_v18 = vsel %vm15083_vm2, %v27719_v54, %v17931_v8 }
0x2432   : > { %v23503_v40 = vpop.eup %23502  ;;  %v17934_v61 = vadd.f32 -1.0, %v23501_v28  ;;  %21550 = vmatprep.mubr.msk.f32.mxu0 %vm28322_vm11, %v27770_v18 }
0x2433   : > { %v17933_v2 = vadd.f32 -1.0, %v23503_v40  ;;  %21551 = vmatmul.mubr.msk.f32.gmra.mrb[40].mxu0 %vm28323_vm3, %v27773_v24  ;;  %21572 = vmatmul.mubr.msk.f32.gmra.mrb[36].mxu1 %vm1330_vm0, %v27414_v11 }
0x2434   : > { %21574 = vmatprep.mubr.msk.f32.mxu1 %vm1330_vm0, %v27426_v56  ;;  %v27789_v57 = vsel %vm15086_vm15, %v27722_v46, %v17934_v61 }
0x2435   : > { %v23505_v48 = vpop.eup %23504  ;;  %v27786_v38 = vsel %vm15085_vm12, %v27725_v41, %v17933_v2  ;;  %v27825_v41 = vld [vmem:[%s28326_s2 + $0x1] ss:$0 sm:$0xff]  ;;  %s28335_s2 = sld [smem:[#allocation23_spill]] }
0x2436   : > { %v23507_v54 = vpop.eup %23506  ;;  %v17936_v4 = vadd.f32 -1.0, %v23505_v48  ;;  %21553 = vmatprep.mubr.msk.f32.mxu0 %vm28266_vm1, %v27786_v38 }
0x2437   : > { %v17935_v11 = vadd.f32 -1.0, %v23507_v54  ;;  %21554 = vmatmul.mubr.msk.f32.gmra.mrb[42].mxu0 %vm28325_vm10, %v27789_v57  ;;  %21575 = vmatmul.mubr.msk.f32.gmra.mrb[38].mxu1 %vm1330_vm0, %v27422_v12  ;;  %v27822_v12 = vld [vmem:[%s28324_s1 + $0x1] ss:$0 sm:$0xff]  ;;  %s28338_s1 = sld [smem:[#allocation25_spill]] }
0x2438   : > { %21577 = vmatprep.mubr.msk.f32.mxu1 %vm1330_vm0, %v27434_v35  ;;  %v27805_v46 = vsel %vm15088_vm5, %v27732_v3, %v17936_v4 }
0x2439   : > { %v27802_v56 = vsel %vm15087_vm9, %v27737_v26, %v17935_v11 }
0x243a   : > { %21556 = vmatprep.mubr.msk.f32.mxu0 %vm28327_vm8, %v27802_v56 }
0x243b   : > { %21557 = vmatmul.mubr.msk.f32.gmra.mrb[44].mxu0 %vm28328_vm7, %v27805_v46  ;;  %21578 = vmatmul.mubr.msk.f32.gmra.mrb[40].mxu1 %vm1330_vm0, %v27430_v55 }
0x243c   : > { %21580 = vmatprep.mubr.msk.f32.mxu1 %vm1330_vm0, %v27442_v44 }
0x243f   : > { %21581 = vmatmul.mubr.msk.f32.gmra.mrb[42].mxu1 %vm1330_vm0, %v27438_v59 }
0x2440   : > { %21583 = vmatprep.mubr.msk.f32.mxu1 %vm1330_vm0, %v27450_v42 }
0x2443   : > { %21584 = vmatmul.mubr.msk.f32.gmra.mrb[44].mxu1 %vm1330_vm0, %v27446_v39  ;;  %vm28329_vm0 = vmmov %vm28266_vm1 }
0x2444   : > { %vm28330_vm4 = vmmov %vm28329_vm0 }
0x2445   : > { %vm28331_vm13 = vmmov %vm28329_vm0 }
0x2446   : > { %vm28332_vm14 = vmmov %vm28329_vm0 }
0x2447   : > { %vm28333_vm2 = vmmov %vm28329_vm0 }
0x2448   : > { %vm28334_vm6 = vmmov %vm28329_vm0 }
0x2449   : > { %vm28336_vm11 = vmmov %vm28329_vm0 }
0x244a   : > { %vm28337_vm3 = vmmov %vm28329_vm0 }
0x244b   : > { %vm28339_vm12 = vmmov %vm28329_vm0 }
0x244c   : > { %vm28340_vm15 = vmmov %vm28329_vm0 }
0x244d   : > { %vm28341_vm1 = vmmov %vm28329_vm0 }
0x244e   : > { %vm28342_vm10 = vmmov %vm28329_vm0 }
0x244f   : > { %vm28348_vm9 = vmmov %vm28329_vm0 }
0x2450   : > { %vm28350_vm5 = vmmov %vm28329_vm0 }
0x2451   : > { %vm28352_vm8 = vmmov %vm28329_vm0 }
0x2452   : > { %vm28354_vm7 = vmmov %vm28329_vm0 }
0x24fa   : > { %v21543_v35 = vpop.f32.mrb[34].mxu0 }
0x24fb   : > { %v22578_v34 = vadd.f32 %v21543_v35, %v27822_v12  ;;  %v15426_v55 = vpop.f32.mrb[35].mxu0 }
0x24fc   : > { %v22579_v33 = vadd.f32 %v27822_v12, %v15426_v55 }
0x24fd   : > { %v15506_v44 = vadd.f32 %v22578_v34, %v27825_v41 }
0x24fe   : > { %v15505_v59 = vadd.f32 %v22579_v33, %v27825_v41  ;;  %v21546_v25 = vpop.f32.mrb[36].mxu0 }
0x24ff   : > { %v17970_v51 = vmul.f32 -1.442695, %v15506_v44  ;;  %v22580_v42 = vadd.f32 %v21546_v25, %v27822_v12  ;;  %v15436_v52 = vpop.f32.mrb[37].mxu0 }
0x2500   : > { %v17969_v39 = vmul.f32 -1.442695, %v15505_v59  ;;  %v22581_v3 = vadd.f32 %v27822_v12, %v15436_v52 }
0x2501   : > { %23508 = vpow2.f32 %v17970_v51  ;;  %v15508_v58 = vadd.f32 %v22580_v42, %v27825_v41 }
0x2502   : > { %23510 = vpow2.f32 %v17969_v39  ;;  %v15507_v14 = vadd.f32 %v22581_v3, %v27825_v41  ;;  %v21549_v26 = vpop.f32.mrb[38].mxu0  ;;  %v27835_v53 = vpop.f32.mrb[34].mxu1 }
0x2503   : > { %v17972_v29 = vmul.f32 -1.442695, %v15508_v58  ;;  %v22582_v37 = vadd.f32 %v21549_v26, %v27822_v12  ;;  %v15446_v19 = vpop.f32.mrb[39].mxu0  ;;  %v27838_v43 = vpop.f32.mrb[35].mxu1 }
0x2504   : > { %v17971_v32 = vmul.f32 -1.442695, %v15507_v14  ;;  %v22583_v27 = vadd.f32 %v27822_v12, %v15446_v19 }
0x2505   : > { %23512 = vpow2.f32 %v17972_v29  ;;  %v15510_v20 = vadd.f32 %v22582_v37, %v27825_v41 }
0x2506   : > { %23514 = vpow2.f32 %v17971_v32  ;;  %v15509_v36 = vadd.f32 %v22583_v27, %v27825_v41  ;;  %v21552_v17 = vpop.f32.mrb[40].mxu0  ;;  %v27843_v15 = vpop.f32.mrb[36].mxu1 }
0x2507   : > { %v17974_v7 = vmul.f32 -1.442695, %v15510_v20  ;;  %v22584_v47 = vadd.f32 %v21552_v17, %v27822_v12  ;;  %v15456_v45 = vpop.f32.mrb[41].mxu0  ;;  %v27846_v8 = vpop.f32.mrb[37].mxu1 }
0x2508   : > { %v17973_v28 = vmul.f32 -1.442695, %v15509_v36  ;;  %v22585_v40 = vadd.f32 %v27822_v12, %v15456_v45 }
0x2509   : > { %23516 = vpow2.f32 %v17974_v7  ;;  %v15512_v61 = vadd.f32 %v22584_v47, %v27825_v41 }
0x250a   : > { %23518 = vpow2.f32 %v17973_v28  ;;  %v15511_v2 = vadd.f32 %v22585_v40, %v27825_v41  ;;  %v21555_v48 = vpop.f32.mrb[42].mxu0  ;;  %v27851_v54 = vpop.f32.mrb[38].mxu1 }
0x250b   : > { %v23509_v4 = vpop.eup %23508  ;;  %v17976_v11 = vmul.f32 -1.442695, %v15512_v61  ;;  %v22586_v35 = vadd.f32 %v21555_v48, %v27822_v12  ;;  %v15466_v34 = vpop.f32.mrb[43].mxu0 }
0x250c   : > { %v27854_v55 = vpop.f32.mrb[39].mxu1  ;;  %v23511_v33 = vpop.eup %23510  ;;  %v15554_v44 = vadd.f32 1.0, %v23509_v4  ;;  %v17975_v59 = vmul.f32 -1.442695, %v15511_v2  ;;  %v22587_v25 = vadd.f32 %v27822_v12, %v15466_v34 }
0x250d   : > { %v15553_v51 = vadd.f32 1.0, %v23511_v33  ;;  %23520 = vpow2.f32 %v17976_v11  ;;  %v15514_v42 = vadd.f32 %v22586_v35, %v27825_v41 }
0x250e   : > { %23522 = vrcp.f32 %v15554_v44  ;;  %v15513_v52 = vadd.f32 %v22587_v25, %v27825_v41  ;;  %v21558_v39 = vpop.f32.mrb[44].mxu0  ;;  %v27859_v3 = vpop.f32.mrb[40].mxu1 }
0x250f   : > { %v23513_v58 = vpop.eup %23512  ;;  %23524 = vrcp.f32 %v15553_v51  ;;  %v17978_v14 = vmul.f32 -1.442695, %v15514_v42  ;;  %v22588_v26 = vadd.f32 %v21558_v39, %v27822_v12  ;;  %v15476_v29 = vpop.f32.mrb[45].mxu0 }
0x2510   : > { %v27862_v37 = vpop.f32.mrb[41].mxu1  ;;  %v23515_v19 = vpop.eup %23514  ;;  %v15556_v32 = vadd.f32 1.0, %v23513_v58  ;;  %23526 = vpow2.f32 %v17975_v59  ;;  %v17977_v27 = vmul.f32 -1.442695, %v15513_v52  ;;  %v22589_v20 = vadd.f32 %v27822_v12, %v15476_v29 }
0x2511   : > { %v15555_v36 = vadd.f32 1.0, %v23515_v19  ;;  %23528 = vpow2.f32 %v17978_v14  ;;  %v15516_v17 = vadd.f32 %v22588_v26, %v27825_v41 }
0x2512   : > { %23530 = vrcp.f32 %v15556_v32  ;;  %v15515_v7 = vadd.f32 %v22589_v20, %v27825_v41  ;;  %v27867_v47 = vpop.f32.mrb[42].mxu1 }
0x2513   : > { %v23517_v45 = vpop.eup %23516  ;;  %23532 = vrcp.f32 %v15555_v36  ;;  %v17980_v28 = vmul.f32 -1.442695, %v15516_v17  ;;  %v27869_v40 = vpop.f32.mrb[43].mxu1 }
0x2514   : > { %v23519_v61 = vpop.eup %23518  ;;  %v15558_v2 = vadd.f32 1.0, %v23517_v45  ;;  %23534 = vpow2.f32 %v17977_v27  ;;  %v17979_v48 = vmul.f32 -1.442695, %v15515_v7 }
0x2515   : > { %v15557_v4 = vadd.f32 1.0, %v23519_v61  ;;  %23536 = vpow2.f32 %v17980_v28 }
0x2516   : > { %23538 = vrcp.f32 %v15558_v2  ;;  %v27871_v12 = vpop.f32.mrb[44].mxu1 }
0x2517   : > { %v23521_v11 = vpop.eup %23520  ;;  %23540 = vrcp.f32 %v15557_v4  ;;  %v27873_v35 = vpop.f32.mrb[45].mxu1 }
0x2518   : > { %v23523_v41 = vpop.eup %23522  ;;  %v15560_v34 = vadd.f32 1.0, %v23521_v11  ;;  %23542 = vpow2.f32 %v17979_v48 }
0x2519   : > { %v23525_v33 = vpop.eup %23524  ;;  %v15590_v44 = vmul.f32 %v23523_v41, %v28290_v22  ;;  %v15602_v59 = vsub.f32 1.0, %v23523_v41 }
0x251a   : > { %v23527_v25 = vpop.eup %23526  ;;  %23544 = vrcp.f32 %v15560_v34  ;;  %v15589_v51 = vmul.f32 %v23525_v33, %v28288_v21  ;;  %v15601_v42 = vsub.f32 1.0, %v23525_v33 }
0x251b   : > { %v23529_v52 = vpop.eup %23528  ;;  %v15559_v39 = vadd.f32 1.0, %v23527_v25  ;;  %v15614_v58 = vmul.f32 %v15602_v59, %v27730_v62 }
0x251c   : > { %v23531_v14 = vpop.eup %23530  ;;  %v15562_v26 = vadd.f32 1.0, %v23529_v52  ;;  %v15613_v29 = vmul.f32 %v15601_v42, %v27728_v31 }
0x251d   : > { %v23533_v19 = vpop.eup %23532  ;;  %23546 = vrcp.f32 %v15559_v39  ;;  %v15626_v32 = vadd.f32 %v15614_v58, %v15590_v44  ;;  %v15592_v27 = vmul.f32 %v23531_v14, %v28294_v5  ;;  %v15604_v20 = vsub.f32 1.0, %v23531_v14 }
0x251e   : > { %v23535_v36 = vpop.eup %23534  ;;  %23548 = vrcp.f32 %v15562_v26  ;;  %v15625_v17 = vadd.f32 %v15613_v29, %v15589_v51  ;;  %v15591_v7 = vmul.f32 %v23533_v19, %v28292_v50  ;;  %v15603_v45 = vsub.f32 1.0, %v23533_v19 }
0x251f   : > { %v23537_v28 = vpop.eup %23536  ;;  %v15561_v61 = vadd.f32 1.0, %v23535_v36  ;;  %v15847_v62 = vmul.f32 %v27835_v53, %v15626_v32  ;;  %v15616_v2 = vmul.f32 %v15604_v20, %v27745_v6 }
0x2520   : > { %v23539_v48 = vpop.eup %23538  ;;  %v15564_v31 = vadd.f32 1.0, %v23537_v28  ;;  %v15846_v4 = vmul.f32 %v27838_v43, %v15625_v17  ;;  %v15615_v11 = vmul.f32 %v15603_v45, %v27743_v1 }
0x2521   : > { %v23541_v41 = vpop.eup %23540  ;;  %23550 = vrcp.f32 %v15561_v61  ;;  %v15861_v34 = vsel %vm28329_vm0, %v15847_v62, 0.0  ;;  %v15628_v33 = vadd.f32 %v15616_v2, %v15592_v27  ;;  %v15594_v44 = vmul.f32 %v23539_v48, %v28298_v30 }
0x2522   : > { %v23543_v59 = vpop.eup %23542  ;;  %23552 = vrcp.f32 %v15564_v31  ;;  %15862 = vadd.xlane.f32.xlu1 %v15861_v34  ;;  %v15627_v25 = vadd.f32 %v15615_v11, %v15591_v7  ;;  %v15606_v53 = vsub.f32 1.0, %v23539_v48  ;;  %v15593_v42 = vmul.f32 %v23541_v41, %v28296_v13 }
0x2523   : > { %v15563_v51 = vadd.f32 1.0, %v23543_v59  ;;  %v15849_v6 = vmul.f32 %v27843_v15, %v15628_v33  ;;  %v15605_v43 = vsub.f32 1.0, %v23541_v41  ;;  %v15858_v58 = vsel %vm28330_vm4, %v15846_v4, 0.0  ;;  %vm28357_vm4 = vmmov %vm28329_vm0 }
0x2524   : > { %v23545_v52 = vpop.eup %23544  ;;  %v15848_v1 = vmul.f32 %v27846_v8, %v15627_v25  ;;  %v15618_v39 = vmul.f32 %v15606_v53, %v27757_v16 }
0x2525   : > { %23554 = vrcp.f32 %v15563_v51  ;;  %v15617_v14 = vmul.f32 %v15605_v43, %v27754_v63  ;;  %v15596_v26 = vmul.f32 %v23545_v52, %v28302_v9  ;;  %v15608_v19 = vsub.f32 1.0, %v23545_v52 }
0x2526   : > { %15859 = vadd.xlane.f32.xlu1 %v15858_v58  ;;  %v15630_v29 = vadd.f32 %v15618_v39, %v15594_v44  ;;  %v15867_v7 = vsel %vm28331_vm13, %v15849_v6, 0.0  ;;  %v17999_v39 = vld [vmem:[%s28335_s2 + $0x10] sm:$0xff]  ;;  %v18000_v58 = vld [vmem:[%s28335_s2 + $0x18] sm:$0xff]  ;;  %vm28360_vm13 = vmmov %vm28329_vm0  ;;  %s28364_s2 = sld [smem:[#allocation24_spill]] }
0x2527   : > { %v23547_v32 = vpop.eup %23546  ;;  %v15629_v15 = vadd.f32 %v15617_v14, %v15593_v42  ;;  %v15620_v36 = vmul.f32 %v15608_v19, %v27773_v24  ;;  %v22388_v14 = vpack.c.bf16 %v18000_v58, %v17999_v39 }
0x2528   : > { %v23549_v27 = vpop.eup %23548  ;;  %v15851_v20 = vmul.f32 %v27851_v54, %v15630_v29  ;;  %v15595_v8 = vmul.f32 %v23547_v32, %v28300_v0  ;;  %v15607_v16 = vsub.f32 1.0, %v23547_v32  ;;  %v16235_v29 = vld [vmem:[%s28338_s1 + $0x8] sm:$0xff]  ;;  %v10959_v32 = vpop.xlane.xlu0 %10958 }
0x2529   : > { %v15850_v17 = vmul.f32 %v27854_v55, %v15629_v15  ;;  %v15598_v63 = vmul.f32 %v23549_v27, %v28306_v23  ;;  %v15610_v45 = vsub.f32 1.0, %v23549_v27  ;;  %v15632_v28 = vadd.f32 %v15620_v36, %v15596_v26  ;;  %22389 = vmatprep.subr.bf16.mxu1 %v22388_v14  ;;  %v16234_v26 = vld [vmem:[%s28338_s1] sm:$0xff] }
0x252a   : > { %15868 = vadd.xlane.f32.xlu1 %v15867_v7  ;;  %v15619_v61 = vmul.f32 %v15607_v16, %v27770_v18  ;;  %v15864_v55 = vsel %vm28332_vm14, %v15848_v1, 0.0  ;;  %v15873_v51 = vsel %vm28333_vm2, %v15851_v20, 0.0  ;;  %22391 = vmatpush3.bf16.msra.mxu1 %v22388_v14  ;;  %v22392_v19 = vpack.c.bf16 %v16235_v29, %v16234_v26  ;;  %v28344_v26 = vld [vmem:[#allocation39_spill] sm:$0xff]  ;;  %vm28361_vm14 = vmmov %vm28329_vm0 }
0x252b   : > { %v23551_v62 = vpop.eup %23550  ;;  %v15622_v2 = vmul.f32 %v15610_v45, %v27789_v57  ;;  %v15853_v24 = vmul.f32 %v27859_v3, %v15632_v28  ;;  %vm28362_vm2 = vmmov %vm28329_vm0 }
0x252c   : > { %v23553_v54 = vpop.eup %23552  ;;  %v15631_v48 = vadd.f32 %v15619_v61, %v15595_v8  ;;  %v15597_v31 = vmul.f32 %v23551_v62, %v28304_v10  ;;  %v15609_v4 = vsub.f32 1.0, %v23551_v62  ;;  %22393 = vmatprep.subr.bf16.mxu0 %v22392_v19  ;;  %v10962_v15 = vpop.xlane.xlu0 %10961 }
0x252d   : > { %v15634_v11 = vadd.f32 %v15622_v2, %v15598_v63  ;;  %v15600_v41 = vmul.f32 %v23553_v54, %v28310_v60  ;;  %v15612_v34 = vsub.f32 1.0, %v23553_v54  ;;  %v15879_v52 = vsel %vm28336_vm11, %v15853_v24, 0.0  ;;  %22395 = vmatpush3.bf16.msra.mxu0 %v22392_v19  ;;  %vm28365_vm11 = vmmov %vm28329_vm0 }
0x252e   : > { %v15852_v33 = vmul.f32 %v27862_v37, %v15631_v48  ;;  %15865 = vadd.xlane.f32.xlu1 %v15864_v55  ;;  %v15621_v18 = vmul.f32 %v15609_v4, %v27786_v38 }
0x252f   : > { %v23555_v44 = vpop.eup %23554  ;;  %v15855_v57 = vmul.f32 %v27867_v47, %v15634_v11  ;;  %v15624_v3 = vmul.f32 %v15612_v34, %v27805_v46  ;;  %v15870_v47 = vsel %vm28334_vm6, %v15850_v17, 0.0  ;;  %vm28363_vm6 = vmmov %vm28329_vm0 }
0x2530   : > { %v15633_v59 = vadd.f32 %v15621_v18, %v15597_v31  ;;  %v15599_v25 = vmul.f32 %v23555_v44, %v28308_v49  ;;  %v15611_v53 = vsub.f32 1.0, %v23555_v44  ;;  %v15876_v1 = vsel %vm28337_vm3, %v15852_v33, 0.0  ;;  %v10965_v27 = vpop.xlane.xlu0 %10964  ;;  %vm28366_vm3 = vmmov %vm28329_vm0 }
0x2531   : > { %v15636_v6 = vadd.f32 %v15624_v3, %v15600_v41 }
0x2532   : > { %v15854_v42 = vmul.f32 %v27869_v40, %v15633_v59  ;;  %15874 = vadd.xlane.f32.xlu1 %v15873_v51  ;;  %v15623_v37 = vmul.f32 %v15611_v53, %v27802_v56  ;;  %v15885_v56 = vsel %vm28339_vm12, %v15855_v57, 0.0  ;;  %vm16245_vm12 = vcmask 261120  }
0x2533   : > { %v15857_v43 = vmul.f32 %v27871_v12, %v15636_v6 }
0x2534   : > { %v15635_v38 = vadd.f32 %v15623_v37, %v15599_v25  ;;  %v15882_v40 = vsel %vm28340_vm15, %v15854_v42, 0.0  ;;  %v10968_v20 = vpop.xlane.xlu0 %10967  ;;  %v28343_v37 = vld [vmem:[#allocation38_spill] sm:$0xff]  ;;  %vm16591_vm15 = vcmask 31744  }
0x2536   : > { %v15856_v46 = vmul.f32 %v27873_v35, %v15635_v38  ;;  %15871 = vadd.xlane.f32.xlu1 %v15870_v47  ;;  %v15891_v35 = vsel %vm28342_vm10, %v15857_v43, 0.0 }
0x2538   : > { %v15888_v12 = vsel %vm28341_vm1, %v15856_v46, 0.0  ;;  %v10971_v16 = vpop.xlane.xlu0 %10970 }
0x253a   : > { %15880 = vadd.xlane.f32.xlu1 %v15879_v52 }
0x253c   : > { %v10974_v54 = vpop.xlane.xlu0 %10973 }
0x253e   : > { %15877 = vadd.xlane.f32.xlu1 %v15876_v1 }
0x2540   : > { %v27927_v44 = vpop.xlane.xlu0 %10976 }
0x2542   : > { %15886 = vadd.xlane.f32.xlu1 %v15885_v56 }
0x2544   : > { %v10980_v52 = vpop.xlane.xlu0 %10979 }
0x2546   : > { %15883 = vadd.xlane.f32.xlu1 %v15882_v40 }
0x254a   : > { %15889 = vadd.xlane.f32.xlu1 %v15888_v12 }
0x254e   : > { %15892 = vadd.xlane.f32.xlu1 %v15891_v35 }
0x25af   : > { %v15863_v36 = vpop.xlane.xlu1 %15862 }
0x25b0   : > { %v15895_v8 = vmax.f32 %v10962_v15, %v15863_v36 }
0x25b2   : > { %v15907_v17 = vsub.f32 %v10962_v15, %v15895_v8  ;;  %v15943_v7 = vsub.f32 %v15863_v36, %v15895_v8 }
0x25b3   : > { %v15860_v63 = vpop.xlane.xlu1 %15859 }
0x25b4   : > { %v15920_v45 = vmul.f32 1.442695, %v15907_v17  ;;  %v15956_v28 = vmul.f32 1.442695, %v15943_v7  ;;  %v15894_v61 = vmax.f32 %v10959_v32, %v15860_v63 }
0x25b6   : > { %23556 = vpow2.f32 %v15920_v45  ;;  %v15906_v62 = vsub.f32 %v10959_v32, %v15894_v61  ;;  %v15942_v2 = vsub.f32 %v15860_v63, %v15894_v61  ;;  %v27935_v63 = vpop.xlane.xlu0 %10982  ;;  %v28345_v45 = vld [vmem:[#allocation40_spill] sm:$0xff] }
0x25b7   : > { %23558 = vpow2.f32 %v15956_v28  ;;  %v15869_v24 = vpop.xlane.xlu1 %15868 }
0x25b8   : > { %v15918_v48 = vmul.f32 1.442695, %v15906_v62  ;;  %v15954_v31 = vmul.f32 1.442695, %v15942_v2  ;;  %v15897_v4 = vmax.f32 %v10968_v20, %v15869_v24 }
0x25ba   : > { %23560 = vpow2.f32 %v15918_v48  ;;  %v15909_v55 = vsub.f32 %v10968_v20, %v15897_v4  ;;  %v15945_v11 = vsub.f32 %v15869_v24, %v15897_v4 }
0x25bb   : > { %23562 = vpow2.f32 %v15954_v31  ;;  %v15866_v41 = vpop.xlane.xlu1 %15865 }
0x25bc   : > { %v15924_v34 = vmul.f32 1.442695, %v15909_v55  ;;  %v15960_v33 = vmul.f32 1.442695, %v15945_v11  ;;  %v15896_v18 = vmax.f32 %v10965_v27, %v15866_v41 }
0x25be   : > { %23564 = vpow2.f32 %v15924_v34  ;;  %v15908_v57 = vsub.f32 %v10965_v27, %v15896_v18  ;;  %v15944_v3 = vsub.f32 %v15866_v41, %v15896_v18  ;;  %v28346_v41 = vld [vmem:[#allocation41_spill] sm:$0xff] }
0x25bf   : > { %23566 = vpow2.f32 %v15960_v33  ;;  %v15875_v59 = vpop.xlane.xlu1 %15874 }
0x25c0   : > { %v23557_v25 = vpop.eup %23556  ;;  %v15922_v53 = vmul.f32 1.442695, %v15908_v57  ;;  %v15958_v51 = vmul.f32 1.442695, %v15944_v3  ;;  %v15899_v6 = vmax.f32 %v10974_v54, %v15875_v59  ;;  %v10986_v3 = vpop.xlane.xlu0 %10985 }
0x25c1   : > { %v23559_v42 = vpop.eup %23558  ;;  %v16003_v43 = vmul.f32 %v23557_v25, %v28343_v37 }
0x25c2   : > { %v15979_v38 = vadd.f32 %v23559_v42, %v23557_v25  ;;  %v16015_v47 = vmul.f32 %v23559_v42, %v28290_v22  ;;  %23568 = vpow2.f32 %v15922_v53  ;;  %v15911_v46 = vsub.f32 %v10974_v54, %v15899_v6 }
0x25c3   : > { %23570 = vpow2.f32 %v15958_v51  ;;  %v15947_v1 = vsub.f32 %v15875_v59, %v15899_v6  ;;  %v15872_v56 = vpop.xlane.xlu1 %15871 }
0x25c4   : > { %v23561_v40 = vpop.eup %23560  ;;  %v27931_v12 = vadd.f32 %v16015_v47, %v16003_v43  ;;  %v15928_v35 = vmul.f32 1.442695, %v15911_v46  ;;  %v15898_v39 = vmax.f32 %v10971_v16, %v15872_v56  ;;  %23572 = vrcp.f32 %v15979_v38  ;;  %v28347_v43 = vld [vmem:[#allocation42_spill] sm:$0xff] }
0x25c5   : > { %v23563_v58 = vpop.eup %23562  ;;  %v15964_v14 = vmul.f32 1.442695, %v15947_v1  ;;  %v16002_v29 = vmul.f32 %v23561_v40, %v28344_v26 }
0x25c6   : > { %v15978_v19 = vadd.f32 %v23563_v58, %v23561_v40  ;;  %23574 = vpow2.f32 %v15928_v35  ;;  %v15910_v32 = vsub.f32 %v10971_v16, %v15898_v39  ;;  %v15946_v22 = vsub.f32 %v15872_v56, %v15898_v39 }
0x25c7   : > { %23576 = vpow2.f32 %v15964_v14  ;;  %v15881_v15 = vpop.xlane.xlu1 %15880  ;;  %v16014_v27 = vmul.f32 %v23563_v58, %v28288_v21 }
0x25c8   : > { %v23565_v20 = vpop.eup %23564  ;;  %23578 = vrcp.f32 %v15978_v19  ;;  %v15926_v36 = vmul.f32 1.442695, %v15910_v32  ;;  %v15962_v8 = vmul.f32 1.442695, %v15946_v22  ;;  %v15901_v17 = vmax.f32 %v10980_v52, %v15881_v15  ;;  %v10989_v19 = vpop.xlane.xlu0 %10988 }
0x25c9   : > { %v23567_v7 = vpop.eup %23566  ;;  %v16005_v28 = vmul.f32 %v23565_v20, %v28345_v45  ;;  %v16026_v61 = vadd.f32 %v16014_v27, %v16002_v29 }
0x25ca   : > { %v15981_v62 = vadd.f32 %v23567_v7, %v23565_v20  ;;  %v16017_v2 = vmul.f32 %v23567_v7, %v28294_v5  ;;  %23580 = vpow2.f32 %v15926_v36  ;;  %v15913_v16 = vsub.f32 %v10980_v52, %v15901_v17 }
0x25cb   : > { %23582 = vpow2.f32 %v15962_v8  ;;  %v15949_v54 = vsub.f32 %v15881_v15, %v15901_v17  ;;  %v15878_v24 = vpop.xlane.xlu1 %15877 }
0x25cc   : > { %v23569_v21 = vpop.eup %23568  ;;  %v27939_v48 = vadd.f32 %v16017_v2, %v16005_v28  ;;  %v15932_v31 = vmul.f32 1.442695, %v15913_v16  ;;  %v15900_v4 = vmax.f32 %v27927_v44, %v15878_v24  ;;  %23584 = vrcp.f32 %v15981_v62  ;;  %v28351_v62 = vld [vmem:[#allocation44_spill] sm:$0xff] }
0x25cd   : > { %v23571_v55 = vpop.eup %23570  ;;  %v15968_v11 = vmul.f32 1.442695, %v15949_v54  ;;  %v16004_v34 = vmul.f32 %v23569_v21, %v28346_v41 }
0x25ce   : > { %v15980_v33 = vadd.f32 %v23571_v55, %v23569_v21  ;;  %23586 = vpow2.f32 %v15932_v31  ;;  %v15912_v5 = vsub.f32 %v27927_v44, %v15900_v4  ;;  %v15948_v18 = vsub.f32 %v15878_v24, %v15900_v4  ;;  %v23573_v57 = vpop.eup %23572  ;;  %v10992_v31 = vpop.xlane.xlu0 %10991 }
0x25cf   : > { %23588 = vpow2.f32 %v15968_v11  ;;  %v15887_v59 = vpop.xlane.xlu1 %15886  ;;  %v16016_v25 = vmul.f32 %v23571_v55, %v28292_v50  ;;  %v16039_v39 = vmul.f32 %v23573_v57, %v27931_v12 }
0x25d0   : > { %v23575_v53 = vpop.eup %23574  ;;  %23590 = vrcp.f32 %v15980_v33  ;;  %v15930_v51 = vmul.f32 1.442695, %v15912_v5  ;;  %v15966_v6 = vmul.f32 1.442695, %v15948_v18  ;;  %v15903_v42 = vmax.f32 %v10986_v3, %v15887_v59 }
0x25d1   : > { %v23577_v37 = vpop.eup %23576  ;;  %v16007_v38 = vmul.f32 %v23575_v53, %v28347_v43  ;;  %v16028_v47 = vadd.f32 %v16016_v25, %v16004_v34 }
0x25d2   : > { %v23579_v46 = vpop.eup %23578  ;;  %v15983_v52 = vadd.f32 %v23577_v37, %v23575_v53  ;;  %v16019_v44 = vmul.f32 %v23577_v37, %v28298_v30  ;;  %23592 = vpow2.f32 %v15930_v51  ;;  %v15915_v1 = vsub.f32 %v10986_v3, %v15903_v42  ;;  %v28349_v30 = vld [vmem:[#allocation43_spill] sm:$0xff]  ;;  %v28353_v3 = vld [vmem:[#allocation45_spill] sm:$0xff] }
0x25d3   : > { %23594 = vpow2.f32 %v15966_v6  ;;  %v15951_v56 = vsub.f32 %v15887_v59, %v15903_v42  ;;  %v15884_v40 = vpop.xlane.xlu1 %15883  ;;  %v16038_v35 = vmul.f32 %v23579_v46, %v16026_v61 }
0x25d4   : > { %v23581_v50 = vpop.eup %23580  ;;  %v27948_v58 = vadd.f32 %v16019_v44, %v16007_v38  ;;  %v15936_v14 = vmul.f32 1.442695, %v15915_v1  ;;  %v15902_v26 = vmax.f32 %v27935_v63, %v15884_v40  ;;  %23596 = vrcp.f32 %v15983_v52  ;;  %v28355_v38 = vld [vmem:[#allocation46_spill] sm:$0xff] }
0x25d5   : > { %v23583_v29 = vpop.eup %23582  ;;  %v15972_v32 = vmul.f32 1.442695, %v15951_v56  ;;  %21590 = vmatprep.mubr.msk.f32.mxu1 %vm28348_vm9, %v16038_v35  ;;  %v16006_v22 = vmul.f32 %v23581_v50, %v28349_v30 }
0x25d6   : > { %v15982_v15 = vadd.f32 %v23583_v29, %v23581_v50  ;;  %23598 = vpow2.f32 %v15936_v14  ;;  %v15914_v27 = vsub.f32 %v27935_v63, %v15902_v26  ;;  %v15950_v20 = vsub.f32 %v15884_v40, %v15902_v26  ;;  %21591 = vmatmul.mubr.msk.f32.vlgmr.msra.gmra.mrb[22].mxu1 %vm28350_vm5, %v16039_v39  ;;  %v23585_v12 = vpop.eup %23584  ;;  %v28356_v39 = vld [vmem:[#allocation47_spill] sm:$0xff] }
0x25d7   : > { %23600 = vpow2.f32 %v15972_v32  ;;  %v15890_v36 = vpop.xlane.xlu1 %15889  ;;  %v16018_v8 = vmul.f32 %v23583_v29, %v28296_v13  ;;  %v16041_v5 = vmul.f32 %v23585_v12, %v27939_v48 }
0x25d8   : > { %v23587_v17 = vpop.eup %23586  ;;  %23602 = vrcp.f32 %v15982_v15  ;;  %v15934_v7 = vmul.f32 1.442695, %v15914_v27  ;;  %v15970_v45 = vmul.f32 1.442695, %v15950_v20  ;;  %v15904_v28 = vmax.f32 %v10989_v19, %v15890_v36 }
0x25d9   : > { %v23589_v61 = vpop.eup %23588  ;;  %v16009_v2 = vmul.f32 %v23587_v17, %v28351_v62  ;;  %v16030_v16 = vadd.f32 %v16018_v8, %v16006_v22  ;;  %v28358_v22 = vld [vmem:[#allocation49_spill] sm:$0xff] }
0x25da   : > { %v23591_v54 = vpop.eup %23590  ;;  %v15985_v24 = vadd.f32 %v23589_v61, %v23587_v17  ;;  %v16021_v63 = vmul.f32 %v23589_v61, %v28302_v9  ;;  %23604 = vpow2.f32 %v15934_v7  ;;  %v15916_v21 = vsub.f32 %v10989_v19, %v15904_v28 }
0x25db   : > { %23606 = vpow2.f32 %v15970_v45  ;;  %v15952_v4 = vsub.f32 %v15890_v36, %v15904_v28  ;;  %v15893_v55 = vpop.xlane.xlu1 %15892  ;;  %v16040_v13 = vmul.f32 %v23591_v54, %v16028_v47  ;;  %v28359_v45 = vld [vmem:[#allocation48_spill] sm:$0xff] }
0x25dc   : > { %v23593_v11 = vpop.eup %23592  ;;  %v16033_v41 = vadd.f32 %v16021_v63, %v16009_v2  ;;  %v15938_v34 = vmul.f32 1.442695, %v15916_v21  ;;  %v15905_v33 = vmax.f32 %v10992_v31, %v15893_v55  ;;  %23608 = vrcp.f32 %v15985_v24 }
0x25dd   : > { %v23595_v18 = vpop.eup %23594  ;;  %v15974_v57 = vmul.f32 1.442695, %v15952_v4  ;;  %21593 = vmatprep.mubr.msk.f32.mxu1 %vm28352_vm8, %v16040_v13  ;;  %v16008_v9 = vmul.f32 %v23593_v11, %v28353_v3  ;;  %v16237_v4 = vld [vmem:[%s28338_s1 + $0x18] sm:$0xff]  ;;  %v16419_v13 = vld [vmem:[%s24043_s21] sm:$0xff] }
0x25de   : > { %v15984_v59 = vadd.f32 %v23595_v18, %v23593_v11  ;;  %23610 = vpow2.f32 %v15938_v34  ;;  %v15917_v25 = vsub.f32 %v10992_v31, %v15905_v33  ;;  %v15953_v53 = vsub.f32 %v15893_v55, %v15905_v33  ;;  %21594 = vmatmul.mubr.msk.f32.gmra.mrb[24].mxu1 %vm28354_vm7, %v16041_v5  ;;  %v23597_v51 = vpop.eup %23596  ;;  %v16236_v31 = vld [vmem:[%s28338_s1 + $0x10] sm:$0xff]  ;;  %v16420_v11 = vld [vmem:[%s24043_s21 + $0x8] sm:$0xff]  ;;  %v18002_v34 = vld [vmem:[%s28364_s2 + $0x1] ss:$0 sm:$0xff]  ;;  %s28015_s2 = scalar_lea.vmem %s24053_s14, %s24075_s0 }
0x25df   : > { %23612 = vpow2.f32 %v15974_v57  ;;  %v16020_v6 = vmul.f32 %v23595_v18, %v28300_v0  ;;  %v16043_v50 = vmul.f32 %v23597_v51, %v27948_v58  ;;  %v22396_v55 = vpack.c.bf16 %v16237_v4, %v16236_v31 }
0x25e0   : > { %v23599_v42 = vpop.eup %23598  ;;  %23614 = vrcp.f32 %v15984_v59  ;;  %v15940_v48 = vmul.f32 1.442695, %v15917_v25  ;;  %v15976_v37 = vmul.f32 1.442695, %v15953_v53 }
0x25e1   : > { %v23601_v43 = vpop.eup %23600  ;;  %v16011_v47 = vmul.f32 %v23599_v42, %v28355_v38  ;;  %v16032_v46 = vadd.f32 %v16020_v6, %v16008_v9  ;;  %22397 = vmatprep.subr.bf16.mxu0 %v22396_v55 }
0x25e2   : > { %v23603_v52 = vpop.eup %23602  ;;  %v16023_v44 = vmul.f32 %v23601_v43, %v28306_v23  ;;  %23616 = vpow2.f32 %v15940_v48  ;;  %v15987_v1 = vadd.f32 %v23601_v43, %v23599_v42  ;;  %22399 = vmatpush3.bf16.msra.mxu0 %v22396_v55 }
0x25e3   : > { %23618 = vpow2.f32 %v15976_v37  ;;  %v16042_v56 = vmul.f32 %v23603_v52, %v16030_v16 }
0x25e4   : > { %v23605_v40 = vpop.eup %23604  ;;  %v16035_v35 = vadd.f32 %v16023_v44, %v16011_v47  ;;  %23620 = vrcp.f32 %v15987_v1 }
0x25e5   : > { %v23607_v0 = vpop.eup %23606  ;;  %21596 = vmatprep.mubr.msk.f32.mxu1 %vm28329_vm0, %v16042_v56  ;;  %v16010_v14 = vmul.f32 %v23605_v40, %v28356_v39 }
0x25e6   : > { %v15986_v26 = vadd.f32 %v23607_v0, %v23605_v40  ;;  %21597 = vmatmul.mubr.msk.f32.gmra.mrb[26].mxu1 %vm28357_vm4, %v16043_v50  ;;  %v16022_v29 = vmul.f32 %v23607_v0, %v28304_v10  ;;  %v23609_v19 = vpop.eup %23608 }
0x25e7   : > { %v16045_v8 = vmul.f32 %v23609_v19, %v16033_v41  ;;  %v22400_v41 = vpack.c.bf16 %v16420_v11, %v16419_v13 }
0x25e8   : > { %v23611_v23 = vpop.eup %23610  ;;  %23622 = vrcp.f32 %v15986_v26  ;;  %v16034_v32 = vadd.f32 %v16022_v29, %v16010_v14 }
0x25e9   : > { %v23613_v30 = vpop.eup %23612  ;;  %v16012_v15 = vmul.f32 %v23611_v23, %v28358_v22  ;;  %22401 = vmatprep.subr.bf16.mxu1 %v22400_v41 }
0x25ea   : > { %v23615_v27 = vpop.eup %23614  ;;  %v15988_v58 = vadd.f32 %v23613_v30, %v23611_v23  ;;  %v16024_v20 = vmul.f32 %v23613_v30, %v28308_v49  ;;  %22403 = vmatpush3.bf16.msra.mxu1 %v22400_v41 }
0x25eb   : > { %v16044_v12 = vmul.f32 %v23615_v27, %v16032_v46  ;;  %v16421_v27 = vld [vmem:[%s24043_s21 + $0x10] sm:$0xff] }
0x25ec   : > { %v23617_v36 = vpop.eup %23616  ;;  %23624 = vrcp.f32 %v15988_v58  ;;  %v16036_v17 = vadd.f32 %v16024_v20, %v16012_v15  ;;  %v16422_v58 = vld [vmem:[%s24043_s21 + $0x18] sm:$0xff] }
0x25ed   : > { %v23619_v7 = vpop.eup %23618  ;;  %v16013_v10 = vmul.f32 %v23617_v36, %v28359_v45  ;;  %21599 = vmatprep.mubr.msk.f32.mxu1 %vm28360_vm13, %v16044_v12  ;;  %v22404_v20 = vpack.c.bf16 %v16422_v58, %v16421_v27  ;;  %v18015_v12 = vld [vmem:[%s24038_s29] ss:$0 sm:$0xff] }
0x25ee   : > { %v15989_v28 = vadd.f32 %v23619_v7, %v23617_v36  ;;  %v16025_v61 = vmul.f32 %v23619_v7, %v28310_v60  ;;  %21600 = vmatmul.mubr.msk.f32.gmra.mrb[28].mxu1 %vm28361_vm14, %v16045_v8  ;;  %v23621_v49 = vpop.eup %23620 }
0x25ef   : > { %v16047_v54 = vmul.f32 %v23621_v49, %v16035_v35  ;;  %22405 = vmatprep.subr.bf16.mxu1 %v22404_v20 }
0x25f0   : > { %23626 = vrcp.f32 %v15989_v28  ;;  %v16037_v62 = vadd.f32 %v16025_v61, %v16013_v10  ;;  %22407 = vmatpush3.bf16.msra.mxu1 %v22404_v20 }
0x25f2   : > { %v23623_v2 = vpop.eup %23622 }
0x25f3   : > { %v16046_v16 = vmul.f32 %v23623_v2, %v16034_v32 }
0x25f5   : > { %21602 = vmatprep.mubr.msk.f32.mxu1 %vm28362_vm2, %v16046_v16 }
0x25f6   : > { %v23625_v24 = vpop.eup %23624  ;;  %21603 = vmatmul.mubr.msk.f32.gmra.mrb[30].mxu1 %vm28363_vm6, %v16047_v54 }
0x25f7   : > { %v16048_v63 = vmul.f32 %v23625_v24, %v16036_v17 }
0x25f9   : > { %21605 = vmatprep.mubr.msk.f32.mxu1 %vm28365_vm11, %v16048_v63 }
0x25fa   : > { %v23627_v60 = vpop.eup %23626 }
0x25fb   : > { %v16049_v21 = vmul.f32 %v23627_v60, %v16037_v62 }
0x25fd   : > { %21606 = vmatmul.mubr.msk.f32.gmra.mrb[32].mxu1 %vm28366_vm3, %v16049_v21 }
0x26a9   : > { %v21592_v33 = vpop.f32.mrb[22].mxu1 }
0x26aa   : > { %v16169_v5 = vadd.f32 %v21592_v33, %v18002_v34  ;;  %v16163_v18 = vpop.f32.mrb[23].mxu1 }
0x26ab   : > { %v16164_v57 = vadd.f32 %v18002_v34, %v16163_v18 }
0x26ac   : > { %v16223_v9 = vmax.f32 %v16169_v5, 0.0 }
0x26ad   : > { %v16222_v3 = vmax.f32 %v16164_v57, 0.0 }
0x26af   : > { %21616 = vmatprep.mubr.msk.f32.mxu0 %vm16245_vm12, %v16222_v3 }
0x26b0   : > { %21617 = vmatmul.mubr.msk.f32.vlgmr.msra.gmra.mrb[46].mxu0 %vm16245_vm12, %v16223_v9 }
0x26b1   : > { %v21595_v59 = vpop.f32.mrb[24].mxu1 }
0x26b2   : > { %v16179_v25 = vadd.f32 %v21595_v59, %v18002_v34  ;;  %v16173_v53 = vpop.f32.mrb[25].mxu1 }
0x26b3   : > { %v16174_v51 = vadd.f32 %v18002_v34, %v16173_v53 }
0x26b4   : > { %v16225_v42 = vmax.f32 %v16179_v25, 0.0 }
0x26b5   : > { %v16224_v6 = vmax.f32 %v16174_v51, 0.0 }
0x26b7   : > { %21619 = vmatprep.mubr.msk.f32.mxu0 %vm16245_vm12, %v16224_v6 }
0x26b8   : > { %21620 = vmatmul.mubr.msk.f32.gmra.mrb[48].mxu0 %vm16245_vm12, %v16225_v42 }
0x26b9   : > { %v21598_v48 = vpop.f32.mrb[26].mxu1 }
0x26ba   : > { %v16189_v37 = vadd.f32 %v21598_v48, %v18002_v34  ;;  %v16183_v43 = vpop.f32.mrb[27].mxu1  ;;  %v18028_v48 = vld [vmem:[%s24048_s19] ss:$0 sm:$0xff] }
0x26bb   : > { %v16184_v38 = vadd.f32 %v18002_v34, %v16183_v43 }
0x26bc   : > { %v16227_v46 = vmax.f32 %v16189_v37, 0.0 }
0x26bd   : > { %v16226_v47 = vmax.f32 %v16184_v38, 0.0 }
0x26bf   : > { %21622 = vmatprep.mubr.msk.f32.mxu0 %vm16245_vm12, %v16226_v47 }
0x26c0   : > { %21623 = vmatmul.mubr.msk.f32.gmra.mrb[50].mxu0 %vm16245_vm12, %v16227_v46 }
0x26c1   : > { %v21601_v52 = vpop.f32.mrb[28].mxu1 }
0x26c2   : > { %v16199_v44 = vadd.f32 %v21601_v52, %v18002_v34  ;;  %v16193_v1 = vpop.f32.mrb[29].mxu1 }
0x26c3   : > { %v16194_v56 = vadd.f32 %v18002_v34, %v16193_v1 }
0x26c4   : > { %v16229_v35 = vmax.f32 %v16199_v44, 0.0 }
0x26c5   : > { %v16228_v40 = vmax.f32 %v16194_v56, 0.0 }
0x26c7   : > { %21625 = vmatprep.mubr.msk.f32.mxu0 %vm16245_vm12, %v16228_v40 }
0x26c8   : > { %21626 = vmatmul.mubr.msk.f32.gmra.mrb[52].mxu0 %vm16245_vm12, %v16229_v35 }
0x26c9   : > { %v21604_v50 = vpop.f32.mrb[30].mxu1 }
0x26ca   : > { %v16209_v0 = vadd.f32 %v21604_v50, %v18002_v34  ;;  %v16203_v39 = vpop.f32.mrb[31].mxu1 }
0x26cb   : > { %v16204_v14 = vadd.f32 %v18002_v34, %v16203_v39 }
0x26cc   : > { %v16231_v29 = vmax.f32 %v16209_v0, 0.0 }
0x26cd   : > { %v16230_v26 = vmax.f32 %v16204_v14, 0.0 }
0x26cf   : > { %21628 = vmatprep.mubr.msk.f32.mxu0 %vm16245_vm12, %v16230_v26 }
0x26d0   : > { %v21607_v19 = vpop.f32.mrb[32].mxu1  ;;  %21629 = vmatmul.mubr.msk.f32.gmra.mrb[54].mxu0 %vm16245_vm12, %v16231_v29 }
0x26d1   : > { %v16219_v23 = vadd.f32 %v21607_v19, %v18002_v34  ;;  %v16213_v32 = vpop.f32.mrb[33].mxu1 }
0x26d2   : > { %v16214_v30 = vadd.f32 %v18002_v34, %v16213_v32 }
0x26d3   : > { %v16233_v15 = vmax.f32 %v16219_v23, 0.0 }
0x26d4   : > { %v16232_v22 = vmax.f32 %v16214_v30, 0.0 }
0x26d6   : > { %21631 = vmatprep.mubr.msk.f32.mxu0 %vm16245_vm12, %v16232_v22 }
0x26d7   : > { %21632 = vmatmul.mubr.msk.f32.gmra.mrb[56].mxu0 %vm16245_vm12, %v16233_v15 }
0x2783   : > { %v21618_v36 = vpop.f32.mrb[46].mxu0 }
0x2784   : > { %v16354_v8 = vadd.f32 %v21618_v36, %v18015_v12  ;;  %v16348_v17 = vpop.f32.mrb[47].mxu0 }
0x2785   : > { %v16349_v7 = vadd.f32 %v18015_v12, %v16348_v17 }
0x2786   : > { %v16408_v10 = vmax.f32 %v16354_v8, 0.0 }
0x2787   : > { %v16407_v45 = vmax.f32 %v16349_v7, 0.0 }
0x2789   : > { %21642 = vmatprep.mubr.msk.f32.mxu1 %vm16245_vm12, %v16407_v45 }
0x278a   : > { %21643 = vmatmul.mubr.msk.f32.vlgmr.msra.gmra.mrb[58].mxu1 %vm16245_vm12, %v16408_v10 }
0x278b   : > { %v21621_v28 = vpop.f32.mrb[48].mxu0 }
0x278c   : > { %v16364_v61 = vadd.f32 %v21621_v28, %v18015_v12  ;;  %v16358_v62 = vpop.f32.mrb[49].mxu0 }
0x278d   : > { %v16359_v49 = vadd.f32 %v18015_v12, %v16358_v62 }
0x278e   : > { %v16410_v16 = vmax.f32 %v16364_v61, 0.0 }
0x278f   : > { %v16409_v2 = vmax.f32 %v16359_v49, 0.0 }
0x2791   : > { %21645 = vmatprep.mubr.msk.f32.mxu1 %vm16245_vm12, %v16409_v2 }
0x2792   : > { %21646 = vmatmul.mubr.msk.f32.gmra.mrb[60].mxu1 %vm16245_vm12, %v16410_v16 }
0x2793   : > { %v21624_v54 = vpop.f32.mrb[50].mxu0 }
0x2794   : > { %v16374_v24 = vadd.f32 %v21624_v54, %v18015_v12  ;;  %v16368_v63 = vpop.f32.mrb[51].mxu0 }
0x2795   : > { %v16369_v60 = vadd.f32 %v18015_v12, %v16368_v63 }
0x2796   : > { %v16412_v31 = vmax.f32 %v16374_v24, 0.0 }
0x2797   : > { %v16411_v21 = vmax.f32 %v16369_v60, 0.0 }
0x2799   : > { %21648 = vmatprep.mubr.msk.f32.mxu1 %vm16245_vm12, %v16411_v21 }
0x279a   : > { %21649 = vmatmul.mubr.msk.f32.gmra.mrb[62].mxu1 %vm16245_vm12, %v16412_v31 }
0x279b   : > { %v21627_v4 = vpop.f32.mrb[52].mxu0 }
0x279c   : > { %v16384_v55 = vadd.f32 %v21627_v4, %v18015_v12  ;;  %v16378_v13 = vpop.f32.mrb[53].mxu0 }
0x279d   : > { %v16379_v11 = vadd.f32 %v18015_v12, %v16378_v13 }
0x279e   : > { %v16414_v34 = vmax.f32 %v16384_v55, 0.0 }
0x279f   : > { %v16413_v41 = vmax.f32 %v16379_v11, 0.0 }
0x27a1   : > { %21651 = vmatprep.mubr.msk.f32.mxu1 %vm16245_vm12, %v16413_v41 }
0x27a2   : > { %21652 = vmatmul.mubr.msk.f32.gmra.mrb[64].mxu1 %vm16245_vm12, %v16414_v34 }
0x27a3   : > { %v21630_v33 = vpop.f32.mrb[54].mxu0 }
0x27a4   : > { %v16394_v5 = vadd.f32 %v21630_v33, %v18015_v12  ;;  %v16388_v18 = vpop.f32.mrb[55].mxu0 }
0x27a5   : > { %v16389_v57 = vadd.f32 %v18015_v12, %v16388_v18 }
0x27a6   : > { %v16416_v9 = vmax.f32 %v16394_v5, 0.0 }
0x27a7   : > { %v16415_v3 = vmax.f32 %v16389_v57, 0.0 }
0x27a9   : > { %21654 = vmatprep.mubr.msk.f32.mxu1 %vm16245_vm12, %v16415_v3 }
0x27aa   : > { %v21633_v59 = vpop.f32.mrb[56].mxu0  ;;  %21655 = vmatmul.mubr.msk.f32.gmra.mrb[66].mxu1 %vm16245_vm12, %v16416_v9 }
0x27ab   : > { %v16404_v25 = vadd.f32 %v21633_v59, %v18015_v12  ;;  %v16398_v53 = vpop.f32.mrb[57].mxu0 }
0x27ac   : > { %v16399_v51 = vadd.f32 %v18015_v12, %v16398_v53 }
0x27ad   : > { %v16418_v42 = vmax.f32 %v16404_v25, 0.0 }
0x27ae   : > { %v16417_v6 = vmax.f32 %v16399_v51, 0.0 }
0x27b0   : > { %21657 = vmatprep.mubr.msk.f32.mxu1 %vm16245_vm12, %v16417_v6 }
0x27b1   : > { %21658 = vmatmul.mubr.msk.f32.gmra.mrb[68].mxu1 %vm16245_vm12, %v16418_v42 }
0x285d   : > { %v21644_v37 = vpop.f32.mrb[58].mxu1 }
0x285e   : > { %v16538_v43 = vadd.f32 %v21644_v37, %v18028_v48  ;;  %v16532_v38 = vpop.f32.mrb[59].mxu1 }
0x285f   : > { %v16533_v47 = vadd.f32 %v18028_v48, %v16532_v38 }
0x2860   : > { %16593 = vst.msk [vmem:[%s28015_s2 + $0x8] sm:$0xff] %vm16591_vm15, %v16538_v43 }
0x2861   : > { %16592 = vst.msk [vmem:[%s28015_s2] sm:$0xff] %vm16591_vm15, %v16533_v47 }
0x2865   : > { %v21647_v46 = vpop.f32.mrb[60].mxu1 }
0x2866   : > { %v16548_v52 = vadd.f32 %v21647_v46, %v18028_v48  ;;  %v16542_v44 = vpop.f32.mrb[61].mxu1 }
0x2867   : > { %v16543_v1 = vadd.f32 %v18028_v48, %v16542_v44 }
0x2868   : > { %16595 = vst.msk [vmem:[%s28015_s2 + $0x18] sm:$0xff] %vm16591_vm15, %v16548_v52 }
0x2869   : > { %16594 = vst.msk [vmem:[%s28015_s2 + $0x10] sm:$0xff] %vm16591_vm15, %v16543_v1 }
0x286d   : > { %v21650_v56 = vpop.f32.mrb[62].mxu1 }
0x286e   : > { %v16558_v40 = vadd.f32 %v21650_v56, %v18028_v48  ;;  %v16552_v35 = vpop.f32.mrb[63].mxu1 }
0x286f   : > { %v16553_v50 = vadd.f32 %v18028_v48, %v16552_v35 }
0x2870   : > { %16597 = vst.msk [vmem:[%s28015_s2 + $0x28] sm:$0xff] %vm16591_vm15, %v16558_v40 }
0x2871   : > { %16596 = vst.msk [vmem:[%s28015_s2 + $0x20] sm:$0xff] %vm16591_vm15, %v16553_v50 }
0x2875   : > { %v21653_v0 = vpop.f32.mrb[64].mxu1 }
0x2876   : > { %v16568_v39 = vadd.f32 %v21653_v0, %v18028_v48  ;;  %v16562_v14 = vpop.f32.mrb[65].mxu1 }
0x2877   : > { %v16563_v26 = vadd.f32 %v18028_v48, %v16562_v14 }
0x2878   : > { %16599 = vst.msk [vmem:[%s28015_s2 + $0x38] sm:$0xff] %vm16591_vm15, %v16568_v39 }
0x2879   : > { %16598 = vst.msk [vmem:[%s28015_s2 + $0x30] sm:$0xff] %vm16591_vm15, %v16563_v26 }
0x287d   : > { %v21656_v29 = vpop.f32.mrb[66].mxu1 }
0x287e   : > { %v16578_v19 = vadd.f32 %v21656_v29, %v18028_v48  ;;  %v16572_v23 = vpop.f32.mrb[67].mxu1 }
0x287f   : > { %v16573_v32 = vadd.f32 %v18028_v48, %v16572_v23 }
0x2880   : > { %16601 = vst.msk [vmem:[%s28015_s2 + $0x48] sm:$0xff] %vm16591_vm15, %v16578_v19 }
0x2881   : > { %16600 = vst.msk [vmem:[%s28015_s2 + $0x40] sm:$0xff] %vm16591_vm15, %v16573_v32 }
0x2884   : > { %v21659_v30 = vpop.f32.mrb[68].mxu1 }
0x2885   : > { %v16588_v22 = vadd.f32 %v21659_v30, %v18028_v48  ;;  %v16582_v15 = vpop.f32.mrb[69].mxu1 }
0x2886   : > { %v16583_v27 = vadd.f32 %v18028_v48, %v16582_v15 }
0x2887   : > { %16603 = vst.msk [vmem:[%s28015_s2 + $0x58] sm:$0xff] %vm16591_vm15, %v16588_v22 }
0x2888   : > { %16602 = vst.msk [vmem:[%s28015_s2 + $0x50] sm:$0xff] %vm16591_vm15, %v16583_v27 }
0x2889 PF: > { %s93_s7 = sadd.s32 1, %s23793_s7  }
0x288a   : > { %p90_p4 = scmp.ge.s32.totalorder %s93_s7, 4  }
0x288c   :  { %92 = sbr.rel (!%p90_p4) target bundleno = 77 (0x4d), region = 344 }

</bundles_post_ra>
